<compile_context>
chip_gen: v7x
topology: tpu7x:2x2x1
jax: 0.10.0
libtpu: 0.0.40
codegen_flags: <defaults>
</compile_context>

<pallas_src>
import math
import functools

import jax
import jax.numpy as jnp
from jax.experimental import pallas as pl
from jax.experimental.pallas import tpu as pltpu


STRUCTURE = {
    'vgg16': [['conv_3x3', 3, 64], ['relu'], ['conv_3x3', 64, 64], ['relu'],
              ['maxpool_down'],
              ['conv_3x3', 64, 128], ['relu'], ['conv_3x3', 128, 128], ['relu'],
              ['maxpool_down'],
              ['conv_3x3', 128, 256], ['relu'], ['conv_3x3', 256, 256], ['relu'],
              ['conv_3x3', 256, 256], ['relu'],
              ['maxpool_down'],
              ['conv_3x3', 256, 512], ['relu'], ['conv_3x3', 512, 512], ['relu'],
              ['conv_3x3', 512, 512], ['relu']],
    'additional': [['maxpool_down'],
                   ['conv_3x3', 512, 512], ['relu'], ['conv_3x3', 512, 512], ['relu'],
                   ['conv_3x3', 512, 512], ['relu'],
                   ['maxpool_flat'],
                   ['conv_dilation', 512, 1024], ['relu'],
                   ['conv_1x1', 1024, 1024], ['relu'],
                   ['conv_1x1', 1024, 512], ['batch_norm', 512], ['relu'],
                   ['upsample']],
    'reducer': [['conv_3x3', 512, 256], ['batch_norm', 256], ['relu']],
}

_VMEM_LIMIT = 48 * 1024 * 1024  # safe on v7x (64 MiB phys), generous on v5e/v6e (128 MiB)


def _round_up(x, m):
    return ((x + m - 1) // m) * m


def _row_tile(m):
    """Row (M) tile: whole thing if small, else 512 rows (sweet spot per measured sweeps)."""
    m8 = _round_up(max(m, 1), 8)
    return m8 if m8 <= 512 else 512


def _choose_tk(k_p):
    """Largest tk <= 512 that is a multiple of 128 and divides the padded K."""
    q = k_p // 128
    for d in (4, 3, 2, 1):
        if q % d == 0:
            return 128 * d
    return 128


# ---------------------------------------------------------------------------
# Pallas kernels
# ---------------------------------------------------------------------------

def _make_matmul_kernel(apply_relu):
    def kern(x_ref, w_ref, b_ref, o_ref, acc_ref):
        @pl.when(pl.program_id(2) == 0)
        def _init():
            acc_ref[...] = jnp.zeros_like(acc_ref)

        acc_ref[...] += jnp.dot(x_ref[...], w_ref[...],
                                preferred_element_type=jnp.float32)

        @pl.when(pl.program_id(2) == pl.num_programs(2) - 1)
        def _store():
            y = acc_ref[...] + b_ref[...]
            if apply_relu:
                y = jnp.maximum(y, 0.0)
            o_ref[...] = y
    return kern


def matmul_bias_act(x, w, b, *, relu):
    """x: (M, K) bf16, w: (K, Cout) bf16, b: (Cout,) f32. Returns (M, Cout) f32."""
    M, K = x.shape
    Cout = w.shape[1]

    K_p = _round_up(K, 128)
    Cout_p = _round_up(Cout, 128)               # lane-dense output tiles (Cout=64 -> 128)
    tm = _row_tile(M)
    M_p = _round_up(_round_up(M, 8), tm)
    tn = 256 if Cout_p % 256 == 0 else 128      # 256-wide tiles feed the v6e/v7x MXU fully
    tk = _choose_tk(K_p)

    if (M_p, K_p) != (M, K):
        x = jnp.pad(x, ((0, M_p - M), (0, K_p - K)))
    if (K_p, Cout_p) != (K, Cout):
        w = jnp.pad(w, ((0, K_p - K), (0, Cout_p - Cout)))
    if Cout_p != Cout:
        b = jnp.pad(b, (0, Cout_p - Cout))
    b = b.reshape(1, Cout_p).astype(jnp.float32)

    grid = (M_p // tm, Cout_p // tn, K_p // tk)

    out = pl.pallas_call(
        _make_matmul_kernel(relu),
        out_shape=jax.ShapeDtypeStruct((M_p, Cout_p), jnp.float32),
        grid=grid,
        in_specs=[
            pl.BlockSpec((tm, tk), lambda i, j, k: (i, k)),
            pl.BlockSpec((tk, tn), lambda i, j, k: (k, j)),
            pl.BlockSpec((1, tn), lambda i, j, k: (0, j)),
        ],
        out_specs=pl.BlockSpec((tm, tn), lambda i, j, k: (i, j)),
        scratch_shapes=[pltpu.VMEM((tm, tn), jnp.float32)],
        compiler_params=pltpu.CompilerParams(
            dimension_semantics=("parallel", "parallel", "arbitrary"),
            vmem_limit_bytes=_VMEM_LIMIT,
        ),
    )(x, w, b)

    if (M_p, Cout_p) != (M, Cout):
        out = out[:M, :Cout]
    return out


def _max_tap_kernel(x_ref, o_ref):
    o_ref[...] = jnp.max(x_ref[...], axis=0)


def max_over_taps(taps_tmc):
    """taps_tmc: (T, M, C) -> (M, C) max over the pooling-window taps, tiled over M."""
    T, M, C = taps_tmc.shape
    tm = _row_tile(M)
    M_p = _round_up(_round_up(M, 8), tm)
    if M_p != M:
        taps_tmc = jnp.pad(taps_tmc, ((0, 0), (0, M_p - M), (0, 0)))
    out = pl.pallas_call(
        _max_tap_kernel,
        out_shape=jax.ShapeDtypeStruct((M_p, C), jnp.float32),
        grid=(M_p // tm,),
        in_specs=[pl.BlockSpec((T, tm, C), lambda i: (0, i, 0))],
        out_specs=pl.BlockSpec((tm, C), lambda i: (i, 0)),
        compiler_params=pltpu.CompilerParams(
            dimension_semantics=("parallel",),
            vmem_limit_bytes=_VMEM_LIMIT,
        ),
    )(taps_tmc)
    return out[:M] if M_p != M else out


def _bn_stats_kernel(x_ref, sum_ref, sq_ref):
    @pl.when(pl.program_id(0) == 0)
    def _init():
        sum_ref[...] = jnp.zeros_like(sum_ref)
        sq_ref[...] = jnp.zeros_like(sq_ref)
    x = x_ref[...]
    sum_ref[...] += jnp.sum(x, axis=0, keepdims=True)
    sq_ref[...] += jnp.sum(x * x, axis=0, keepdims=True)


def _make_scale_shift_kernel(apply_relu):
    def kern(x_ref, s_ref, t_ref, o_ref):
        y = x_ref[...] * s_ref[...] + t_ref[...]
        if apply_relu:
            y = jnp.maximum(y, 0.0)
        o_ref[...] = y
    return kern


def batchnorm_act(x_mc, gamma, beta, *, relu, eps=1e-5):
    """x_mc: (M, C), M = N*H*W. Train-mode BatchNorm2d semantics (batch statistics)."""
    M, C = x_mc.shape
    tm = _row_tile(M)
    M_p = _round_up(_round_up(M, 8), tm)
    x_p = jnp.pad(x_mc, ((0, M_p - M), (0, 0))) if M_p != M else x_mc  # zero rows: no effect

    sums, sqs = pl.pallas_call(
        _bn_stats_kernel,
        out_shape=(jax.ShapeDtypeStruct((1, C), jnp.float32),
                   jax.ShapeDtypeStruct((1, C), jnp.float32)),
        grid=(M_p // tm,),
        in_specs=[pl.BlockSpec((tm, C), lambda i: (i, 0))],
        out_specs=(pl.BlockSpec((1, C), lambda i: (0, 0)),
                   pl.BlockSpec((1, C), lambda i: (0, 0))),
        compiler_params=pltpu.CompilerParams(
            dimension_semantics=("arbitrary",),
            vmem_limit_bytes=_VMEM_LIMIT,
        ),
    )(x_p)

    inv_m = 1.0 / float(M)
    mean = sums * inv_m
    var = jnp.maximum(sqs * inv_m - mean * mean, 0.0)     # biased variance (train mode)
    scale = gamma.reshape(1, C) * jax.lax.rsqrt(var + eps)
    shift = beta.reshape(1, C) - mean * scale

    out = pl.pallas_call(
        _make_scale_shift_kernel(relu),
        out_shape=jax.ShapeDtypeStruct((M_p, C), jnp.float32),
        grid=(M_p // tm,),
        in_specs=[pl.BlockSpec((tm, C), lambda i: (i, 0)),
                  pl.BlockSpec((1, C), lambda i: (0, 0)),
                  pl.BlockSpec((1, C), lambda i: (0, 0))],
        out_specs=pl.BlockSpec((tm, C), lambda i: (i, 0)),
        compiler_params=pltpu.CompilerParams(
            dimension_semantics=("parallel",),
            vmem_limit_bytes=_VMEM_LIMIT,
        ),
    )(x_p, scale, shift)
    return out[:M] if M_p != M else out


# ---------------------------------------------------------------------------
# Layer wrappers (JAX glue: im2col / tap extraction / reshapes)
# ---------------------------------------------------------------------------

def conv2d(x_nhwc, w, b, *, ksize, dilation, padding, relu):
    """'same'-size conv. w: (Cout, Cin, k, k) PyTorch layout, b: (Cout,)."""
    N, H, W, Cin = x_nhwc.shape
    Cout = w.shape[0]
    x_bf = x_nhwc.astype(jnp.bfloat16)          # bf16 operands, f32 MXU accumulation
    if ksize == 1:
        patches = x_bf.reshape(N * H * W, Cin)
        K = Cin
    else:
        d, p = dilation, padding
        xp = jnp.pad(x_bf, ((0, 0), (p, p), (p, p), (0, 0)))
        taps = []
        for ky in range(ksize):
            for kx in range(ksize):
                taps.append(xp[:, ky * d:ky * d + H, kx * d:kx * d + W, :])
        pt = jnp.stack(taps, axis=-1)                      # (N, H, W, Cin, k*k)
        patches = pt.reshape(N * H * W, Cin * ksize * ksize)
        K = Cin * ksize * ksize
    w_mat = w.reshape(Cout, K).T.astype(jnp.bfloat16)      # (K, Cout); matches patch ordering
    y = matmul_bias_act(patches, w_mat, b, relu=relu)
    return y.reshape(N, H, W, Cout)


def maxpool(x_nhwc, *, ksize, stride, padding):
    N, H, W, C = x_nhwc.shape
    Ho = (H + 2 * padding - ksize) // stride + 1
    Wo = (W + 2 * padding - ksize) // stride + 1
    xp = x_nhwc
    if padding:
        xp = jnp.pad(x_nhwc, ((0, 0), (padding, padding), (padding, padding), (0, 0)),
                     constant_values=-jnp.inf)
    taps = []
    for ky in range(ksize):
        for kx in range(ksize):
            taps.append(xp[:, ky:ky + Ho * stride:stride, kx:kx + Wo * stride:stride, :])
    taps_tmc = jnp.stack(taps, axis=0).reshape(ksize * ksize, N * Ho * Wo, C)
    out = max_over_taps(taps_tmc)
    return out.reshape(N, Ho, Wo, C)


def upsample2_nearest(x_nhwc):
    return jnp.repeat(jnp.repeat(x_nhwc, 2, axis=1), 2, axis=2)


# ---------------------------------------------------------------------------
# Parameter init (deterministic, He-normal for convs) and block execution
# ---------------------------------------------------------------------------

def init_params(key):
    params = {}
    for block_name, layers in STRUCTURE.items():
        plist = []
        for layer in layers:
            kind = layer[0]
            if kind in ('conv_3x3', 'conv_1x1', 'conv_dilation'):
                cin, cout = layer[1], layer[2]
                k = 1 if kind == 'conv_1x1' else 3
                key, kw = jax.random.split(key)
                fan_in = cin * k * k
                w = jax.random.normal(kw, (cout, cin, k, k), jnp.float32) * math.sqrt(2.0 / fan_in)
                b = jnp.zeros((cout,), jnp.float32)
                plist.append((w, b))
            elif kind == 'batch_norm':
                c = layer[1]
                key, kg, kb = jax.random.split(key, 3)
                gamma = 1.0 + 0.1 * jax.random.normal(kg, (c,), jnp.float32)
                beta = 0.1 * jax.random.normal(kb, (c,), jnp.float32)
                plist.append((gamma, beta))
            else:
                plist.append(None)
        params[block_name] = plist
    return params


def run_block(x, layers, plist):
    i = 0
    while i < len(layers):
        layer = layers[i]
        kind = layer[0]
        fuse_relu = (i + 1 < len(layers)) and (layers[i + 1][0] == 'relu')
        if kind in ('conv_3x3', 'conv_1x1', 'conv_dilation'):
            w, b = plist[i]
            if kind == 'conv_3x3':
                x = conv2d(x, w, b, ksize=3, dilation=1, padding=1, relu=fuse_relu)
            elif kind == 'conv_1x1':
                x = conv2d(x, w, b, ksize=1, dilation=1, padding=0, relu=fuse_relu)
            else:  # conv_dilation: 3x3, dilation=6, padding=6
                x = conv2d(x, w, b, ksize=3, dilation=6, padding=6, relu=fuse_relu)
            if fuse_relu:
                i += 1
        elif kind == 'batch_norm':
            gamma, beta = plist[i]
            N, H, W, C = x.shape
            x = batchnorm_act(x.reshape(N * H * W, C), gamma, beta,
                              relu=fuse_relu).reshape(N, H, W, C)
            if fuse_relu:
                i += 1
        elif kind == 'relu':
            x = jnp.maximum(x, 0.0)  # only hit if not fused (not the case in STRUCTURE)
        elif kind == 'maxpool_down':
            x = maxpool(x, ksize=2, stride=2, padding=0)
        elif kind == 'maxpool_flat':
            x = maxpool(x, ksize=3, stride=1, padding=1)
        elif kind == 'upsample':
            x = upsample2_nearest(x)
        else:
            raise ValueError(kind)
        i += 1
    return x


@jax.jit
def feature_extractor_forward(x_nchw, params):
    # NCHW (PyTorch convention) -> NHWC for the kernels
    x = jnp.transpose(x_nchw, (0, 2, 3, 1))
    base = run_block(x, STRUCTURE['vgg16'], params['vgg16'])
    red = run_block(base, STRUCTURE['reducer'], params['reducer'])
    add = run_block(base, STRUCTURE['additional'], params['additional'])
    y = jnp.concatenate([red, add], axis=-1)          # channel concat (dim=1 in NCHW)
    return jnp.transpose(y, (0, 3, 1, 2))             # back to NCHW


if __name__ == "__main__":
    key = jax.random.PRNGKey(0)
    key, kx = jax.random.split(key)
    # Input: batch=2, 3 channels (RGB), 16x16 spatial (divisible by 16 so the
    # additional-branch maxpool + upsample round-trips back to the base resolution).
    x = jax.random.normal(kx, (2, 3, 16, 16), jnp.float32)
    params = init_params(key)

    y = feature_extractor_forward(x, params)
    y = jax.block_until_ready(y)

    # vgg downsamples 16x16 -> 2x2; reducer keeps 2x2x256, additional ends at 2x2x512.
    assert y.shape == (2, 256 + 512, 2, 2), y.shape
    assert jnp.isfinite(y).all()
    print("KERNEL_OK")
</pallas_src>

<mosaic_0001>
module attributes {stable_mosaic.version = 11 : i64} {
  func.func @kern(%arg0: i32, %arg1: i32, %arg2: i32, %arg3: memref<512x128xbf16, #tpu.memory_space<vmem>>, %arg4: memref<128x128xbf16, #tpu.memory_space<vmem>>, %arg5: memref<1x128xf32, #tpu.memory_space<vmem>>, %arg6: memref<512x128xf32, #tpu.memory_space<vmem>>, %arg7: memref<512x128xf32, #tpu.memory_space<vmem>>) attributes {dimension_semantics = [#tpu.dimension_semantics<parallel>, #tpu.dimension_semantics<parallel>, #tpu.dimension_semantics<arbitrary>], iteration_bounds = array<i64: 1, 1, 1>, scalar_prefetch = 0 : i64, scratch_operands = 1 : i64, tpu.core_type = #tpu.core_type<tc>, window_params = [{transform_indices = @transform_0, window_bounds = array<i64: 512, 128>}, {transform_indices = @transform_1, window_bounds = array<i64: 128, 128>}, {transform_indices = @transform_2, window_bounds = array<i64: 1, 128>}, {transform_indices = @transform_3, window_bounds = array<i64: 512, 128>}]} {
    %c0_i32 = arith.constant 0 : i32
    %0 = arith.cmpi eq, %arg2, %c0_i32 : i32
    %1 = arith.extui %0 : i1 to i32
    %c0_i32_0 = arith.constant 0 : i32
    %2 = arith.cmpi ne, %1, %c0_i32_0 : i32
    scf.if %2 {
      %cst_10 = arith.constant 0.000000e+00 : f32
      %12 = vector.broadcast %cst_10 : f32 to vector<512x128xf32>
      %c0_11 = arith.constant 0 : index
      %c0_12 = arith.constant 0 : index
      %13 = vector.load %arg7[%c0_11, %c0_12] : memref<512x128xf32, #tpu.memory_space<vmem>>, vector<512x128xf32>
      tpu.vector_store %arg7[%c0_11, %c0_12], %12 {strides = array<i32>} : memref<512x128xf32, #tpu.memory_space<vmem>>, vector<512x128xf32>,
    } else {
    }
    %c0 = arith.constant 0 : index
    %c0_1 = arith.constant 0 : index
    %3 = vector.load %arg7[%c0, %c0_1] : memref<512x128xf32, #tpu.memory_space<vmem>>, vector<512x128xf32>
    %c0_2 = arith.constant 0 : index
    %c0_3 = arith.constant 0 : index
    %4 = vector.load %arg3[%c0_2, %c0_3] : memref<512x128xbf16, #tpu.memory_space<vmem>>, vector<512x128xbf16>
    %c0_4 = arith.constant 0 : index
    %c0_5 = arith.constant 0 : index
    %5 = vector.load %arg4[%c0_4, %c0_5] : memref<128x128xbf16, #tpu.memory_space<vmem>>, vector<128x128xbf16>
    %cst = arith.constant dense<0.000000e+00> : vector<512x128xf32>
    %6 = tpu.matmul %4, %5, %cst {dimension_numbers = #tpu.dot_dimension_numbers<[1], [0], [0], [1], [0, 0, 1, 1], [], []>} : vector<512x128xbf16>, vector<128x128xbf16>, vector<512x128xf32> -> vector<512x128xf32>
    %7 = arith.addf %3, %6 : vector<512x128xf32>
    %c0_6 = arith.constant 0 : index
    %c0_7 = arith.constant 0 : index
    %8 = vector.load %arg7[%c0_6, %c0_7] : memref<512x128xf32, #tpu.memory_space<vmem>>, vector<512x128xf32>
    tpu.vector_store %arg7[%c0_6, %c0_7], %7 {strides = array<i32>} : memref<512x128xf32, #tpu.memory_space<vmem>>, vector<512x128xf32>,
    %c0_i32_8 = arith.constant 0 : i32
    %9 = arith.cmpi eq, %arg2, %c0_i32_8 : i32
    %10 = arith.extui %9 : i1 to i32
    %c0_i32_9 = arith.constant 0 : i32
    %11 = arith.cmpi ne, %10, %c0_i32_9 : i32
    scf.if %11 {
      %c0_10 = arith.constant 0 : index
      %c0_11 = arith.constant 0 : index
      %12 = vector.load %arg7[%c0_10, %c0_11] : memref<512x128xf32, #tpu.memory_space<vmem>>, vector<512x128xf32>
      %c0_12 = arith.constant 0 : index
      %c0_13 = arith.constant 0 : index
      %13 = vector.load %arg5[%c0_12, %c0_13] : memref<1x128xf32, #tpu.memory_space<vmem>>, vector<1x128xf32>
      %14 = vector.broadcast %13 : vector<1x128xf32> to vector<512x128xf32>
      %15 = arith.addf %12, %14 : vector<512x128xf32>
      %cst_14 = arith.constant 0.000000e+00 : f32
      %16 = vector.broadcast %cst_14 : f32 to vector<512x128xf32>
      %17 = arith.maximumf %15, %16 : vector<512x128xf32>
      %c0_15 = arith.constant 0 : index
      %c0_16 = arith.constant 0 : index
      %18 = vector.load %arg6[%c0_15, %c0_16] : memref<512x128xf32, #tpu.memory_space<vmem>>, vector<512x128xf32>
      tpu.vector_store %arg6[%c0_15, %c0_16], %17 {strides = array<i32>} : memref<512x128xf32, #tpu.memory_space<vmem>>, vector<512x128xf32>,
    } else {
    }
    return
  }
  func.func @transform_0(%arg0: i32, %arg1: i32, %arg2: i32) -> (i32, i32) {
    %c0_i32 = arith.constant 0 : i32
    return %arg0, %arg2 : i32, i32
  }
  func.func @transform_1(%arg0: i32, %arg1: i32, %arg2: i32) -> (i32, i32) {
    %c0_i32 = arith.constant 0 : i32
    return %arg2, %arg1 : i32, i32
  }
  func.func @transform_2(%arg0: i32, %arg1: i32, %arg2: i32) -> (i32, i32) {
    %c0_i32 = arith.constant 0 : i32
    %c0_i32_0 = arith.constant 0 : i32
    return %c0_i32, %arg1 : i32, i32
  }
  func.func @transform_3(%arg0: i32, %arg1: i32, %arg2: i32) -> (i32, i32) {
    %c0_i32 = arith.constant 0 : i32
    return %arg0, %arg1 : i32, i32
  }
}

module attributes {stable_mosaic.version = 11 : i64} {
  func.func @kern(%arg0: i32, %arg1: i32, %arg2: i32, %arg3: memref<512x128xbf16, #tpu.memory_space<vmem>>, %arg4: memref<128x128xbf16, #tpu.memory_space<vmem>>, %arg5: memref<1x128xf32, #tpu.memory_space<vmem>>, %arg6: memref<512x128xf32, #tpu.memory_space<vmem>>, %arg7: memref<512x128xf32, #tpu.memory_space<vmem>>) attributes {dimension_semantics = [#tpu.dimension_semantics<parallel>, #tpu.dimension_semantics<parallel>, #tpu.dimension_semantics<arbitrary>], iteration_bounds = array<i64: 1, 1, 5>, scalar_prefetch = 0 : i64, scratch_operands = 1 : i64, tpu.core_type = #tpu.core_type<tc>, window_params = [{transform_indices = @transform_0, window_bounds = array<i64: 512, 128>}, {transform_indices = @transform_1, window_bounds = array<i64: 128, 128>}, {transform_indices = @transform_2, window_bounds = array<i64: 1, 128>}, {transform_indices = @transform_3, window_bounds = array<i64: 512, 128>}]} {
    %c0_i32 = arith.constant 0 : i32
    %0 = arith.cmpi eq, %arg2, %c0_i32 : i32
    %1 = arith.extui %0 : i1 to i32
    %c0_i32_0 = arith.constant 0 : i32
    %2 = arith.cmpi ne, %1, %c0_i32_0 : i32
    scf.if %2 {
      %cst_9 = arith.constant 0.000000e+00 : f32
      %12 = vector.broadcast %cst_9 : f32 to vector<512x128xf32>
      %c0_10 = arith.constant 0 : index
      %c0_11 = arith.constant 0 : index
      %13 = vector.load %arg7[%c0_10, %c0_11] : memref<512x128xf32, #tpu.memory_space<vmem>>, vector<512x128xf32>
      tpu.vector_store %arg7[%c0_10, %c0_11], %12 {strides = array<i32>} : memref<512x128xf32, #tpu.memory_space<vmem>>, vector<512x128xf32>,
    } else {
    }
    %c0 = arith.constant 0 : index
    %c0_1 = arith.constant 0 : index
    %3 = vector.load %arg7[%c0, %c0_1] : memref<512x128xf32, #tpu.memory_space<vmem>>, vector<512x128xf32>
    %c0_2 = arith.constant 0 : index
    %c0_3 = arith.constant 0 : index
    %4 = vector.load %arg3[%c0_2, %c0_3] : memref<512x128xbf16, #tpu.memory_space<vmem>>, vector<512x128xbf16>
    %c0_4 = arith.constant 0 : index
    %c0_5 = arith.constant 0 : index
    %5 = vector.load %arg4[%c0_4, %c0_5] : memref<128x128xbf16, #tpu.memory_space<vmem>>, vector<128x128xbf16>
    %cst = arith.constant dense<0.000000e+00> : vector<512x128xf32>
    %6 = tpu.matmul %4, %5, %cst {dimension_numbers = #tpu.dot_dimension_numbers<[1], [0], [0], [1], [0, 0, 1, 1], [], []>} : vector<512x128xbf16>, vector<128x128xbf16>, vector<512x128xf32> -> vector<512x128xf32>
    %7 = arith.addf %3, %6 : vector<512x128xf32>
    %c0_6 = arith.constant 0 : index
    %c0_7 = arith.constant 0 : index
    %8 = vector.load %arg7[%c0_6, %c0_7] : memref<512x128xf32, #tpu.memory_space<vmem>>, vector<512x128xf32>
    tpu.vector_store %arg7[%c0_6, %c0_7], %7 {strides = array<i32>} : memref<512x128xf32, #tpu.memory_space<vmem>>, vector<512x128xf32>,
    %c4_i32 = arith.constant 4 : i32
    %9 = arith.cmpi eq, %arg2, %c4_i32 : i32
    %10 = arith.extui %9 : i1 to i32
    %c0_i32_8 = arith.constant 0 : i32
    %11 = arith.cmpi ne, %10, %c0_i32_8 : i32
    scf.if %11 {
      %c0_9 = arith.constant 0 : index
      %c0_10 = arith.constant 0 : index
      %12 = vector.load %arg7[%c0_9, %c0_10] : memref<512x128xf32, #tpu.memory_space<vmem>>, vector<512x128xf32>
      %c0_11 = arith.constant 0 : index
      %c0_12 = arith.constant 0 : index
      %13 = vector.load %arg5[%c0_11, %c0_12] : memref<1x128xf32, #tpu.memory_space<vmem>>, vector<1x128xf32>
      %14 = vector.broadcast %13 : vector<1x128xf32> to vector<512x128xf32>
      %15 = arith.addf %12, %14 : vector<512x128xf32>
      %cst_13 = arith.constant 0.000000e+00 : f32
      %16 = vector.broadcast %cst_13 : f32 to vector<512x128xf32>
      %17 = arith.maximumf %15, %16 : vector<512x128xf32>
      %c0_14 = arith.constant 0 : index
      %c0_15 = arith.constant 0 : index
      %18 = vector.load %arg6[%c0_14, %c0_15] : memref<512x128xf32, #tpu.memory_space<vmem>>, vector<512x128xf32>
      tpu.vector_store %arg6[%c0_14, %c0_15], %17 {strides = array<i32>} : memref<512x128xf32, #tpu.memory_space<vmem>>, vector<512x128xf32>,
    } else {
    }
    return
  }
  func.func @transform_0(%arg0: i32, %arg1: i32, %arg2: i32) -> (i32, i32) {
    %c0_i32 = arith.constant 0 : i32
    return %arg0, %arg2 : i32, i32
  }
  func.func @transform_1(%arg0: i32, %arg1: i32, %arg2: i32) -> (i32, i32) {
    %c0_i32 = arith.constant 0 : i32
    return %arg2, %arg1 : i32, i32
  }
  func.func @transform_2(%arg0: i32, %arg1: i32, %arg2: i32) -> (i32, i32) {
    %c0_i32 = arith.constant 0 : i32
    %c0_i32_0 = arith.constant 0 : i32
    return %c0_i32, %arg1 : i32, i32
  }
  func.func @transform_3(%arg0: i32, %arg1: i32, %arg2: i32) -> (i32, i32) {
    %c0_i32 = arith.constant 0 : i32
    return %arg0, %arg1 : i32, i32
  }
}

module attributes {stable_mosaic.version = 11 : i64} {
  func.func @_max_tap_kernel(%arg0: i32, %arg1: memref<4x128x64xf32, #tpu.memory_space<vmem>>, %arg2: memref<128x64xf32, #tpu.memory_space<vmem>>) attributes {dimension_semantics = [#tpu.dimension_semantics<parallel>], iteration_bounds = array<i64: 1>, scalar_prefetch = 0 : i64, scratch_operands = 0 : i64, tpu.core_type = #tpu.core_type<tc>, window_params = [{transform_indices = @transform_0, window_bounds = array<i64: 4, 128, 64>}, {transform_indices = @transform_1, window_bounds = array<i64: 128, 64>}]} {
    %c0 = arith.constant 0 : index
    %c0_0 = arith.constant 0 : index
    %c0_1 = arith.constant 0 : index
    %0 = vector.load %arg1[%c0, %c0_0, %c0_1] : memref<4x128x64xf32, #tpu.memory_space<vmem>>, vector<4x128x64xf32>
    %cst = arith.constant dense<0xFF800000> : vector<128x64xf32>
    %1 = vector.multi_reduction <maximumf>, %0, %cst [0] : vector<4x128x64xf32> to vector<128x64xf32>
    %c0_2 = arith.constant 0 : index
    %c0_3 = arith.constant 0 : index
    %2 = vector.load %arg2[%c0_2, %c0_3] : memref<128x64xf32, #tpu.memory_space<vmem>>, vector<128x64xf32>
    tpu.vector_store %arg2[%c0_2, %c0_3], %1 {strides = array<i32>} : memref<128x64xf32, #tpu.memory_space<vmem>>, vector<128x64xf32>,
    return
  }
  func.func @transform_0(%arg0: i32) -> (i32, i32, i32) {
    %c0_i32 = arith.constant 0 : i32
    %c0_i32_0 = arith.constant 0 : i32
    %c0_i32_1 = arith.constant 0 : i32
    return %c0_i32, %arg0, %c0_i32_0 : i32, i32, i32
  }
  func.func @transform_1(%arg0: i32) -> (i32, i32) {
    %c0_i32 = arith.constant 0 : i32
    %c0_i32_0 = arith.constant 0 : i32
    return %arg0, %c0_i32 : i32, i32
  }
}

module attributes {stable_mosaic.version = 11 : i64} {
  func.func @kern(%arg0: i32, %arg1: i32, %arg2: i32, %arg3: memref<128x128xbf16, #tpu.memory_space<vmem>>, %arg4: memref<128x128xbf16, #tpu.memory_space<vmem>>, %arg5: memref<1x128xf32, #tpu.memory_space<vmem>>, %arg6: memref<128x128xf32, #tpu.memory_space<vmem>>, %arg7: memref<128x128xf32, #tpu.memory_space<vmem>>) attributes {dimension_semantics = [#tpu.dimension_semantics<parallel>, #tpu.dimension_semantics<parallel>, #tpu.dimension_semantics<arbitrary>], iteration_bounds = array<i64: 1, 1, 5>, scalar_prefetch = 0 : i64, scratch_operands = 1 : i64, tpu.core_type = #tpu.core_type<tc>, window_params = [{transform_indices = @transform_0, window_bounds = array<i64: 128, 128>}, {transform_indices = @transform_1, window_bounds = array<i64: 128, 128>}, {transform_indices = @transform_2, window_bounds = array<i64: 1, 128>}, {transform_indices = @transform_3, window_bounds = array<i64: 128, 128>}]} {
    %c0_i32 = arith.constant 0 : i32
    %0 = arith.cmpi eq, %arg2, %c0_i32 : i32
    %1 = arith.extui %0 : i1 to i32
    %c0_i32_0 = arith.constant 0 : i32
    %2 = arith.cmpi ne, %1, %c0_i32_0 : i32
    scf.if %2 {
      %cst_9 = arith.constant 0.000000e+00 : f32
      %12 = vector.broadcast %cst_9 : f32 to vector<128x128xf32>
      %c0_10 = arith.constant 0 : index
      %c0_11 = arith.constant 0 : index
      %13 = vector.load %arg7[%c0_10, %c0_11] : memref<128x128xf32, #tpu.memory_space<vmem>>, vector<128x128xf32>
      tpu.vector_store %arg7[%c0_10, %c0_11], %12 {strides = array<i32>} : memref<128x128xf32, #tpu.memory_space<vmem>>, vector<128x128xf32>,
    } else {
    }
    %c0 = arith.constant 0 : index
    %c0_1 = arith.constant 0 : index
    %3 = vector.load %arg7[%c0, %c0_1] : memref<128x128xf32, #tpu.memory_space<vmem>>, vector<128x128xf32>
    %c0_2 = arith.constant 0 : index
    %c0_3 = arith.constant 0 : index
    %4 = vector.load %arg3[%c0_2, %c0_3] : memref<128x128xbf16, #tpu.memory_space<vmem>>, vector<128x128xbf16>
    %c0_4 = arith.constant 0 : index
    %c0_5 = arith.constant 0 : index
    %5 = vector.load %arg4[%c0_4, %c0_5] : memref<128x128xbf16, #tpu.memory_space<vmem>>, vector<128x128xbf16>
    %cst = arith.constant dense<0.000000e+00> : vector<128x128xf32>
    %6 = tpu.matmul %4, %5, %cst {dimension_numbers = #tpu.dot_dimension_numbers<[1], [0], [0], [1], [0, 0, 1, 1], [], []>} : vector<128x128xbf16>, vector<128x128xbf16>, vector<128x128xf32> -> vector<128x128xf32>
    %7 = arith.addf %3, %6 : vector<128x128xf32>
    %c0_6 = arith.constant 0 : index
    %c0_7 = arith.constant 0 : index
    %8 = vector.load %arg7[%c0_6, %c0_7] : memref<128x128xf32, #tpu.memory_space<vmem>>, vector<128x128xf32>
    tpu.vector_store %arg7[%c0_6, %c0_7], %7 {strides = array<i32>} : memref<128x128xf32, #tpu.memory_space<vmem>>, vector<128x128xf32>,
    %c4_i32 = arith.constant 4 : i32
    %9 = arith.cmpi eq, %arg2, %c4_i32 : i32
    %10 = arith.extui %9 : i1 to i32
    %c0_i32_8 = arith.constant 0 : i32
    %11 = arith.cmpi ne, %10, %c0_i32_8 : i32
    scf.if %11 {
      %c0_9 = arith.constant 0 : index
      %c0_10 = arith.constant 0 : index
      %12 = vector.load %arg7[%c0_9, %c0_10] : memref<128x128xf32, #tpu.memory_space<vmem>>, vector<128x128xf32>
      %c0_11 = arith.constant 0 : index
      %c0_12 = arith.constant 0 : index
      %13 = vector.load %arg5[%c0_11, %c0_12] : memref<1x128xf32, #tpu.memory_space<vmem>>, vector<1x128xf32>
      %14 = vector.broadcast %13 : vector<1x128xf32> to vector<128x128xf32>
      %15 = arith.addf %12, %14 : vector<128x128xf32>
      %cst_13 = arith.constant 0.000000e+00 : f32
      %16 = vector.broadcast %cst_13 : f32 to vector<128x128xf32>
      %17 = arith.maximumf %15, %16 : vector<128x128xf32>
      %c0_14 = arith.constant 0 : index
      %c0_15 = arith.constant 0 : index
      %18 = vector.load %arg6[%c0_14, %c0_15] : memref<128x128xf32, #tpu.memory_space<vmem>>, vector<128x128xf32>
      tpu.vector_store %arg6[%c0_14, %c0_15], %17 {strides = array<i32>} : memref<128x128xf32, #tpu.memory_space<vmem>>, vector<128x128xf32>,
    } else {
    }
    return
  }
  func.func @transform_0(%arg0: i32, %arg1: i32, %arg2: i32) -> (i32, i32) {
    %c0_i32 = arith.constant 0 : i32
    return %arg0, %arg2 : i32, i32
  }
  func.func @transform_1(%arg0: i32, %arg1: i32, %arg2: i32) -> (i32, i32) {
    %c0_i32 = arith.constant 0 : i32
    return %arg2, %arg1 : i32, i32
  }
  func.func @transform_2(%arg0: i32, %arg1: i32, %arg2: i32) -> (i32, i32) {
    %c0_i32 = arith.constant 0 : i32
    %c0_i32_0 = arith.constant 0 : i32
    return %c0_i32, %arg1 : i32, i32
  }
  func.func @transform_3(%arg0: i32, %arg1: i32, %arg2: i32) -> (i32, i32) {
    %c0_i32 = arith.constant 0 : i32
    return %arg0, %arg1 : i32, i32
  }
}

module attributes {stable_mosaic.version = 11 : i64} {
  func.func @kern(%arg0: i32, %arg1: i32, %arg2: i32, %arg3: memref<128x384xbf16, #tpu.memory_space<vmem>>, %arg4: memref<384x128xbf16, #tpu.memory_space<vmem>>, %arg5: memref<1x128xf32, #tpu.memory_space<vmem>>, %arg6: memref<128x128xf32, #tpu.memory_space<vmem>>, %arg7: memref<128x128xf32, #tpu.memory_space<vmem>>) attributes {dimension_semantics = [#tpu.dimension_semantics<parallel>, #tpu.dimension_semantics<parallel>, #tpu.dimension_semantics<arbitrary>], iteration_bounds = array<i64: 1, 1, 3>, scalar_prefetch = 0 : i64, scratch_operands = 1 : i64, tpu.core_type = #tpu.core_type<tc>, window_params = [{transform_indices = @transform_0, window_bounds = array<i64: 128, 384>}, {transform_indices = @transform_1, window_bounds = array<i64: 384, 128>}, {transform_indices = @transform_2, window_bounds = array<i64: 1, 128>}, {transform_indices = @transform_3, window_bounds = array<i64: 128, 128>}]} {
    %c0_i32 = arith.constant 0 : i32
    %0 = arith.cmpi eq, %arg2, %c0_i32 : i32
    %1 = arith.extui %0 : i1 to i32
    %c0_i32_0 = arith.constant 0 : i32
    %2 = arith.cmpi ne, %1, %c0_i32_0 : i32
    scf.if %2 {
      %cst_9 = arith.constant 0.000000e+00 : f32
      %12 = vector.broadcast %cst_9 : f32 to vector<128x128xf32>
      %c0_10 = arith.constant 0 : index
      %c0_11 = arith.constant 0 : index
      %13 = vector.load %arg7[%c0_10, %c0_11] : memref<128x128xf32, #tpu.memory_space<vmem>>, vector<128x128xf32>
      tpu.vector_store %arg7[%c0_10, %c0_11], %12 {strides = array<i32>} : memref<128x128xf32, #tpu.memory_space<vmem>>, vector<128x128xf32>,
    } else {
    }
    %c0 = arith.constant 0 : index
    %c0_1 = arith.constant 0 : index
    %3 = vector.load %arg7[%c0, %c0_1] : memref<128x128xf32, #tpu.memory_space<vmem>>, vector<128x128xf32>
    %c0_2 = arith.constant 0 : index
    %c0_3 = arith.constant 0 : index
    %4 = vector.load %arg3[%c0_2, %c0_3] : memref<128x384xbf16, #tpu.memory_space<vmem>>, vector<128x384xbf16>
    %c0_4 = arith.constant 0 : index
    %c0_5 = arith.constant 0 : index
    %5 = vector.load %arg4[%c0_4, %c0_5] : memref<384x128xbf16, #tpu.memory_space<vmem>>, vector<384x128xbf16>
    %cst = arith.constant dense<0.000000e+00> : vector<128x128xf32>
    %6 = tpu.matmul %4, %5, %cst {dimension_numbers = #tpu.dot_dimension_numbers<[1], [0], [0], [1], [0, 0, 1, 1], [], []>} : vector<128x384xbf16>, vector<384x128xbf16>, vector<128x128xf32> -> vector<128x128xf32>
    %7 = arith.addf %3, %6 : vector<128x128xf32>
    %c0_6 = arith.constant 0 : index
    %c0_7 = arith.constant 0 : index
    %8 = vector.load %arg7[%c0_6, %c0_7] : memref<128x128xf32, #tpu.memory_space<vmem>>, vector<128x128xf32>
    tpu.vector_store %arg7[%c0_6, %c0_7], %7 {strides = array<i32>} : memref<128x128xf32, #tpu.memory_space<vmem>>, vector<128x128xf32>,
    %c2_i32 = arith.constant 2 : i32
    %9 = arith.cmpi eq, %arg2, %c2_i32 : i32
    %10 = arith.extui %9 : i1 to i32
    %c0_i32_8 = arith.constant 0 : i32
    %11 = arith.cmpi ne, %10, %c0_i32_8 : i32
    scf.if %11 {
      %c0_9 = arith.constant 0 : index
      %c0_10 = arith.constant 0 : index
      %12 = vector.load %arg7[%c0_9, %c0_10] : memref<128x128xf32, #tpu.memory_space<vmem>>, vector<128x128xf32>
      %c0_11 = arith.constant 0 : index
      %c0_12 = arith.constant 0 : index
      %13 = vector.load %arg5[%c0_11, %c0_12] : memref<1x128xf32, #tpu.memory_space<vmem>>, vector<1x128xf32>
      %14 = vector.broadcast %13 : vector<1x128xf32> to vector<128x128xf32>
      %15 = arith.addf %12, %14 : vector<128x128xf32>
      %cst_13 = arith.constant 0.000000e+00 : f32
      %16 = vector.broadcast %cst_13 : f32 to vector<128x128xf32>
      %17 = arith.maximumf %15, %16 : vector<128x128xf32>
      %c0_14 = arith.constant 0 : index
      %c0_15 = arith.constant 0 : index
      %18 = vector.load %arg6[%c0_14, %c0_15] : memref<128x128xf32, #tpu.memory_space<vmem>>, vector<128x128xf32>
      tpu.vector_store %arg6[%c0_14, %c0_15], %17 {strides = array<i32>} : memref<128x128xf32, #tpu.memory_space<vmem>>, vector<128x128xf32>,
    } else {
    }
    return
  }
  func.func @transform_0(%arg0: i32, %arg1: i32, %arg2: i32) -> (i32, i32) {
    %c0_i32 = arith.constant 0 : i32
    return %arg0, %arg2 : i32, i32
  }
  func.func @transform_1(%arg0: i32, %arg1: i32, %arg2: i32) -> (i32, i32) {
    %c0_i32 = arith.constant 0 : i32
    return %arg2, %arg1 : i32, i32
  }
  func.func @transform_2(%arg0: i32, %arg1: i32, %arg2: i32) -> (i32, i32) {
    %c0_i32 = arith.constant 0 : i32
    %c0_i32_0 = arith.constant 0 : i32
    return %c0_i32, %arg1 : i32, i32
  }
  func.func @transform_3(%arg0: i32, %arg1: i32, %arg2: i32) -> (i32, i32) {
    %c0_i32 = arith.constant 0 : i32
    return %arg0, %arg1 : i32, i32
  }
}

module attributes {stable_mosaic.version = 11 : i64} {
  func.func @_max_tap_kernel(%arg0: i32, %arg1: memref<4x32x128xf32, #tpu.memory_space<vmem>>, %arg2: memref<32x128xf32, #tpu.memory_space<vmem>>) attributes {dimension_semantics = [#tpu.dimension_semantics<parallel>], iteration_bounds = array<i64: 1>, scalar_prefetch = 0 : i64, scratch_operands = 0 : i64, tpu.core_type = #tpu.core_type<tc>, window_params = [{transform_indices = @transform_0, window_bounds = array<i64: 4, 32, 128>}, {transform_indices = @transform_1, window_bounds = array<i64: 32, 128>}]} {
    %c0 = arith.constant 0 : index
    %c0_0 = arith.constant 0 : index
    %c0_1 = arith.constant 0 : index
    %0 = vector.load %arg1[%c0, %c0_0, %c0_1] : memref<4x32x128xf32, #tpu.memory_space<vmem>>, vector<4x32x128xf32>
    %cst = arith.constant dense<0xFF800000> : vector<32x128xf32>
    %1 = vector.multi_reduction <maximumf>, %0, %cst [0] : vector<4x32x128xf32> to vector<32x128xf32>
    %c0_2 = arith.constant 0 : index
    %c0_3 = arith.constant 0 : index
    %2 = vector.load %arg2[%c0_2, %c0_3] : memref<32x128xf32, #tpu.memory_space<vmem>>, vector<32x128xf32>
    tpu.vector_store %arg2[%c0_2, %c0_3], %1 {strides = array<i32>} : memref<32x128xf32, #tpu.memory_space<vmem>>, vector<32x128xf32>,
    return
  }
  func.func @transform_0(%arg0: i32) -> (i32, i32, i32) {
    %c0_i32 = arith.constant 0 : i32
    %c0_i32_0 = arith.constant 0 : i32
    %c0_i32_1 = arith.constant 0 : i32
    return %c0_i32, %arg0, %c0_i32_0 : i32, i32, i32
  }
  func.func @transform_1(%arg0: i32) -> (i32, i32) {
    %c0_i32 = arith.constant 0 : i32
    %c0_i32_0 = arith.constant 0 : i32
    return %arg0, %c0_i32 : i32, i32
  }
}

module attributes {stable_mosaic.version = 11 : i64} {
  func.func @kern(%arg0: i32, %arg1: i32, %arg2: i32, %arg3: memref<32x384xbf16, #tpu.memory_space<vmem>>, %arg4: memref<384x256xbf16, #tpu.memory_space<vmem>>, %arg5: memref<1x256xf32, #tpu.memory_space<vmem>>, %arg6: memref<32x256xf32, #tpu.memory_space<vmem>>, %arg7: memref<32x256xf32, #tpu.memory_space<vmem>>) attributes {dimension_semantics = [#tpu.dimension_semantics<parallel>, #tpu.dimension_semantics<parallel>, #tpu.dimension_semantics<arbitrary>], iteration_bounds = array<i64: 1, 1, 3>, scalar_prefetch = 0 : i64, scratch_operands = 1 : i64, tpu.core_type = #tpu.core_type<tc>, window_params = [{transform_indices = @transform_0, window_bounds = array<i64: 32, 384>}, {transform_indices = @transform_1, window_bounds = array<i64: 384, 256>}, {transform_indices = @transform_2, window_bounds = array<i64: 1, 256>}, {transform_indices = @transform_3, window_bounds = array<i64: 32, 256>}]} {
    %c0_i32 = arith.constant 0 : i32
    %0 = arith.cmpi eq, %arg2, %c0_i32 : i32
    %1 = arith.extui %0 : i1 to i32
    %c0_i32_0 = arith.constant 0 : i32
    %2 = arith.cmpi ne, %1, %c0_i32_0 : i32
    scf.if %2 {
      %cst_9 = arith.constant 0.000000e+00 : f32
      %12 = vector.broadcast %cst_9 : f32 to vector<32x256xf32>
      %c0_10 = arith.constant 0 : index
      %c0_11 = arith.constant 0 : index
      %13 = vector.load %arg7[%c0_10, %c0_11] : memref<32x256xf32, #tpu.memory_space<vmem>>, vector<32x256xf32>
      tpu.vector_store %arg7[%c0_10, %c0_11], %12 {strides = array<i32>} : memref<32x256xf32, #tpu.memory_space<vmem>>, vector<32x256xf32>,
    } else {
    }
    %c0 = arith.constant 0 : index
    %c0_1 = arith.constant 0 : index
    %3 = vector.load %arg7[%c0, %c0_1] : memref<32x256xf32, #tpu.memory_space<vmem>>, vector<32x256xf32>
    %c0_2 = arith.constant 0 : index
    %c0_3 = arith.constant 0 : index
    %4 = vector.load %arg3[%c0_2, %c0_3] : memref<32x384xbf16, #tpu.memory_space<vmem>>, vector<32x384xbf16>
    %c0_4 = arith.constant 0 : index
    %c0_5 = arith.constant 0 : index
    %5 = vector.load %arg4[%c0_4, %c0_5] : memref<384x256xbf16, #tpu.memory_space<vmem>>, vector<384x256xbf16>
    %cst = arith.constant dense<0.000000e+00> : vector<32x256xf32>
    %6 = tpu.matmul %4, %5, %cst {dimension_numbers = #tpu.dot_dimension_numbers<[1], [0], [0], [1], [0, 0, 1, 1], [], []>} : vector<32x384xbf16>, vector<384x256xbf16>, vector<32x256xf32> -> vector<32x256xf32>
    %7 = arith.addf %3, %6 : vector<32x256xf32>
    %c0_6 = arith.constant 0 : index
    %c0_7 = arith.constant 0 : index
    %8 = vector.load %arg7[%c0_6, %c0_7] : memref<32x256xf32, #tpu.memory_space<vmem>>, vector<32x256xf32>
    tpu.vector_store %arg7[%c0_6, %c0_7], %7 {strides = array<i32>} : memref<32x256xf32, #tpu.memory_space<vmem>>, vector<32x256xf32>,
    %c2_i32 = arith.constant 2 : i32
    %9 = arith.cmpi eq, %arg2, %c2_i32 : i32
    %10 = arith.extui %9 : i1 to i32
    %c0_i32_8 = arith.constant 0 : i32
    %11 = arith.cmpi ne, %10, %c0_i32_8 : i32
    scf.if %11 {
      %c0_9 = arith.constant 0 : index
      %c0_10 = arith.constant 0 : index
      %12 = vector.load %arg7[%c0_9, %c0_10] : memref<32x256xf32, #tpu.memory_space<vmem>>, vector<32x256xf32>
      %c0_11 = arith.constant 0 : index
      %c0_12 = arith.constant 0 : index
      %13 = vector.load %arg5[%c0_11, %c0_12] : memref<1x256xf32, #tpu.memory_space<vmem>>, vector<1x256xf32>
      %14 = vector.broadcast %13 : vector<1x256xf32> to vector<32x256xf32>
      %15 = arith.addf %12, %14 : vector<32x256xf32>
      %cst_13 = arith.constant 0.000000e+00 : f32
      %16 = vector.broadcast %cst_13 : f32 to vector<32x256xf32>
      %17 = arith.maximumf %15, %16 : vector<32x256xf32>
      %c0_14 = arith.constant 0 : index
      %c0_15 = arith.constant 0 : index
      %18 = vector.load %arg6[%c0_14, %c0_15] : memref<32x256xf32, #tpu.memory_space<vmem>>, vector<32x256xf32>
      tpu.vector_store %arg6[%c0_14, %c0_15], %17 {strides = array<i32>} : memref<32x256xf32, #tpu.memory_space<vmem>>, vector<32x256xf32>,
    } else {
    }
    return
  }
  func.func @transform_0(%arg0: i32, %arg1: i32, %arg2: i32) -> (i32, i32) {
    %c0_i32 = arith.constant 0 : i32
    return %arg0, %arg2 : i32, i32
  }
  func.func @transform_1(%arg0: i32, %arg1: i32, %arg2: i32) -> (i32, i32) {
    %c0_i32 = arith.constant 0 : i32
    return %arg2, %arg1 : i32, i32
  }
  func.func @transform_2(%arg0: i32, %arg1: i32, %arg2: i32) -> (i32, i32) {
    %c0_i32 = arith.constant 0 : i32
    %c0_i32_0 = arith.constant 0 : i32
    return %c0_i32, %arg1 : i32, i32
  }
  func.func @transform_3(%arg0: i32, %arg1: i32, %arg2: i32) -> (i32, i32) {
    %c0_i32 = arith.constant 0 : i32
    return %arg0, %arg1 : i32, i32
  }
}

module attributes {stable_mosaic.version = 11 : i64} {
  func.func @kern(%arg0: i32, %arg1: i32, %arg2: i32, %arg3: memref<32x384xbf16, #tpu.memory_space<vmem>>, %arg4: memref<384x256xbf16, #tpu.memory_space<vmem>>, %arg5: memref<1x256xf32, #tpu.memory_space<vmem>>, %arg6: memref<32x256xf32, #tpu.memory_space<vmem>>, %arg7: memref<32x256xf32, #tpu.memory_space<vmem>>) attributes {dimension_semantics = [#tpu.dimension_semantics<parallel>, #tpu.dimension_semantics<parallel>, #tpu.dimension_semantics<arbitrary>], iteration_bounds = array<i64: 1, 1, 6>, scalar_prefetch = 0 : i64, scratch_operands = 1 : i64, tpu.core_type = #tpu.core_type<tc>, window_params = [{transform_indices = @transform_0, window_bounds = array<i64: 32, 384>}, {transform_indices = @transform_1, window_bounds = array<i64: 384, 256>}, {transform_indices = @transform_2, window_bounds = array<i64: 1, 256>}, {transform_indices = @transform_3, window_bounds = array<i64: 32, 256>}]} {
    %c0_i32 = arith.constant 0 : i32
    %0 = arith.cmpi eq, %arg2, %c0_i32 : i32
    %1 = arith.extui %0 : i1 to i32
    %c0_i32_0 = arith.constant 0 : i32
    %2 = arith.cmpi ne, %1, %c0_i32_0 : i32
    scf.if %2 {
      %cst_9 = arith.constant 0.000000e+00 : f32
      %12 = vector.broadcast %cst_9 : f32 to vector<32x256xf32>
      %c0_10 = arith.constant 0 : index
      %c0_11 = arith.constant 0 : index
      %13 = vector.load %arg7[%c0_10, %c0_11] : memref<32x256xf32, #tpu.memory_space<vmem>>, vector<32x256xf32>
      tpu.vector_store %arg7[%c0_10, %c0_11], %12 {strides = array<i32>} : memref<32x256xf32, #tpu.memory_space<vmem>>, vector<32x256xf32>,
    } else {
    }
    %c0 = arith.constant 0 : index
    %c0_1 = arith.constant 0 : index
    %3 = vector.load %arg7[%c0, %c0_1] : memref<32x256xf32, #tpu.memory_space<vmem>>, vector<32x256xf32>
    %c0_2 = arith.constant 0 : index
    %c0_3 = arith.constant 0 : index
    %4 = vector.load %arg3[%c0_2, %c0_3] : memref<32x384xbf16, #tpu.memory_space<vmem>>, vector<32x384xbf16>
    %c0_4 = arith.constant 0 : index
    %c0_5 = arith.constant 0 : index
    %5 = vector.load %arg4[%c0_4, %c0_5] : memref<384x256xbf16, #tpu.memory_space<vmem>>, vector<384x256xbf16>
    %cst = arith.constant dense<0.000000e+00> : vector<32x256xf32>
    %6 = tpu.matmul %4, %5, %cst {dimension_numbers = #tpu.dot_dimension_numbers<[1], [0], [0], [1], [0, 0, 1, 1], [], []>} : vector<32x384xbf16>, vector<384x256xbf16>, vector<32x256xf32> -> vector<32x256xf32>
    %7 = arith.addf %3, %6 : vector<32x256xf32>
    %c0_6 = arith.constant 0 : index
    %c0_7 = arith.constant 0 : index
    %8 = vector.load %arg7[%c0_6, %c0_7] : memref<32x256xf32, #tpu.memory_space<vmem>>, vector<32x256xf32>
    tpu.vector_store %arg7[%c0_6, %c0_7], %7 {strides = array<i32>} : memref<32x256xf32, #tpu.memory_space<vmem>>, vector<32x256xf32>,
    %c5_i32 = arith.constant 5 : i32
    %9 = arith.cmpi eq, %arg2, %c5_i32 : i32
    %10 = arith.extui %9 : i1 to i32
    %c0_i32_8 = arith.constant 0 : i32
    %11 = arith.cmpi ne, %10, %c0_i32_8 : i32
    scf.if %11 {
      %c0_9 = arith.constant 0 : index
      %c0_10 = arith.constant 0 : index
      %12 = vector.load %arg7[%c0_9, %c0_10] : memref<32x256xf32, #tpu.memory_space<vmem>>, vector<32x256xf32>
      %c0_11 = arith.constant 0 : index
      %c0_12 = arith.constant 0 : index
      %13 = vector.load %arg5[%c0_11, %c0_12] : memref<1x256xf32, #tpu.memory_space<vmem>>, vector<1x256xf32>
      %14 = vector.broadcast %13 : vector<1x256xf32> to vector<32x256xf32>
      %15 = arith.addf %12, %14 : vector<32x256xf32>
      %cst_13 = arith.constant 0.000000e+00 : f32
      %16 = vector.broadcast %cst_13 : f32 to vector<32x256xf32>
      %17 = arith.maximumf %15, %16 : vector<32x256xf32>
      %c0_14 = arith.constant 0 : index
      %c0_15 = arith.constant 0 : index
      %18 = vector.load %arg6[%c0_14, %c0_15] : memref<32x256xf32, #tpu.memory_space<vmem>>, vector<32x256xf32>
      tpu.vector_store %arg6[%c0_14, %c0_15], %17 {strides = array<i32>} : memref<32x256xf32, #tpu.memory_space<vmem>>, vector<32x256xf32>,
    } else {
    }
    return
  }
  func.func @transform_0(%arg0: i32, %arg1: i32, %arg2: i32) -> (i32, i32) {
    %c0_i32 = arith.constant 0 : i32
    return %arg0, %arg2 : i32, i32
  }
  func.func @transform_1(%arg0: i32, %arg1: i32, %arg2: i32) -> (i32, i32) {
    %c0_i32 = arith.constant 0 : i32
    return %arg2, %arg1 : i32, i32
  }
  func.func @transform_2(%arg0: i32, %arg1: i32, %arg2: i32) -> (i32, i32) {
    %c0_i32 = arith.constant 0 : i32
    %c0_i32_0 = arith.constant 0 : i32
    return %c0_i32, %arg1 : i32, i32
  }
  func.func @transform_3(%arg0: i32, %arg1: i32, %arg2: i32) -> (i32, i32) {
    %c0_i32 = arith.constant 0 : i32
    return %arg0, %arg1 : i32, i32
  }
}

module attributes {stable_mosaic.version = 11 : i64} {
  func.func @_max_tap_kernel(%arg0: i32, %arg1: memref<4x8x256xf32, #tpu.memory_space<vmem>>, %arg2: memref<8x256xf32, #tpu.memory_space<vmem>>) attributes {dimension_semantics = [#tpu.dimension_semantics<parallel>], iteration_bounds = array<i64: 1>, scalar_prefetch = 0 : i64, scratch_operands = 0 : i64, tpu.core_type = #tpu.core_type<tc>, window_params = [{transform_indices = @transform_0, window_bounds = array<i64: 4, 8, 256>}, {transform_indices = @transform_1, window_bounds = array<i64: 8, 256>}]} {
    %c0 = arith.constant 0 : index
    %c0_0 = arith.constant 0 : index
    %c0_1 = arith.constant 0 : index
    %0 = vector.load %arg1[%c0, %c0_0, %c0_1] : memref<4x8x256xf32, #tpu.memory_space<vmem>>, vector<4x8x256xf32>
    %cst = arith.constant dense<0xFF800000> : vector<8x256xf32>
    %1 = vector.multi_reduction <maximumf>, %0, %cst [0] : vector<4x8x256xf32> to vector<8x256xf32>
    %c0_2 = arith.constant 0 : index
    %c0_3 = arith.constant 0 : index
    %2 = vector.load %arg2[%c0_2, %c0_3] : memref<8x256xf32, #tpu.memory_space<vmem>>, vector<8x256xf32>
    tpu.vector_store %arg2[%c0_2, %c0_3], %1 {strides = array<i32>} : memref<8x256xf32, #tpu.memory_space<vmem>>, vector<8x256xf32>,
    return
  }
  func.func @transform_0(%arg0: i32) -> (i32, i32, i32) {
    %c0_i32 = arith.constant 0 : i32
    %c0_i32_0 = arith.constant 0 : i32
    %c0_i32_1 = arith.constant 0 : i32
    return %c0_i32, %arg0, %c0_i32_0 : i32, i32, i32
  }
  func.func @transform_1(%arg0: i32) -> (i32, i32) {
    %c0_i32 = arith.constant 0 : i32
    %c0_i32_0 = arith.constant 0 : i32
    return %arg0, %c0_i32 : i32, i32
  }
}

module attributes {stable_mosaic.version = 11 : i64} {
  func.func @kern(%arg0: i32, %arg1: i32, %arg2: i32, %arg3: memref<8x384xbf16, #tpu.memory_space<vmem>>, %arg4: memref<384x256xbf16, #tpu.memory_space<vmem>>, %arg5: memref<1x256xf32, #tpu.memory_space<vmem>>, %arg6: memref<8x256xf32, #tpu.memory_space<vmem>>, %arg7: memref<8x256xf32, #tpu.memory_space<vmem>>) attributes {dimension_semantics = [#tpu.dimension_semantics<parallel>, #tpu.dimension_semantics<parallel>, #tpu.dimension_semantics<arbitrary>], iteration_bounds = array<i64: 1, 2, 6>, scalar_prefetch = 0 : i64, scratch_operands = 1 : i64, tpu.core_type = #tpu.core_type<tc>, window_params = [{transform_indices = @transform_0, window_bounds = array<i64: 8, 384>}, {transform_indices = @transform_1, window_bounds = array<i64: 384, 256>}, {transform_indices = @transform_2, window_bounds = array<i64: 1, 256>}, {transform_indices = @transform_3, window_bounds = array<i64: 8, 256>}]} {
    %c0_i32 = arith.constant 0 : i32
    %0 = arith.cmpi eq, %arg2, %c0_i32 : i32
    %1 = arith.extui %0 : i1 to i32
    %c0_i32_0 = arith.constant 0 : i32
    %2 = arith.cmpi ne, %1, %c0_i32_0 : i32
    scf.if %2 {
      %cst_9 = arith.constant 0.000000e+00 : f32
      %12 = vector.broadcast %cst_9 : f32 to vector<8x256xf32>
      %c0_10 = arith.constant 0 : index
      %c0_11 = arith.constant 0 : index
      %13 = vector.load %arg7[%c0_10, %c0_11] : memref<8x256xf32, #tpu.memory_space<vmem>>, vector<8x256xf32>
      tpu.vector_store %arg7[%c0_10, %c0_11], %12 {strides = array<i32>} : memref<8x256xf32, #tpu.memory_space<vmem>>, vector<8x256xf32>,
    } else {
    }
    %c0 = arith.constant 0 : index
    %c0_1 = arith.constant 0 : index
    %3 = vector.load %arg7[%c0, %c0_1] : memref<8x256xf32, #tpu.memory_space<vmem>>, vector<8x256xf32>
    %c0_2 = arith.constant 0 : index
    %c0_3 = arith.constant 0 : index
    %4 = vector.load %arg3[%c0_2, %c0_3] : memref<8x384xbf16, #tpu.memory_space<vmem>>, vector<8x384xbf16>
    %c0_4 = arith.constant 0 : index
    %c0_5 = arith.constant 0 : index
    %5 = vector.load %arg4[%c0_4, %c0_5] : memref<384x256xbf16, #tpu.memory_space<vmem>>, vector<384x256xbf16>
    %cst = arith.constant dense<0.000000e+00> : vector<8x256xf32>
    %6 = tpu.matmul %4, %5, %cst {dimension_numbers = #tpu.dot_dimension_numbers<[1], [0], [0], [1], [0, 0, 1, 1], [], []>} : vector<8x384xbf16>, vector<384x256xbf16>, vector<8x256xf32> -> vector<8x256xf32>
    %7 = arith.addf %3, %6 : vector<8x256xf32>
    %c0_6 = arith.constant 0 : index
    %c0_7 = arith.constant 0 : index
    %8 = vector.load %arg7[%c0_6, %c0_7] : memref<8x256xf32, #tpu.memory_space<vmem>>, vector<8x256xf32>
    tpu.vector_store %arg7[%c0_6, %c0_7], %7 {strides = array<i32>} : memref<8x256xf32, #tpu.memory_space<vmem>>, vector<8x256xf32>,
    %c5_i32 = arith.constant 5 : i32
    %9 = arith.cmpi eq, %arg2, %c5_i32 : i32
    %10 = arith.extui %9 : i1 to i32
    %c0_i32_8 = arith.constant 0 : i32
    %11 = arith.cmpi ne, %10, %c0_i32_8 : i32
    scf.if %11 {
      %c0_9 = arith.constant 0 : index
      %c0_10 = arith.constant 0 : index
      %12 = vector.load %arg7[%c0_9, %c0_10] : memref<8x256xf32, #tpu.memory_space<vmem>>, vector<8x256xf32>
      %c0_11 = arith.constant 0 : index
      %c0_12 = arith.constant 0 : index
      %13 = vector.load %arg5[%c0_11, %c0_12] : memref<1x256xf32, #tpu.memory_space<vmem>>, vector<1x256xf32>
      %14 = vector.broadcast %13 : vector<1x256xf32> to vector<8x256xf32>
      %15 = arith.addf %12, %14 : vector<8x256xf32>
      %cst_13 = arith.constant 0.000000e+00 : f32
      %16 = vector.broadcast %cst_13 : f32 to vector<8x256xf32>
      %17 = arith.maximumf %15, %16 : vector<8x256xf32>
      %c0_14 = arith.constant 0 : index
      %c0_15 = arith.constant 0 : index
      %18 = vector.load %arg6[%c0_14, %c0_15] : memref<8x256xf32, #tpu.memory_space<vmem>>, vector<8x256xf32>
      tpu.vector_store %arg6[%c0_14, %c0_15], %17 {strides = array<i32>} : memref<8x256xf32, #tpu.memory_space<vmem>>, vector<8x256xf32>,
    } else {
    }
    return
  }
  func.func @transform_0(%arg0: i32, %arg1: i32, %arg2: i32) -> (i32, i32) {
    %c0_i32 = arith.constant 0 : i32
    return %arg0, %arg2 : i32, i32
  }
  func.func @transform_1(%arg0: i32, %arg1: i32, %arg2: i32) -> (i32, i32) {
    %c0_i32 = arith.constant 0 : i32
    return %arg2, %arg1 : i32, i32
  }
  func.func @transform_2(%arg0: i32, %arg1: i32, %arg2: i32) -> (i32, i32) {
    %c0_i32 = arith.constant 0 : i32
    %c0_i32_0 = arith.constant 0 : i32
    return %c0_i32, %arg1 : i32, i32
  }
  func.func @transform_3(%arg0: i32, %arg1: i32, %arg2: i32) -> (i32, i32) {
    %c0_i32 = arith.constant 0 : i32
    return %arg0, %arg1 : i32, i32
  }
}

module attributes {stable_mosaic.version = 11 : i64} {
  func.func @kern(%arg0: i32, %arg1: i32, %arg2: i32, %arg3: memref<8x512xbf16, #tpu.memory_space<vmem>>, %arg4: memref<512x256xbf16, #tpu.memory_space<vmem>>, %arg5: memref<1x256xf32, #tpu.memory_space<vmem>>, %arg6: memref<8x256xf32, #tpu.memory_space<vmem>>, %arg7: memref<8x256xf32, #tpu.memory_space<vmem>>) attributes {dimension_semantics = [#tpu.dimension_semantics<parallel>, #tpu.dimension_semantics<parallel>, #tpu.dimension_semantics<arbitrary>], iteration_bounds = array<i64: 1, 2, 9>, scalar_prefetch = 0 : i64, scratch_operands = 1 : i64, tpu.core_type = #tpu.core_type<tc>, window_params = [{transform_indices = @transform_0, window_bounds = array<i64: 8, 512>}, {transform_indices = @transform_1, window_bounds = array<i64: 512, 256>}, {transform_indices = @transform_2, window_bounds = array<i64: 1, 256>}, {transform_indices = @transform_3, window_bounds = array<i64: 8, 256>}]} {
    %c0_i32 = arith.constant 0 : i32
    %0 = arith.cmpi eq, %arg2, %c0_i32 : i32
    %1 = arith.extui %0 : i1 to i32
    %c0_i32_0 = arith.constant 0 : i32
    %2 = arith.cmpi ne, %1, %c0_i32_0 : i32
    scf.if %2 {
      %cst_9 = arith.constant 0.000000e+00 : f32
      %12 = vector.broadcast %cst_9 : f32 to vector<8x256xf32>
      %c0_10 = arith.constant 0 : index
      %c0_11 = arith.constant 0 : index
      %13 = vector.load %arg7[%c0_10, %c0_11] : memref<8x256xf32, #tpu.memory_space<vmem>>, vector<8x256xf32>
      tpu.vector_store %arg7[%c0_10, %c0_11], %12 {strides = array<i32>} : memref<8x256xf32, #tpu.memory_space<vmem>>, vector<8x256xf32>,
    } else {
    }
    %c0 = arith.constant 0 : index
    %c0_1 = arith.constant 0 : index
    %3 = vector.load %arg7[%c0, %c0_1] : memref<8x256xf32, #tpu.memory_space<vmem>>, vector<8x256xf32>
    %c0_2 = arith.constant 0 : index
    %c0_3 = arith.constant 0 : index
    %4 = vector.load %arg3[%c0_2, %c0_3] : memref<8x512xbf16, #tpu.memory_space<vmem>>, vector<8x512xbf16>
    %c0_4 = arith.constant 0 : index
    %c0_5 = arith.constant 0 : index
    %5 = vector.load %arg4[%c0_4, %c0_5] : memref<512x256xbf16, #tpu.memory_space<vmem>>, vector<512x256xbf16>
    %cst = arith.constant dense<0.000000e+00> : vector<8x256xf32>
    %6 = tpu.matmul %4, %5, %cst {dimension_numbers = #tpu.dot_dimension_numbers<[1], [0], [0], [1], [0, 0, 1, 1], [], []>} : vector<8x512xbf16>, vector<512x256xbf16>, vector<8x256xf32> -> vector<8x256xf32>
    %7 = arith.addf %3, %6 : vector<8x256xf32>
    %c0_6 = arith.constant 0 : index
    %c0_7 = arith.constant 0 : index
    %8 = vector.load %arg7[%c0_6, %c0_7] : memref<8x256xf32, #tpu.memory_space<vmem>>, vector<8x256xf32>
    tpu.vector_store %arg7[%c0_6, %c0_7], %7 {strides = array<i32>} : memref<8x256xf32, #tpu.memory_space<vmem>>, vector<8x256xf32>,
    %c8_i32 = arith.constant 8 : i32
    %9 = arith.cmpi eq, %arg2, %c8_i32 : i32
    %10 = arith.extui %9 : i1 to i32
    %c0_i32_8 = arith.constant 0 : i32
    %11 = arith.cmpi ne, %10, %c0_i32_8 : i32
    scf.if %11 {
      %c0_9 = arith.constant 0 : index
      %c0_10 = arith.constant 0 : index
      %12 = vector.load %arg7[%c0_9, %c0_10] : memref<8x256xf32, #tpu.memory_space<vmem>>, vector<8x256xf32>
      %c0_11 = arith.constant 0 : index
      %c0_12 = arith.constant 0 : index
      %13 = vector.load %arg5[%c0_11, %c0_12] : memref<1x256xf32, #tpu.memory_space<vmem>>, vector<1x256xf32>
      %14 = vector.broadcast %13 : vector<1x256xf32> to vector<8x256xf32>
      %15 = arith.addf %12, %14 : vector<8x256xf32>
      %cst_13 = arith.constant 0.000000e+00 : f32
      %16 = vector.broadcast %cst_13 : f32 to vector<8x256xf32>
      %17 = arith.maximumf %15, %16 : vector<8x256xf32>
      %c0_14 = arith.constant 0 : index
      %c0_15 = arith.constant 0 : index
      %18 = vector.load %arg6[%c0_14, %c0_15] : memref<8x256xf32, #tpu.memory_space<vmem>>, vector<8x256xf32>
      tpu.vector_store %arg6[%c0_14, %c0_15], %17 {strides = array<i32>} : memref<8x256xf32, #tpu.memory_space<vmem>>, vector<8x256xf32>,
    } else {
    }
    return
  }
  func.func @transform_0(%arg0: i32, %arg1: i32, %arg2: i32) -> (i32, i32) {
    %c0_i32 = arith.constant 0 : i32
    return %arg0, %arg2 : i32, i32
  }
  func.func @transform_1(%arg0: i32, %arg1: i32, %arg2: i32) -> (i32, i32) {
    %c0_i32 = arith.constant 0 : i32
    return %arg2, %arg1 : i32, i32
  }
  func.func @transform_2(%arg0: i32, %arg1: i32, %arg2: i32) -> (i32, i32) {
    %c0_i32 = arith.constant 0 : i32
    %c0_i32_0 = arith.constant 0 : i32
    return %c0_i32, %arg1 : i32, i32
  }
  func.func @transform_3(%arg0: i32, %arg1: i32, %arg2: i32) -> (i32, i32) {
    %c0_i32 = arith.constant 0 : i32
    return %arg0, %arg1 : i32, i32
  }
}

module attributes {stable_mosaic.version = 11 : i64} {
  func.func @kern(%arg0: i32, %arg1: i32, %arg2: i32, %arg3: memref<8x512xbf16, #tpu.memory_space<vmem>>, %arg4: memref<512x256xbf16, #tpu.memory_space<vmem>>, %arg5: memref<1x256xf32, #tpu.memory_space<vmem>>, %arg6: memref<8x256xf32, #tpu.memory_space<vmem>>, %arg7: memref<8x256xf32, #tpu.memory_space<vmem>>) attributes {dimension_semantics = [#tpu.dimension_semantics<parallel>, #tpu.dimension_semantics<parallel>, #tpu.dimension_semantics<arbitrary>], iteration_bounds = array<i64: 1, 1, 9>, scalar_prefetch = 0 : i64, scratch_operands = 1 : i64, tpu.core_type = #tpu.core_type<tc>, window_params = [{transform_indices = @transform_0, window_bounds = array<i64: 8, 512>}, {transform_indices = @transform_1, window_bounds = array<i64: 512, 256>}, {transform_indices = @transform_2, window_bounds = array<i64: 1, 256>}, {transform_indices = @transform_3, window_bounds = array<i64: 8, 256>}]} {
    %c0_i32 = arith.constant 0 : i32
    %0 = arith.cmpi eq, %arg2, %c0_i32 : i32
    %1 = arith.extui %0 : i1 to i32
    %c0_i32_0 = arith.constant 0 : i32
    %2 = arith.cmpi ne, %1, %c0_i32_0 : i32
    scf.if %2 {
      %cst_9 = arith.constant 0.000000e+00 : f32
      %12 = vector.broadcast %cst_9 : f32 to vector<8x256xf32>
      %c0_10 = arith.constant 0 : index
      %c0_11 = arith.constant 0 : index
      %13 = vector.load %arg7[%c0_10, %c0_11] : memref<8x256xf32, #tpu.memory_space<vmem>>, vector<8x256xf32>
      tpu.vector_store %arg7[%c0_10, %c0_11], %12 {strides = array<i32>} : memref<8x256xf32, #tpu.memory_space<vmem>>, vector<8x256xf32>,
    } else {
    }
    %c0 = arith.constant 0 : index
    %c0_1 = arith.constant 0 : index
    %3 = vector.load %arg7[%c0, %c0_1] : memref<8x256xf32, #tpu.memory_space<vmem>>, vector<8x256xf32>
    %c0_2 = arith.constant 0 : index
    %c0_3 = arith.constant 0 : index
    %4 = vector.load %arg3[%c0_2, %c0_3] : memref<8x512xbf16, #tpu.memory_space<vmem>>, vector<8x512xbf16>
    %c0_4 = arith.constant 0 : index
    %c0_5 = arith.constant 0 : index
    %5 = vector.load %arg4[%c0_4, %c0_5] : memref<512x256xbf16, #tpu.memory_space<vmem>>, vector<512x256xbf16>
    %cst = arith.constant dense<0.000000e+00> : vector<8x256xf32>
    %6 = tpu.matmul %4, %5, %cst {dimension_numbers = #tpu.dot_dimension_numbers<[1], [0], [0], [1], [0, 0, 1, 1], [], []>} : vector<8x512xbf16>, vector<512x256xbf16>, vector<8x256xf32> -> vector<8x256xf32>
    %7 = arith.addf %3, %6 : vector<8x256xf32>
    %c0_6 = arith.constant 0 : index
    %c0_7 = arith.constant 0 : index
    %8 = vector.load %arg7[%c0_6, %c0_7] : memref<8x256xf32, #tpu.memory_space<vmem>>, vector<8x256xf32>
    tpu.vector_store %arg7[%c0_6, %c0_7], %7 {strides = array<i32>} : memref<8x256xf32, #tpu.memory_space<vmem>>, vector<8x256xf32>,
    %c8_i32 = arith.constant 8 : i32
    %9 = arith.cmpi eq, %arg2, %c8_i32 : i32
    %10 = arith.extui %9 : i1 to i32
    %c0_i32_8 = arith.constant 0 : i32
    %11 = arith.cmpi ne, %10, %c0_i32_8 : i32
    scf.if %11 {
      %c0_9 = arith.constant 0 : index
      %c0_10 = arith.constant 0 : index
      %12 = vector.load %arg7[%c0_9, %c0_10] : memref<8x256xf32, #tpu.memory_space<vmem>>, vector<8x256xf32>
      %c0_11 = arith.constant 0 : index
      %c0_12 = arith.constant 0 : index
      %13 = vector.load %arg5[%c0_11, %c0_12] : memref<1x256xf32, #tpu.memory_space<vmem>>, vector<1x256xf32>
      %14 = vector.broadcast %13 : vector<1x256xf32> to vector<8x256xf32>
      %15 = arith.addf %12, %14 : vector<8x256xf32>
      %c0_13 = arith.constant 0 : index
      %c0_14 = arith.constant 0 : index
      %16 = vector.load %arg6[%c0_13, %c0_14] : memref<8x256xf32, #tpu.memory_space<vmem>>, vector<8x256xf32>
      tpu.vector_store %arg6[%c0_13, %c0_14], %15 {strides = array<i32>} : memref<8x256xf32, #tpu.memory_space<vmem>>, vector<8x256xf32>,
    } else {
    }
    return
  }
  func.func @transform_0(%arg0: i32, %arg1: i32, %arg2: i32) -> (i32, i32) {
    %c0_i32 = arith.constant 0 : i32
    return %arg0, %arg2 : i32, i32
  }
  func.func @transform_1(%arg0: i32, %arg1: i32, %arg2: i32) -> (i32, i32) {
    %c0_i32 = arith.constant 0 : i32
    return %arg2, %arg1 : i32, i32
  }
  func.func @transform_2(%arg0: i32, %arg1: i32, %arg2: i32) -> (i32, i32) {
    %c0_i32 = arith.constant 0 : i32
    %c0_i32_0 = arith.constant 0 : i32
    return %c0_i32, %arg1 : i32, i32
  }
  func.func @transform_3(%arg0: i32, %arg1: i32, %arg2: i32) -> (i32, i32) {
    %c0_i32 = arith.constant 0 : i32
    return %arg0, %arg1 : i32, i32
  }
}

module attributes {stable_mosaic.version = 11 : i64} {
  func.func @_bn_stats_kernel(%arg0: i32, %arg1: memref<8x256xf32, #tpu.memory_space<vmem>>, %arg2: memref<1x256xf32, #tpu.memory_space<vmem>>, %arg3: memref<1x256xf32, #tpu.memory_space<vmem>>) attributes {dimension_semantics = [#tpu.dimension_semantics<arbitrary>], iteration_bounds = array<i64: 1>, scalar_prefetch = 0 : i64, scratch_operands = 0 : i64, tpu.core_type = #tpu.core_type<tc>, window_params = [{transform_indices = @transform_0, window_bounds = array<i64: 8, 256>}, {pipeline_mode = #tpu.pipeline_mode<synchronous>, transform_indices = @transform_1, window_bounds = array<i64: 1, 256>}, {pipeline_mode = #tpu.pipeline_mode<synchronous>, transform_indices = @transform_2, window_bounds = array<i64: 1, 256>}]} {
    %c0_i32 = arith.constant 0 : i32
    %0 = arith.cmpi eq, %arg0, %c0_i32 : i32
    %1 = arith.extui %0 : i1 to i32
    %c0_i32_0 = arith.constant 0 : i32
    %2 = arith.cmpi ne, %1, %c0_i32_0 : i32
    scf.if %2 {
      %cst_11 = arith.constant 0.000000e+00 : f32
      %15 = vector.broadcast %cst_11 : f32 to vector<1x256xf32>
      %c0_12 = arith.constant 0 : index
      %c0_13 = arith.constant 0 : index
      %16 = vector.load %arg2[%c0_12, %c0_13] : memref<1x256xf32, #tpu.memory_space<vmem>>, vector<1x256xf32>
      tpu.vector_store %arg2[%c0_12, %c0_13], %15 {strides = array<i32>} : memref<1x256xf32, #tpu.memory_space<vmem>>, vector<1x256xf32>,
      %cst_14 = arith.constant 0.000000e+00 : f32
      %17 = vector.broadcast %cst_14 : f32 to vector<1x256xf32>
      %c0_15 = arith.constant 0 : index
      %c0_16 = arith.constant 0 : index
      %18 = vector.load %arg3[%c0_15, %c0_16] : memref<1x256xf32, #tpu.memory_space<vmem>>, vector<1x256xf32>
      tpu.vector_store %arg3[%c0_15, %c0_16], %17 {strides = array<i32>} : memref<1x256xf32, #tpu.memory_space<vmem>>, vector<1x256xf32>,
    } else {
    }
    %c0 = arith.constant 0 : index
    %c0_1 = arith.constant 0 : index
    %3 = vector.load %arg1[%c0, %c0_1] : memref<8x256xf32, #tpu.memory_space<vmem>>, vector<8x256xf32>
    %c0_2 = arith.constant 0 : index
    %c0_3 = arith.constant 0 : index
    %4 = vector.load %arg2[%c0_2, %c0_3] : memref<1x256xf32, #tpu.memory_space<vmem>>, vector<1x256xf32>
    %cst = arith.constant dense<0.000000e+00> : vector<256xf32>
    %5 = vector.multi_reduction <add>, %3, %cst [0] : vector<8x256xf32> to vector<256xf32>
    %6 = vector.shape_cast %5 : vector<256xf32> to vector<1x256xf32>
    %7 = arith.addf %4, %6 : vector<1x256xf32>
    %c0_4 = arith.constant 0 : index
    %c0_5 = arith.constant 0 : index
    %8 = vector.load %arg2[%c0_4, %c0_5] : memref<1x256xf32, #tpu.memory_space<vmem>>, vector<1x256xf32>
    tpu.vector_store %arg2[%c0_4, %c0_5], %7 {strides = array<i32>} : memref<1x256xf32, #tpu.memory_space<vmem>>, vector<1x256xf32>,
    %c0_6 = arith.constant 0 : index
    %c0_7 = arith.constant 0 : index
    %9 = vector.load %arg3[%c0_6, %c0_7] : memref<1x256xf32, #tpu.memory_space<vmem>>, vector<1x256xf32>
    %10 = arith.mulf %3, %3 : vector<8x256xf32>
    %cst_8 = arith.constant dense<0.000000e+00> : vector<256xf32>
    %11 = vector.multi_reduction <add>, %10, %cst_8 [0] : vector<8x256xf32> to vector<256xf32>
    %12 = vector.shape_cast %11 : vector<256xf32> to vector<1x256xf32>
    %13 = arith.addf %9, %12 : vector<1x256xf32>
    %c0_9 = arith.constant 0 : index
    %c0_10 = arith.constant 0 : index
    %14 = vector.load %arg3[%c0_9, %c0_10] : memref<1x256xf32, #tpu.memory_space<vmem>>, vector<1x256xf32>
    tpu.vector_store %arg3[%c0_9, %c0_10], %13 {strides = array<i32>} : memref<1x256xf32, #tpu.memory_space<vmem>>, vector<1x256xf32>,
    return
  }
  func.func @transform_0(%arg0: i32) -> (i32, i32) {
    %c0_i32 = arith.constant 0 : i32
    %c0_i32_0 = arith.constant 0 : i32
    return %arg0, %c0_i32 : i32, i32
  }
  func.func @transform_1(%arg0: i32) -> (i32, i32) {
    %c0_i32 = arith.constant 0 : i32
    %c0_i32_0 = arith.constant 0 : i32
    %c0_i32_1 = arith.constant 0 : i32
    return %c0_i32, %c0_i32_0 : i32, i32
  }
  func.func @transform_2(%arg0: i32) -> (i32, i32) {
    %c0_i32 = arith.constant 0 : i32
    %c0_i32_0 = arith.constant 0 : i32
    %c0_i32_1 = arith.constant 0 : i32
    return %c0_i32, %c0_i32_0 : i32, i32
  }
}

module attributes {stable_mosaic.version = 11 : i64} {
  func.func @kern(%arg0: i32, %arg1: memref<8x256xf32, #tpu.memory_space<vmem>>, %arg2: memref<1x256xf32, #tpu.memory_space<vmem>>, %arg3: memref<1x256xf32, #tpu.memory_space<vmem>>, %arg4: memref<8x256xf32, #tpu.memory_space<vmem>>) attributes {dimension_semantics = [#tpu.dimension_semantics<parallel>], iteration_bounds = array<i64: 1>, scalar_prefetch = 0 : i64, scratch_operands = 0 : i64, tpu.core_type = #tpu.core_type<tc>, window_params = [{transform_indices = @transform_0, window_bounds = array<i64: 8, 256>}, {pipeline_mode = #tpu.pipeline_mode<synchronous>, transform_indices = @transform_1, window_bounds = array<i64: 1, 256>}, {pipeline_mode = #tpu.pipeline_mode<synchronous>, transform_indices = @transform_2, window_bounds = array<i64: 1, 256>}, {transform_indices = @transform_3, window_bounds = array<i64: 8, 256>}]} {
    %c0 = arith.constant 0 : index
    %c0_0 = arith.constant 0 : index
    %0 = vector.load %arg1[%c0, %c0_0] : memref<8x256xf32, #tpu.memory_space<vmem>>, vector<8x256xf32>
    %c0_1 = arith.constant 0 : index
    %c0_2 = arith.constant 0 : index
    %1 = vector.load %arg2[%c0_1, %c0_2] : memref<1x256xf32, #tpu.memory_space<vmem>>, vector<1x256xf32>
    %2 = vector.broadcast %1 : vector<1x256xf32> to vector<8x256xf32>
    %3 = arith.mulf %0, %2 : vector<8x256xf32>
    %c0_3 = arith.constant 0 : index
    %c0_4 = arith.constant 0 : index
    %4 = vector.load %arg3[%c0_3, %c0_4] : memref<1x256xf32, #tpu.memory_space<vmem>>, vector<1x256xf32>
    %5 = vector.broadcast %4 : vector<1x256xf32> to vector<8x256xf32>
    %6 = arith.addf %3, %5 : vector<8x256xf32>
    %cst = arith.constant 0.000000e+00 : f32
    %7 = vector.broadcast %cst : f32 to vector<8x256xf32>
    %8 = arith.maximumf %6, %7 : vector<8x256xf32>
    %c0_5 = arith.constant 0 : index
    %c0_6 = arith.constant 0 : index
    %9 = vector.load %arg4[%c0_5, %c0_6] : memref<8x256xf32, #tpu.memory_space<vmem>>, vector<8x256xf32>
    tpu.vector_store %arg4[%c0_5, %c0_6], %8 {strides = array<i32>} : memref<8x256xf32, #tpu.memory_space<vmem>>, vector<8x256xf32>,
    return
  }
  func.func @transform_0(%arg0: i32) -> (i32, i32) {
    %c0_i32 = arith.constant 0 : i32
    %c0_i32_0 = arith.constant 0 : i32
    return %arg0, %c0_i32 : i32, i32
  }
  func.func @transform_1(%arg0: i32) -> (i32, i32) {
    %c0_i32 = arith.constant 0 : i32
    %c0_i32_0 = arith.constant 0 : i32
    %c0_i32_1 = arith.constant 0 : i32
    return %c0_i32, %c0_i32_0 : i32, i32
  }
  func.func @transform_2(%arg0: i32) -> (i32, i32) {
    %c0_i32 = arith.constant 0 : i32
    %c0_i32_0 = arith.constant 0 : i32
    %c0_i32_1 = arith.constant 0 : i32
    return %c0_i32, %c0_i32_0 : i32, i32
  }
  func.func @transform_3(%arg0: i32) -> (i32, i32) {
    %c0_i32 = arith.constant 0 : i32
    %c0_i32_0 = arith.constant 0 : i32
    return %arg0, %c0_i32 : i32, i32
  }
}

module attributes {stable_mosaic.version = 11 : i64} {
  func.func @_max_tap_kernel(%arg0: i32, %arg1: memref<4x8x512xf32, #tpu.memory_space<vmem>>, %arg2: memref<8x512xf32, #tpu.memory_space<vmem>>) attributes {dimension_semantics = [#tpu.dimension_semantics<parallel>], iteration_bounds = array<i64: 1>, scalar_prefetch = 0 : i64, scratch_operands = 0 : i64, tpu.core_type = #tpu.core_type<tc>, window_params = [{transform_indices = @transform_0, window_bounds = array<i64: 4, 8, 512>}, {transform_indices = @transform_1, window_bounds = array<i64: 8, 512>}]} {
    %c0 = arith.constant 0 : index
    %c0_0 = arith.constant 0 : index
    %c0_1 = arith.constant 0 : index
    %0 = vector.load %arg1[%c0, %c0_0, %c0_1] : memref<4x8x512xf32, #tpu.memory_space<vmem>>, vector<4x8x512xf32>
    %cst = arith.constant dense<0xFF800000> : vector<8x512xf32>
    %1 = vector.multi_reduction <maximumf>, %0, %cst [0] : vector<4x8x512xf32> to vector<8x512xf32>
    %c0_2 = arith.constant 0 : index
    %c0_3 = arith.constant 0 : index
    %2 = vector.load %arg2[%c0_2, %c0_3] : memref<8x512xf32, #tpu.memory_space<vmem>>, vector<8x512xf32>
    tpu.vector_store %arg2[%c0_2, %c0_3], %1 {strides = array<i32>} : memref<8x512xf32, #tpu.memory_space<vmem>>, vector<8x512xf32>,
    return
  }
  func.func @transform_0(%arg0: i32) -> (i32, i32, i32) {
    %c0_i32 = arith.constant 0 : i32
    %c0_i32_0 = arith.constant 0 : i32
    %c0_i32_1 = arith.constant 0 : i32
    return %c0_i32, %arg0, %c0_i32_0 : i32, i32, i32
  }
  func.func @transform_1(%arg0: i32) -> (i32, i32) {
    %c0_i32 = arith.constant 0 : i32
    %c0_i32_0 = arith.constant 0 : i32
    return %arg0, %c0_i32 : i32, i32
  }
}

module attributes {stable_mosaic.version = 11 : i64} {
  func.func @_max_tap_kernel(%arg0: i32, %arg1: memref<9x8x512xf32, #tpu.memory_space<vmem>>, %arg2: memref<8x512xf32, #tpu.memory_space<vmem>>) attributes {dimension_semantics = [#tpu.dimension_semantics<parallel>], iteration_bounds = array<i64: 1>, scalar_prefetch = 0 : i64, scratch_operands = 0 : i64, tpu.core_type = #tpu.core_type<tc>, window_params = [{transform_indices = @transform_0, window_bounds = array<i64: 9, 8, 512>}, {transform_indices = @transform_1, window_bounds = array<i64: 8, 512>}]} {
    %c0 = arith.constant 0 : index
    %c0_0 = arith.constant 0 : index
    %c0_1 = arith.constant 0 : index
    %0 = vector.load %arg1[%c0, %c0_0, %c0_1] : memref<9x8x512xf32, #tpu.memory_space<vmem>>, vector<9x8x512xf32>
    %cst = arith.constant dense<0xFF800000> : vector<8x512xf32>
    %1 = vector.multi_reduction <maximumf>, %0, %cst [0] : vector<9x8x512xf32> to vector<8x512xf32>
    %c0_2 = arith.constant 0 : index
    %c0_3 = arith.constant 0 : index
    %2 = vector.load %arg2[%c0_2, %c0_3] : memref<8x512xf32, #tpu.memory_space<vmem>>, vector<8x512xf32>
    tpu.vector_store %arg2[%c0_2, %c0_3], %1 {strides = array<i32>} : memref<8x512xf32, #tpu.memory_space<vmem>>, vector<8x512xf32>,
    return
  }
  func.func @transform_0(%arg0: i32) -> (i32, i32, i32) {
    %c0_i32 = arith.constant 0 : i32
    %c0_i32_0 = arith.constant 0 : i32
    %c0_i32_1 = arith.constant 0 : i32
    return %c0_i32, %arg0, %c0_i32_0 : i32, i32, i32
  }
  func.func @transform_1(%arg0: i32) -> (i32, i32) {
    %c0_i32 = arith.constant 0 : i32
    %c0_i32_0 = arith.constant 0 : i32
    return %arg0, %c0_i32 : i32, i32
  }
}

module attributes {stable_mosaic.version = 11 : i64} {
  func.func @kern(%arg0: i32, %arg1: i32, %arg2: i32, %arg3: memref<8x512xbf16, #tpu.memory_space<vmem>>, %arg4: memref<512x256xbf16, #tpu.memory_space<vmem>>, %arg5: memref<1x256xf32, #tpu.memory_space<vmem>>, %arg6: memref<8x256xf32, #tpu.memory_space<vmem>>, %arg7: memref<8x256xf32, #tpu.memory_space<vmem>>) attributes {dimension_semantics = [#tpu.dimension_semantics<parallel>, #tpu.dimension_semantics<parallel>, #tpu.dimension_semantics<arbitrary>], iteration_bounds = array<i64: 1, 4, 9>, scalar_prefetch = 0 : i64, scratch_operands = 1 : i64, tpu.core_type = #tpu.core_type<tc>, window_params = [{transform_indices = @transform_0, window_bounds = array<i64: 8, 512>}, {transform_indices = @transform_1, window_bounds = array<i64: 512, 256>}, {transform_indices = @transform_2, window_bounds = array<i64: 1, 256>}, {transform_indices = @transform_3, window_bounds = array<i64: 8, 256>}]} {
    %c0_i32 = arith.constant 0 : i32
    %0 = arith.cmpi eq, %arg2, %c0_i32 : i32
    %1 = arith.extui %0 : i1 to i32
    %c0_i32_0 = arith.constant 0 : i32
    %2 = arith.cmpi ne, %1, %c0_i32_0 : i32
    scf.if %2 {
      %cst_9 = arith.constant 0.000000e+00 : f32
      %12 = vector.broadcast %cst_9 : f32 to vector<8x256xf32>
      %c0_10 = arith.constant 0 : index
      %c0_11 = arith.constant 0 : index
      %13 = vector.load %arg7[%c0_10, %c0_11] : memref<8x256xf32, #tpu.memory_space<vmem>>, vector<8x256xf32>
      tpu.vector_store %arg7[%c0_10, %c0_11], %12 {strides = array<i32>} : memref<8x256xf32, #tpu.memory_space<vmem>>, vector<8x256xf32>,
    } else {
    }
    %c0 = arith.constant 0 : index
    %c0_1 = arith.constant 0 : index
    %3 = vector.load %arg7[%c0, %c0_1] : memref<8x256xf32, #tpu.memory_space<vmem>>, vector<8x256xf32>
    %c0_2 = arith.constant 0 : index
    %c0_3 = arith.constant 0 : index
    %4 = vector.load %arg3[%c0_2, %c0_3] : memref<8x512xbf16, #tpu.memory_space<vmem>>, vector<8x512xbf16>
    %c0_4 = arith.constant 0 : index
    %c0_5 = arith.constant 0 : index
    %5 = vector.load %arg4[%c0_4, %c0_5] : memref<512x256xbf16, #tpu.memory_space<vmem>>, vector<512x256xbf16>
    %cst = arith.constant dense<0.000000e+00> : vector<8x256xf32>
    %6 = tpu.matmul %4, %5, %cst {dimension_numbers = #tpu.dot_dimension_numbers<[1], [0], [0], [1], [0, 0, 1, 1], [], []>} : vector<8x512xbf16>, vector<512x256xbf16>, vector<8x256xf32> -> vector<8x256xf32>
    %7 = arith.addf %3, %6 : vector<8x256xf32>
    %c0_6 = arith.constant 0 : index
    %c0_7 = arith.constant 0 : index
    %8 = vector.load %arg7[%c0_6, %c0_7] : memref<8x256xf32, #tpu.memory_space<vmem>>, vector<8x256xf32>
    tpu.vector_store %arg7[%c0_6, %c0_7], %7 {strides = array<i32>} : memref<8x256xf32, #tpu.memory_space<vmem>>, vector<8x256xf32>,
    %c8_i32 = arith.constant 8 : i32
    %9 = arith.cmpi eq, %arg2, %c8_i32 : i32
    %10 = arith.extui %9 : i1 to i32
    %c0_i32_8 = arith.constant 0 : i32
    %11 = arith.cmpi ne, %10, %c0_i32_8 : i32
    scf.if %11 {
      %c0_9 = arith.constant 0 : index
      %c0_10 = arith.constant 0 : index
      %12 = vector.load %arg7[%c0_9, %c0_10] : memref<8x256xf32, #tpu.memory_space<vmem>>, vector<8x256xf32>
      %c0_11 = arith.constant 0 : index
      %c0_12 = arith.constant 0 : index
      %13 = vector.load %arg5[%c0_11, %c0_12] : memref<1x256xf32, #tpu.memory_space<vmem>>, vector<1x256xf32>
      %14 = vector.broadcast %13 : vector<1x256xf32> to vector<8x256xf32>
      %15 = arith.addf %12, %14 : vector<8x256xf32>
      %cst_13 = arith.constant 0.000000e+00 : f32
      %16 = vector.broadcast %cst_13 : f32 to vector<8x256xf32>
      %17 = arith.maximumf %15, %16 : vector<8x256xf32>
      %c0_14 = arith.constant 0 : index
      %c0_15 = arith.constant 0 : index
      %18 = vector.load %arg6[%c0_14, %c0_15] : memref<8x256xf32, #tpu.memory_space<vmem>>, vector<8x256xf32>
      tpu.vector_store %arg6[%c0_14, %c0_15], %17 {strides = array<i32>} : memref<8x256xf32, #tpu.memory_space<vmem>>, vector<8x256xf32>,
    } else {
    }
    return
  }
  func.func @transform_0(%arg0: i32, %arg1: i32, %arg2: i32) -> (i32, i32) {
    %c0_i32 = arith.constant 0 : i32
    return %arg0, %arg2 : i32, i32
  }
  func.func @transform_1(%arg0: i32, %arg1: i32, %arg2: i32) -> (i32, i32) {
    %c0_i32 = arith.constant 0 : i32
    return %arg2, %arg1 : i32, i32
  }
  func.func @transform_2(%arg0: i32, %arg1: i32, %arg2: i32) -> (i32, i32) {
    %c0_i32 = arith.constant 0 : i32
    %c0_i32_0 = arith.constant 0 : i32
    return %c0_i32, %arg1 : i32, i32
  }
  func.func @transform_3(%arg0: i32, %arg1: i32, %arg2: i32) -> (i32, i32) {
    %c0_i32 = arith.constant 0 : i32
    return %arg0, %arg1 : i32, i32
  }
}

module attributes {stable_mosaic.version = 11 : i64} {
  func.func @kern(%arg0: i32, %arg1: i32, %arg2: i32, %arg3: memref<8x512xbf16, #tpu.memory_space<vmem>>, %arg4: memref<512x256xbf16, #tpu.memory_space<vmem>>, %arg5: memref<1x256xf32, #tpu.memory_space<vmem>>, %arg6: memref<8x256xf32, #tpu.memory_space<vmem>>, %arg7: memref<8x256xf32, #tpu.memory_space<vmem>>) attributes {dimension_semantics = [#tpu.dimension_semantics<parallel>, #tpu.dimension_semantics<parallel>, #tpu.dimension_semantics<arbitrary>], iteration_bounds = array<i64: 1, 4, 2>, scalar_prefetch = 0 : i64, scratch_operands = 1 : i64, tpu.core_type = #tpu.core_type<tc>, window_params = [{transform_indices = @transform_0, window_bounds = array<i64: 8, 512>}, {transform_indices = @transform_1, window_bounds = array<i64: 512, 256>}, {transform_indices = @transform_2, window_bounds = array<i64: 1, 256>}, {transform_indices = @transform_3, window_bounds = array<i64: 8, 256>}]} {
    %c0_i32 = arith.constant 0 : i32
    %0 = arith.cmpi eq, %arg2, %c0_i32 : i32
    %1 = arith.extui %0 : i1 to i32
    %c0_i32_0 = arith.constant 0 : i32
    %2 = arith.cmpi ne, %1, %c0_i32_0 : i32
    scf.if %2 {
      %cst_9 = arith.constant 0.000000e+00 : f32
      %12 = vector.broadcast %cst_9 : f32 to vector<8x256xf32>
      %c0_10 = arith.constant 0 : index
      %c0_11 = arith.constant 0 : index
      %13 = vector.load %arg7[%c0_10, %c0_11] : memref<8x256xf32, #tpu.memory_space<vmem>>, vector<8x256xf32>
      tpu.vector_store %arg7[%c0_10, %c0_11], %12 {strides = array<i32>} : memref<8x256xf32, #tpu.memory_space<vmem>>, vector<8x256xf32>,
    } else {
    }
    %c0 = arith.constant 0 : index
    %c0_1 = arith.constant 0 : index
    %3 = vector.load %arg7[%c0, %c0_1] : memref<8x256xf32, #tpu.memory_space<vmem>>, vector<8x256xf32>
    %c0_2 = arith.constant 0 : index
    %c0_3 = arith.constant 0 : index
    %4 = vector.load %arg3[%c0_2, %c0_3] : memref<8x512xbf16, #tpu.memory_space<vmem>>, vector<8x512xbf16>
    %c0_4 = arith.constant 0 : index
    %c0_5 = arith.constant 0 : index
    %5 = vector.load %arg4[%c0_4, %c0_5] : memref<512x256xbf16, #tpu.memory_space<vmem>>, vector<512x256xbf16>
    %cst = arith.constant dense<0.000000e+00> : vector<8x256xf32>
    %6 = tpu.matmul %4, %5, %cst {dimension_numbers = #tpu.dot_dimension_numbers<[1], [0], [0], [1], [0, 0, 1, 1], [], []>} : vector<8x512xbf16>, vector<512x256xbf16>, vector<8x256xf32> -> vector<8x256xf32>
    %7 = arith.addf %3, %6 : vector<8x256xf32>
    %c0_6 = arith.constant 0 : index
    %c0_7 = arith.constant 0 : index
    %8 = vector.load %arg7[%c0_6, %c0_7] : memref<8x256xf32, #tpu.memory_space<vmem>>, vector<8x256xf32>
    tpu.vector_store %arg7[%c0_6, %c0_7], %7 {strides = array<i32>} : memref<8x256xf32, #tpu.memory_space<vmem>>, vector<8x256xf32>,
    %c1_i32 = arith.constant 1 : i32
    %9 = arith.cmpi eq, %arg2, %c1_i32 : i32
    %10 = arith.extui %9 : i1 to i32
    %c0_i32_8 = arith.constant 0 : i32
    %11 = arith.cmpi ne, %10, %c0_i32_8 : i32
    scf.if %11 {
      %c0_9 = arith.constant 0 : index
      %c0_10 = arith.constant 0 : index
      %12 = vector.load %arg7[%c0_9, %c0_10] : memref<8x256xf32, #tpu.memory_space<vmem>>, vector<8x256xf32>
      %c0_11 = arith.constant 0 : index
      %c0_12 = arith.constant 0 : index
      %13 = vector.load %arg5[%c0_11, %c0_12] : memref<1x256xf32, #tpu.memory_space<vmem>>, vector<1x256xf32>
      %14 = vector.broadcast %13 : vector<1x256xf32> to vector<8x256xf32>
      %15 = arith.addf %12, %14 : vector<8x256xf32>
      %cst_13 = arith.constant 0.000000e+00 : f32
      %16 = vector.broadcast %cst_13 : f32 to vector<8x256xf32>
      %17 = arith.maximumf %15, %16 : vector<8x256xf32>
      %c0_14 = arith.constant 0 : index
      %c0_15 = arith.constant 0 : index
      %18 = vector.load %arg6[%c0_14, %c0_15] : memref<8x256xf32, #tpu.memory_space<vmem>>, vector<8x256xf32>
      tpu.vector_store %arg6[%c0_14, %c0_15], %17 {strides = array<i32>} : memref<8x256xf32, #tpu.memory_space<vmem>>, vector<8x256xf32>,
    } else {
    }
    return
  }
  func.func @transform_0(%arg0: i32, %arg1: i32, %arg2: i32) -> (i32, i32) {
    %c0_i32 = arith.constant 0 : i32
    return %arg0, %arg2 : i32, i32
  }
  func.func @transform_1(%arg0: i32, %arg1: i32, %arg2: i32) -> (i32, i32) {
    %c0_i32 = arith.constant 0 : i32
    return %arg2, %arg1 : i32, i32
  }
  func.func @transform_2(%arg0: i32, %arg1: i32, %arg2: i32) -> (i32, i32) {
    %c0_i32 = arith.constant 0 : i32
    %c0_i32_0 = arith.constant 0 : i32
    return %c0_i32, %arg1 : i32, i32
  }
  func.func @transform_3(%arg0: i32, %arg1: i32, %arg2: i32) -> (i32, i32) {
    %c0_i32 = arith.constant 0 : i32
    return %arg0, %arg1 : i32, i32
  }
}

module attributes {stable_mosaic.version = 11 : i64} {
  func.func @kern(%arg0: i32, %arg1: i32, %arg2: i32, %arg3: memref<8x512xbf16, #tpu.memory_space<vmem>>, %arg4: memref<512x256xbf16, #tpu.memory_space<vmem>>, %arg5: memref<1x256xf32, #tpu.memory_space<vmem>>, %arg6: memref<8x256xf32, #tpu.memory_space<vmem>>, %arg7: memref<8x256xf32, #tpu.memory_space<vmem>>) attributes {dimension_semantics = [#tpu.dimension_semantics<parallel>, #tpu.dimension_semantics<parallel>, #tpu.dimension_semantics<arbitrary>], iteration_bounds = array<i64: 1, 2, 2>, scalar_prefetch = 0 : i64, scratch_operands = 1 : i64, tpu.core_type = #tpu.core_type<tc>, window_params = [{transform_indices = @transform_0, window_bounds = array<i64: 8, 512>}, {transform_indices = @transform_1, window_bounds = array<i64: 512, 256>}, {transform_indices = @transform_2, window_bounds = array<i64: 1, 256>}, {transform_indices = @transform_3, window_bounds = array<i64: 8, 256>}]} {
    %c0_i32 = arith.constant 0 : i32
    %0 = arith.cmpi eq, %arg2, %c0_i32 : i32
    %1 = arith.extui %0 : i1 to i32
    %c0_i32_0 = arith.constant 0 : i32
    %2 = arith.cmpi ne, %1, %c0_i32_0 : i32
    scf.if %2 {
      %cst_9 = arith.constant 0.000000e+00 : f32
      %12 = vector.broadcast %cst_9 : f32 to vector<8x256xf32>
      %c0_10 = arith.constant 0 : index
      %c0_11 = arith.constant 0 : index
      %13 = vector.load %arg7[%c0_10, %c0_11] : memref<8x256xf32, #tpu.memory_space<vmem>>, vector<8x256xf32>
      tpu.vector_store %arg7[%c0_10, %c0_11], %12 {strides = array<i32>} : memref<8x256xf32, #tpu.memory_space<vmem>>, vector<8x256xf32>,
    } else {
    }
    %c0 = arith.constant 0 : index
    %c0_1 = arith.constant 0 : index
    %3 = vector.load %arg7[%c0, %c0_1] : memref<8x256xf32, #tpu.memory_space<vmem>>, vector<8x256xf32>
    %c0_2 = arith.constant 0 : index
    %c0_3 = arith.constant 0 : index
    %4 = vector.load %arg3[%c0_2, %c0_3] : memref<8x512xbf16, #tpu.memory_space<vmem>>, vector<8x512xbf16>
    %c0_4 = arith.constant 0 : index
    %c0_5 = arith.constant 0 : index
    %5 = vector.load %arg4[%c0_4, %c0_5] : memref<512x256xbf16, #tpu.memory_space<vmem>>, vector<512x256xbf16>
    %cst = arith.constant dense<0.000000e+00> : vector<8x256xf32>
    %6 = tpu.matmul %4, %5, %cst {dimension_numbers = #tpu.dot_dimension_numbers<[1], [0], [0], [1], [0, 0, 1, 1], [], []>} : vector<8x512xbf16>, vector<512x256xbf16>, vector<8x256xf32> -> vector<8x256xf32>
    %7 = arith.addf %3, %6 : vector<8x256xf32>
    %c0_6 = arith.constant 0 : index
    %c0_7 = arith.constant 0 : index
    %8 = vector.load %arg7[%c0_6, %c0_7] : memref<8x256xf32, #tpu.memory_space<vmem>>, vector<8x256xf32>
    tpu.vector_store %arg7[%c0_6, %c0_7], %7 {strides = array<i32>} : memref<8x256xf32, #tpu.memory_space<vmem>>, vector<8x256xf32>,
    %c1_i32 = arith.constant 1 : i32
    %9 = arith.cmpi eq, %arg2, %c1_i32 : i32
    %10 = arith.extui %9 : i1 to i32
    %c0_i32_8 = arith.constant 0 : i32
    %11 = arith.cmpi ne, %10, %c0_i32_8 : i32
    scf.if %11 {
      %c0_9 = arith.constant 0 : index
      %c0_10 = arith.constant 0 : index
      %12 = vector.load %arg7[%c0_9, %c0_10] : memref<8x256xf32, #tpu.memory_space<vmem>>, vector<8x256xf32>
      %c0_11 = arith.constant 0 : index
      %c0_12 = arith.constant 0 : index
      %13 = vector.load %arg5[%c0_11, %c0_12] : memref<1x256xf32, #tpu.memory_space<vmem>>, vector<1x256xf32>
      %14 = vector.broadcast %13 : vector<1x256xf32> to vector<8x256xf32>
      %15 = arith.addf %12, %14 : vector<8x256xf32>
      %c0_13 = arith.constant 0 : index
      %c0_14 = arith.constant 0 : index
      %16 = vector.load %arg6[%c0_13, %c0_14] : memref<8x256xf32, #tpu.memory_space<vmem>>, vector<8x256xf32>
      tpu.vector_store %arg6[%c0_13, %c0_14], %15 {strides = array<i32>} : memref<8x256xf32, #tpu.memory_space<vmem>>, vector<8x256xf32>,
    } else {
    }
    return
  }
  func.func @transform_0(%arg0: i32, %arg1: i32, %arg2: i32) -> (i32, i32) {
    %c0_i32 = arith.constant 0 : i32
    return %arg0, %arg2 : i32, i32
  }
  func.func @transform_1(%arg0: i32, %arg1: i32, %arg2: i32) -> (i32, i32) {
    %c0_i32 = arith.constant 0 : i32
    return %arg2, %arg1 : i32, i32
  }
  func.func @transform_2(%arg0: i32, %arg1: i32, %arg2: i32) -> (i32, i32) {
    %c0_i32 = arith.constant 0 : i32
    %c0_i32_0 = arith.constant 0 : i32
    return %c0_i32, %arg1 : i32, i32
  }
  func.func @transform_3(%arg0: i32, %arg1: i32, %arg2: i32) -> (i32, i32) {
    %c0_i32 = arith.constant 0 : i32
    return %arg0, %arg1 : i32, i32
  }
}

module attributes {stable_mosaic.version = 11 : i64} {
  func.func @_bn_stats_kernel(%arg0: i32, %arg1: memref<8x512xf32, #tpu.memory_space<vmem>>, %arg2: memref<1x512xf32, #tpu.memory_space<vmem>>, %arg3: memref<1x512xf32, #tpu.memory_space<vmem>>) attributes {dimension_semantics = [#tpu.dimension_semantics<arbitrary>], iteration_bounds = array<i64: 1>, scalar_prefetch = 0 : i64, scratch_operands = 0 : i64, tpu.core_type = #tpu.core_type<tc>, window_params = [{transform_indices = @transform_0, window_bounds = array<i64: 8, 512>}, {pipeline_mode = #tpu.pipeline_mode<synchronous>, transform_indices = @transform_1, window_bounds = array<i64: 1, 512>}, {pipeline_mode = #tpu.pipeline_mode<synchronous>, transform_indices = @transform_2, window_bounds = array<i64: 1, 512>}]} {
    %c0_i32 = arith.constant 0 : i32
    %0 = arith.cmpi eq, %arg0, %c0_i32 : i32
    %1 = arith.extui %0 : i1 to i32
    %c0_i32_0 = arith.constant 0 : i32
    %2 = arith.cmpi ne, %1, %c0_i32_0 : i32
    scf.if %2 {
      %cst_11 = arith.constant 0.000000e+00 : f32
      %15 = vector.broadcast %cst_11 : f32 to vector<1x512xf32>
      %c0_12 = arith.constant 0 : index
      %c0_13 = arith.constant 0 : index
      %16 = vector.load %arg2[%c0_12, %c0_13] : memref<1x512xf32, #tpu.memory_space<vmem>>, vector<1x512xf32>
      tpu.vector_store %arg2[%c0_12, %c0_13], %15 {strides = array<i32>} : memref<1x512xf32, #tpu.memory_space<vmem>>, vector<1x512xf32>,
      %cst_14 = arith.constant 0.000000e+00 : f32
      %17 = vector.broadcast %cst_14 : f32 to vector<1x512xf32>
      %c0_15 = arith.constant 0 : index
      %c0_16 = arith.constant 0 : index
      %18 = vector.load %arg3[%c0_15, %c0_16] : memref<1x512xf32, #tpu.memory_space<vmem>>, vector<1x512xf32>
      tpu.vector_store %arg3[%c0_15, %c0_16], %17 {strides = array<i32>} : memref<1x512xf32, #tpu.memory_space<vmem>>, vector<1x512xf32>,
    } else {
    }
    %c0 = arith.constant 0 : index
    %c0_1 = arith.constant 0 : index
    %3 = vector.load %arg1[%c0, %c0_1] : memref<8x512xf32, #tpu.memory_space<vmem>>, vector<8x512xf32>
    %c0_2 = arith.constant 0 : index
    %c0_3 = arith.constant 0 : index
    %4 = vector.load %arg2[%c0_2, %c0_3] : memref<1x512xf32, #tpu.memory_space<vmem>>, vector<1x512xf32>
    %cst = arith.constant dense<0.000000e+00> : vector<512xf32>
    %5 = vector.multi_reduction <add>, %3, %cst [0] : vector<8x512xf32> to vector<512xf32>
    %6 = vector.shape_cast %5 : vector<512xf32> to vector<1x512xf32>
    %7 = arith.addf %4, %6 : vector<1x512xf32>
    %c0_4 = arith.constant 0 : index
    %c0_5 = arith.constant 0 : index
    %8 = vector.load %arg2[%c0_4, %c0_5] : memref<1x512xf32, #tpu.memory_space<vmem>>, vector<1x512xf32>
    tpu.vector_store %arg2[%c0_4, %c0_5], %7 {strides = array<i32>} : memref<1x512xf32, #tpu.memory_space<vmem>>, vector<1x512xf32>,
    %c0_6 = arith.constant 0 : index
    %c0_7 = arith.constant 0 : index
    %9 = vector.load %arg3[%c0_6, %c0_7] : memref<1x512xf32, #tpu.memory_space<vmem>>, vector<1x512xf32>
    %10 = arith.mulf %3, %3 : vector<8x512xf32>
    %cst_8 = arith.constant dense<0.000000e+00> : vector<512xf32>
    %11 = vector.multi_reduction <add>, %10, %cst_8 [0] : vector<8x512xf32> to vector<512xf32>
    %12 = vector.shape_cast %11 : vector<512xf32> to vector<1x512xf32>
    %13 = arith.addf %9, %12 : vector<1x512xf32>
    %c0_9 = arith.constant 0 : index
    %c0_10 = arith.constant 0 : index
    %14 = vector.load %arg3[%c0_9, %c0_10] : memref<1x512xf32, #tpu.memory_space<vmem>>, vector<1x512xf32>
    tpu.vector_store %arg3[%c0_9, %c0_10], %13 {strides = array<i32>} : memref<1x512xf32, #tpu.memory_space<vmem>>, vector<1x512xf32>,
    return
  }
  func.func @transform_0(%arg0: i32) -> (i32, i32) {
    %c0_i32 = arith.constant 0 : i32
    %c0_i32_0 = arith.constant 0 : i32
    return %arg0, %c0_i32 : i32, i32
  }
  func.func @transform_1(%arg0: i32) -> (i32, i32) {
    %c0_i32 = arith.constant 0 : i32
    %c0_i32_0 = arith.constant 0 : i32
    %c0_i32_1 = arith.constant 0 : i32
    return %c0_i32, %c0_i32_0 : i32, i32
  }
  func.func @transform_2(%arg0: i32) -> (i32, i32) {
    %c0_i32 = arith.constant 0 : i32
    %c0_i32_0 = arith.constant 0 : i32
    %c0_i32_1 = arith.constant 0 : i32
    return %c0_i32, %c0_i32_0 : i32, i32
  }
}

module attributes {stable_mosaic.version = 11 : i64} {
  func.func @kern(%arg0: i32, %arg1: memref<8x512xf32, #tpu.memory_space<vmem>>, %arg2: memref<1x512xf32, #tpu.memory_space<vmem>>, %arg3: memref<1x512xf32, #tpu.memory_space<vmem>>, %arg4: memref<8x512xf32, #tpu.memory_space<vmem>>) attributes {dimension_semantics = [#tpu.dimension_semantics<parallel>], iteration_bounds = array<i64: 1>, scalar_prefetch = 0 : i64, scratch_operands = 0 : i64, tpu.core_type = #tpu.core_type<tc>, window_params = [{transform_indices = @transform_0, window_bounds = array<i64: 8, 512>}, {pipeline_mode = #tpu.pipeline_mode<synchronous>, transform_indices = @transform_1, window_bounds = array<i64: 1, 512>}, {pipeline_mode = #tpu.pipeline_mode<synchronous>, transform_indices = @transform_2, window_bounds = array<i64: 1, 512>}, {transform_indices = @transform_3, window_bounds = array<i64: 8, 512>}]} {
    %c0 = arith.constant 0 : index
    %c0_0 = arith.constant 0 : index
    %0 = vector.load %arg1[%c0, %c0_0] : memref<8x512xf32, #tpu.memory_space<vmem>>, vector<8x512xf32>
    %c0_1 = arith.constant 0 : index
    %c0_2 = arith.constant 0 : index
    %1 = vector.load %arg2[%c0_1, %c0_2] : memref<1x512xf32, #tpu.memory_space<vmem>>, vector<1x512xf32>
    %2 = vector.broadcast %1 : vector<1x512xf32> to vector<8x512xf32>
    %3 = arith.mulf %0, %2 : vector<8x512xf32>
    %c0_3 = arith.constant 0 : index
    %c0_4 = arith.constant 0 : index
    %4 = vector.load %arg3[%c0_3, %c0_4] : memref<1x512xf32, #tpu.memory_space<vmem>>, vector<1x512xf32>
    %5 = vector.broadcast %4 : vector<1x512xf32> to vector<8x512xf32>
    %6 = arith.addf %3, %5 : vector<8x512xf32>
    %cst = arith.constant 0.000000e+00 : f32
    %7 = vector.broadcast %cst : f32 to vector<8x512xf32>
    %8 = arith.maximumf %6, %7 : vector<8x512xf32>
    %c0_5 = arith.constant 0 : index
    %c0_6 = arith.constant 0 : index
    %9 = vector.load %arg4[%c0_5, %c0_6] : memref<8x512xf32, #tpu.memory_space<vmem>>, vector<8x512xf32>
    tpu.vector_store %arg4[%c0_5, %c0_6], %8 {strides = array<i32>} : memref<8x512xf32, #tpu.memory_space<vmem>>, vector<8x512xf32>,
    return
  }
  func.func @transform_0(%arg0: i32) -> (i32, i32) {
    %c0_i32 = arith.constant 0 : i32
    %c0_i32_0 = arith.constant 0 : i32
    return %arg0, %c0_i32 : i32, i32
  }
  func.func @transform_1(%arg0: i32) -> (i32, i32) {
    %c0_i32 = arith.constant 0 : i32
    %c0_i32_0 = arith.constant 0 : i32
    %c0_i32_1 = arith.constant 0 : i32
    return %c0_i32, %c0_i32_0 : i32, i32
  }
  func.func @transform_2(%arg0: i32) -> (i32, i32) {
    %c0_i32 = arith.constant 0 : i32
    %c0_i32_0 = arith.constant 0 : i32
    %c0_i32_1 = arith.constant 0 : i32
    return %c0_i32, %c0_i32_0 : i32, i32
  }
  func.func @transform_3(%arg0: i32) -> (i32, i32) {
    %c0_i32 = arith.constant 0 : i32
    %c0_i32_0 = arith.constant 0 : i32
    return %arg0, %c0_i32 : i32, i32
  }
}

</mosaic_0001>

<bundles_post_ra>
// kernel: feature_extractor_forward.26
= control target key start
LH: loop header
LB: loop body
LE: loop exit
PB: predicated region body
PF: predicated region fallthrough
CT: control target
= control target key end

     0   :  { %s1772_s1 = inlined_call_operand.vmem [shape: bf16[128,128], index: 1, kind: input, shape index: {}]   ;;  %s1773_s0 = inlined_call_operand.vmem [shape: bf16[512,128], index: 0, kind: input, shape index: {}]   ;;  %s1774_s2 = inlined_call_operand.vmem [shape: f32[1,128], index: 2, kind: input, shape index: {}]   ;;  %s1775_s3 = inlined_call_operand.vmem [shape: f32[512,128], index: 3, kind: output, shape index: {}]  }
   0x1   :  { %v1331_v0 = vld [vmem:[%s1772_s1] sm:$0xff]   ;;  %v1332_v1 = vld [vmem:[%s1772_s1 + $0x8] sm:$0xff]   ;;  %v1333_v2 = vld [vmem:[%s1772_s1 + $0x10] sm:$0xff]  }
   0x2   :  { %1235 = vmatprep.subr.bf16.mxu0 %v1331_v0  ;;  %1315 = vmatprep.subr.bf16.mxu1 %v1331_v0  ;;  %v1334_v3 = vld [vmem:[%s1772_s1 + $0x18] sm:$0xff]   ;;  %v1339_v4 = vld [vmem:[%s1773_s0] sm:$0xff]   ;;  %v1336_v7 = vld [vmem:[%s1772_s1 + $0x28] sm:$0xff]  }
   0x3   :  { %1236 = vmatpush3.bf16.msra.mxu0 %v1331_v0  ;;  %1323 = vmatpush3.bf16.msra.mxu1 %v1331_v0  ;;  %v1340_v5 = vld [vmem:[%s1773_s0 + $0x80] sm:$0xff]   ;;  %v1337_v8 = vld [vmem:[%s1772_s1 + $0x30] sm:$0xff]   ;;  %v1338_v9 = vld [vmem:[%s1772_s1 + $0x38] sm:$0xff]  }
   0x4   :  { %1237 = vmatprep.subr.bf16.mxu0 %v1332_v1  ;;  %1316 = vmatprep.subr.bf16.mxu1 %v1332_v1  ;;  %v1335_v6 = vld [vmem:[%s1772_s1 + $0x20] sm:$0xff]   ;;  %v1341_v10 = vld [vmem:[%s1773_s0 + $0x8] sm:$0xff]   ;;  %v1343_v12 = vld [vmem:[%s1773_s0 + $0x10] sm:$0xff]  }
   0x5   :  { %1251 = vmatprep.mubr.bf16.mxu0 %v1339_v4  ;;  %1283 = vmatprep.mubr.bf16.mxu1 %v1340_v5  ;;  %v1342_v11 = vld [vmem:[%s1773_s0 + $0x88] sm:$0xff]   ;;  %v1344_v13 = vld [vmem:[%s1773_s0 + $0x90] sm:$0xff]   ;;  %v1345_v14 = vld [vmem:[%s1773_s0 + $0x18] sm:$0xff]  }
   0x6   :  { %v1346_v15 = vld [vmem:[%s1773_s0 + $0x98] sm:$0xff]   ;;  %v1347_v16 = vld [vmem:[%s1773_s0 + $0x20] sm:$0xff]   ;;  %v1349_v18 = vld [vmem:[%s1773_s0 + $0x28] sm:$0xff]  }
   0x7   :  { %1238 = vmatpush3.bf16.msra.mxu0 %v1332_v1  ;;  %1324 = vmatpush3.bf16.msra.mxu1 %v1332_v1  ;;  %v1348_v17 = vld [vmem:[%s1773_s0 + $0xa0] sm:$0xff]   ;;  %v1350_v19 = vld [vmem:[%s1773_s0 + $0xa8] sm:$0xff]   ;;  %v1351_v20 = vld [vmem:[%s1773_s0 + $0x30] sm:$0xff]  }
   0x8   :  { %1239 = vmatprep.subr.bf16.mxu0 %v1333_v2  ;;  %1317 = vmatprep.subr.bf16.mxu1 %v1333_v2  ;;  %v1352_v21 = vld [vmem:[%s1773_s0 + $0xb0] sm:$0xff]   ;;  %v1353_v22 = vld [vmem:[%s1773_s0 + $0x38] sm:$0xff]   ;;  %v1355_v24 = vld [vmem:[%s1773_s0 + $0x40] sm:$0xff]  }
   0x9   :  { %v1354_v23 = vld [vmem:[%s1773_s0 + $0xb8] sm:$0xff]   ;;  %v1356_v25 = vld [vmem:[%s1773_s0 + $0xc0] sm:$0xff]   ;;  %v1357_v26 = vld [vmem:[%s1773_s0 + $0x48] sm:$0xff]  }
   0xa   :  { %v1358_v27 = vld [vmem:[%s1773_s0 + $0xc8] sm:$0xff]   ;;  %v1359_v28 = vld [vmem:[%s1773_s0 + $0x50] sm:$0xff]   ;;  %v1361_v30 = vld [vmem:[%s1773_s0 + $0x58] sm:$0xff]  }
   0xb   :  { %1240 = vmatpush3.bf16.msra.mxu0 %v1333_v2  ;;  %1325 = vmatpush3.bf16.msra.mxu1 %v1333_v2  ;;  %v1360_v29 = vld [vmem:[%s1773_s0 + $0xd0] sm:$0xff]   ;;  %v1362_v31 = vld [vmem:[%s1773_s0 + $0xd8] sm:$0xff]   ;;  %v1363_v32 = vld [vmem:[%s1773_s0 + $0x60] sm:$0xff]  }
   0xc   :  { %1241 = vmatprep.subr.bf16.mxu0 %v1334_v3  ;;  %1318 = vmatprep.subr.bf16.mxu1 %v1334_v3  ;;  %v1364_v33 = vld [vmem:[%s1773_s0 + $0xe0] sm:$0xff]   ;;  %v1365_v34 = vld [vmem:[%s1773_s0 + $0x68] sm:$0xff]   ;;  %v1367_v36 = vld [vmem:[%s1773_s0 + $0x70] sm:$0xff]  }
   0xd   :  { %v1366_v35 = vld [vmem:[%s1773_s0 + $0xe8] sm:$0xff]   ;;  %v1368_v37 = vld [vmem:[%s1773_s0 + $0xf0] sm:$0xff]   ;;  %v1369_v38 = vld [vmem:[%s1773_s0 + $0x78] sm:$0xff]  }
   0xe   :  { %v1370_v39 = vld [vmem:[%s1773_s0 + $0xf8] sm:$0xff]   ;;  %v1514_v40 = vld [vmem:[%s1774_s2] ss:$0 sm:$0xff] }
   0xf   :  { %1242 = vmatpush3.bf16.msra.mxu0 %v1334_v3  ;;  %1326 = vmatpush3.bf16.msra.mxu1 %v1334_v3 }
  0x10   :  { %1243 = vmatprep.subr.bf16.mxu0 %v1335_v6  ;;  %1319 = vmatprep.subr.bf16.mxu1 %v1335_v6 }
  0x13   :  { %1244 = vmatpush3.bf16.msra.mxu0 %v1335_v6  ;;  %1327 = vmatpush3.bf16.msra.mxu1 %v1335_v6 }
  0x14   :  { %1245 = vmatprep.subr.bf16.mxu0 %v1336_v7  ;;  %1320 = vmatprep.subr.bf16.mxu1 %v1336_v7 }
  0x17   :  { %1246 = vmatpush3.bf16.msra.mxu0 %v1336_v7  ;;  %1328 = vmatpush3.bf16.msra.mxu1 %v1336_v7 }
  0x18   :  { %1247 = vmatprep.subr.bf16.mxu0 %v1337_v8  ;;  %1321 = vmatprep.subr.bf16.mxu1 %v1337_v8 }
  0x1b   :  { %1248 = vmatpush3.bf16.msra.mxu0 %v1337_v8  ;;  %1329 = vmatpush3.bf16.msra.mxu1 %v1337_v8 }
  0x1c   :  { %1249 = vmatprep.subr.bf16.mxu0 %v1338_v9  ;;  %1322 = vmatprep.subr.bf16.mxu1 %v1338_v9 }
  0x1f   :  { %1250 = vmatpush3.bf16.msra.mxu0 %v1338_v9  ;;  %1330 = vmatpush3.bf16.msra.mxu1 %v1338_v9 }
  0x22   :  { %1252 = vmatmul.mubr.bf16.vlgmr.msra.gmra.mrb[0].mxu0 %v1341_v10  ;;  %1284 = vmatmul.mubr.bf16.vlgmr.msra.gmra.mrb[0].mxu1 %v1342_v11 }
  0x23   :  { %1255 = vmatprep.mubr.bf16.mxu0 %v1343_v12  ;;  %1287 = vmatprep.mubr.bf16.mxu1 %v1344_v13 }
  0x2a   :  { %1256 = vmatmul.mubr.bf16.gmra.mrb[4].mxu0 %v1345_v14  ;;  %1288 = vmatmul.mubr.bf16.gmra.mrb[4].mxu1 %v1346_v15 }
  0x2b   :  { %1259 = vmatprep.mubr.bf16.mxu0 %v1347_v16  ;;  %1291 = vmatprep.mubr.bf16.mxu1 %v1348_v17 }
  0x32   :  { %1260 = vmatmul.mubr.bf16.gmra.mrb[8].mxu0 %v1349_v18  ;;  %1292 = vmatmul.mubr.bf16.gmra.mrb[8].mxu1 %v1350_v19 }
  0x33   :  { %1263 = vmatprep.mubr.bf16.mxu0 %v1351_v20  ;;  %1295 = vmatprep.mubr.bf16.mxu1 %v1352_v21 }
  0x3a   :  { %1264 = vmatmul.mubr.bf16.gmra.mrb[12].mxu0 %v1353_v22  ;;  %1296 = vmatmul.mubr.bf16.gmra.mrb[12].mxu1 %v1354_v23 }
  0x3b   :  { %1267 = vmatprep.mubr.bf16.mxu0 %v1355_v24  ;;  %1299 = vmatprep.mubr.bf16.mxu1 %v1356_v25 }
  0x42   :  { %1268 = vmatmul.mubr.bf16.gmra.mrb[16].mxu0 %v1357_v26  ;;  %1300 = vmatmul.mubr.bf16.gmra.mrb[16].mxu1 %v1358_v27 }
  0x43   :  { %1271 = vmatprep.mubr.bf16.mxu0 %v1359_v28  ;;  %1303 = vmatprep.mubr.bf16.mxu1 %v1360_v29 }
  0x4a   :  { %1272 = vmatmul.mubr.bf16.gmra.mrb[20].mxu0 %v1361_v30  ;;  %1304 = vmatmul.mubr.bf16.gmra.mrb[20].mxu1 %v1362_v31 }
  0x4b   :  { %1275 = vmatprep.mubr.bf16.mxu0 %v1363_v32  ;;  %1307 = vmatprep.mubr.bf16.mxu1 %v1364_v33 }
  0x52   :  { %1276 = vmatmul.mubr.bf16.gmra.mrb[24].mxu0 %v1365_v34  ;;  %1308 = vmatmul.mubr.bf16.gmra.mrb[24].mxu1 %v1366_v35 }
  0x53   :  { %1279 = vmatprep.mubr.bf16.mxu0 %v1367_v36  ;;  %1311 = vmatprep.mubr.bf16.mxu1 %v1368_v37 }
  0x5a   :  { %1280 = vmatmul.mubr.bf16.gmra.mrb[28].mxu0 %v1369_v38  ;;  %1312 = vmatmul.mubr.bf16.gmra.mrb[28].mxu1 %v1370_v39 }
  0xf5   :  { %v1253_v41 = vpop.f32.mrb[0].mxu0  ;;  %v1285_v42 = vpop.f32.mrb[0].mxu1 }
  0xf6   :  { %v960_v43 = vadd.f32 %v1253_v41, %v1514_v40  ;;  %v992_v44 = vadd.f32 %v1285_v42, %v1514_v40  ;;  %v501_v45 = vpop.f32.mrb[1].mxu0  ;;  %v629_v46 = vpop.f32.mrb[1].mxu1 }
  0xf7   :  { %v958_v47 = vadd.f32 %v1514_v40, %v501_v45  ;;  %v990_v48 = vadd.f32 %v1514_v40, %v629_v46  ;;  %v1254_v49 = vpop.f32.mrb[2].mxu0  ;;  %v1286_v50 = vpop.f32.mrb[2].mxu1 }
  0xf8   :  { %v1024_v51 = vmax.f32 %v960_v43, 0.0  ;;  %v1056_v52 = vmax.f32 %v992_v44, 0.0  ;;  %v961_v53 = vadd.f32 %v1254_v49, %v1514_v40  ;;  %v993_v54 = vadd.f32 %v1286_v50, %v1514_v40  ;;  %v504_v55 = vpop.f32.mrb[3].mxu0  ;;  %v632_v56 = vpop.f32.mrb[3].mxu1 }
  0xf9   :  { %v1022_v57 = vmax.f32 %v958_v47, 0.0  ;;  %v1054_v58 = vmax.f32 %v990_v48, 0.0  ;;  %v959_v59 = vadd.f32 %v1514_v40, %v504_v55  ;;  %v991_v60 = vadd.f32 %v1514_v40, %v632_v56 }
  0xfa   :  { %1088 = vst [vmem:[%s1775_s3 + $0x10] sm:$0xff] %v1024_v51  ;;  %1120 = vst [vmem:[%s1775_s3 + $0x110] sm:$0xff] %v1056_v52  ;;  %v1025_v61 = vmax.f32 %v961_v53, 0.0  ;;  %v1057_v62 = vmax.f32 %v993_v54, 0.0 }
  0xfb   :  { %1086 = vst [vmem:[%s1775_s3] sm:$0xff] %v1022_v57  ;;  %1118 = vst [vmem:[%s1775_s3 + $0x100] sm:$0xff] %v1054_v58  ;;  %v1023_v63 = vmax.f32 %v959_v59, 0.0  ;;  %v1055_v0 = vmax.f32 %v991_v60, 0.0 }
  0xfc   :  { %1089 = vst [vmem:[%s1775_s3 + $0x18] sm:$0xff] %v1025_v61  ;;  %1121 = vst [vmem:[%s1775_s3 + $0x118] sm:$0xff] %v1057_v62 }
  0xfd   :  { %1087 = vst [vmem:[%s1775_s3 + $0x8] sm:$0xff] %v1023_v63  ;;  %1119 = vst [vmem:[%s1775_s3 + $0x108] sm:$0xff] %v1055_v0  ;;  %v1257_v1 = vpop.f32.mrb[4].mxu0  ;;  %v1289_v2 = vpop.f32.mrb[4].mxu1 }
  0xfe   :  { %v964_v3 = vadd.f32 %v1257_v1, %v1514_v40  ;;  %v996_v4 = vadd.f32 %v1289_v2, %v1514_v40  ;;  %v517_v5 = vpop.f32.mrb[5].mxu0  ;;  %v645_v6 = vpop.f32.mrb[5].mxu1 }
  0xff   :  { %v962_v7 = vadd.f32 %v1514_v40, %v517_v5  ;;  %v994_v8 = vadd.f32 %v1514_v40, %v645_v6  ;;  %v1258_v9 = vpop.f32.mrb[6].mxu0  ;;  %v1290_v10 = vpop.f32.mrb[6].mxu1 }
 0x100   :  { %v1028_v11 = vmax.f32 %v964_v3, 0.0  ;;  %v1060_v12 = vmax.f32 %v996_v4, 0.0  ;;  %v965_v13 = vadd.f32 %v1258_v9, %v1514_v40  ;;  %v997_v14 = vadd.f32 %v1290_v10, %v1514_v40  ;;  %v520_v15 = vpop.f32.mrb[7].mxu0  ;;  %v648_v16 = vpop.f32.mrb[7].mxu1 }
 0x101   :  { %v1026_v17 = vmax.f32 %v962_v7, 0.0  ;;  %v1058_v18 = vmax.f32 %v994_v8, 0.0  ;;  %v963_v19 = vadd.f32 %v1514_v40, %v520_v15  ;;  %v995_v20 = vadd.f32 %v1514_v40, %v648_v16 }
 0x102   :  { %1092 = vst [vmem:[%s1775_s3 + $0x30] sm:$0xff] %v1028_v11  ;;  %1124 = vst [vmem:[%s1775_s3 + $0x130] sm:$0xff] %v1060_v12  ;;  %v1029_v21 = vmax.f32 %v965_v13, 0.0  ;;  %v1061_v22 = vmax.f32 %v997_v14, 0.0 }
 0x103   :  { %1090 = vst [vmem:[%s1775_s3 + $0x20] sm:$0xff] %v1026_v17  ;;  %1122 = vst [vmem:[%s1775_s3 + $0x120] sm:$0xff] %v1058_v18  ;;  %v1027_v23 = vmax.f32 %v963_v19, 0.0  ;;  %v1059_v24 = vmax.f32 %v995_v20, 0.0 }
 0x104   :  { %1093 = vst [vmem:[%s1775_s3 + $0x38] sm:$0xff] %v1029_v21  ;;  %1125 = vst [vmem:[%s1775_s3 + $0x138] sm:$0xff] %v1061_v22 }
 0x105   :  { %1091 = vst [vmem:[%s1775_s3 + $0x28] sm:$0xff] %v1027_v23  ;;  %1123 = vst [vmem:[%s1775_s3 + $0x128] sm:$0xff] %v1059_v24  ;;  %v1261_v25 = vpop.f32.mrb[8].mxu0  ;;  %v1293_v26 = vpop.f32.mrb[8].mxu1 }
 0x106   :  { %v968_v27 = vadd.f32 %v1261_v25, %v1514_v40  ;;  %v1000_v28 = vadd.f32 %v1293_v26, %v1514_v40  ;;  %v533_v29 = vpop.f32.mrb[9].mxu0  ;;  %v661_v30 = vpop.f32.mrb[9].mxu1 }
 0x107   :  { %v966_v31 = vadd.f32 %v1514_v40, %v533_v29  ;;  %v998_v32 = vadd.f32 %v1514_v40, %v661_v30  ;;  %v1262_v33 = vpop.f32.mrb[10].mxu0  ;;  %v1294_v34 = vpop.f32.mrb[10].mxu1 }
 0x108   :  { %v1032_v35 = vmax.f32 %v968_v27, 0.0  ;;  %v1064_v36 = vmax.f32 %v1000_v28, 0.0  ;;  %v969_v37 = vadd.f32 %v1262_v33, %v1514_v40  ;;  %v1001_v38 = vadd.f32 %v1294_v34, %v1514_v40  ;;  %v536_v39 = vpop.f32.mrb[11].mxu0  ;;  %v664_v41 = vpop.f32.mrb[11].mxu1 }
 0x109   :  { %v1030_v42 = vmax.f32 %v966_v31, 0.0  ;;  %v1062_v43 = vmax.f32 %v998_v32, 0.0  ;;  %v967_v44 = vadd.f32 %v1514_v40, %v536_v39  ;;  %v999_v45 = vadd.f32 %v1514_v40, %v664_v41 }
 0x10a   :  { %1096 = vst [vmem:[%s1775_s3 + $0x50] sm:$0xff] %v1032_v35  ;;  %1128 = vst [vmem:[%s1775_s3 + $0x150] sm:$0xff] %v1064_v36  ;;  %v1033_v46 = vmax.f32 %v969_v37, 0.0  ;;  %v1065_v47 = vmax.f32 %v1001_v38, 0.0 }
 0x10b   :  { %1094 = vst [vmem:[%s1775_s3 + $0x40] sm:$0xff] %v1030_v42  ;;  %1126 = vst [vmem:[%s1775_s3 + $0x140] sm:$0xff] %v1062_v43  ;;  %v1031_v48 = vmax.f32 %v967_v44, 0.0  ;;  %v1063_v49 = vmax.f32 %v999_v45, 0.0 }
 0x10c   :  { %1097 = vst [vmem:[%s1775_s3 + $0x58] sm:$0xff] %v1033_v46  ;;  %1129 = vst [vmem:[%s1775_s3 + $0x158] sm:$0xff] %v1065_v47 }
 0x10d   :  { %1095 = vst [vmem:[%s1775_s3 + $0x48] sm:$0xff] %v1031_v48  ;;  %1127 = vst [vmem:[%s1775_s3 + $0x148] sm:$0xff] %v1063_v49  ;;  %v1265_v50 = vpop.f32.mrb[12].mxu0  ;;  %v1297_v51 = vpop.f32.mrb[12].mxu1 }
 0x10e   :  { %v972_v52 = vadd.f32 %v1265_v50, %v1514_v40  ;;  %v1004_v53 = vadd.f32 %v1297_v51, %v1514_v40  ;;  %v549_v54 = vpop.f32.mrb[13].mxu0  ;;  %v677_v55 = vpop.f32.mrb[13].mxu1 }
 0x10f   :  { %v970_v56 = vadd.f32 %v1514_v40, %v549_v54  ;;  %v1002_v57 = vadd.f32 %v1514_v40, %v677_v55  ;;  %v1266_v58 = vpop.f32.mrb[14].mxu0  ;;  %v1298_v59 = vpop.f32.mrb[14].mxu1 }
 0x110   :  { %v1036_v60 = vmax.f32 %v972_v52, 0.0  ;;  %v1068_v61 = vmax.f32 %v1004_v53, 0.0  ;;  %v973_v62 = vadd.f32 %v1266_v58, %v1514_v40  ;;  %v1005_v63 = vadd.f32 %v1298_v59, %v1514_v40  ;;  %v552_v0 = vpop.f32.mrb[15].mxu0  ;;  %v680_v1 = vpop.f32.mrb[15].mxu1 }
 0x111   :  { %v1034_v2 = vmax.f32 %v970_v56, 0.0  ;;  %v1066_v3 = vmax.f32 %v1002_v57, 0.0  ;;  %v971_v4 = vadd.f32 %v1514_v40, %v552_v0  ;;  %v1003_v5 = vadd.f32 %v1514_v40, %v680_v1 }
 0x112   :  { %1100 = vst [vmem:[%s1775_s3 + $0x70] sm:$0xff] %v1036_v60  ;;  %1132 = vst [vmem:[%s1775_s3 + $0x170] sm:$0xff] %v1068_v61  ;;  %v1037_v6 = vmax.f32 %v973_v62, 0.0  ;;  %v1069_v7 = vmax.f32 %v1005_v63, 0.0 }
 0x113   :  { %1098 = vst [vmem:[%s1775_s3 + $0x60] sm:$0xff] %v1034_v2  ;;  %1130 = vst [vmem:[%s1775_s3 + $0x160] sm:$0xff] %v1066_v3  ;;  %v1035_v8 = vmax.f32 %v971_v4, 0.0  ;;  %v1067_v9 = vmax.f32 %v1003_v5, 0.0 }
 0x114   :  { %1101 = vst [vmem:[%s1775_s3 + $0x78] sm:$0xff] %v1037_v6  ;;  %1133 = vst [vmem:[%s1775_s3 + $0x178] sm:$0xff] %v1069_v7 }
 0x115   :  { %1099 = vst [vmem:[%s1775_s3 + $0x68] sm:$0xff] %v1035_v8  ;;  %1131 = vst [vmem:[%s1775_s3 + $0x168] sm:$0xff] %v1067_v9  ;;  %v1269_v10 = vpop.f32.mrb[16].mxu0  ;;  %v1301_v11 = vpop.f32.mrb[16].mxu1 }
 0x116   :  { %v976_v12 = vadd.f32 %v1269_v10, %v1514_v40  ;;  %v1008_v13 = vadd.f32 %v1301_v11, %v1514_v40  ;;  %v565_v14 = vpop.f32.mrb[17].mxu0  ;;  %v693_v15 = vpop.f32.mrb[17].mxu1 }
 0x117   :  { %v974_v16 = vadd.f32 %v1514_v40, %v565_v14  ;;  %v1006_v17 = vadd.f32 %v1514_v40, %v693_v15  ;;  %v1270_v18 = vpop.f32.mrb[18].mxu0  ;;  %v1302_v19 = vpop.f32.mrb[18].mxu1 }
 0x118   :  { %v1040_v20 = vmax.f32 %v976_v12, 0.0  ;;  %v1072_v21 = vmax.f32 %v1008_v13, 0.0  ;;  %v977_v22 = vadd.f32 %v1270_v18, %v1514_v40  ;;  %v1009_v23 = vadd.f32 %v1302_v19, %v1514_v40  ;;  %v568_v24 = vpop.f32.mrb[19].mxu0  ;;  %v696_v25 = vpop.f32.mrb[19].mxu1 }
 0x119   :  { %v1038_v26 = vmax.f32 %v974_v16, 0.0  ;;  %v1070_v27 = vmax.f32 %v1006_v17, 0.0  ;;  %v975_v28 = vadd.f32 %v1514_v40, %v568_v24  ;;  %v1007_v29 = vadd.f32 %v1514_v40, %v696_v25 }
 0x11a   :  { %1104 = vst [vmem:[%s1775_s3 + $0x90] sm:$0xff] %v1040_v20  ;;  %1136 = vst [vmem:[%s1775_s3 + $0x190] sm:$0xff] %v1072_v21  ;;  %v1041_v30 = vmax.f32 %v977_v22, 0.0  ;;  %v1073_v31 = vmax.f32 %v1009_v23, 0.0 }
 0x11b   :  { %1102 = vst [vmem:[%s1775_s3 + $0x80] sm:$0xff] %v1038_v26  ;;  %1134 = vst [vmem:[%s1775_s3 + $0x180] sm:$0xff] %v1070_v27  ;;  %v1039_v32 = vmax.f32 %v975_v28, 0.0  ;;  %v1071_v33 = vmax.f32 %v1007_v29, 0.0 }
 0x11c   :  { %1105 = vst [vmem:[%s1775_s3 + $0x98] sm:$0xff] %v1041_v30  ;;  %1137 = vst [vmem:[%s1775_s3 + $0x198] sm:$0xff] %v1073_v31 }
 0x11d   :  { %1103 = vst [vmem:[%s1775_s3 + $0x88] sm:$0xff] %v1039_v32  ;;  %1135 = vst [vmem:[%s1775_s3 + $0x188] sm:$0xff] %v1071_v33  ;;  %v1273_v34 = vpop.f32.mrb[20].mxu0  ;;  %v1305_v35 = vpop.f32.mrb[20].mxu1 }
 0x11e   :  { %v980_v36 = vadd.f32 %v1273_v34, %v1514_v40  ;;  %v1012_v37 = vadd.f32 %v1305_v35, %v1514_v40  ;;  %v581_v38 = vpop.f32.mrb[21].mxu0  ;;  %v709_v39 = vpop.f32.mrb[21].mxu1 }
 0x11f   :  { %v978_v41 = vadd.f32 %v1514_v40, %v581_v38  ;;  %v1010_v42 = vadd.f32 %v1514_v40, %v709_v39  ;;  %v1274_v43 = vpop.f32.mrb[22].mxu0  ;;  %v1306_v44 = vpop.f32.mrb[22].mxu1 }
 0x120   :  { %v1044_v45 = vmax.f32 %v980_v36, 0.0  ;;  %v1076_v46 = vmax.f32 %v1012_v37, 0.0  ;;  %v981_v47 = vadd.f32 %v1274_v43, %v1514_v40  ;;  %v1013_v48 = vadd.f32 %v1306_v44, %v1514_v40  ;;  %v584_v49 = vpop.f32.mrb[23].mxu0  ;;  %v712_v50 = vpop.f32.mrb[23].mxu1 }
 0x121   :  { %v1042_v51 = vmax.f32 %v978_v41, 0.0  ;;  %v1074_v52 = vmax.f32 %v1010_v42, 0.0  ;;  %v979_v53 = vadd.f32 %v1514_v40, %v584_v49  ;;  %v1011_v54 = vadd.f32 %v1514_v40, %v712_v50 }
 0x122   :  { %1108 = vst [vmem:[%s1775_s3 + $0xb0] sm:$0xff] %v1044_v45  ;;  %1140 = vst [vmem:[%s1775_s3 + $0x1b0] sm:$0xff] %v1076_v46  ;;  %v1045_v55 = vmax.f32 %v981_v47, 0.0  ;;  %v1077_v56 = vmax.f32 %v1013_v48, 0.0 }
 0x123   :  { %1106 = vst [vmem:[%s1775_s3 + $0xa0] sm:$0xff] %v1042_v51  ;;  %1138 = vst [vmem:[%s1775_s3 + $0x1a0] sm:$0xff] %v1074_v52  ;;  %v1043_v57 = vmax.f32 %v979_v53, 0.0  ;;  %v1075_v58 = vmax.f32 %v1011_v54, 0.0 }
 0x124   :  { %1109 = vst [vmem:[%s1775_s3 + $0xb8] sm:$0xff] %v1045_v55  ;;  %1141 = vst [vmem:[%s1775_s3 + $0x1b8] sm:$0xff] %v1077_v56 }
 0x125   :  { %1107 = vst [vmem:[%s1775_s3 + $0xa8] sm:$0xff] %v1043_v57  ;;  %1139 = vst [vmem:[%s1775_s3 + $0x1a8] sm:$0xff] %v1075_v58  ;;  %v1277_v59 = vpop.f32.mrb[24].mxu0  ;;  %v1309_v60 = vpop.f32.mrb[24].mxu1 }
 0x126   :  { %v984_v61 = vadd.f32 %v1277_v59, %v1514_v40  ;;  %v1016_v62 = vadd.f32 %v1309_v60, %v1514_v40  ;;  %v597_v63 = vpop.f32.mrb[25].mxu0  ;;  %v725_v0 = vpop.f32.mrb[25].mxu1 }
 0x127   :  { %v982_v1 = vadd.f32 %v1514_v40, %v597_v63  ;;  %v1014_v2 = vadd.f32 %v1514_v40, %v725_v0  ;;  %v1278_v3 = vpop.f32.mrb[26].mxu0  ;;  %v1310_v4 = vpop.f32.mrb[26].mxu1 }
 0x128   :  { %v1048_v5 = vmax.f32 %v984_v61, 0.0  ;;  %v1080_v6 = vmax.f32 %v1016_v62, 0.0  ;;  %v985_v7 = vadd.f32 %v1278_v3, %v1514_v40  ;;  %v1017_v8 = vadd.f32 %v1310_v4, %v1514_v40  ;;  %v600_v9 = vpop.f32.mrb[27].mxu0  ;;  %v728_v10 = vpop.f32.mrb[27].mxu1 }
 0x129   :  { %v1046_v11 = vmax.f32 %v982_v1, 0.0  ;;  %v1078_v12 = vmax.f32 %v1014_v2, 0.0  ;;  %v983_v13 = vadd.f32 %v1514_v40, %v600_v9  ;;  %v1015_v14 = vadd.f32 %v1514_v40, %v728_v10 }
 0x12a   :  { %1112 = vst [vmem:[%s1775_s3 + $0xd0] sm:$0xff] %v1048_v5  ;;  %1144 = vst [vmem:[%s1775_s3 + $0x1d0] sm:$0xff] %v1080_v6  ;;  %v1049_v15 = vmax.f32 %v985_v7, 0.0  ;;  %v1081_v16 = vmax.f32 %v1017_v8, 0.0 }
 0x12b   :  { %1110 = vst [vmem:[%s1775_s3 + $0xc0] sm:$0xff] %v1046_v11  ;;  %1142 = vst [vmem:[%s1775_s3 + $0x1c0] sm:$0xff] %v1078_v12  ;;  %v1047_v17 = vmax.f32 %v983_v13, 0.0  ;;  %v1079_v18 = vmax.f32 %v1015_v14, 0.0 }
 0x12c   :  { %1113 = vst [vmem:[%s1775_s3 + $0xd8] sm:$0xff] %v1049_v15  ;;  %1145 = vst [vmem:[%s1775_s3 + $0x1d8] sm:$0xff] %v1081_v16 }
 0x12d   :  { %1111 = vst [vmem:[%s1775_s3 + $0xc8] sm:$0xff] %v1047_v17  ;;  %1143 = vst [vmem:[%s1775_s3 + $0x1c8] sm:$0xff] %v1079_v18  ;;  %v1281_v19 = vpop.f32.mrb[28].mxu0  ;;  %v1313_v20 = vpop.f32.mrb[28].mxu1 }
 0x12e   :  { %v988_v21 = vadd.f32 %v1281_v19, %v1514_v40  ;;  %v1020_v22 = vadd.f32 %v1313_v20, %v1514_v40  ;;  %v613_v23 = vpop.f32.mrb[29].mxu0  ;;  %v741_v24 = vpop.f32.mrb[29].mxu1 }
 0x12f   :  { %v986_v25 = vadd.f32 %v1514_v40, %v613_v23  ;;  %v1018_v26 = vadd.f32 %v1514_v40, %v741_v24  ;;  %v1282_v27 = vpop.f32.mrb[30].mxu0  ;;  %v1314_v28 = vpop.f32.mrb[30].mxu1 }
 0x130   :  { %v1052_v29 = vmax.f32 %v988_v21, 0.0  ;;  %v1084_v30 = vmax.f32 %v1020_v22, 0.0  ;;  %v989_v31 = vadd.f32 %v1282_v27, %v1514_v40  ;;  %v1021_v32 = vadd.f32 %v1314_v28, %v1514_v40  ;;  %v616_v33 = vpop.f32.mrb[31].mxu0  ;;  %v744_v34 = vpop.f32.mrb[31].mxu1 }
 0x131   :  { %v1050_v35 = vmax.f32 %v986_v25, 0.0  ;;  %v1082_v36 = vmax.f32 %v1018_v26, 0.0  ;;  %v987_v37 = vadd.f32 %v1514_v40, %v616_v33  ;;  %v1019_v38 = vadd.f32 %v1514_v40, %v744_v34 }
 0x132   :  { %1116 = vst [vmem:[%s1775_s3 + $0xf0] sm:$0xff] %v1052_v29  ;;  %1148 = vst [vmem:[%s1775_s3 + $0x1f0] sm:$0xff] %v1084_v30  ;;  %v1053_v39 = vmax.f32 %v989_v31, 0.0  ;;  %v1085_v41 = vmax.f32 %v1021_v32, 0.0 }
 0x133   :  { %1114 = vst [vmem:[%s1775_s3 + $0xe0] sm:$0xff] %v1050_v35  ;;  %1146 = vst [vmem:[%s1775_s3 + $0x1e0] sm:$0xff] %v1082_v36  ;;  %v1051_v42 = vmax.f32 %v987_v37, 0.0  ;;  %v1083_v40 = vmax.f32 %v1019_v38, 0.0 }
 0x134   :  { %1117 = vst [vmem:[%s1775_s3 + $0xf8] sm:$0xff] %v1053_v39  ;;  %1149 = vst [vmem:[%s1775_s3 + $0x1f8] sm:$0xff] %v1085_v41 }
 0x135   :  { %1115 = vst [vmem:[%s1775_s3 + $0xe8] sm:$0xff] %v1051_v42  ;;  %1147 = vst [vmem:[%s1775_s3 + $0x1e8] sm:$0xff] %v1083_v40 }

// kernel: feature_extractor_forward.27
= control target key start
LH: loop header
LB: loop body
LE: loop exit
PB: predicated region body
PF: predicated region fallthrough
CT: control target
= control target key end

     0   :  { %s2127_s12 = smov 0   ;;  %s2129_s13 = smov 0   ;;  %s2695_s0 = inlined_call_operand.vmem [shape: bf16[512,640], index: 0, kind: input, shape index: {}]   ;;  %s2696_s1 = inlined_call_operand.vmem [shape: bf16[640,128], index: 1, kind: input, shape index: {}]   ;;  %s2697_s2 = inlined_call_operand.vmem [shape: f32[1,128], index: 2, kind: input, shape index: {}]   ;;  %s2698_s3 = inlined_call_operand.vmem [shape: f32[512,128], index: 3, kind: output, shape index: {}]  }
   0x1   :  { %s2131_s14 = smov 0   ;;  %s2133_s15 = smov 0  }
   0x2   :  { %s2135_s16 = smov 0  }
   0x3 LB: > { %s25_s17 = sadd.s32 1, %s2100_s15  ;;  %p48_p1 = scmp.ne.s32.totalorder %s2092_s13, %s2088_s12  ;;  %s2104_s16 = sphi %s2135_s16, %s13_s16   ;;  %s2100_s15 = sphi %s2133_s15, %s2702_s15   ;;  %s2096_s14 = sphi %s2131_s14, %s2701_s14   ;;  %s2092_s13 = sphi %s2129_s13, %s2700_s13   ;;  %s2088_s12 = sphi %s2127_s12, %s2699_s12  }
   0x4   : > { %p26_p0 = scmp.ge.s32.totalorder %s25_s17, 5  ;;  %p49_p2 = scmp.eq.s32.totalorder %s2104_s16, 0 }
   0x5   : > { %s41_s19 = sadd.s32 1, %s2092_s13  ;;  %p1795_p5 = scmp.ge.s32.totalorder %s2104_s16, 5 }
   0x6   : > { %s2704_s17 = smov (%p26_p0, %s25_s17), 0  ;;  %p50_p3 = por %p49_p2, %p48_p1 }
   0x7   : > { %s37_s18 = ssub.s32 %s2100_s15, %s2704_s17  ;;  %162 = sbr.rel (%p1795_p5) target bundleno = 60 (0x3c), region = 20 }
   0x8   : > { %p39_p4 = scmp.eq.s32.totalorder %s37_s18, 0 }
   0xa   : > { %s2162_s20 = scalar_select %p39_p4, %s2092_s13, %s41_s19  }
   0xe   : > { %165 = sbr.rel (!%p50_p3) target bundleno = 60 (0x3c), region = 24  ;;  %s167_s21 = sand.u32 (%p50_p3), 1, %s2092_s13  }
   0xf   : > { %s1797_s22 = sshll.u32 (%p50_p3), %s2100_s15, 2  ;;  %s1796_s23 = sshll.u32 (%p50_p3), %s167_s21, 8 }
  0x10   : > { %s2170_s26 = scalar_lea.vmem (%p50_p3), %s2695_s0, %s1797_s22  ;;  %s2174_s27 = scalar_lea.vmem (%p50_p3), [#allocation3], %s1796_s23 }
  0x11   : > { %v190_v0 = vld [vmem:[%s2170_s26] sm:$0xf] (%p50_p3)  ;;  %v192_v1 = vld [vmem:[%s2170_s26 + $0x14] sm:$0xf] (%p50_p3)  ;;  %v194_v2 = vld [vmem:[%s2170_s26 + $0x28] sm:$0xf] (%p50_p3) }
  0x12   : > { %191 = vst [vmem:[%s2174_s27] sm:$0xf] (%p50_p3), %v190_v0  ;;  %193 = vst [vmem:[%s2174_s27 + $0x4] sm:$0xf] (%p50_p3), %v192_v1  ;;  %v196_v3 = vld [vmem:[%s2170_s26 + $0x3c] sm:$0xf] (%p50_p3) }
  0x13   : > { %v198_v4 = vld [vmem:[%s2170_s26 + $0x50] sm:$0xf] (%p50_p3)  ;;  %195 = vst [vmem:[%s2174_s27 + $0x8] sm:$0xf] (%p50_p3), %v194_v2  ;;  %197 = vst [vmem:[%s2174_s27 + $0xc] sm:$0xf] (%p50_p3), %v196_v3 }
  0x14   : > { %199 = vst [vmem:[%s2174_s27 + $0x10] sm:$0xf] (%p50_p3), %v198_v4  ;;  %v200_v5 = vld [vmem:[%s2170_s26 + $0x64] sm:$0xf] (%p50_p3)  ;;  %v202_v6 = vld [vmem:[%s2170_s26 + $0x78] sm:$0xf] (%p50_p3) }
  0x15   : > { %v204_v7 = vld [vmem:[%s2170_s26 + $0x8c] sm:$0xf]  ;;  %201 = vst [vmem:[%s2174_s27 + $0x14] sm:$0xf] %v200_v5  ;;  %203 = vst [vmem:[%s2174_s27 + $0x18] sm:$0xf] %v202_v6 }
  0x16   : > { %205 = vst [vmem:[%s2174_s27 + $0x1c] sm:$0xf] %v204_v7  ;;  %v206_v8 = vld [vmem:[%s2170_s26 + $0xa0] sm:$0xf]  ;;  %v208_v9 = vld [vmem:[%s2170_s26 + $0xb4] sm:$0xf] }
  0x17   : > { %v210_v10 = vld [vmem:[%s2170_s26 + $0xc8] sm:$0xf]  ;;  %207 = vst [vmem:[%s2174_s27 + $0x20] sm:$0xf] %v206_v8  ;;  %209 = vst [vmem:[%s2174_s27 + $0x24] sm:$0xf] %v208_v9 }
  0x18   : > { %211 = vst [vmem:[%s2174_s27 + $0x28] sm:$0xf] %v210_v10  ;;  %v212_v11 = vld [vmem:[%s2170_s26 + $0xdc] sm:$0xf]  ;;  %v214_v12 = vld [vmem:[%s2170_s26 + $0xf0] sm:$0xf] }
  0x19   : > { %v216_v13 = vld [vmem:[%s2170_s26 + $0x104] sm:$0xf]  ;;  %213 = vst [vmem:[%s2174_s27 + $0x2c] sm:$0xf] %v212_v11  ;;  %215 = vst [vmem:[%s2174_s27 + $0x30] sm:$0xf] %v214_v12 }
  0x1a   : > { %217 = vst [vmem:[%s2174_s27 + $0x34] sm:$0xf] %v216_v13  ;;  %v218_v14 = vld [vmem:[%s2170_s26 + $0x118] sm:$0xf]  ;;  %v220_v15 = vld [vmem:[%s2170_s26 + $0x12c] sm:$0xf] }
  0x1b   : > { %v222_v16 = vld [vmem:[%s2170_s26 + $0x140] sm:$0xf]  ;;  %219 = vst [vmem:[%s2174_s27 + $0x38] sm:$0xf] %v218_v14  ;;  %221 = vst [vmem:[%s2174_s27 + $0x3c] sm:$0xf] %v220_v15 }
  0x1c   : > { %223 = vst [vmem:[%s2174_s27 + $0x40] sm:$0xf] %v222_v16  ;;  %v224_v17 = vld [vmem:[%s2170_s26 + $0x154] sm:$0xf]  ;;  %v226_v18 = vld [vmem:[%s2170_s26 + $0x168] sm:$0xf] }
  0x1d   : > { %v228_v19 = vld [vmem:[%s2170_s26 + $0x17c] sm:$0xf]  ;;  %225 = vst [vmem:[%s2174_s27 + $0x44] sm:$0xf] %v224_v17  ;;  %227 = vst [vmem:[%s2174_s27 + $0x48] sm:$0xf] %v226_v18 }
  0x1e   : > { %229 = vst [vmem:[%s2174_s27 + $0x4c] sm:$0xf] %v228_v19  ;;  %v230_v20 = vld [vmem:[%s2170_s26 + $0x190] sm:$0xf]  ;;  %v232_v21 = vld [vmem:[%s2170_s26 + $0x1a4] sm:$0xf] }
  0x1f   : > { %v234_v22 = vld [vmem:[%s2170_s26 + $0x1b8] sm:$0xf]  ;;  %231 = vst [vmem:[%s2174_s27 + $0x50] sm:$0xf] %v230_v20  ;;  %233 = vst [vmem:[%s2174_s27 + $0x54] sm:$0xf] %v232_v21 }
  0x20   : > { %235 = vst [vmem:[%s2174_s27 + $0x58] sm:$0xf] %v234_v22  ;;  %v236_v23 = vld [vmem:[%s2170_s26 + $0x1cc] sm:$0xf]  ;;  %v238_v24 = vld [vmem:[%s2170_s26 + $0x1e0] sm:$0xf] }
  0x21   : > { %v240_v25 = vld [vmem:[%s2170_s26 + $0x1f4] sm:$0xf]  ;;  %237 = vst [vmem:[%s2174_s27 + $0x5c] sm:$0xf] %v236_v23  ;;  %239 = vst [vmem:[%s2174_s27 + $0x60] sm:$0xf] %v238_v24 }
  0x22   : > { %241 = vst [vmem:[%s2174_s27 + $0x64] sm:$0xf] %v240_v25  ;;  %v242_v26 = vld [vmem:[%s2170_s26 + $0x208] sm:$0xf]  ;;  %v244_v27 = vld [vmem:[%s2170_s26 + $0x21c] sm:$0xf] }
  0x23   : > { %v246_v28 = vld [vmem:[%s2170_s26 + $0x230] sm:$0xf]  ;;  %243 = vst [vmem:[%s2174_s27 + $0x68] sm:$0xf] %v242_v26  ;;  %245 = vst [vmem:[%s2174_s27 + $0x6c] sm:$0xf] %v244_v27 }
  0x24   : > { %247 = vst [vmem:[%s2174_s27 + $0x70] sm:$0xf] %v246_v28  ;;  %v248_v29 = vld [vmem:[%s2170_s26 + $0x244] sm:$0xf]  ;;  %v250_v30 = vld [vmem:[%s2170_s26 + $0x258] sm:$0xf] }
  0x25   : > { %v252_v31 = vld [vmem:[%s2170_s26 + $0x26c] sm:$0xf]  ;;  %249 = vst [vmem:[%s2174_s27 + $0x74] sm:$0xf] %v248_v29  ;;  %251 = vst [vmem:[%s2174_s27 + $0x78] sm:$0xf] %v250_v30 }
  0x26   : > { %253 = vst [vmem:[%s2174_s27 + $0x7c] sm:$0xf] %v252_v31  ;;  %v254_v32 = vld [vmem:[%s2170_s26 + $0x280] sm:$0xf]  ;;  %v256_v33 = vld [vmem:[%s2170_s26 + $0x294] sm:$0xf] }
  0x27   : > { %v258_v34 = vld [vmem:[%s2170_s26 + $0x2a8] sm:$0xf]  ;;  %255 = vst [vmem:[%s2174_s27 + $0x80] sm:$0xf] %v254_v32  ;;  %257 = vst [vmem:[%s2174_s27 + $0x84] sm:$0xf] %v256_v33 }
  0x28   : > { %259 = vst [vmem:[%s2174_s27 + $0x88] sm:$0xf] %v258_v34  ;;  %v260_v35 = vld [vmem:[%s2170_s26 + $0x2bc] sm:$0xf]  ;;  %v262_v36 = vld [vmem:[%s2170_s26 + $0x2d0] sm:$0xf] }
  0x29   : > { %v264_v37 = vld [vmem:[%s2170_s26 + $0x2e4] sm:$0xf]  ;;  %261 = vst [vmem:[%s2174_s27 + $0x8c] sm:$0xf] %v260_v35  ;;  %263 = vst [vmem:[%s2174_s27 + $0x90] sm:$0xf] %v262_v36 }
  0x2a   : > { %265 = vst [vmem:[%s2174_s27 + $0x94] sm:$0xf] %v264_v37  ;;  %v266_v38 = vld [vmem:[%s2170_s26 + $0x2f8] sm:$0xf]  ;;  %v268_v39 = vld [vmem:[%s2170_s26 + $0x30c] sm:$0xf] }
  0x2b   : > { %v270_v40 = vld [vmem:[%s2170_s26 + $0x320] sm:$0xf]  ;;  %267 = vst [vmem:[%s2174_s27 + $0x98] sm:$0xf] %v266_v38  ;;  %269 = vst [vmem:[%s2174_s27 + $0x9c] sm:$0xf] %v268_v39 }
  0x2c   : > { %271 = vst [vmem:[%s2174_s27 + $0xa0] sm:$0xf] %v270_v40  ;;  %v272_v41 = vld [vmem:[%s2170_s26 + $0x334] sm:$0xf]  ;;  %v274_v42 = vld [vmem:[%s2170_s26 + $0x348] sm:$0xf] }
  0x2d   : > { %v276_v43 = vld [vmem:[%s2170_s26 + $0x35c] sm:$0xf]  ;;  %273 = vst [vmem:[%s2174_s27 + $0xa4] sm:$0xf] %v272_v41  ;;  %275 = vst [vmem:[%s2174_s27 + $0xa8] sm:$0xf] %v274_v42 }
  0x2e   : > { %277 = vst [vmem:[%s2174_s27 + $0xac] sm:$0xf] %v276_v43  ;;  %v278_v44 = vld [vmem:[%s2170_s26 + $0x370] sm:$0xf]  ;;  %v280_v45 = vld [vmem:[%s2170_s26 + $0x384] sm:$0xf] }
  0x2f   : > { %v282_v46 = vld [vmem:[%s2170_s26 + $0x398] sm:$0xf]  ;;  %279 = vst [vmem:[%s2174_s27 + $0xb0] sm:$0xf] %v278_v44  ;;  %281 = vst [vmem:[%s2174_s27 + $0xb4] sm:$0xf] %v280_v45 }
  0x30   : > { %283 = vst [vmem:[%s2174_s27 + $0xb8] sm:$0xf] %v282_v46  ;;  %v284_v47 = vld [vmem:[%s2170_s26 + $0x3ac] sm:$0xf]  ;;  %v286_v48 = vld [vmem:[%s2170_s26 + $0x3c0] sm:$0xf] }
  0x31   : > { %v288_v49 = vld [vmem:[%s2170_s26 + $0x3d4] sm:$0xf]  ;;  %285 = vst [vmem:[%s2174_s27 + $0xbc] sm:$0xf] %v284_v47  ;;  %287 = vst [vmem:[%s2174_s27 + $0xc0] sm:$0xf] %v286_v48 }
  0x32   : > { %289 = vst [vmem:[%s2174_s27 + $0xc4] sm:$0xf] %v288_v49  ;;  %v290_v50 = vld [vmem:[%s2170_s26 + $0x3e8] sm:$0xf]  ;;  %v292_v51 = vld [vmem:[%s2170_s26 + $0x3fc] sm:$0xf] }
  0x33   : > { %v294_v52 = vld [vmem:[%s2170_s26 + $0x410] sm:$0xf]  ;;  %291 = vst [vmem:[%s2174_s27 + $0xc8] sm:$0xf] %v290_v50  ;;  %293 = vst [vmem:[%s2174_s27 + $0xcc] sm:$0xf] %v292_v51 }
  0x34   : > { %295 = vst [vmem:[%s2174_s27 + $0xd0] sm:$0xf] %v294_v52  ;;  %v296_v53 = vld [vmem:[%s2170_s26 + $0x424] sm:$0xf]  ;;  %v298_v54 = vld [vmem:[%s2170_s26 + $0x438] sm:$0xf] }
  0x35   : > { %v300_v55 = vld [vmem:[%s2170_s26 + $0x44c] sm:$0xf]  ;;  %297 = vst [vmem:[%s2174_s27 + $0xd4] sm:$0xf] %v296_v53  ;;  %299 = vst [vmem:[%s2174_s27 + $0xd8] sm:$0xf] %v298_v54 }
  0x36   : > { %301 = vst [vmem:[%s2174_s27 + $0xdc] sm:$0xf] %v300_v55  ;;  %v302_v56 = vld [vmem:[%s2170_s26 + $0x460] sm:$0xf]  ;;  %v304_v57 = vld [vmem:[%s2170_s26 + $0x474] sm:$0xf] }
  0x37   : > { %v306_v58 = vld [vmem:[%s2170_s26 + $0x488] sm:$0xf]  ;;  %303 = vst [vmem:[%s2174_s27 + $0xe0] sm:$0xf] %v302_v56  ;;  %305 = vst [vmem:[%s2174_s27 + $0xe4] sm:$0xf] %v304_v57 }
  0x38   : > { %307 = vst [vmem:[%s2174_s27 + $0xe8] sm:$0xf] %v306_v58  ;;  %v308_v59 = vld [vmem:[%s2170_s26 + $0x49c] sm:$0xf]  ;;  %v310_v60 = vld [vmem:[%s2170_s26 + $0x4b0] sm:$0xf] }
  0x39   : > { %v312_v61 = vld [vmem:[%s2170_s26 + $0x4c4] sm:$0xf]  ;;  %309 = vst [vmem:[%s2174_s27 + $0xec] sm:$0xf] %v308_v59  ;;  %311 = vst [vmem:[%s2174_s27 + $0xf0] sm:$0xf] %v310_v60 }
  0x3a   : > { %313 = vst [vmem:[%s2174_s27 + $0xf4] sm:$0xf] %v312_v61  ;;  %v314_v62 = vld [vmem:[%s2170_s26 + $0x4d8] sm:$0xf]  ;;  %v316_v63 = vld [vmem:[%s2170_s26 + $0x4ec] sm:$0xf] }
  0x3b   : > { %315 = vst [vmem:[%s2174_s27 + $0xf8] sm:$0xf] %v314_v62  ;;  %317 = vst [vmem:[%s2174_s27 + $0xfc] sm:$0xf] %v316_v63 }
  0x3c PF: > { %p1798_p6 = scmp.ge.s32.totalorder %s2104_s16, 1  ;;  %p479_p7 = scmp.lt.s32.totalorder %s2104_s16, 6 }
  0x3e   : > { %p480_p8 = pnand %p1798_p6, %p479_p7 }
  0x3f   : > { %s486_s28 = sand.u32 (!%p480_p8), 1, %s2088_s12   ;;  %s1800_s29 = sshll.u32 (!%p480_p8), %s2096_s14, 4 }
  0x40   : > { %483 = sbr.rel (%p480_p8) target bundleno = 440 (0x1b8), region = 69  ;;  %s1799_s30 = sshll.u32 (!%p480_p8), %s486_s28, 8 }
  0x41   : > { %p525_p9 = scmp.lt.s32.totalorder (!%p480_p8), %s1800_s29, 79  ;;  %s2311_s8 = scalar_lea.vmem (!%p480_p8), [#allocation3], %s1799_s30 }
  0x42   : > { %p1802_p10 = scmp.ne.s32.totalorder (!%p480_p8), %s2096_s14, 0 }
  0x47   : > { %s2706_s29 = smov (!%p525_p9, %s1800_s29), 79  ;;  %549 = sbr.rel (%p1802_p10) target bundleno = 105 (0x69), region = 77 }
  0x48   : > { %s1801_s4 = sshll.u32 %s2706_s29, 2  ;;  %v2106_v0 = vmov (!%p1802_p10), 0.0  }
  0x49   : > { %s2309_s7 = scalar_lea.vmem %s2696_s1, %s1801_s4  ;;  %550 = vst [vmem:[#allocation2] sm:$0xff] (!%p1802_p10), %v2106_v0  ;;  %551 = vst [vmem:[#allocation2 + $0x8] sm:$0xff] (!%p1802_p10), %v2106_v0 }
  0x4a   : > { %552 = vst [vmem:[#allocation2 + $0x10] sm:$0xff] (!%p1802_p10), %v2106_v0  ;;  %553 = vst [vmem:[#allocation2 + $0x18] sm:$0xff] (!%p1802_p10), %v2106_v0 }
  0x4b   : > { %554 = vst [vmem:[#allocation2 + $0x20] sm:$0xff] (!%p1802_p10), %v2106_v0  ;;  %555 = vst [vmem:[#allocation2 + $0x28] sm:$0xff] (!%p1802_p10), %v2106_v0 }
  0x4c   : > { %556 = vst [vmem:[#allocation2 + $0x30] sm:$0xff] (!%p1802_p10), %v2106_v0  ;;  %557 = vst [vmem:[#allocation2 + $0x38] sm:$0xff] (!%p1802_p10), %v2106_v0 }
  0x4d   : > { %558 = vst [vmem:[#allocation2 + $0x40] sm:$0xff] (!%p1802_p10), %v2106_v0  ;;  %559 = vst [vmem:[#allocation2 + $0x48] sm:$0xff] (!%p1802_p10), %v2106_v0 }
  0x4e   : > { %560 = vst [vmem:[#allocation2 + $0x50] sm:$0xff] %v2106_v0  ;;  %561 = vst [vmem:[#allocation2 + $0x58] sm:$0xff] %v2106_v0 }
  0x4f   : > { %562 = vst [vmem:[#allocation2 + $0x60] sm:$0xff] %v2106_v0  ;;  %563 = vst [vmem:[#allocation2 + $0x68] sm:$0xff] %v2106_v0 }
  0x50   : > { %564 = vst [vmem:[#allocation2 + $0x70] sm:$0xff] %v2106_v0  ;;  %565 = vst [vmem:[#allocation2 + $0x78] sm:$0xff] %v2106_v0 }
  0x51   : > { %566 = vst [vmem:[#allocation2 + $0x80] sm:$0xff] %v2106_v0  ;;  %567 = vst [vmem:[#allocation2 + $0x88] sm:$0xff] %v2106_v0 }
  0x52   : > { %568 = vst [vmem:[#allocation2 + $0x90] sm:$0xff] %v2106_v0  ;;  %569 = vst [vmem:[#allocation2 + $0x98] sm:$0xff] %v2106_v0 }
  0x53   : > { %570 = vst [vmem:[#allocation2 + $0xa0] sm:$0xff] %v2106_v0  ;;  %571 = vst [vmem:[#allocation2 + $0xa8] sm:$0xff] %v2106_v0 }
  0x54   : > { %572 = vst [vmem:[#allocation2 + $0xb0] sm:$0xff] %v2106_v0  ;;  %573 = vst [vmem:[#allocation2 + $0xb8] sm:$0xff] %v2106_v0 }
  0x55   : > { %574 = vst [vmem:[#allocation2 + $0xc0] sm:$0xff] %v2106_v0  ;;  %575 = vst [vmem:[#allocation2 + $0xc8] sm:$0xff] %v2106_v0 }
  0x56   : > { %576 = vst [vmem:[#allocation2 + $0xd0] sm:$0xff] %v2106_v0  ;;  %577 = vst [vmem:[#allocation2 + $0xd8] sm:$0xff] %v2106_v0 }
  0x57   : > { %578 = vst [vmem:[#allocation2 + $0xe0] sm:$0xff] %v2106_v0  ;;  %579 = vst [vmem:[#allocation2 + $0xe8] sm:$0xff] %v2106_v0 }
  0x58   : > { %580 = vst [vmem:[#allocation2 + $0xf0] sm:$0xff] %v2106_v0  ;;  %581 = vst [vmem:[#allocation2 + $0xf8] sm:$0xff] %v2106_v0 }
  0x59   : > { %582 = vst [vmem:[#allocation2 + $0x100] sm:$0xff] %v2106_v0  ;;  %583 = vst [vmem:[#allocation2 + $0x108] sm:$0xff] %v2106_v0 }
  0x5a   : > { %584 = vst [vmem:[#allocation2 + $0x110] sm:$0xff] %v2106_v0  ;;  %585 = vst [vmem:[#allocation2 + $0x118] sm:$0xff] %v2106_v0 }
  0x5b   : > { %586 = vst [vmem:[#allocation2 + $0x120] sm:$0xff] %v2106_v0  ;;  %587 = vst [vmem:[#allocation2 + $0x128] sm:$0xff] %v2106_v0 }
  0x5c   : > { %588 = vst [vmem:[#allocation2 + $0x130] sm:$0xff] %v2106_v0  ;;  %589 = vst [vmem:[#allocation2 + $0x138] sm:$0xff] %v2106_v0 }
  0x5d   : > { %590 = vst [vmem:[#allocation2 + $0x140] sm:$0xff] %v2106_v0  ;;  %591 = vst [vmem:[#allocation2 + $0x148] sm:$0xff] %v2106_v0 }
  0x5e   : > { %592 = vst [vmem:[#allocation2 + $0x150] sm:$0xff] %v2106_v0  ;;  %593 = vst [vmem:[#allocation2 + $0x158] sm:$0xff] %v2106_v0 }
  0x5f   : > { %594 = vst [vmem:[#allocation2 + $0x160] sm:$0xff] %v2106_v0  ;;  %595 = vst [vmem:[#allocation2 + $0x168] sm:$0xff] %v2106_v0 }
  0x60   : > { %596 = vst [vmem:[#allocation2 + $0x170] sm:$0xff] %v2106_v0  ;;  %597 = vst [vmem:[#allocation2 + $0x178] sm:$0xff] %v2106_v0 }
  0x61   : > { %598 = vst [vmem:[#allocation2 + $0x180] sm:$0xff] %v2106_v0  ;;  %599 = vst [vmem:[#allocation2 + $0x188] sm:$0xff] %v2106_v0 }
  0x62   : > { %600 = vst [vmem:[#allocation2 + $0x190] sm:$0xff] %v2106_v0  ;;  %601 = vst [vmem:[#allocation2 + $0x198] sm:$0xff] %v2106_v0 }
  0x63   : > { %602 = vst [vmem:[#allocation2 + $0x1a0] sm:$0xff] %v2106_v0  ;;  %603 = vst [vmem:[#allocation2 + $0x1a8] sm:$0xff] %v2106_v0 }
  0x64   : > { %604 = vst [vmem:[#allocation2 + $0x1b0] sm:$0xff] %v2106_v0  ;;  %605 = vst [vmem:[#allocation2 + $0x1b8] sm:$0xff] %v2106_v0 }
  0x65   : > { %606 = vst [vmem:[#allocation2 + $0x1c0] sm:$0xff] %v2106_v0  ;;  %607 = vst [vmem:[#allocation2 + $0x1c8] sm:$0xff] %v2106_v0 }
  0x66   : > { %608 = vst [vmem:[#allocation2 + $0x1d0] sm:$0xff] %v2106_v0  ;;  %609 = vst [vmem:[#allocation2 + $0x1d8] sm:$0xff] %v2106_v0 }
  0x67   : > { %610 = vst [vmem:[#allocation2 + $0x1e0] sm:$0xff] %v2106_v0  ;;  %611 = vst [vmem:[#allocation2 + $0x1e8] sm:$0xff] %v2106_v0 }
  0x68   : > { %612 = vst [vmem:[#allocation2 + $0x1f0] sm:$0xff] %v2106_v0  ;;  %613 = vst [vmem:[#allocation2 + $0x1f8] sm:$0xff] %v2106_v0 }
  0x69 PF: > { %v2026_v1 = vld [vmem:[%s2309_s7] sm:$0xff]   ;;  %v2027_v2 = vld [vmem:[%s2309_s7 + $0x8] sm:$0xff]   ;;  %v2028_v3 = vld [vmem:[%s2309_s7 + $0x10] sm:$0xff]   ;;  %p1843_p11 = scmp.ne.s32.totalorder %s2096_s14, 4 }
  0x6a   : > { %1889 = vmatprep.subr.bf16.mxu0 %v2026_v1  ;;  %1969 = vmatprep.subr.bf16.mxu1 %v2026_v1  ;;  %v2029_v4 = vld [vmem:[%s2309_s7 + $0x18] sm:$0xff]   ;;  %v2034_v5 = vld [vmem:[%s2311_s8] sm:$0xff]   ;;  %v2031_v8 = vld [vmem:[%s2309_s7 + $0x28] sm:$0xff]  }
  0x6b   : > { %1890 = vmatpush3.bf16.msra.mxu0 %v2026_v1  ;;  %1977 = vmatpush3.bf16.msra.mxu1 %v2026_v1  ;;  %v2035_v6 = vld [vmem:[%s2311_s8 + $0x80] sm:$0xff]   ;;  %v2032_v9 = vld [vmem:[%s2309_s7 + $0x30] sm:$0xff]   ;;  %v2033_v10 = vld [vmem:[%s2309_s7 + $0x38] sm:$0xff]  }
  0x6c   : > { %1891 = vmatprep.subr.bf16.mxu0 %v2027_v2  ;;  %1970 = vmatprep.subr.bf16.mxu1 %v2027_v2  ;;  %v2030_v7 = vld [vmem:[%s2309_s7 + $0x20] sm:$0xff]   ;;  %v2036_v11 = vld [vmem:[%s2311_s8 + $0x8] sm:$0xff]   ;;  %v2038_v13 = vld [vmem:[%s2311_s8 + $0x10] sm:$0xff]  }
  0x6d   : > { %1905 = vmatprep.mubr.bf16.mxu0 %v2034_v5  ;;  %1937 = vmatprep.mubr.bf16.mxu1 %v2035_v6  ;;  %v2037_v12 = vld [vmem:[%s2311_s8 + $0x88] sm:$0xff]   ;;  %v2039_v14 = vld [vmem:[%s2311_s8 + $0x90] sm:$0xff]   ;;  %v2040_v15 = vld [vmem:[%s2311_s8 + $0x18] sm:$0xff]  }
  0x6e   : > { %v2041_v16 = vld [vmem:[%s2311_s8 + $0x98] sm:$0xff]   ;;  %v2042_v17 = vld [vmem:[%s2311_s8 + $0x20] sm:$0xff]   ;;  %v2044_v19 = vld [vmem:[%s2311_s8 + $0x28] sm:$0xff]  }
  0x6f   : > { %1892 = vmatpush3.bf16.msra.mxu0 %v2027_v2  ;;  %1978 = vmatpush3.bf16.msra.mxu1 %v2027_v2  ;;  %v2043_v18 = vld [vmem:[%s2311_s8 + $0xa0] sm:$0xff]   ;;  %v2045_v20 = vld [vmem:[%s2311_s8 + $0xa8] sm:$0xff]   ;;  %v2046_v21 = vld [vmem:[%s2311_s8 + $0x30] sm:$0xff]  }
  0x70   : > { %1893 = vmatprep.subr.bf16.mxu0 %v2028_v3  ;;  %1971 = vmatprep.subr.bf16.mxu1 %v2028_v3  ;;  %v2047_v22 = vld [vmem:[%s2311_s8 + $0xb0] sm:$0xff]   ;;  %v2048_v23 = vld [vmem:[%s2311_s8 + $0x38] sm:$0xff]   ;;  %v2050_v25 = vld [vmem:[%s2311_s8 + $0x40] sm:$0xff]  }
  0x71   : > { %v2049_v24 = vld [vmem:[%s2311_s8 + $0xb8] sm:$0xff]   ;;  %v2051_v26 = vld [vmem:[%s2311_s8 + $0xc0] sm:$0xff]   ;;  %v2052_v27 = vld [vmem:[%s2311_s8 + $0x48] sm:$0xff]  }
  0x72   : > { %v2053_v28 = vld [vmem:[%s2311_s8 + $0xc8] sm:$0xff]   ;;  %v2054_v29 = vld [vmem:[%s2311_s8 + $0x50] sm:$0xff]   ;;  %v2056_v31 = vld [vmem:[%s2311_s8 + $0x58] sm:$0xff]  }
  0x73   : > { %1894 = vmatpush3.bf16.msra.mxu0 %v2028_v3  ;;  %1979 = vmatpush3.bf16.msra.mxu1 %v2028_v3  ;;  %v2055_v30 = vld [vmem:[%s2311_s8 + $0xd0] sm:$0xff]   ;;  %v2057_v32 = vld [vmem:[%s2311_s8 + $0xd8] sm:$0xff]   ;;  %v2058_v33 = vld [vmem:[%s2311_s8 + $0x60] sm:$0xff]  }
  0x74   : > { %1895 = vmatprep.subr.bf16.mxu0 %v2029_v4  ;;  %1972 = vmatprep.subr.bf16.mxu1 %v2029_v4  ;;  %v2059_v34 = vld [vmem:[%s2311_s8 + $0xe0] sm:$0xff]   ;;  %v2060_v35 = vld [vmem:[%s2311_s8 + $0x68] sm:$0xff]   ;;  %v2062_v37 = vld [vmem:[%s2311_s8 + $0x70] sm:$0xff]  }
  0x75   : > { %v2061_v36 = vld [vmem:[%s2311_s8 + $0xe8] sm:$0xff]   ;;  %v2063_v38 = vld [vmem:[%s2311_s8 + $0xf0] sm:$0xff]   ;;  %v2064_v39 = vld [vmem:[%s2311_s8 + $0x78] sm:$0xff]  }
  0x76   : > { %v2065_v40 = vld [vmem:[%s2311_s8 + $0xf8] sm:$0xff]   ;;  %v616_v41 = vld [vmem:[#allocation2 + $0x10] sm:$0xff]  ;;  %v614_v43 = vld [vmem:[#allocation2] sm:$0xff] }
  0x77   : > { %1896 = vmatpush3.bf16.msra.mxu0 %v2029_v4  ;;  %1980 = vmatpush3.bf16.msra.mxu1 %v2029_v4  ;;  %v648_v42 = vld [vmem:[#allocation2 + $0x110] sm:$0xff]  ;;  %v646_v44 = vld [vmem:[#allocation2 + $0x100] sm:$0xff]  ;;  %v617_v47 = vld [vmem:[#allocation2 + $0x18] sm:$0xff] }
  0x78   : > { %1897 = vmatprep.subr.bf16.mxu0 %v2030_v7  ;;  %1973 = vmatprep.subr.bf16.mxu1 %v2030_v7  ;;  %v649_v48 = vld [vmem:[#allocation2 + $0x118] sm:$0xff]  ;;  %v615_v53 = vld [vmem:[#allocation2 + $0x8] sm:$0xff]  ;;  %v620_v1 = vld [vmem:[#allocation2 + $0x30] sm:$0xff] }
  0x79   : > { %v647_v54 = vld [vmem:[#allocation2 + $0x108] sm:$0xff]  ;;  %v652_v2 = vld [vmem:[#allocation2 + $0x130] sm:$0xff]  ;;  %v618_v3 = vld [vmem:[#allocation2 + $0x20] sm:$0xff] }
  0x7a   : > { %v650_v4 = vld [vmem:[#allocation2 + $0x120] sm:$0xff] }
  0x7b   : > { %1898 = vmatpush3.bf16.msra.mxu0 %v2030_v7  ;;  %1981 = vmatpush3.bf16.msra.mxu1 %v2030_v7  ;;  %v621_v7 = vld [vmem:[#allocation2 + $0x38] sm:$0xff] }
  0x7c   : > { %1899 = vmatprep.subr.bf16.mxu0 %v2031_v8  ;;  %1974 = vmatprep.subr.bf16.mxu1 %v2031_v8 }
  0x7f   : > { %1900 = vmatpush3.bf16.msra.mxu0 %v2031_v8  ;;  %1982 = vmatpush3.bf16.msra.mxu1 %v2031_v8  ;;  %v653_v8 = vld [vmem:[#allocation2 + $0x138] sm:$0xff] }
  0x80   : > { %1901 = vmatprep.subr.bf16.mxu0 %v2032_v9  ;;  %1975 = vmatprep.subr.bf16.mxu1 %v2032_v9 }
  0x83   : > { %1902 = vmatpush3.bf16.msra.mxu0 %v2032_v9  ;;  %1983 = vmatpush3.bf16.msra.mxu1 %v2032_v9 }
  0x84   : > { %1903 = vmatprep.subr.bf16.mxu0 %v2033_v10  ;;  %1976 = vmatprep.subr.bf16.mxu1 %v2033_v10 }
  0x87   : > { %1904 = vmatpush3.bf16.msra.mxu0 %v2033_v10  ;;  %1984 = vmatpush3.bf16.msra.mxu1 %v2033_v10 }
  0x8a   : > { %1906 = vmatmul.mubr.bf16.vlgmr.msra.gmra.mrb[0].mxu0 %v2036_v11  ;;  %1938 = vmatmul.mubr.bf16.vlgmr.msra.gmra.mrb[0].mxu1 %v2037_v12 }
  0x8b   : > { %1909 = vmatprep.mubr.bf16.mxu0 %v2038_v13  ;;  %1941 = vmatprep.mubr.bf16.mxu1 %v2039_v14  ;;  %v619_v13 = vld [vmem:[#allocation2 + $0x28] sm:$0xff] }
  0x8c   : > { %v651_v14 = vld [vmem:[#allocation2 + $0x128] sm:$0xff] }
  0x92   : > { %1910 = vmatmul.mubr.bf16.gmra.mrb[4].mxu0 %v2040_v15  ;;  %1942 = vmatmul.mubr.bf16.gmra.mrb[4].mxu1 %v2041_v16 }
  0x93   : > { %1913 = vmatprep.mubr.bf16.mxu0 %v2042_v17  ;;  %1945 = vmatprep.mubr.bf16.mxu1 %v2043_v18 }
  0x9a   : > { %1914 = vmatmul.mubr.bf16.gmra.mrb[8].mxu0 %v2044_v19  ;;  %1946 = vmatmul.mubr.bf16.gmra.mrb[8].mxu1 %v2045_v20 }
  0x9b   : > { %1917 = vmatprep.mubr.bf16.mxu0 %v2046_v21  ;;  %1949 = vmatprep.mubr.bf16.mxu1 %v2047_v22 }
  0xa2   : > { %1918 = vmatmul.mubr.bf16.gmra.mrb[12].mxu0 %v2048_v23  ;;  %1950 = vmatmul.mubr.bf16.gmra.mrb[12].mxu1 %v2049_v24 }
  0xa3   : > { %1921 = vmatprep.mubr.bf16.mxu0 %v2050_v25  ;;  %1953 = vmatprep.mubr.bf16.mxu1 %v2051_v26  ;;  %v624_v25 = vld [vmem:[#allocation2 + $0x50] sm:$0xff] }
  0xa4   : > { %v656_v26 = vld [vmem:[#allocation2 + $0x150] sm:$0xff] }
  0xaa   : > { %1922 = vmatmul.mubr.bf16.gmra.mrb[16].mxu0 %v2052_v27  ;;  %1954 = vmatmul.mubr.bf16.gmra.mrb[16].mxu1 %v2053_v28  ;;  %v622_v27 = vld [vmem:[#allocation2 + $0x40] sm:$0xff] }
  0xab   : > { %1925 = vmatprep.mubr.bf16.mxu0 %v2054_v29  ;;  %1957 = vmatprep.mubr.bf16.mxu1 %v2055_v30  ;;  %v654_v28 = vld [vmem:[#allocation2 + $0x140] sm:$0xff] }
  0xb2   : > { %1926 = vmatmul.mubr.bf16.gmra.mrb[20].mxu0 %v2056_v31  ;;  %1958 = vmatmul.mubr.bf16.gmra.mrb[20].mxu1 %v2057_v32  ;;  %v625_v31 = vld [vmem:[#allocation2 + $0x58] sm:$0xff] }
  0xb3   : > { %1929 = vmatprep.mubr.bf16.mxu0 %v2058_v33  ;;  %1961 = vmatprep.mubr.bf16.mxu1 %v2059_v34  ;;  %v657_v32 = vld [vmem:[#allocation2 + $0x158] sm:$0xff] }
  0xba   : > { %1930 = vmatmul.mubr.bf16.gmra.mrb[24].mxu0 %v2060_v35  ;;  %1962 = vmatmul.mubr.bf16.gmra.mrb[24].mxu1 %v2061_v36 }
  0xbb   : > { %1933 = vmatprep.mubr.bf16.mxu0 %v2062_v37  ;;  %1965 = vmatprep.mubr.bf16.mxu1 %v2063_v38  ;;  %v623_v37 = vld [vmem:[#allocation2 + $0x48] sm:$0xff] }
  0xbc   : > { %v655_v38 = vld [vmem:[#allocation2 + $0x148] sm:$0xff] }
  0xc2   : > { %1934 = vmatmul.mubr.bf16.gmra.mrb[28].mxu0 %v2064_v39  ;;  %1966 = vmatmul.mubr.bf16.gmra.mrb[28].mxu1 %v2065_v40 }
 0x15d   : > { %v1907_v45 = vpop.f32.mrb[0].mxu0  ;;  %v1939_v46 = vpop.f32.mrb[0].mxu1 }
 0x15e   : > { %v1289_v49 = vadd.f32 %v1907_v45, %v616_v41  ;;  %v1321_v50 = vadd.f32 %v1939_v46, %v648_v42  ;;  %v1032_v51 = vpop.f32.mrb[1].mxu0  ;;  %v1160_v52 = vpop.f32.mrb[1].mxu1 }
 0x15f   : > { %v1287_v55 = vadd.f32 %v1032_v51, %v614_v43  ;;  %v1319_v56 = vadd.f32 %v1160_v52, %v646_v44  ;;  %v1908_v57 = vpop.f32.mrb[2].mxu0  ;;  %v1940_v58 = vpop.f32.mrb[2].mxu1  ;;  %v626_v51 = vld [vmem:[#allocation2 + $0x60] sm:$0xff] }
 0x160   : > { %1353 = vst [vmem:[#allocation2 + $0x10] sm:$0xff] %v1289_v49  ;;  %1385 = vst [vmem:[#allocation2 + $0x110] sm:$0xff] %v1321_v50  ;;  %v1290_v59 = vadd.f32 %v1908_v57, %v617_v47  ;;  %v1322_v60 = vadd.f32 %v1940_v58, %v649_v48  ;;  %v1035_v61 = vpop.f32.mrb[3].mxu0  ;;  %v1163_v62 = vpop.f32.mrb[3].mxu1  ;;  %v628_v49 = vld [vmem:[#allocation2 + $0x70] sm:$0xff]  ;;  %v658_v52 = vld [vmem:[#allocation2 + $0x160] sm:$0xff] }
 0x161   : > { %1351 = vst [vmem:[#allocation2] sm:$0xff] %v1287_v55  ;;  %1383 = vst [vmem:[#allocation2 + $0x100] sm:$0xff] %v1319_v56  ;;  %v1288_v63 = vadd.f32 %v1035_v61, %v615_v53  ;;  %v1320_v0 = vadd.f32 %v1163_v62, %v647_v54  ;;  %v660_v50 = vld [vmem:[#allocation2 + $0x170] sm:$0xff]  ;;  %v629_v55 = vld [vmem:[#allocation2 + $0x78] sm:$0xff] }
 0x162   : > { %1354 = vst [vmem:[#allocation2 + $0x18] sm:$0xff] %v1290_v59  ;;  %1386 = vst [vmem:[#allocation2 + $0x118] sm:$0xff] %v1322_v60  ;;  %v661_v56 = vld [vmem:[#allocation2 + $0x178] sm:$0xff]  ;;  %v627_v61 = vld [vmem:[#allocation2 + $0x68] sm:$0xff] }
 0x163   : > { %1352 = vst [vmem:[#allocation2 + $0x8] sm:$0xff] %v1288_v63  ;;  %1384 = vst [vmem:[#allocation2 + $0x108] sm:$0xff] %v1320_v0  ;;  %v659_v62 = vld [vmem:[#allocation2 + $0x168] sm:$0xff] }
 0x165   : > { %v1911_v5 = vpop.f32.mrb[4].mxu0  ;;  %v1943_v6 = vpop.f32.mrb[4].mxu1 }
 0x166   : > { %v1293_v9 = vadd.f32 %v1911_v5, %v620_v1  ;;  %v1325_v10 = vadd.f32 %v1943_v6, %v652_v2  ;;  %v1048_v11 = vpop.f32.mrb[5].mxu0  ;;  %v1176_v12 = vpop.f32.mrb[5].mxu1 }
 0x167   : > { %v1291_v15 = vadd.f32 %v1048_v11, %v618_v3  ;;  %v1323_v16 = vadd.f32 %v1176_v12, %v650_v4  ;;  %v1912_v17 = vpop.f32.mrb[6].mxu0  ;;  %v1944_v18 = vpop.f32.mrb[6].mxu1  ;;  %v630_v11 = vld [vmem:[#allocation2 + $0x80] sm:$0xff] }
 0x168   : > { %1357 = vst [vmem:[#allocation2 + $0x30] sm:$0xff] %v1293_v9  ;;  %1389 = vst [vmem:[#allocation2 + $0x130] sm:$0xff] %v1325_v10  ;;  %v1294_v19 = vadd.f32 %v1912_v17, %v621_v7  ;;  %v1326_v20 = vadd.f32 %v1944_v18, %v653_v8  ;;  %v1051_v21 = vpop.f32.mrb[7].mxu0  ;;  %v1179_v22 = vpop.f32.mrb[7].mxu1  ;;  %v632_v9 = vld [vmem:[#allocation2 + $0x90] sm:$0xff]  ;;  %v662_v12 = vld [vmem:[#allocation2 + $0x180] sm:$0xff] }
 0x169   : > { %1355 = vst [vmem:[#allocation2 + $0x20] sm:$0xff] %v1291_v15  ;;  %1387 = vst [vmem:[#allocation2 + $0x120] sm:$0xff] %v1323_v16  ;;  %v1292_v23 = vadd.f32 %v1051_v21, %v619_v13  ;;  %v1324_v24 = vadd.f32 %v1179_v22, %v651_v14  ;;  %v664_v10 = vld [vmem:[#allocation2 + $0x190] sm:$0xff]  ;;  %v633_v15 = vld [vmem:[#allocation2 + $0x98] sm:$0xff] }
 0x16a   : > { %1358 = vst [vmem:[#allocation2 + $0x38] sm:$0xff] %v1294_v19  ;;  %1390 = vst [vmem:[#allocation2 + $0x138] sm:$0xff] %v1326_v20  ;;  %v665_v16 = vld [vmem:[#allocation2 + $0x198] sm:$0xff]  ;;  %v631_v21 = vld [vmem:[#allocation2 + $0x88] sm:$0xff] }
 0x16b   : > { %1356 = vst [vmem:[#allocation2 + $0x28] sm:$0xff] %v1292_v23  ;;  %1388 = vst [vmem:[#allocation2 + $0x128] sm:$0xff] %v1324_v24  ;;  %v663_v22 = vld [vmem:[#allocation2 + $0x188] sm:$0xff] }
 0x16d   : > { %v1915_v29 = vpop.f32.mrb[8].mxu0  ;;  %v1947_v30 = vpop.f32.mrb[8].mxu1 }
 0x16e   : > { %v1297_v33 = vadd.f32 %v1915_v29, %v624_v25  ;;  %v1329_v34 = vadd.f32 %v1947_v30, %v656_v26  ;;  %v1064_v35 = vpop.f32.mrb[9].mxu0  ;;  %v1192_v36 = vpop.f32.mrb[9].mxu1 }
 0x16f   : > { %v1295_v39 = vadd.f32 %v1064_v35, %v622_v27  ;;  %v1327_v40 = vadd.f32 %v1192_v36, %v654_v28  ;;  %v1916_v41 = vpop.f32.mrb[10].mxu0  ;;  %v1948_v42 = vpop.f32.mrb[10].mxu1  ;;  %v634_v35 = vld [vmem:[#allocation2 + $0xa0] sm:$0xff] }
 0x170   : > { %1361 = vst [vmem:[#allocation2 + $0x50] sm:$0xff] %v1297_v33  ;;  %1393 = vst [vmem:[#allocation2 + $0x150] sm:$0xff] %v1329_v34  ;;  %v1298_v43 = vadd.f32 %v1916_v41, %v625_v31  ;;  %v1330_v44 = vadd.f32 %v1948_v42, %v657_v32  ;;  %v1067_v45 = vpop.f32.mrb[11].mxu0  ;;  %v1195_v46 = vpop.f32.mrb[11].mxu1  ;;  %v636_v33 = vld [vmem:[#allocation2 + $0xb0] sm:$0xff]  ;;  %v666_v36 = vld [vmem:[#allocation2 + $0x1a0] sm:$0xff] }
 0x171   : > { %1359 = vst [vmem:[#allocation2 + $0x40] sm:$0xff] %v1295_v39  ;;  %1391 = vst [vmem:[#allocation2 + $0x140] sm:$0xff] %v1327_v40  ;;  %v1296_v47 = vadd.f32 %v1067_v45, %v623_v37  ;;  %v1328_v48 = vadd.f32 %v1195_v46, %v655_v38  ;;  %v668_v34 = vld [vmem:[#allocation2 + $0x1b0] sm:$0xff]  ;;  %v637_v39 = vld [vmem:[#allocation2 + $0xb8] sm:$0xff] }
 0x172   : > { %1362 = vst [vmem:[#allocation2 + $0x58] sm:$0xff] %v1298_v43  ;;  %1394 = vst [vmem:[#allocation2 + $0x158] sm:$0xff] %v1330_v44  ;;  %v669_v40 = vld [vmem:[#allocation2 + $0x1b8] sm:$0xff]  ;;  %v635_v45 = vld [vmem:[#allocation2 + $0xa8] sm:$0xff] }
 0x173   : > { %1360 = vst [vmem:[#allocation2 + $0x48] sm:$0xff] %v1296_v47  ;;  %1392 = vst [vmem:[#allocation2 + $0x148] sm:$0xff] %v1328_v48  ;;  %v667_v46 = vld [vmem:[#allocation2 + $0x1a8] sm:$0xff] }
 0x175   : > { %v1919_v53 = vpop.f32.mrb[12].mxu0  ;;  %v1951_v54 = vpop.f32.mrb[12].mxu1 }
 0x176   : > { %v1301_v57 = vadd.f32 %v1919_v53, %v628_v49  ;;  %v1333_v58 = vadd.f32 %v1951_v54, %v660_v50  ;;  %v1080_v59 = vpop.f32.mrb[13].mxu0  ;;  %v1208_v60 = vpop.f32.mrb[13].mxu1 }
 0x177   : > { %v1299_v63 = vadd.f32 %v1080_v59, %v626_v51  ;;  %v1331_v0 = vadd.f32 %v1208_v60, %v658_v52  ;;  %v1920_v1 = vpop.f32.mrb[14].mxu0  ;;  %v1952_v2 = vpop.f32.mrb[14].mxu1  ;;  %v638_v59 = vld [vmem:[#allocation2 + $0xc0] sm:$0xff] }
 0x178   : > { %1365 = vst [vmem:[#allocation2 + $0x70] sm:$0xff] %v1301_v57  ;;  %1397 = vst [vmem:[#allocation2 + $0x170] sm:$0xff] %v1333_v58  ;;  %v1302_v3 = vadd.f32 %v1920_v1, %v629_v55  ;;  %v1334_v4 = vadd.f32 %v1952_v2, %v661_v56  ;;  %v1083_v5 = vpop.f32.mrb[15].mxu0  ;;  %v1211_v6 = vpop.f32.mrb[15].mxu1  ;;  %v640_v57 = vld [vmem:[#allocation2 + $0xd0] sm:$0xff]  ;;  %v670_v60 = vld [vmem:[#allocation2 + $0x1c0] sm:$0xff] }
 0x179   : > { %1363 = vst [vmem:[#allocation2 + $0x60] sm:$0xff] %v1299_v63  ;;  %1395 = vst [vmem:[#allocation2 + $0x160] sm:$0xff] %v1331_v0  ;;  %v1300_v7 = vadd.f32 %v1083_v5, %v627_v61  ;;  %v1332_v8 = vadd.f32 %v1211_v6, %v659_v62  ;;  %v672_v58 = vld [vmem:[#allocation2 + $0x1d0] sm:$0xff]  ;;  %v641_v63 = vld [vmem:[#allocation2 + $0xd8] sm:$0xff] }
 0x17a   : > { %1366 = vst [vmem:[#allocation2 + $0x78] sm:$0xff] %v1302_v3  ;;  %1398 = vst [vmem:[#allocation2 + $0x178] sm:$0xff] %v1334_v4  ;;  %v673_v0 = vld [vmem:[#allocation2 + $0x1d8] sm:$0xff]  ;;  %v639_v5 = vld [vmem:[#allocation2 + $0xc8] sm:$0xff] }
 0x17b   : > { %1364 = vst [vmem:[#allocation2 + $0x68] sm:$0xff] %v1300_v7  ;;  %1396 = vst [vmem:[#allocation2 + $0x168] sm:$0xff] %v1332_v8  ;;  %v671_v6 = vld [vmem:[#allocation2 + $0x1c8] sm:$0xff] }
 0x17d   : > { %v1923_v13 = vpop.f32.mrb[16].mxu0  ;;  %v1955_v14 = vpop.f32.mrb[16].mxu1 }
 0x17e   : > { %v1305_v17 = vadd.f32 %v1923_v13, %v632_v9  ;;  %v1337_v18 = vadd.f32 %v1955_v14, %v664_v10  ;;  %v1096_v19 = vpop.f32.mrb[17].mxu0  ;;  %v1224_v20 = vpop.f32.mrb[17].mxu1 }
 0x17f   : > { %v1303_v23 = vadd.f32 %v1096_v19, %v630_v11  ;;  %v1335_v24 = vadd.f32 %v1224_v20, %v662_v12  ;;  %v1924_v25 = vpop.f32.mrb[18].mxu0  ;;  %v1956_v26 = vpop.f32.mrb[18].mxu1  ;;  %v642_v19 = vld [vmem:[#allocation2 + $0xe0] sm:$0xff] }
 0x180   : > { %1369 = vst [vmem:[#allocation2 + $0x90] sm:$0xff] %v1305_v17  ;;  %1401 = vst [vmem:[#allocation2 + $0x190] sm:$0xff] %v1337_v18  ;;  %v1306_v27 = vadd.f32 %v1924_v25, %v633_v15  ;;  %v1338_v28 = vadd.f32 %v1956_v26, %v665_v16  ;;  %v1099_v29 = vpop.f32.mrb[19].mxu0  ;;  %v1227_v30 = vpop.f32.mrb[19].mxu1  ;;  %v644_v17 = vld [vmem:[#allocation2 + $0xf0] sm:$0xff]  ;;  %v674_v20 = vld [vmem:[#allocation2 + $0x1e0] sm:$0xff] }
 0x181   : > { %1367 = vst [vmem:[#allocation2 + $0x80] sm:$0xff] %v1303_v23  ;;  %1399 = vst [vmem:[#allocation2 + $0x180] sm:$0xff] %v1335_v24  ;;  %v1304_v31 = vadd.f32 %v1099_v29, %v631_v21  ;;  %v1336_v32 = vadd.f32 %v1227_v30, %v663_v22  ;;  %v676_v18 = vld [vmem:[#allocation2 + $0x1f0] sm:$0xff]  ;;  %v645_v23 = vld [vmem:[#allocation2 + $0xf8] sm:$0xff] }
 0x182   : > { %1370 = vst [vmem:[#allocation2 + $0x98] sm:$0xff] %v1306_v27  ;;  %1402 = vst [vmem:[#allocation2 + $0x198] sm:$0xff] %v1338_v28  ;;  %v677_v24 = vld [vmem:[#allocation2 + $0x1f8] sm:$0xff]  ;;  %v643_v29 = vld [vmem:[#allocation2 + $0xe8] sm:$0xff] }
 0x183   : > { %1368 = vst [vmem:[#allocation2 + $0x88] sm:$0xff] %v1304_v31  ;;  %1400 = vst [vmem:[#allocation2 + $0x188] sm:$0xff] %v1336_v32  ;;  %v675_v30 = vld [vmem:[#allocation2 + $0x1e8] sm:$0xff] }
 0x185   : > { %v1927_v37 = vpop.f32.mrb[20].mxu0  ;;  %v1959_v38 = vpop.f32.mrb[20].mxu1 }
 0x186   : > { %v1309_v41 = vadd.f32 %v1927_v37, %v636_v33  ;;  %v1341_v42 = vadd.f32 %v1959_v38, %v668_v34  ;;  %v1112_v43 = vpop.f32.mrb[21].mxu0  ;;  %v1240_v44 = vpop.f32.mrb[21].mxu1 }
 0x187   : > { %v1307_v47 = vadd.f32 %v1112_v43, %v634_v35  ;;  %v1339_v48 = vadd.f32 %v1240_v44, %v666_v36  ;;  %v1928_v49 = vpop.f32.mrb[22].mxu0  ;;  %v1960_v50 = vpop.f32.mrb[22].mxu1  ;;  %v1420_v43 = vld [vmem:[#allocation2 + $0x8] sm:$0xff] (!%p1843_p11) }
 0x188   : > { %1373 = vst [vmem:[#allocation2 + $0xb0] sm:$0xff] %v1309_v41  ;;  %1405 = vst [vmem:[#allocation2 + $0x1b0] sm:$0xff] %v1341_v42  ;;  %v1310_v51 = vadd.f32 %v1928_v49, %v637_v39  ;;  %v1342_v52 = vadd.f32 %v1960_v50, %v669_v40  ;;  %v1115_v53 = vpop.f32.mrb[23].mxu0  ;;  %v1243_v54 = vpop.f32.mrb[23].mxu1  ;;  %v1419_v41 = vld [vmem:[#allocation2] sm:$0xff] (!%p1843_p11) }
 0x189   : > { %1371 = vst [vmem:[#allocation2 + $0xa0] sm:$0xff] %v1307_v47  ;;  %1403 = vst [vmem:[#allocation2 + $0x1a0] sm:$0xff] %v1339_v48  ;;  %v1308_v55 = vadd.f32 %v1115_v53, %v635_v45  ;;  %v1340_v56 = vadd.f32 %v1243_v54, %v667_v46  ;;  %v2422_v42 = vld [vmem:[%s2697_s2] ss:$0 sm:$0xff] (!%p1843_p11)  ;;  %v1421_v46 = vld [vmem:[#allocation2 + $0x10] sm:$0xff] (!%p1843_p11) }
 0x18a   : > { %1374 = vst [vmem:[#allocation2 + $0xb8] sm:$0xff] %v1310_v51  ;;  %1406 = vst [vmem:[#allocation2 + $0x1b8] sm:$0xff] %v1342_v52  ;;  %v1490_v44 = vadd.f32 (!%p1843_p11), %v2422_v42, %v1419_v41  ;;  %v1491_v45 = vadd.f32 (!%p1843_p11), %v2422_v42, %v1420_v43  ;;  %v1422_v47 = vld [vmem:[#allocation2 + $0x18] sm:$0xff] (!%p1843_p11)  ;;  %v1423_v48 = vld [vmem:[#allocation2 + $0x20] sm:$0xff] (!%p1843_p11)  ;;  %v1492_v49 = vadd.f32 (!%p1843_p11), %v2422_v42, %v1421_v46 }
 0x18b   : > { %1372 = vst [vmem:[#allocation2 + $0xa8] sm:$0xff] %v1308_v55  ;;  %1404 = vst [vmem:[#allocation2 + $0x1a8] sm:$0xff] %v1340_v56  ;;  %v1493_v50 = vadd.f32 (!%p1843_p11), %v2422_v42, %v1422_v47  ;;  %v1494_v51 = vadd.f32 (!%p1843_p11), %v2422_v42, %v1423_v48  ;;  %v1424_v52 = vld [vmem:[#allocation2 + $0x28] sm:$0xff] (!%p1843_p11)  ;;  %v1425_v53 = vld [vmem:[#allocation2 + $0x30] sm:$0xff] (!%p1843_p11) }
 0x18c   : > { %v1426_v54 = vld [vmem:[#allocation2 + $0x38] sm:$0xff] (!%p1843_p11)  ;;  %v1554_v55 = vmax.f32 (!%p1843_p11), %v1490_v44, 0.0  ;;  %v1555_v56 = vmax.f32 (!%p1843_p11), %v1491_v45, 0.0 }
 0x18d   : > { %v1931_v61 = vpop.f32.mrb[24].mxu0  ;;  %v1963_v62 = vpop.f32.mrb[24].mxu1 }
 0x18e   : > { %v1313_v1 = vadd.f32 %v1931_v61, %v640_v57  ;;  %v1345_v2 = vadd.f32 %v1963_v62, %v672_v58  ;;  %v1128_v3 = vpop.f32.mrb[25].mxu0  ;;  %v1256_v4 = vpop.f32.mrb[25].mxu1  ;;  %v1495_v57 = vadd.f32 (!%p1843_p11), %v2422_v42, %v1424_v52  ;;  %v1496_v58 = vadd.f32 (!%p1843_p11), %v2422_v42, %v1425_v53  ;;  %v1429_v61 = vld [vmem:[#allocation2 + $0x50] sm:$0xff] (!%p1843_p11)  ;;  %1618 = vst [vmem:[%s2698_s3] sm:$0xff] (!%p1843_p11), %v1554_v55 }
 0x18f   : > { %v1311_v7 = vadd.f32 %v1128_v3, %v638_v59  ;;  %v1343_v8 = vadd.f32 %v1256_v4, %v670_v60  ;;  %v1932_v9 = vpop.f32.mrb[26].mxu0  ;;  %v1964_v10 = vpop.f32.mrb[26].mxu1  ;;  %v1427_v59 = vld [vmem:[#allocation2 + $0x40] sm:$0xff] (!%p1843_p11)  ;;  %v1428_v60 = vld [vmem:[#allocation2 + $0x48] sm:$0xff] (!%p1843_p11)  ;;  %v1556_v62 = vmax.f32 (!%p1843_p11), %v1492_v49, 0.0  ;;  %1619 = vst [vmem:[%s2698_s3 + $0x8] sm:$0xff] (!%p1843_p11), %v1555_v56 }
 0x190   : > { %1377 = vst [vmem:[#allocation2 + $0xd0] sm:$0xff] %v1313_v1  ;;  %1409 = vst [vmem:[#allocation2 + $0x1d0] sm:$0xff] %v1345_v2  ;;  %v1314_v11 = vadd.f32 %v1932_v9, %v641_v63  ;;  %v1346_v12 = vadd.f32 %v1964_v10, %v673_v0  ;;  %v1131_v13 = vpop.f32.mrb[27].mxu0  ;;  %v1259_v14 = vpop.f32.mrb[27].mxu1  ;;  %v1557_v63 = vmax.f32 (!%p1843_p11), %v1493_v50, 0.0  ;;  %v1558_v0 = vmax.f32 (!%p1843_p11), %v1494_v51, 0.0 }
 0x191   : > { %1375 = vst [vmem:[#allocation2 + $0xc0] sm:$0xff] %v1311_v7  ;;  %1407 = vst [vmem:[#allocation2 + $0x1c0] sm:$0xff] %v1343_v8  ;;  %v1312_v15 = vadd.f32 %v1131_v13, %v639_v5  ;;  %v1344_v16 = vadd.f32 %v1259_v14, %v671_v6  ;;  %v1497_v1 = vadd.f32 (!%p1843_p11), %v2422_v42, %v1426_v54  ;;  %v1430_v2 = vld [vmem:[#allocation2 + $0x58] sm:$0xff] (!%p1843_p11)  ;;  %v1431_v3 = vld [vmem:[#allocation2 + $0x60] sm:$0xff] (!%p1843_p11)  ;;  %v1559_v5 = vmax.f32 (!%p1843_p11), %v1495_v57, 0.0 }
 0x192   : > { %1378 = vst [vmem:[#allocation2 + $0xd8] sm:$0xff] %v1314_v11  ;;  %1410 = vst [vmem:[#allocation2 + $0x1d8] sm:$0xff] %v1346_v12  ;;  %v1432_v4 = vld [vmem:[#allocation2 + $0x68] sm:$0xff] (!%p1843_p11)  ;;  %v1560_v6 = vmax.f32 (!%p1843_p11), %v1496_v58, 0.0  ;;  %v1498_v7 = vadd.f32 (!%p1843_p11), %v2422_v42, %v1427_v59  ;;  %v1499_v8 = vadd.f32 (!%p1843_p11), %v2422_v42, %v1428_v60  ;;  %v1433_v9 = vld [vmem:[#allocation2 + $0x70] sm:$0xff] (!%p1843_p11)  ;;  %v1500_v12 = vadd.f32 (!%p1843_p11), %v2422_v42, %v1429_v61 }
 0x193   : > { %1376 = vst [vmem:[#allocation2 + $0xc8] sm:$0xff] %v1312_v15  ;;  %1408 = vst [vmem:[#allocation2 + $0x1c8] sm:$0xff] %v1344_v16  ;;  %v1434_v10 = vld [vmem:[#allocation2 + $0x78] sm:$0xff] (!%p1843_p11)  ;;  %v1561_v11 = vmax.f32 (!%p1843_p11), %v1497_v1, 0.0  ;;  %v1501_v13 = vadd.f32 (!%p1843_p11), %v2422_v42, %v1430_v2  ;;  %v1502_v14 = vadd.f32 (!%p1843_p11), %v2422_v42, %v1431_v3  ;;  %v1435_v15 = vld [vmem:[#allocation2 + $0x80] sm:$0xff] (!%p1843_p11) }
 0x194   : > { %1620 = vst [vmem:[%s2698_s3 + $0x10] sm:$0xff] (!%p1843_p11), %v1556_v62  ;;  %1621 = vst [vmem:[%s2698_s3 + $0x18] sm:$0xff] (!%p1843_p11), %v1557_v63  ;;  %v1436_v16 = vld [vmem:[#allocation2 + $0x88] sm:$0xff] (!%p1843_p11) }
 0x195   : > { %v1935_v21 = vpop.f32.mrb[28].mxu0  ;;  %v1967_v22 = vpop.f32.mrb[28].mxu1  ;;  %1418 = sbr.rel (%p1843_p11) target bundleno = 440 (0x1b8), region = 81  ;;  %1622 = vst [vmem:[%s2698_s3 + $0x20] sm:$0xff] (!%p1843_p11), %v1558_v0  ;;  %1623 = vst [vmem:[%s2698_s3 + $0x28] sm:$0xff] (!%p1843_p11), %v1559_v5  ;;  %v1451_v0 = vld [vmem:[#allocation2 + $0x100] sm:$0xff] (!%p1843_p11) }
 0x196   : > { %v1317_v25 = vadd.f32 %v1935_v21, %v644_v17  ;;  %v1349_v26 = vadd.f32 %v1967_v22, %v676_v18  ;;  %v1144_v27 = vpop.f32.mrb[29].mxu0  ;;  %v1272_v28 = vpop.f32.mrb[29].mxu1  ;;  %1624 = vst [vmem:[%s2698_s3 + $0x30] sm:$0xff] (!%p1843_p11), %v1560_v6  ;;  %v1562_v17 = vmax.f32 (!%p1843_p11), %v1498_v7, 0.0  ;;  %v1563_v18 = vmax.f32 (!%p1843_p11), %v1499_v8, 0.0  ;;  %v1437_v21 = vld [vmem:[#allocation2 + $0x90] sm:$0xff] (!%p1843_p11) }
 0x197   : > { %v1315_v31 = vadd.f32 %v1144_v27, %v642_v19  ;;  %v1347_v32 = vadd.f32 %v1272_v28, %v674_v20  ;;  %v1936_v33 = vpop.f32.mrb[30].mxu0  ;;  %v1968_v34 = vpop.f32.mrb[30].mxu1  ;;  %v1503_v19 = vadd.f32 (!%p1843_p11), %v2422_v42, %v1432_v4  ;;  %v1504_v20 = vadd.f32 (!%p1843_p11), %v2422_v42, %v1433_v9  ;;  %v1438_v22 = vld [vmem:[#allocation2 + $0x98] sm:$0xff] (!%p1843_p11)  ;;  %1625 = vst [vmem:[%s2698_s3 + $0x38] sm:$0xff] (!%p1843_p11), %v1561_v11  ;;  %v1440_v28 = vld [vmem:[#allocation2 + $0xa8] sm:$0xff] (!%p1843_p11)  ;;  %v1445_v46 = vld [vmem:[#allocation2 + $0xd0] sm:$0xff] (!%p1843_p11) }
 0x198   : > { %1381 = vst [vmem:[#allocation2 + $0xf0] sm:$0xff] %v1317_v25  ;;  %1413 = vst [vmem:[#allocation2 + $0x1f0] sm:$0xff] %v1349_v26  ;;  %v1318_v35 = vadd.f32 %v1936_v33, %v645_v23  ;;  %v1350_v36 = vadd.f32 %v1968_v34, %v677_v24  ;;  %v1147_v37 = vpop.f32.mrb[31].mxu0  ;;  %v1275_v38 = vpop.f32.mrb[31].mxu1  ;;  %v1439_v23 = vld [vmem:[#allocation2 + $0xa0] sm:$0xff] (!%p1843_p11)  ;;  %v1564_v24 = vmax.f32 (!%p1843_p11), %v1500_v12, 0.0  ;;  %v1505_v27 = vadd.f32 (!%p1843_p11), %v2422_v42, %v1434_v10 }
 0x199   : > { %1379 = vst [vmem:[#allocation2 + $0xe0] sm:$0xff] %v1315_v31  ;;  %1411 = vst [vmem:[#allocation2 + $0x1e0] sm:$0xff] %v1347_v32  ;;  %v1316_v39 = vadd.f32 %v1147_v37, %v643_v29  ;;  %v1348_v40 = vadd.f32 %v1275_v38, %v675_v30  ;;  %v1565_v25 = vmax.f32 (!%p1843_p11), %v1501_v13, 0.0  ;;  %v1566_v26 = vmax.f32 (!%p1843_p11), %v1502_v14, 0.0  ;;  %v1441_v29 = vld [vmem:[#allocation2 + $0xb0] sm:$0xff] (!%p1843_p11)  ;;  %v1442_v34 = vld [vmem:[#allocation2 + $0xb8] sm:$0xff] (!%p1843_p11) }
 0x19a   : > { %1382 = vst [vmem:[#allocation2 + $0xf8] sm:$0xff] %v1318_v35  ;;  %1414 = vst [vmem:[#allocation2 + $0x1f8] sm:$0xff] %v1350_v36  ;;  %v1567_v30 = vmax.f32 (!%p1843_p11), %v1503_v19, 0.0  ;;  %v1568_v31 = vmax.f32 (!%p1843_p11), %v1504_v20, 0.0  ;;  %v1506_v32 = vadd.f32 (!%p1843_p11), %v2422_v42, %v1435_v15  ;;  %v1507_v33 = vadd.f32 (!%p1843_p11), %v2422_v42, %v1436_v16  ;;  %v1446_v47 = vld [vmem:[#allocation2 + $0xd8] sm:$0xff] (!%p1843_p11)  ;;  %v1452_v1 = vld [vmem:[#allocation2 + $0x108] sm:$0xff] (!%p1843_p11) }
 0x19b   : > { %1380 = vst [vmem:[#allocation2 + $0xe8] sm:$0xff] %v1316_v39  ;;  %1412 = vst [vmem:[#allocation2 + $0x1e8] sm:$0xff] %v1348_v40  ;;  %v1569_v35 = vmax.f32 (!%p1843_p11), %v1505_v27, 0.0  ;;  %v1508_v36 = vadd.f32 (!%p1843_p11), %v2422_v42, %v1437_v21  ;;  %v1509_v37 = vadd.f32 (!%p1843_p11), %v2422_v42, %v1438_v22  ;;  %v1510_v38 = vadd.f32 (!%p1843_p11), %v2422_v42, %v1439_v23  ;;  %v1443_v39 = vld [vmem:[#allocation2 + $0xc0] sm:$0xff] (!%p1843_p11)  ;;  %v1444_v40 = vld [vmem:[#allocation2 + $0xc8] sm:$0xff] (!%p1843_p11) }
 0x19c   : > { %1626 = vst [vmem:[%s2698_s3 + $0x40] sm:$0xff] %v1562_v17  ;;  %1627 = vst [vmem:[%s2698_s3 + $0x48] sm:$0xff] %v1563_v18  ;;  %v1570_v41 = vmax.f32 %v1506_v32, 0.0  ;;  %v1571_v43 = vmax.f32 %v1507_v33, 0.0  ;;  %v1511_v44 = vadd.f32 %v2422_v42, %v1440_v28  ;;  %v1512_v45 = vadd.f32 %v2422_v42, %v1441_v29  ;;  %v1453_v6 = vld [vmem:[#allocation2 + $0x110] sm:$0xff]  ;;  %v1454_v7 = vld [vmem:[#allocation2 + $0x118] sm:$0xff] }
 0x19d   : > { %1628 = vst [vmem:[%s2698_s3 + $0x50] sm:$0xff] %v1564_v24  ;;  %1629 = vst [vmem:[%s2698_s3 + $0x58] sm:$0xff] %v1565_v25  ;;  %v1572_v49 = vmax.f32 %v1508_v36, 0.0  ;;  %v1573_v50 = vmax.f32 %v1509_v37, 0.0  ;;  %v1574_v51 = vmax.f32 %v1510_v38, 0.0  ;;  %v1513_v52 = vadd.f32 %v2422_v42, %v1442_v34  ;;  %v1455_v8 = vld [vmem:[#allocation2 + $0x120] sm:$0xff] }
 0x19e   : > { %1630 = vst [vmem:[%s2698_s3 + $0x60] sm:$0xff] %v1566_v26  ;;  %1631 = vst [vmem:[%s2698_s3 + $0x68] sm:$0xff] %v1567_v30  ;;  %v1575_v55 = vmax.f32 %v1511_v44, 0.0  ;;  %v1576_v56 = vmax.f32 %v1512_v45, 0.0  ;;  %v1514_v57 = vadd.f32 %v2422_v42, %v1443_v39  ;;  %v1515_v58 = vadd.f32 %v2422_v42, %v1444_v40  ;;  %v1456_v13 = vld [vmem:[#allocation2 + $0x128] sm:$0xff]  ;;  %v1457_v14 = vld [vmem:[#allocation2 + $0x130] sm:$0xff] }
 0x19f   : > { %1632 = vst [vmem:[%s2698_s3 + $0x70] sm:$0xff] %v1568_v31  ;;  %1633 = vst [vmem:[%s2698_s3 + $0x78] sm:$0xff] %v1569_v35  ;;  %v1449_v54 = vld [vmem:[#allocation2 + $0xf0] sm:$0xff]  ;;  %v1577_v60 = vmax.f32 %v1513_v52, 0.0  ;;  %v1516_v61 = vadd.f32 %v2422_v42, %v1445_v46  ;;  %v1517_v62 = vadd.f32 %v2422_v42, %v1446_v47  ;;  %v1522_v17 = vadd.f32 %v2422_v42, %v1451_v0  ;;  %v1458_v19 = vld [vmem:[#allocation2 + $0x138] sm:$0xff] }
 0x1a0   : > { %v1447_v48 = vld [vmem:[#allocation2 + $0xe0] sm:$0xff]  ;;  %1634 = vst [vmem:[%s2698_s3 + $0x80] sm:$0xff] %v1570_v41  ;;  %1635 = vst [vmem:[%s2698_s3 + $0x88] sm:$0xff] %v1571_v43  ;;  %v1578_v2 = vmax.f32 %v1514_v57, 0.0  ;;  %v1579_v3 = vmax.f32 %v1515_v58, 0.0  ;;  %v1520_v5 = vadd.f32 %v2422_v42, %v1449_v54  ;;  %v1523_v18 = vadd.f32 %v2422_v42, %v1452_v1  ;;  %v1460_v25 = vld [vmem:[#allocation2 + $0x148] sm:$0xff] }
 0x1a1   : > { %v1450_v59 = vld [vmem:[#allocation2 + $0xf8] sm:$0xff]  ;;  %1636 = vst [vmem:[%s2698_s3 + $0x90] sm:$0xff] %v1572_v49  ;;  %1637 = vst [vmem:[%s2698_s3 + $0x98] sm:$0xff] %v1573_v50  ;;  %v1518_v63 = vadd.f32 %v2422_v42, %v1447_v48  ;;  %v1580_v9 = vmax.f32 %v1516_v61, 0.0  ;;  %v1581_v10 = vmax.f32 %v1517_v62, 0.0  ;;  %v1524_v21 = vadd.f32 %v2422_v42, %v1453_v6  ;;  %v1459_v24 = vld [vmem:[#allocation2 + $0x140] sm:$0xff] }
 0x1a2   : > { %v1448_v53 = vld [vmem:[#allocation2 + $0xe8] sm:$0xff]  ;;  %1638 = vst [vmem:[%s2698_s3 + $0xa0] sm:$0xff] %v1574_v51  ;;  %1639 = vst [vmem:[%s2698_s3 + $0xa8] sm:$0xff] %v1575_v55  ;;  %v1521_v12 = vadd.f32 %v2422_v42, %v1450_v59  ;;  %v1584_v16 = vmax.f32 %v1520_v5, 0.0  ;;  %v1525_v22 = vadd.f32 %v2422_v42, %v1454_v7  ;;  %v1526_v23 = vadd.f32 %v2422_v42, %v1455_v8  ;;  %v1461_v30 = vld [vmem:[#allocation2 + $0x150] sm:$0xff] }
 0x1a3   : > { %1640 = vst [vmem:[%s2698_s3 + $0xb0] sm:$0xff] %v1576_v56  ;;  %v1519_v4 = vadd.f32 %v2422_v42, %v1448_v53  ;;  %1641 = vst [vmem:[%s2698_s3 + $0xb8] sm:$0xff] %v1577_v60  ;;  %v1582_v11 = vmax.f32 %v1518_v63, 0.0  ;;  %v1586_v26 = vmax.f32 %v1522_v17, 0.0  ;;  %v1587_v27 = vmax.f32 %v1523_v18, 0.0  ;;  %v1462_v31 = vld [vmem:[#allocation2 + $0x158] sm:$0xff] }
 0x1a4   : > { %1642 = vst [vmem:[%s2698_s3 + $0xc0] sm:$0xff] %v1578_v2  ;;  %1643 = vst [vmem:[%s2698_s3 + $0xc8] sm:$0xff] %v1579_v3  ;;  %v1585_v20 = vmax.f32 %v1521_v12, 0.0  ;;  %v1527_v28 = vadd.f32 %v2422_v42, %v1456_v13  ;;  %v1528_v29 = vadd.f32 %v2422_v42, %v1457_v14  ;;  %v1463_v32 = vld [vmem:[#allocation2 + $0x160] sm:$0xff]  ;;  %v1588_v33 = vmax.f32 %v1524_v21, 0.0  ;;  %v1464_v37 = vld [vmem:[#allocation2 + $0x168] sm:$0xff] }
 0x1a5   : > { %v1583_v15 = vmax.f32 %v1519_v4, 0.0  ;;  %1644 = vst [vmem:[%s2698_s3 + $0xd0] sm:$0xff] %v1580_v9  ;;  %1645 = vst [vmem:[%s2698_s3 + $0xd8] sm:$0xff] %v1581_v10  ;;  %v1589_v34 = vmax.f32 %v1525_v22, 0.0  ;;  %v1590_v35 = vmax.f32 %v1526_v23, 0.0  ;;  %v1529_v36 = vadd.f32 %v2422_v42, %v1458_v19  ;;  %v1465_v38 = vld [vmem:[#allocation2 + $0x170] sm:$0xff] }
 0x1a6   : > { %1646 = vst [vmem:[%s2698_s3 + $0xe0] sm:$0xff] %v1582_v11  ;;  %1648 = vst [vmem:[%s2698_s3 + $0xf0] sm:$0xff] %v1584_v16  ;;  %v1591_v39 = vmax.f32 %v1527_v28, 0.0  ;;  %v1592_v40 = vmax.f32 %v1528_v29, 0.0  ;;  %v1530_v41 = vadd.f32 %v2422_v42, %v1459_v24  ;;  %v1531_v43 = vadd.f32 %v2422_v42, %v1460_v25  ;;  %v1466_v44 = vld [vmem:[#allocation2 + $0x178] sm:$0xff]  ;;  %v1467_v49 = vld [vmem:[#allocation2 + $0x180] sm:$0xff] }
 0x1a7   : > { %1647 = vst [vmem:[%s2698_s3 + $0xe8] sm:$0xff] %v1583_v15  ;;  %1649 = vst [vmem:[%s2698_s3 + $0xf8] sm:$0xff] %v1585_v20  ;;  %v1593_v45 = vmax.f32 %v1529_v36, 0.0  ;;  %v1532_v46 = vadd.f32 %v2422_v42, %v1461_v30  ;;  %v1533_v47 = vadd.f32 %v2422_v42, %v1462_v31  ;;  %v1534_v48 = vadd.f32 %v2422_v42, %v1463_v32  ;;  %v1468_v50 = vld [vmem:[#allocation2 + $0x188] sm:$0xff]  ;;  %v1469_v55 = vld [vmem:[#allocation2 + $0x190] sm:$0xff] }
 0x1a8   : > { %1650 = vst [vmem:[%s2698_s3 + $0x100] sm:$0xff] %v1586_v26  ;;  %1651 = vst [vmem:[%s2698_s3 + $0x108] sm:$0xff] %v1587_v27  ;;  %v1594_v51 = vmax.f32 %v1530_v41, 0.0  ;;  %v1595_v52 = vmax.f32 %v1531_v43, 0.0  ;;  %v1535_v53 = vadd.f32 %v2422_v42, %v1464_v37  ;;  %v1536_v54 = vadd.f32 %v2422_v42, %v1465_v38  ;;  %v1470_v56 = vld [vmem:[#allocation2 + $0x198] sm:$0xff]  ;;  %v1471_v57 = vld [vmem:[#allocation2 + $0x1a0] sm:$0xff] }
 0x1a9   : > { %1652 = vst [vmem:[%s2698_s3 + $0x110] sm:$0xff] %v1588_v33  ;;  %1653 = vst [vmem:[%s2698_s3 + $0x118] sm:$0xff] %v1589_v34  ;;  %v1596_v58 = vmax.f32 %v1532_v46, 0.0  ;;  %v1597_v59 = vmax.f32 %v1533_v47, 0.0  ;;  %v1598_v60 = vmax.f32 %v1534_v48, 0.0  ;;  %v1537_v61 = vadd.f32 %v2422_v42, %v1466_v44  ;;  %v1472_v62 = vld [vmem:[#allocation2 + $0x1a8] sm:$0xff] }
 0x1aa   : > { %1654 = vst [vmem:[%s2698_s3 + $0x120] sm:$0xff] %v1590_v35  ;;  %1655 = vst [vmem:[%s2698_s3 + $0x128] sm:$0xff] %v1591_v39  ;;  %v1473_v63 = vld [vmem:[#allocation2 + $0x1b0] sm:$0xff]  ;;  %v1599_v0 = vmax.f32 %v1535_v53, 0.0  ;;  %v1600_v1 = vmax.f32 %v1536_v54, 0.0  ;;  %v1538_v2 = vadd.f32 %v2422_v42, %v1467_v49  ;;  %v1539_v3 = vadd.f32 %v2422_v42, %v1468_v50  ;;  %v1474_v4 = vld [vmem:[#allocation2 + $0x1b8] sm:$0xff] }
 0x1ab   : > { %1656 = vst [vmem:[%s2698_s3 + $0x130] sm:$0xff] %v1592_v40  ;;  %1657 = vst [vmem:[%s2698_s3 + $0x138] sm:$0xff] %v1593_v45  ;;  %v1601_v5 = vmax.f32 %v1537_v61, 0.0  ;;  %v1540_v6 = vadd.f32 %v2422_v42, %v1469_v55  ;;  %v1541_v7 = vadd.f32 %v2422_v42, %v1470_v56  ;;  %v1542_v8 = vadd.f32 %v2422_v42, %v1471_v57  ;;  %v1475_v9 = vld [vmem:[#allocation2 + $0x1c0] sm:$0xff]  ;;  %v1476_v10 = vld [vmem:[#allocation2 + $0x1c8] sm:$0xff] }
 0x1ac   : > { %1658 = vst [vmem:[%s2698_s3 + $0x140] sm:$0xff] %v1594_v51  ;;  %1659 = vst [vmem:[%s2698_s3 + $0x148] sm:$0xff] %v1595_v52  ;;  %v1602_v11 = vmax.f32 %v1538_v2, 0.0  ;;  %v1603_v12 = vmax.f32 %v1539_v3, 0.0  ;;  %v1543_v13 = vadd.f32 %v2422_v42, %v1472_v62  ;;  %v1544_v14 = vadd.f32 %v2422_v42, %v1473_v63  ;;  %v1477_v15 = vld [vmem:[#allocation2 + $0x1d0] sm:$0xff]  ;;  %v1478_v16 = vld [vmem:[#allocation2 + $0x1d8] sm:$0xff] }
 0x1ad   : > { %1660 = vst [vmem:[%s2698_s3 + $0x150] sm:$0xff] %v1596_v58  ;;  %1661 = vst [vmem:[%s2698_s3 + $0x158] sm:$0xff] %v1597_v59  ;;  %v1479_v17 = vld [vmem:[#allocation2 + $0x1e0] sm:$0xff]  ;;  %v1604_v18 = vmax.f32 %v1540_v6, 0.0  ;;  %v1605_v19 = vmax.f32 %v1541_v7, 0.0  ;;  %v1606_v20 = vmax.f32 %v1542_v8, 0.0  ;;  %v1545_v21 = vadd.f32 %v2422_v42, %v1474_v4 }
 0x1ae   : > { %1662 = vst [vmem:[%s2698_s3 + $0x160] sm:$0xff] %v1598_v60  ;;  %1663 = vst [vmem:[%s2698_s3 + $0x168] sm:$0xff] %v1599_v0  ;;  %v1480_v22 = vld [vmem:[#allocation2 + $0x1e8] sm:$0xff]  ;;  %v1481_v23 = vld [vmem:[#allocation2 + $0x1f0] sm:$0xff]  ;;  %v1607_v24 = vmax.f32 %v1543_v13, 0.0  ;;  %v1608_v25 = vmax.f32 %v1544_v14, 0.0  ;;  %v1546_v26 = vadd.f32 %v2422_v42, %v1475_v9  ;;  %v1547_v27 = vadd.f32 %v2422_v42, %v1476_v10 }
 0x1af   : > { %1664 = vst [vmem:[%s2698_s3 + $0x170] sm:$0xff] %v1600_v1  ;;  %1665 = vst [vmem:[%s2698_s3 + $0x178] sm:$0xff] %v1601_v5  ;;  %v1482_v28 = vld [vmem:[#allocation2 + $0x1f8] sm:$0xff]  ;;  %v1609_v29 = vmax.f32 %v1545_v21, 0.0  ;;  %v1548_v30 = vadd.f32 %v2422_v42, %v1477_v15  ;;  %v1549_v31 = vadd.f32 %v2422_v42, %v1478_v16  ;;  %v1550_v32 = vadd.f32 %v2422_v42, %v1479_v17 }
 0x1b0   : > { %1666 = vst [vmem:[%s2698_s3 + $0x180] sm:$0xff] %v1602_v11  ;;  %1667 = vst [vmem:[%s2698_s3 + $0x188] sm:$0xff] %v1603_v12  ;;  %v1610_v33 = vmax.f32 %v1546_v26, 0.0  ;;  %v1611_v34 = vmax.f32 %v1547_v27, 0.0  ;;  %v1551_v35 = vadd.f32 %v2422_v42, %v1480_v22  ;;  %v1552_v36 = vadd.f32 %v2422_v42, %v1481_v23 }
 0x1b1   : > { %1668 = vst [vmem:[%s2698_s3 + $0x190] sm:$0xff] %v1604_v18  ;;  %1669 = vst [vmem:[%s2698_s3 + $0x198] sm:$0xff] %v1605_v19  ;;  %v1612_v37 = vmax.f32 %v1548_v30, 0.0  ;;  %v1613_v38 = vmax.f32 %v1549_v31, 0.0  ;;  %v1614_v39 = vmax.f32 %v1550_v32, 0.0  ;;  %v1553_v40 = vadd.f32 %v2422_v42, %v1482_v28 }
 0x1b2   : > { %1670 = vst [vmem:[%s2698_s3 + $0x1a0] sm:$0xff] %v1606_v20  ;;  %1671 = vst [vmem:[%s2698_s3 + $0x1a8] sm:$0xff] %v1607_v24  ;;  %v1615_v41 = vmax.f32 %v1551_v35, 0.0  ;;  %v1616_v43 = vmax.f32 %v1552_v36, 0.0 }
 0x1b3   : > { %1672 = vst [vmem:[%s2698_s3 + $0x1b0] sm:$0xff] %v1608_v25  ;;  %1673 = vst [vmem:[%s2698_s3 + $0x1b8] sm:$0xff] %v1609_v29  ;;  %v1617_v42 = vmax.f32 %v1553_v40, 0.0 }
 0x1b4   : > { %1674 = vst [vmem:[%s2698_s3 + $0x1c0] sm:$0xff] %v1610_v33  ;;  %1675 = vst [vmem:[%s2698_s3 + $0x1c8] sm:$0xff] %v1611_v34 }
 0x1b5   : > { %1676 = vst [vmem:[%s2698_s3 + $0x1d0] sm:$0xff] %v1612_v37  ;;  %1677 = vst [vmem:[%s2698_s3 + $0x1d8] sm:$0xff] %v1613_v38 }
 0x1b6   : > { %1678 = vst [vmem:[%s2698_s3 + $0x1e0] sm:$0xff] %v1614_v39  ;;  %1679 = vst [vmem:[%s2698_s3 + $0x1e8] sm:$0xff] %v1615_v41 }
 0x1b7   : > { %1680 = vst [vmem:[%s2698_s3 + $0x1f0] sm:$0xff] %v1616_v43  ;;  %1681 = vst [vmem:[%s2698_s3 + $0x1f8] sm:$0xff] %v1617_v42 }
 0x1b8 PF: > { %s13_s16 = sadd.s32 1, %s2104_s16   ;;  %s2699_s12 = smov %s2092_s13 }
 0x1b9   : > { %p10_p12 = scmp.ge.s32.totalorder %s13_s16, 7   ;;  %s2700_s13 = smov %s2162_s20 }
 0x1ba   : > { %s2701_s14 = smov %s2100_s15  ;;  %s2702_s15 = smov %s2704_s17 }
 0x1bb   :  { %12 = sbr.rel (!%p10_p12) target bundleno = 3 (0x3), region = 122 }

// kernel: feature_extractor_forward.28
= control target key start
LH: loop header
LB: loop body
LE: loop exit
PB: predicated region body
PF: predicated region fallthrough
CT: control target
= control target key end

     0   :  { %vm72_vm0 = vcmask 523264   ;;  %s535_s0 = inlined_call_operand.vmem [shape: f32[4,128,64], index: 0, kind: input, shape index: {}]   ;;  %s536_s1 = inlined_call_operand.vmem [shape: f32[128,64], index: 1, kind: output, shape index: {}]  }
   0x1   :  { %v8_v0 = vld [vmem:[%s535_s0] sm:$0xff]  ;;  %v9_v7 = vld [vmem:[%s535_s0 + $0x8] sm:$0xff]  ;;  %v10_v15 = vld [vmem:[%s535_s0 + $0x10] sm:$0xff] }
   0x2   :  { %v24_v1 = vld [vmem:[%s535_s0 + $0x80] sm:$0xff]  ;;  %v73_v4 = vsel %vm72_vm0, %v8_v0, -inf  ;;  %v25_v8 = vld [vmem:[%s535_s0 + $0x88] sm:$0xff]  ;;  %v80_v13 = vsel %vm72_vm0, %v9_v7, -inf  ;;  %v26_v19 = vld [vmem:[%s535_s0 + $0x90] sm:$0xff]  ;;  %v87_v22 = vsel %vm72_vm0, %v10_v15, -inf }
   0x3   :  { %v40_v2 = vld [vmem:[%s535_s0 + $0x100] sm:$0xff]  ;;  %v74_v5 = vsel %vm72_vm0, %v24_v1, -inf  ;;  %v41_v11 = vld [vmem:[%s535_s0 + $0x108] sm:$0xff]  ;;  %v81_v14 = vsel %vm72_vm0, %v25_v8, -inf  ;;  %v42_v20 = vld [vmem:[%s535_s0 + $0x110] sm:$0xff]  ;;  %v88_v24 = vsel %vm72_vm0, %v26_v19, -inf }
   0x4   :  { %v56_v3 = vld [vmem:[%s535_s0 + $0x180] sm:$0xff]  ;;  %v76_v6 = vsel %vm72_vm0, %v40_v2, -inf  ;;  %v75_v9 = vmax.f32 %v73_v4, %v74_v5  ;;  %v57_v12 = vld [vmem:[%s535_s0 + $0x188] sm:$0xff]  ;;  %v82_v16 = vmax.f32 %v80_v13, %v81_v14  ;;  %v83_v17 = vsel %vm72_vm0, %v41_v11, -inf  ;;  %v58_v21 = vld [vmem:[%s535_s0 + $0x190] sm:$0xff] }
   0x5   :  { %v78_v10 = vsel %vm72_vm0, %v56_v3, -inf  ;;  %v85_v18 = vsel %vm72_vm0, %v57_v12, -inf  ;;  %v90_v25 = vsel %vm72_vm0, %v42_v20, -inf  ;;  %v92_v26 = vsel %vm72_vm0, %v58_v21, -inf  ;;  %v11_v27 = vld [vmem:[%s535_s0 + $0x18] sm:$0xff]  ;;  %v12_v35 = vld [vmem:[%s535_s0 + $0x20] sm:$0xff] }
   0x6   :  { %v77_v23 = vmax.f32 %v75_v9, %v76_v6  ;;  %v27_v28 = vld [vmem:[%s535_s0 + $0x98] sm:$0xff]  ;;  %v84_v30 = vmax.f32 %v82_v16, %v83_v17  ;;  %v89_v31 = vmax.f32 %v87_v22, %v88_v24  ;;  %v94_v33 = vsel %vm72_vm0, %v11_v27, -inf  ;;  %v28_v36 = vld [vmem:[%s535_s0 + $0xa0] sm:$0xff]  ;;  %v13_v43 = vld [vmem:[%s535_s0 + $0x28] sm:$0xff] }
   0x7   :  { %v43_v29 = vld [vmem:[%s535_s0 + $0x118] sm:$0xff]  ;;  %v95_v34 = vsel %vm72_vm0, %v27_v28, -inf  ;;  %v44_v41 = vld [vmem:[%s535_s0 + $0x120] sm:$0xff]  ;;  %v101_v46 = vsel %vm72_vm0, %v12_v35, -inf  ;;  %v102_v47 = vsel %vm72_vm0, %v28_v36, -inf  ;;  %v29_v48 = vld [vmem:[%s535_s0 + $0xa8] sm:$0xff] }
   0x8   :  { %v59_v32 = vld [vmem:[%s535_s0 + $0x198] sm:$0xff]  ;;  %v79_v37 = vmax.f32 %v77_v23, %v78_v10  ;;  %v96_v38 = vmax.f32 %v94_v33, %v95_v34  ;;  %v97_v39 = vsel %vm72_vm0, %v43_v29, -inf  ;;  %v60_v42 = vld [vmem:[%s535_s0 + $0x1a0] sm:$0xff]  ;;  %v86_v44 = vmax.f32 %v84_v30, %v85_v18  ;;  %v45_v49 = vld [vmem:[%s535_s0 + $0x128] sm:$0xff] }
   0x9   :  { %v99_v40 = vsel %vm72_vm0, %v59_v32, -inf  ;;  %v91_v45 = vmax.f32 %v89_v31, %v90_v25  ;;  %v61_v50 = vld [vmem:[%s535_s0 + $0x1a8] sm:$0xff]  ;;  %v103_v52 = vmax.f32 %v101_v46, %v102_v47  ;;  %v104_v53 = vsel %vm72_vm0, %v44_v41, -inf  ;;  %v14_v55 = vld [vmem:[%s535_s0 + $0x30] sm:$0xff]  ;;  %v15_v63 = vld [vmem:[%s535_s0 + $0x38] sm:$0xff] }
   0xa   :  { %185 = vst.msk [vmem:[%s536_s1] sm:$0xff] %vm72_vm0, %v79_v37  ;;  %v98_v51 = vmax.f32 %v96_v38, %v97_v39  ;;  %v106_v54 = vsel %vm72_vm0, %v60_v42, -inf  ;;  %v30_v56 = vld [vmem:[%s535_s0 + $0xb0] sm:$0xff]  ;;  %186 = vst.msk [vmem:[%s536_s1 + $0x8] sm:$0xff] %vm72_vm0, %v86_v44  ;;  %v108_v59 = vsel %vm72_vm0, %v13_v43, -inf  ;;  %v109_v60 = vsel %vm72_vm0, %v29_v48, -inf }
   0xb   :  { %v46_v57 = vld [vmem:[%s535_s0 + $0x130] sm:$0xff]  ;;  %v93_v58 = vmax.f32 %v91_v45, %v92_v26  ;;  %v111_v61 = vsel %vm72_vm0, %v45_v49, -inf  ;;  %v31_v0 = vld [vmem:[%s535_s0 + $0xb8] sm:$0xff]  ;;  %v105_v2 = vmax.f32 %v103_v52, %v104_v53  ;;  %v110_v3 = vmax.f32 %v108_v59, %v109_v60  ;;  %v16_v7 = vld [vmem:[%s535_s0 + $0x40] sm:$0xff] }
   0xc   :  { %v62_v62 = vld [vmem:[%s535_s0 + $0x1b0] sm:$0xff]  ;;  %v100_v1 = vmax.f32 %v98_v51, %v99_v40  ;;  %v113_v4 = vsel %vm72_vm0, %v61_v50, -inf  ;;  %v47_v5 = vld [vmem:[%s535_s0 + $0x138] sm:$0xff]  ;;  %v115_v8 = vsel %vm72_vm0, %v14_v55, -inf  ;;  %v116_v9 = vsel %vm72_vm0, %v30_v56, -inf  ;;  %v32_v12 = vld [vmem:[%s535_s0 + $0xc0] sm:$0xff] }
   0xd   :  { %v63_v6 = vld [vmem:[%s535_s0 + $0x1b8] sm:$0xff]  ;;  %187 = vst.msk [vmem:[%s536_s1 + $0x10] sm:$0xff] %vm72_vm0, %v93_v58  ;;  %v118_v10 = vsel %vm72_vm0, %v46_v57, -inf  ;;  %v120_v11 = vsel %vm72_vm0, %v62_v62, -inf  ;;  %v107_v13 = vmax.f32 %v105_v2, %v106_v54  ;;  %v112_v14 = vmax.f32 %v110_v3, %v111_v61  ;;  %v48_v17 = vld [vmem:[%s535_s0 + $0x140] sm:$0xff]  ;;  %v17_v19 = vld [vmem:[%s535_s0 + $0x48] sm:$0xff] }
   0xe   :  { %188 = vst.msk [vmem:[%s536_s1 + $0x18] sm:$0xff] %vm72_vm0, %v100_v1  ;;  %v117_v15 = vmax.f32 %v115_v8, %v116_v9  ;;  %v122_v16 = vsel %vm72_vm0, %v15_v63, -inf  ;;  %v64_v18 = vld [vmem:[%s535_s0 + $0x1c0] sm:$0xff]  ;;  %v123_v20 = vsel %vm72_vm0, %v31_v0, -inf  ;;  %v125_v21 = vsel %vm72_vm0, %v47_v5, -inf  ;;  %v33_v24 = vld [vmem:[%s535_s0 + $0xc8] sm:$0xff] }
   0xf   :  { %v127_v22 = vsel %vm72_vm0, %v63_v6, -inf  ;;  %v129_v23 = vsel %vm72_vm0, %v16_v7, -inf  ;;  %v49_v25 = vld [vmem:[%s535_s0 + $0x148] sm:$0xff]  ;;  %189 = vst.msk [vmem:[%s536_s1 + $0x20] sm:$0xff] %vm72_vm0, %v107_v13  ;;  %v114_v26 = vmax.f32 %v112_v14, %v113_v4  ;;  %v124_v28 = vmax.f32 %v122_v16, %v123_v20  ;;  %v18_v31 = vld [vmem:[%s535_s0 + $0x50] sm:$0xff]  ;;  %v19_v43 = vld [vmem:[%s535_s0 + $0x58] sm:$0xff] }
  0x10   :  { %v119_v27 = vmax.f32 %v117_v15, %v118_v10  ;;  %v130_v29 = vsel %vm72_vm0, %v32_v12, -inf  ;;  %v65_v30 = vld [vmem:[%s535_s0 + $0x1c8] sm:$0xff]  ;;  %v132_v33 = vsel %vm72_vm0, %v48_v17, -inf  ;;  %v134_v34 = vsel %vm72_vm0, %v64_v18, -inf  ;;  %v34_v36 = vld [vmem:[%s535_s0 + $0xd0] sm:$0xff]  ;;  %v35_v44 = vld [vmem:[%s535_s0 + $0xd8] sm:$0xff] }
  0x11   :  { %v131_v32 = vmax.f32 %v129_v23, %v130_v29  ;;  %v136_v35 = vsel %vm72_vm0, %v17_v19, -inf  ;;  %v50_v37 = vld [vmem:[%s535_s0 + $0x150] sm:$0xff]  ;;  %190 = vst.msk [vmem:[%s536_s1 + $0x28] sm:$0xff] %vm72_vm0, %v114_v26  ;;  %v126_v40 = vmax.f32 %v124_v28, %v125_v21  ;;  %v137_v41 = vsel %vm72_vm0, %v33_v24, -inf  ;;  %v51_v49 = vld [vmem:[%s535_s0 + $0x158] sm:$0xff]  ;;  %v20_v51 = vld [vmem:[%s535_s0 + $0x60] sm:$0xff] }
  0x12   :  { %v66_v38 = vld [vmem:[%s535_s0 + $0x1d0] sm:$0xff]  ;;  %v121_v39 = vmax.f32 %v119_v27, %v120_v11  ;;  %v139_v42 = vsel %vm72_vm0, %v49_v25, -inf  ;;  %v138_v46 = vmax.f32 %v136_v35, %v137_v41  ;;  %v141_v47 = vsel %vm72_vm0, %v65_v30, -inf  ;;  %v67_v50 = vld [vmem:[%s535_s0 + $0x1d8] sm:$0xff]  ;;  %v36_v56 = vld [vmem:[%s535_s0 + $0xe0] sm:$0xff] }
  0x13   :  { %v133_v45 = vmax.f32 %v131_v32, %v132_v33  ;;  %v143_v48 = vsel %vm72_vm0, %v18_v31, -inf  ;;  %v128_v52 = vmax.f32 %v126_v40, %v127_v22  ;;  %v144_v53 = vsel %vm72_vm0, %v34_v36, -inf  ;;  %v52_v61 = vld [vmem:[%s535_s0 + $0x160] sm:$0xff]  ;;  %v21_v63 = vld [vmem:[%s535_s0 + $0x68] sm:$0xff]  ;;  %v22_v10 = vld [vmem:[%s535_s0 + $0x70] sm:$0xff] }
  0x14   :  { %191 = vst.msk [vmem:[%s536_s1 + $0x30] sm:$0xff] %vm72_vm0, %v121_v39  ;;  %v146_v54 = vsel %vm72_vm0, %v50_v37, -inf  ;;  %v148_v55 = vsel %vm72_vm0, %v66_v38, -inf  ;;  %v140_v58 = vmax.f32 %v138_v46, %v139_v42  ;;  %v145_v59 = vmax.f32 %v143_v48, %v144_v53  ;;  %v68_v62 = vld [vmem:[%s535_s0 + $0x1e0] sm:$0xff]  ;;  %v37_v4 = vld [vmem:[%s535_s0 + $0xe8] sm:$0xff]  ;;  %v38_v16 = vld [vmem:[%s535_s0 + $0xf0] sm:$0xff] }
  0x15   :  { %v135_v57 = vmax.f32 %v133_v45, %v134_v34  ;;  %v150_v60 = vsel %vm72_vm0, %v19_v43, -inf  ;;  %192 = vst.msk [vmem:[%s536_s1 + $0x38] sm:$0xff] %vm72_vm0, %v128_v52  ;;  %v151_v0 = vsel %vm72_vm0, %v35_v44, -inf  ;;  %v153_v1 = vsel %vm72_vm0, %v51_v49, -inf  ;;  %v53_v5 = vld [vmem:[%s535_s0 + $0x168] sm:$0xff]  ;;  %v54_v17 = vld [vmem:[%s535_s0 + $0x170] sm:$0xff] }
  0x16   :  { %v155_v2 = vsel %vm72_vm0, %v67_v50, -inf  ;;  %v157_v3 = vsel %vm72_vm0, %v20_v51, -inf  ;;  %v142_v6 = vmax.f32 %v140_v58, %v141_v47  ;;  %v147_v7 = vmax.f32 %v145_v59, %v146_v54  ;;  %v69_v14 = vld [vmem:[%s535_s0 + $0x1e8] sm:$0xff]  ;;  %v23_v22 = vld [vmem:[%s535_s0 + $0x78] sm:$0xff]  ;;  %v70_v25 = vld [vmem:[%s535_s0 + $0x1f0] sm:$0xff] }
  0x17   :  { %193 = vst.msk [vmem:[%s536_s1 + $0x40] sm:$0xff] %vm72_vm0, %v135_v57  ;;  %v152_v8 = vmax.f32 %v150_v60, %v151_v0  ;;  %v158_v9 = vsel %vm72_vm0, %v36_v56, -inf  ;;  %v160_v12 = vsel %vm72_vm0, %v52_v61, -inf  ;;  %v162_v13 = vsel %vm72_vm0, %v68_v62, -inf  ;;  %v39_v27 = vld [vmem:[%s535_s0 + $0xf8] sm:$0xff] }
  0x18   :  { %v159_v11 = vmax.f32 %v157_v3, %v158_v9  ;;  %v164_v15 = vsel %vm72_vm0, %v21_v63, -inf  ;;  %194 = vst.msk [vmem:[%s536_s1 + $0x48] sm:$0xff] %vm72_vm0, %v142_v6  ;;  %v149_v18 = vmax.f32 %v147_v7, %v148_v55  ;;  %v165_v20 = vsel %vm72_vm0, %v37_v4, -inf  ;;  %v55_v28 = vld [vmem:[%s535_s0 + $0x178] sm:$0xff] }
  0x19   :  { %v154_v19 = vmax.f32 %v152_v8, %v153_v1  ;;  %v167_v21 = vsel %vm72_vm0, %v53_v5, -inf  ;;  %v166_v24 = vmax.f32 %v164_v15, %v165_v20  ;;  %v171_v26 = vsel %vm72_vm0, %v22_v10, -inf  ;;  %v71_v36 = vld [vmem:[%s535_s0 + $0x1f8] sm:$0xff] }
  0x1a   :  { %v161_v23 = vmax.f32 %v159_v11, %v160_v12  ;;  %195 = vst.msk [vmem:[%s536_s1 + $0x50] sm:$0xff] %vm72_vm0, %v149_v18  ;;  %v169_v30 = vsel %vm72_vm0, %v69_v14, -inf  ;;  %v172_v31 = vsel %vm72_vm0, %v38_v16, -inf  ;;  %v174_v32 = vsel %vm72_vm0, %v54_v17, -inf }
  0x1b   :  { %v156_v29 = vmax.f32 %v154_v19, %v155_v2  ;;  %v168_v34 = vmax.f32 %v166_v24, %v167_v21  ;;  %v173_v35 = vmax.f32 %v171_v26, %v172_v31  ;;  %v178_v37 = vsel %vm72_vm0, %v23_v22, -inf }
  0x1c   :  { %v163_v33 = vmax.f32 %v161_v23, %v162_v13  ;;  %v176_v38 = vsel %vm72_vm0, %v70_v25, -inf  ;;  %v179_v39 = vsel %vm72_vm0, %v39_v27, -inf  ;;  %v181_v40 = vsel %vm72_vm0, %v55_v28, -inf }
  0x1d   :  { %196 = vst.msk [vmem:[%s536_s1 + $0x58] sm:$0xff] %vm72_vm0, %v156_v29  ;;  %v170_v41 = vmax.f32 %v168_v34, %v169_v30  ;;  %v175_v42 = vmax.f32 %v173_v35, %v174_v32  ;;  %v180_v43 = vmax.f32 %v178_v37, %v179_v39  ;;  %v183_v44 = vsel %vm72_vm0, %v71_v36, -inf }
  0x1e   :  { %197 = vst.msk [vmem:[%s536_s1 + $0x60] sm:$0xff] %vm72_vm0, %v163_v33 }
  0x1f   :  { %198 = vst.msk [vmem:[%s536_s1 + $0x68] sm:$0xff] %vm72_vm0, %v170_v41  ;;  %v177_v45 = vmax.f32 %v175_v42, %v176_v38  ;;  %v182_v46 = vmax.f32 %v180_v43, %v181_v40 }
  0x21   :  { %199 = vst.msk [vmem:[%s536_s1 + $0x70] sm:$0xff] %vm72_vm0, %v177_v45  ;;  %v184_v47 = vmax.f32 %v182_v46, %v183_v44 }
  0x23   :  { %200 = vst.msk [vmem:[%s536_s1 + $0x78] sm:$0xff] %vm72_vm0, %v184_v47 }

// kernel: feature_extractor_forward.29
= control target key start
LH: loop header
LB: loop body
LE: loop exit
PB: predicated region body
PF: predicated region fallthrough
CT: control target
= control target key end

     0   :  { %s1047_s12 = smov 0   ;;  %s1049_s13 = smov 0   ;;  %s1203_s0 = inlined_call_operand.vmem [shape: bf16[128,640], index: 0, kind: input, shape index: {}]   ;;  %s1204_s1 = inlined_call_operand.vmem [shape: bf16[640,128], index: 1, kind: input, shape index: {}]   ;;  %s1205_s2 = inlined_call_operand.vmem [shape: f32[1,128], index: 2, kind: input, shape index: {}]   ;;  %s1206_s3 = inlined_call_operand.vmem [shape: f32[128,128], index: 3, kind: output, shape index: {}]  }
   0x1   :  { %s1051_s14 = smov 0   ;;  %s1053_s15 = smov 0  }
   0x2   :  { %s1055_s16 = smov 0  }
   0x3 LB: > { %s25_s17 = sadd.s32 1, %s1020_s15  ;;  %p48_p1 = scmp.ne.s32.totalorder %s1012_s13, %s1008_s12  ;;  %s1024_s16 = sphi %s1055_s16, %s13_s16   ;;  %s1020_s15 = sphi %s1053_s15, %s1210_s15   ;;  %s1016_s14 = sphi %s1051_s14, %s1209_s14   ;;  %s1012_s13 = sphi %s1049_s13, %s1208_s13   ;;  %s1008_s12 = sphi %s1047_s12, %s1207_s12  }
   0x4   : > { %p26_p0 = scmp.ge.s32.totalorder %s25_s17, 5  ;;  %p49_p2 = scmp.eq.s32.totalorder %s1024_s16, 0 }
   0x5   : > { %s41_s19 = sadd.s32 1, %s1012_s13  ;;  %p835_p5 = scmp.ge.s32.totalorder %s1024_s16, 5 }
   0x6   : > { %s1212_s17 = smov (%p26_p0, %s25_s17), 0  ;;  %p50_p3 = por %p49_p2, %p48_p1 }
   0x7   : > { %s37_s18 = ssub.s32 %s1020_s15, %s1212_s17  ;;  %162 = sbr.rel (%p835_p5) target bundleno = 28 (0x1c), region = 20 }
   0x8   : > { %p39_p4 = scmp.eq.s32.totalorder %s37_s18, 0 }
   0xa   : > { %s1082_s20 = scalar_select %p39_p4, %s1012_s13, %s41_s19  }
   0xe   : > { %165 = sbr.rel (!%p50_p3) target bundleno = 28 (0x1c), region = 24  ;;  %s167_s21 = sand.u32 (%p50_p3), 1, %s1012_s13  }
   0xf   : > { %s837_s22 = sshll.u32 (%p50_p3), %s1020_s15, 2  ;;  %s836_s23 = sshll.u32 (%p50_p3), %s167_s21, 6 }
  0x10   : > { %s1090_s26 = scalar_lea.vmem (%p50_p3), %s1203_s0, %s837_s22  ;;  %s169_s27 = scalar_lea.vmem (%p50_p3), [#allocation3], %s836_s23 }
  0x11   : > { %v190_v0 = vld [vmem:[%s1090_s26] sm:$0xf] (%p50_p3)  ;;  %v192_v1 = vld [vmem:[%s1090_s26 + $0x14] sm:$0xf] (%p50_p3)  ;;  %v194_v2 = vld [vmem:[%s1090_s26 + $0x28] sm:$0xf] (%p50_p3) }
  0x12   : > { %191 = vst [vmem:[%s169_s27] sm:$0xf] (%p50_p3), %v190_v0  ;;  %193 = vst [vmem:[%s169_s27 + $0x4] sm:$0xf] (%p50_p3), %v192_v1  ;;  %v196_v3 = vld [vmem:[%s1090_s26 + $0x3c] sm:$0xf] (%p50_p3) }
  0x13   : > { %v198_v4 = vld [vmem:[%s1090_s26 + $0x50] sm:$0xf] (%p50_p3)  ;;  %195 = vst [vmem:[%s169_s27 + $0x8] sm:$0xf] (%p50_p3), %v194_v2  ;;  %197 = vst [vmem:[%s169_s27 + $0xc] sm:$0xf] (%p50_p3), %v196_v3 }
  0x14   : > { %199 = vst [vmem:[%s169_s27 + $0x10] sm:$0xf] (%p50_p3), %v198_v4  ;;  %v200_v5 = vld [vmem:[%s1090_s26 + $0x64] sm:$0xf] (%p50_p3)  ;;  %v202_v6 = vld [vmem:[%s1090_s26 + $0x78] sm:$0xf] (%p50_p3) }
  0x15   : > { %v204_v7 = vld [vmem:[%s1090_s26 + $0x8c] sm:$0xf]  ;;  %201 = vst [vmem:[%s169_s27 + $0x14] sm:$0xf] %v200_v5  ;;  %203 = vst [vmem:[%s169_s27 + $0x18] sm:$0xf] %v202_v6 }
  0x16   : > { %205 = vst [vmem:[%s169_s27 + $0x1c] sm:$0xf] %v204_v7  ;;  %v206_v8 = vld [vmem:[%s1090_s26 + $0xa0] sm:$0xf]  ;;  %v208_v9 = vld [vmem:[%s1090_s26 + $0xb4] sm:$0xf] }
  0x17   : > { %v210_v10 = vld [vmem:[%s1090_s26 + $0xc8] sm:$0xf]  ;;  %207 = vst [vmem:[%s169_s27 + $0x20] sm:$0xf] %v206_v8  ;;  %209 = vst [vmem:[%s169_s27 + $0x24] sm:$0xf] %v208_v9 }
  0x18   : > { %211 = vst [vmem:[%s169_s27 + $0x28] sm:$0xf] %v210_v10  ;;  %v212_v11 = vld [vmem:[%s1090_s26 + $0xdc] sm:$0xf]  ;;  %v214_v12 = vld [vmem:[%s1090_s26 + $0xf0] sm:$0xf] }
  0x19   : > { %v216_v13 = vld [vmem:[%s1090_s26 + $0x104] sm:$0xf]  ;;  %213 = vst [vmem:[%s169_s27 + $0x2c] sm:$0xf] %v212_v11  ;;  %215 = vst [vmem:[%s169_s27 + $0x30] sm:$0xf] %v214_v12 }
  0x1a   : > { %217 = vst [vmem:[%s169_s27 + $0x34] sm:$0xf] %v216_v13  ;;  %v218_v14 = vld [vmem:[%s1090_s26 + $0x118] sm:$0xf]  ;;  %v220_v15 = vld [vmem:[%s1090_s26 + $0x12c] sm:$0xf] }
  0x1b   : > { %219 = vst [vmem:[%s169_s27 + $0x38] sm:$0xf] %v218_v14  ;;  %221 = vst [vmem:[%s169_s27 + $0x3c] sm:$0xf] %v220_v15 }
  0x1c PF: > { %p838_p6 = scmp.ge.s32.totalorder %s1024_s16, 1  ;;  %p287_p7 = scmp.lt.s32.totalorder %s1024_s16, 6 }
  0x1e   : > { %p288_p8 = pnand %p838_p6, %p287_p7 }
  0x1f   : > { %s294_s28 = sand.u32 (!%p288_p8), 1, %s1008_s12   ;;  %s840_s29 = sshll.u32 (!%p288_p8), %s1016_s14, 4 }
  0x20   : > { %291 = sbr.rel (%p288_p8) target bundleno = 321 (0x141), region = 69  ;;  %s839_s30 = sshll.u32 (!%p288_p8), %s294_s28, 6 }
  0x21   : > { %p333_p9 = scmp.lt.s32.totalorder (!%p288_p8), %s840_s29, 79  ;;  %s1117_s8 = scalar_lea.vmem (!%p288_p8), [#allocation3], %s839_s30 }
  0x22   : > { %p842_p10 = scmp.ne.s32.totalorder (!%p288_p8), %s1016_s14, 0 }
  0x27   : > { %s1214_s29 = smov (!%p333_p9, %s840_s29), 79  ;;  %357 = sbr.rel (%p842_p10) target bundleno = 49 (0x31), region = 77 }
  0x28   : > { %s841_s4 = sshll.u32 %s1214_s29, 2  ;;  %v1026_v16 = vmov (!%p842_p10), 0.0  }
  0x29   : > { %s1115_s7 = scalar_lea.vmem %s1204_s1, %s841_s4  ;;  %358 = vst [vmem:[#allocation2] sm:$0xff] (!%p842_p10), %v1026_v16  ;;  %359 = vst [vmem:[#allocation2 + $0x8] sm:$0xff] (!%p842_p10), %v1026_v16 }
  0x2a   : > { %360 = vst [vmem:[#allocation2 + $0x10] sm:$0xff] (!%p842_p10), %v1026_v16  ;;  %361 = vst [vmem:[#allocation2 + $0x18] sm:$0xff] (!%p842_p10), %v1026_v16 }
  0x2b   : > { %362 = vst [vmem:[#allocation2 + $0x20] sm:$0xff] (!%p842_p10), %v1026_v16  ;;  %363 = vst [vmem:[#allocation2 + $0x28] sm:$0xff] (!%p842_p10), %v1026_v16 }
  0x2c   : > { %364 = vst [vmem:[#allocation2 + $0x30] sm:$0xff] (!%p842_p10), %v1026_v16  ;;  %365 = vst [vmem:[#allocation2 + $0x38] sm:$0xff] (!%p842_p10), %v1026_v16 }
  0x2d   : > { %366 = vst [vmem:[#allocation2 + $0x40] sm:$0xff] (!%p842_p10), %v1026_v16  ;;  %367 = vst [vmem:[#allocation2 + $0x48] sm:$0xff] (!%p842_p10), %v1026_v16 }
  0x2e   : > { %368 = vst [vmem:[#allocation2 + $0x50] sm:$0xff] %v1026_v16  ;;  %369 = vst [vmem:[#allocation2 + $0x58] sm:$0xff] %v1026_v16 }
  0x2f   : > { %370 = vst [vmem:[#allocation2 + $0x60] sm:$0xff] %v1026_v16  ;;  %371 = vst [vmem:[#allocation2 + $0x68] sm:$0xff] %v1026_v16 }
  0x30   : > { %372 = vst [vmem:[#allocation2 + $0x70] sm:$0xff] %v1026_v16  ;;  %373 = vst [vmem:[#allocation2 + $0x78] sm:$0xff] %v1026_v16 }
  0x31 PF: > { %v970_v17 = vld [vmem:[%s1115_s7] sm:$0xff]   ;;  %v971_v18 = vld [vmem:[%s1115_s7 + $0x8] sm:$0xff]   ;;  %v972_v19 = vld [vmem:[%s1115_s7 + $0x10] sm:$0xff]   ;;  %p859_p11 = scmp.ne.s32.totalorder %s1016_s14, 4 }
  0x32   : > { %881 = vmatprep.subr.bf16.mxu0 %v970_v17  ;;  %913 = vmatprep.subr.bf16.mxu1 %v970_v17  ;;  %v973_v20 = vld [vmem:[%s1115_s7 + $0x18] sm:$0xff]   ;;  %v978_v21 = vld [vmem:[%s1117_s8] sm:$0xff]   ;;  %v975_v24 = vld [vmem:[%s1115_s7 + $0x28] sm:$0xff]  }
  0x33   : > { %882 = vmatpush3.bf16.msra.mxu0 %v970_v17  ;;  %921 = vmatpush3.bf16.msra.mxu1 %v970_v17  ;;  %v979_v22 = vld [vmem:[%s1117_s8 + $0x20] sm:$0xff]   ;;  %v976_v25 = vld [vmem:[%s1115_s7 + $0x30] sm:$0xff]   ;;  %v977_v26 = vld [vmem:[%s1115_s7 + $0x38] sm:$0xff]  }
  0x34   : > { %883 = vmatprep.subr.bf16.mxu0 %v971_v18  ;;  %914 = vmatprep.subr.bf16.mxu1 %v971_v18  ;;  %v974_v23 = vld [vmem:[%s1115_s7 + $0x20] sm:$0xff]   ;;  %v980_v27 = vld [vmem:[%s1117_s8 + $0x8] sm:$0xff]   ;;  %v982_v29 = vld [vmem:[%s1117_s8 + $0x10] sm:$0xff]  }
  0x35   : > { %897 = vmatprep.mubr.bf16.mxu0 %v978_v21  ;;  %905 = vmatprep.mubr.bf16.mxu1 %v979_v22  ;;  %v981_v28 = vld [vmem:[%s1117_s8 + $0x28] sm:$0xff]   ;;  %v983_v30 = vld [vmem:[%s1117_s8 + $0x30] sm:$0xff]   ;;  %v984_v31 = vld [vmem:[%s1117_s8 + $0x18] sm:$0xff]  }
  0x36   : > { %v985_v32 = vld [vmem:[%s1117_s8 + $0x38] sm:$0xff]   ;;  %v376_v33 = vld [vmem:[#allocation2 + $0x10] sm:$0xff]  ;;  %v374_v35 = vld [vmem:[#allocation2] sm:$0xff] }
  0x37   : > { %884 = vmatpush3.bf16.msra.mxu0 %v971_v18  ;;  %922 = vmatpush3.bf16.msra.mxu1 %v971_v18  ;;  %v384_v34 = vld [vmem:[#allocation2 + $0x50] sm:$0xff]  ;;  %v382_v36 = vld [vmem:[#allocation2 + $0x40] sm:$0xff]  ;;  %v377_v39 = vld [vmem:[#allocation2 + $0x18] sm:$0xff] }
  0x38   : > { %885 = vmatprep.subr.bf16.mxu0 %v972_v19  ;;  %915 = vmatprep.subr.bf16.mxu1 %v972_v19  ;;  %v385_v40 = vld [vmem:[#allocation2 + $0x58] sm:$0xff]  ;;  %v375_v45 = vld [vmem:[#allocation2 + $0x8] sm:$0xff]  ;;  %v380_v57 = vld [vmem:[#allocation2 + $0x30] sm:$0xff] }
  0x39   : > { %v383_v46 = vld [vmem:[#allocation2 + $0x48] sm:$0xff]  ;;  %v388_v58 = vld [vmem:[#allocation2 + $0x70] sm:$0xff]  ;;  %v378_v59 = vld [vmem:[#allocation2 + $0x20] sm:$0xff] }
  0x3a   : > { %v386_v60 = vld [vmem:[#allocation2 + $0x60] sm:$0xff]  ;;  %v381_v63 = vld [vmem:[#allocation2 + $0x38] sm:$0xff]  ;;  %v379_v5 = vld [vmem:[#allocation2 + $0x28] sm:$0xff] }
  0x3b   : > { %886 = vmatpush3.bf16.msra.mxu0 %v972_v19  ;;  %923 = vmatpush3.bf16.msra.mxu1 %v972_v19  ;;  %v389_v0 = vld [vmem:[#allocation2 + $0x78] sm:$0xff]  ;;  %v387_v6 = vld [vmem:[#allocation2 + $0x68] sm:$0xff]  ;;  %v860_v18 = vld [vmem:[%s1205_s2] ss:$0 sm:$0xff] (!%p859_p11) }
  0x3c   : > { %887 = vmatprep.subr.bf16.mxu0 %v973_v20  ;;  %916 = vmatprep.subr.bf16.mxu1 %v973_v20 }
  0x3f   : > { %888 = vmatpush3.bf16.msra.mxu0 %v973_v20  ;;  %924 = vmatpush3.bf16.msra.mxu1 %v973_v20 }
  0x40   : > { %889 = vmatprep.subr.bf16.mxu0 %v974_v23  ;;  %917 = vmatprep.subr.bf16.mxu1 %v974_v23 }
  0x43   : > { %890 = vmatpush3.bf16.msra.mxu0 %v974_v23  ;;  %925 = vmatpush3.bf16.msra.mxu1 %v974_v23 }
  0x44   : > { %891 = vmatprep.subr.bf16.mxu0 %v975_v24  ;;  %918 = vmatprep.subr.bf16.mxu1 %v975_v24 }
  0x47   : > { %892 = vmatpush3.bf16.msra.mxu0 %v975_v24  ;;  %926 = vmatpush3.bf16.msra.mxu1 %v975_v24 }
  0x48   : > { %893 = vmatprep.subr.bf16.mxu0 %v976_v25  ;;  %919 = vmatprep.subr.bf16.mxu1 %v976_v25 }
  0x4b   : > { %894 = vmatpush3.bf16.msra.mxu0 %v976_v25  ;;  %927 = vmatpush3.bf16.msra.mxu1 %v976_v25 }
  0x4c   : > { %895 = vmatprep.subr.bf16.mxu0 %v977_v26  ;;  %920 = vmatprep.subr.bf16.mxu1 %v977_v26 }
  0x4f   : > { %896 = vmatpush3.bf16.msra.mxu0 %v977_v26  ;;  %928 = vmatpush3.bf16.msra.mxu1 %v977_v26 }
  0x52   : > { %898 = vmatmul.mubr.bf16.vlgmr.msra.gmra.mrb[0].mxu0 %v980_v27  ;;  %906 = vmatmul.mubr.bf16.vlgmr.msra.gmra.mrb[0].mxu1 %v981_v28 }
  0x53   : > { %901 = vmatprep.mubr.bf16.mxu0 %v982_v29  ;;  %909 = vmatprep.mubr.bf16.mxu1 %v983_v30 }
  0x5a   : > { %902 = vmatmul.mubr.bf16.gmra.mrb[4].mxu0 %v984_v31  ;;  %910 = vmatmul.mubr.bf16.gmra.mrb[4].mxu1 %v985_v32 }
 0x125   : > { %v899_v37 = vpop.f32.mrb[0].mxu0  ;;  %v907_v38 = vpop.f32.mrb[0].mxu1 }
 0x126   : > { %v617_v41 = vadd.f32 %v899_v37, %v376_v33  ;;  %v625_v42 = vadd.f32 %v907_v38, %v384_v34  ;;  %v552_v43 = vpop.f32.mrb[1].mxu0  ;;  %v584_v44 = vpop.f32.mrb[1].mxu1 }
 0x127   : > { %v615_v47 = vadd.f32 %v552_v43, %v374_v35  ;;  %v623_v48 = vadd.f32 %v584_v44, %v382_v36  ;;  %v900_v49 = vpop.f32.mrb[2].mxu0  ;;  %v908_v50 = vpop.f32.mrb[2].mxu1 }
 0x128   : > { %633 = vst [vmem:[#allocation2 + $0x10] sm:$0xff] %v617_v41  ;;  %641 = vst [vmem:[#allocation2 + $0x50] sm:$0xff] %v625_v42  ;;  %v618_v51 = vadd.f32 %v900_v49, %v377_v39  ;;  %v626_v52 = vadd.f32 %v908_v50, %v385_v40  ;;  %v555_v53 = vpop.f32.mrb[3].mxu0  ;;  %v587_v54 = vpop.f32.mrb[3].mxu1 }
 0x129   : > { %631 = vst [vmem:[#allocation2] sm:$0xff] %v615_v47  ;;  %639 = vst [vmem:[#allocation2 + $0x40] sm:$0xff] %v623_v48  ;;  %v616_v55 = vadd.f32 %v555_v53, %v375_v45  ;;  %v624_v56 = vadd.f32 %v587_v54, %v383_v46 }
 0x12a   : > { %634 = vst [vmem:[#allocation2 + $0x18] sm:$0xff] %v618_v51  ;;  %642 = vst [vmem:[#allocation2 + $0x58] sm:$0xff] %v626_v52 }
 0x12b   : > { %632 = vst [vmem:[#allocation2 + $0x8] sm:$0xff] %v616_v55  ;;  %640 = vst [vmem:[#allocation2 + $0x48] sm:$0xff] %v624_v56 }
 0x12d   : > { %v903_v61 = vpop.f32.mrb[4].mxu0  ;;  %v911_v62 = vpop.f32.mrb[4].mxu1  ;;  %650 = sbr.rel (%p859_p11) target bundleno = 321 (0x141), region = 81 }
 0x12e   : > { %v621_v1 = vadd.f32 %v903_v61, %v380_v57  ;;  %v629_v2 = vadd.f32 %v911_v62, %v388_v58  ;;  %v568_v3 = vpop.f32.mrb[5].mxu0  ;;  %v600_v4 = vpop.f32.mrb[5].mxu1 }
 0x12f   : > { %v619_v7 = vadd.f32 %v568_v3, %v378_v59  ;;  %v627_v8 = vadd.f32 %v600_v4, %v386_v60  ;;  %v904_v9 = vpop.f32.mrb[6].mxu0  ;;  %v912_v10 = vpop.f32.mrb[6].mxu1  ;;  %v653_v22 = vld [vmem:[#allocation2 + $0x10] sm:$0xff] (!%p859_p11) }
 0x130   : > { %637 = vst [vmem:[#allocation2 + $0x30] sm:$0xff] %v621_v1  ;;  %645 = vst [vmem:[#allocation2 + $0x70] sm:$0xff] %v629_v2  ;;  %v622_v11 = vadd.f32 %v904_v9, %v381_v63  ;;  %v630_v12 = vadd.f32 %v912_v10, %v389_v0  ;;  %v571_v13 = vpop.f32.mrb[7].mxu0  ;;  %v603_v14 = vpop.f32.mrb[7].mxu1  ;;  %v651_v17 = vld [vmem:[#allocation2] sm:$0xff] (!%p859_p11)  ;;  %v676_v25 = vadd.f32 (!%p859_p11), %v860_v18, %v653_v22  ;;  %v661_v37 = vld [vmem:[#allocation2 + $0x50] sm:$0xff] (!%p859_p11) }
 0x131   : > { %635 = vst [vmem:[#allocation2 + $0x20] sm:$0xff] %v619_v7  ;;  %643 = vst [vmem:[#allocation2 + $0x60] sm:$0xff] %v627_v8  ;;  %v620_v15 = vadd.f32 %v571_v13, %v379_v5  ;;  %v628_v16 = vadd.f32 %v603_v14, %v387_v6  ;;  %v674_v20 = vadd.f32 (!%p859_p11), %v860_v18, %v651_v17  ;;  %v654_v23 = vld [vmem:[#allocation2 + $0x18] sm:$0xff] (!%p859_p11)  ;;  %v659_v35 = vld [vmem:[#allocation2 + $0x40] sm:$0xff] (!%p859_p11) }
 0x132   : > { %638 = vst [vmem:[#allocation2 + $0x38] sm:$0xff] %v622_v11  ;;  %646 = vst [vmem:[#allocation2 + $0x78] sm:$0xff] %v630_v12  ;;  %v652_v19 = vld [vmem:[#allocation2 + $0x8] sm:$0xff] (!%p859_p11)  ;;  %v677_v26 = vadd.f32 (!%p859_p11), %v860_v18, %v654_v23  ;;  %v692_v38 = vmax.f32 (!%p859_p11), %v676_v25, 0.0  ;;  %v662_v42 = vld [vmem:[#allocation2 + $0x58] sm:$0xff] (!%p859_p11)  ;;  %v682_v47 = vadd.f32 (!%p859_p11), %v860_v18, %v659_v35  ;;  %v684_v52 = vadd.f32 (!%p859_p11), %v860_v18, %v661_v37 }
 0x133   : > { %636 = vst [vmem:[#allocation2 + $0x28] sm:$0xff] %v620_v15  ;;  %644 = vst [vmem:[#allocation2 + $0x68] sm:$0xff] %v628_v16  ;;  %v675_v21 = vadd.f32 (!%p859_p11), %v860_v18, %v652_v19  ;;  %v690_v31 = vmax.f32 (!%p859_p11), %v674_v20, 0.0  ;;  %v660_v36 = vld [vmem:[#allocation2 + $0x48] sm:$0xff] (!%p859_p11)  ;;  %v685_v53 = vadd.f32 (!%p859_p11), %v860_v18, %v662_v42 }
 0x134   : > { %v693_v39 = vmax.f32 %v677_v26, 0.0  ;;  %v683_v48 = vadd.f32 %v860_v18, %v660_v36  ;;  %708 = vst [vmem:[%s1206_s3 + $0x10] sm:$0xff] %v692_v38  ;;  %v698_v55 = vmax.f32 %v682_v47, 0.0  ;;  %v700_v59 = vmax.f32 %v684_v52, 0.0 }
 0x135   : > { %v691_v32 = vmax.f32 %v675_v21, 0.0  ;;  %706 = vst [vmem:[%s1206_s3] sm:$0xff] %v690_v31  ;;  %v701_v60 = vmax.f32 %v685_v53, 0.0 }
 0x136   : > { %709 = vst [vmem:[%s1206_s3 + $0x18] sm:$0xff] %v693_v39  ;;  %v699_v56 = vmax.f32 %v683_v48, 0.0  ;;  %714 = vst [vmem:[%s1206_s3 + $0x40] sm:$0xff] %v698_v55 }
 0x137   : > { %v657_v29 = vld [vmem:[#allocation2 + $0x30] sm:$0xff]  ;;  %707 = vst [vmem:[%s1206_s3 + $0x8] sm:$0xff] %v691_v32  ;;  %716 = vst [vmem:[%s1206_s3 + $0x50] sm:$0xff] %v700_v59 }
 0x138   : > { %v655_v24 = vld [vmem:[#allocation2 + $0x20] sm:$0xff]  ;;  %v680_v34 = vadd.f32 %v860_v18, %v657_v29  ;;  %v665_v49 = vld [vmem:[#allocation2 + $0x70] sm:$0xff]  ;;  %715 = vst [vmem:[%s1206_s3 + $0x48] sm:$0xff] %v699_v56  ;;  %717 = vst [vmem:[%s1206_s3 + $0x58] sm:$0xff] %v701_v60 }
 0x139   : > { %v678_v27 = vadd.f32 %v860_v18, %v655_v24  ;;  %v658_v30 = vld [vmem:[#allocation2 + $0x38] sm:$0xff]  ;;  %v663_v43 = vld [vmem:[#allocation2 + $0x60] sm:$0xff]  ;;  %v688_v58 = vadd.f32 %v860_v18, %v665_v49 }
 0x13a   : > { %v656_v28 = vld [vmem:[#allocation2 + $0x28] sm:$0xff]  ;;  %v681_v41 = vadd.f32 %v860_v18, %v658_v30  ;;  %v696_v46 = vmax.f32 %v680_v34, 0.0  ;;  %v666_v50 = vld [vmem:[#allocation2 + $0x78] sm:$0xff]  ;;  %v686_v54 = vadd.f32 %v860_v18, %v663_v43 }
 0x13b   : > { %v679_v33 = vadd.f32 %v860_v18, %v656_v28  ;;  %v694_v40 = vmax.f32 %v678_v27, 0.0  ;;  %v664_v44 = vld [vmem:[#allocation2 + $0x68] sm:$0xff]  ;;  %v689_v62 = vadd.f32 %v860_v18, %v666_v50  ;;  %v704_v0 = vmax.f32 %v688_v58, 0.0 }
 0x13c   : > { %v697_v51 = vmax.f32 %v681_v41, 0.0  ;;  %712 = vst [vmem:[%s1206_s3 + $0x30] sm:$0xff] %v696_v46  ;;  %v687_v57 = vadd.f32 %v860_v18, %v664_v44  ;;  %v702_v61 = vmax.f32 %v686_v54, 0.0 }
 0x13d   : > { %v695_v45 = vmax.f32 %v679_v33, 0.0  ;;  %710 = vst [vmem:[%s1206_s3 + $0x20] sm:$0xff] %v694_v40  ;;  %v705_v1 = vmax.f32 %v689_v62, 0.0  ;;  %720 = vst [vmem:[%s1206_s3 + $0x70] sm:$0xff] %v704_v0 }
 0x13e   : > { %713 = vst [vmem:[%s1206_s3 + $0x38] sm:$0xff] %v697_v51  ;;  %v703_v63 = vmax.f32 %v687_v57, 0.0  ;;  %718 = vst [vmem:[%s1206_s3 + $0x60] sm:$0xff] %v702_v61 }
 0x13f   : > { %711 = vst [vmem:[%s1206_s3 + $0x28] sm:$0xff] %v695_v45  ;;  %721 = vst [vmem:[%s1206_s3 + $0x78] sm:$0xff] %v705_v1 }
 0x140   : > { %719 = vst [vmem:[%s1206_s3 + $0x68] sm:$0xff] %v703_v63 }
 0x141 PF: > { %s13_s16 = sadd.s32 1, %s1024_s16   ;;  %s1207_s12 = smov %s1012_s13 }
 0x142   : > { %p10_p12 = scmp.ge.s32.totalorder %s13_s16, 7   ;;  %s1208_s13 = smov %s1082_s20 }
 0x143   : > { %s1209_s14 = smov %s1020_s15  ;;  %s1210_s15 = smov %s1212_s17 }
 0x144   :  { %12 = sbr.rel (!%p10_p12) target bundleno = 3 (0x3), region = 122 }

// kernel: feature_extractor_forward.30
= control target key start
LH: loop header
LB: loop body
LE: loop exit
PB: predicated region body
PF: predicated region fallthrough
CT: control target
= control target key end

     0   :  { %s1516_s12 = smov 0   ;;  %s1518_s13 = smov 0   ;;  %s1754_s0 = inlined_call_operand.vmem [shape: bf16[128,1152], index: 0, kind: input, shape index: {}]   ;;  %s1755_s1 = inlined_call_operand.vmem [shape: bf16[1152,128], index: 1, kind: input, shape index: {}]   ;;  %s1756_s2 = inlined_call_operand.vmem [shape: f32[1,128], index: 2, kind: input, shape index: {}]   ;;  %s1757_s3 = inlined_call_operand.vmem [shape: f32[128,128], index: 3, kind: output, shape index: {}]  }
   0x1   :  { %s1520_s14 = smov 0   ;;  %s1522_s15 = smov 0  }
   0x2   :  { %s1524_s16 = smov 0  }
   0x3 LB: > { %s25_s17 = sadd.s32 1, %s1489_s15  ;;  %p48_p1 = scmp.ne.s32.totalorder %s1481_s13, %s1477_s12  ;;  %s1493_s16 = sphi %s1524_s16, %s13_s16   ;;  %s1489_s15 = sphi %s1522_s15, %s1761_s15   ;;  %s1485_s14 = sphi %s1520_s14, %s1760_s14   ;;  %s1481_s13 = sphi %s1518_s13, %s1759_s13   ;;  %s1477_s12 = sphi %s1516_s12, %s1758_s12  }
   0x4   : > { %p26_p0 = scmp.ge.s32.totalorder %s25_s17, 3  ;;  %p49_p2 = scmp.eq.s32.totalorder %s1493_s16, 0 }
   0x5   : > { %s41_s19 = sadd.s32 1, %s1481_s13  ;;  %p1152_p5 = scmp.ge.s32.totalorder %s1493_s16, 3 }
   0x6   : > { %s1763_s17 = smov (%p26_p0, %s25_s17), 0  ;;  %p50_p3 = por %p49_p2, %p48_p1 }
   0x7   : > { %s37_s18 = ssub.s32 %s1489_s15, %s1763_s17  ;;  %162 = sbr.rel (%p1152_p5) target bundleno = 37 (0x25), region = 20 }
   0x8   : > { %p39_p4 = scmp.eq.s32.totalorder %s37_s18, 0 }
   0xa   : > { %s1551_s20 = scalar_select %p39_p4, %s1481_s13, %s41_s19  }
   0xe   : > { %165 = sbr.rel (!%p50_p3) target bundleno = 37 (0x25), region = 24  ;;  %s167_s21 = sand.u32 (%p50_p3), 1, %s1481_s13  }
   0xf   : > { %s1243_s22 = smul.u32 (%p50_p3), 12, %s1489_s15 }
  0x10   : > { %s1356_s23 = smul.u32 (%p50_p3), 192, %s167_s21 }
  0x11   : > { %s1559_s26 = scalar_lea.vmem (%p50_p3), %s1754_s0, %s1243_s22 }
  0x12   : > { %v190_v0 = vld [vmem:[%s1559_s26] sm:$0xff] (%p50_p3)  ;;  %v194_v2 = vld [vmem:[%s1559_s26 + $0x48] sm:$0xff] (%p50_p3)  ;;  %s1564_s27 = scalar_lea.vmem (%p50_p3), [#allocation3], %s1356_s23  ;;  %v198_v4 = vld [vmem:[%s1559_s26 + $0x90] sm:$0xff] (%p50_p3) }
  0x13   : > { %v192_v1 = vld [vmem:[%s1559_s26 + $0x24] sm:$0xff] (%p50_p3)  ;;  %191 = vst [vmem:[%s1564_s27] sm:$0xff] (%p50_p3), %v190_v0  ;;  %195 = vst [vmem:[%s1564_s27 + $0x18] sm:$0xff] (%p50_p3), %v194_v2  ;;  %v196_v3 = vld [vmem:[%s1559_s26 + $0x6c] sm:$0xff] (%p50_p3) }
  0x14   : > { %193 = vst [vmem:[%s1564_s27 + $0xc] sm:$0xff] (%p50_p3), %v192_v1  ;;  %v200_v5 = vld [vmem:[%s1559_s26 + $0xb4] sm:$0xff] (%p50_p3)  ;;  %197 = vst [vmem:[%s1564_s27 + $0x24] sm:$0xff] (%p50_p3), %v196_v3  ;;  %v204_v7 = vld [vmem:[%s1559_s26 + $0xfc] sm:$0xff] (%p50_p3) }
  0x15   : > { %199 = vst [vmem:[%s1564_s27 + $0x30] sm:$0xff] %v198_v4  ;;  %201 = vst [vmem:[%s1564_s27 + $0x3c] sm:$0xff] %v200_v5  ;;  %v202_v6 = vld [vmem:[%s1559_s26 + $0xd8] sm:$0xff]  ;;  %v206_v8 = vld [vmem:[%s1559_s26 + $0x120] sm:$0xff] }
  0x16   : > { %203 = vst [vmem:[%s1564_s27 + $0x48] sm:$0xff] %v202_v6  ;;  %205 = vst [vmem:[%s1564_s27 + $0x54] sm:$0xff] %v204_v7  ;;  %v208_v9 = vld [vmem:[%s1559_s26 + $0x144] sm:$0xff]  ;;  %v212_v11 = vld [vmem:[%s1559_s26 + $0x18c] sm:$0xff] }
  0x17   : > { %207 = vst [vmem:[%s1564_s27 + $0x60] sm:$0xff] %v206_v8  ;;  %v210_v10 = vld [vmem:[%s1559_s26 + $0x168] sm:$0xff]  ;;  %209 = vst [vmem:[%s1564_s27 + $0x6c] sm:$0xff] %v208_v9  ;;  %v214_v12 = vld [vmem:[%s1559_s26 + $0x1b0] sm:$0xff] }
  0x18   : > { %211 = vst [vmem:[%s1564_s27 + $0x78] sm:$0xff] %v210_v10  ;;  %213 = vst [vmem:[%s1564_s27 + $0x84] sm:$0xff] %v212_v11  ;;  %v216_v13 = vld [vmem:[%s1559_s26 + $0x1d4] sm:$0xff]  ;;  %v220_v15 = vld [vmem:[%s1559_s26 + $0x21c] sm:$0xff] }
  0x19   : > { %v218_v14 = vld [vmem:[%s1559_s26 + $0x1f8] sm:$0xff]  ;;  %215 = vst [vmem:[%s1564_s27 + $0x90] sm:$0xff] %v214_v12  ;;  %217 = vst [vmem:[%s1564_s27 + $0x9c] sm:$0xff] %v216_v13  ;;  %v1154_v16 = vld [vmem:[%s1559_s26 + $0x8] sm:$0xf] }
  0x1a   : > { %219 = vst [vmem:[%s1564_s27 + $0xa8] sm:$0xff] %v218_v14  ;;  %v1156_v17 = vld [vmem:[%s1559_s26 + $0x2c] sm:$0xf]  ;;  %221 = vst [vmem:[%s1564_s27 + $0xb4] sm:$0xff] %v220_v15  ;;  %v1158_v18 = vld [vmem:[%s1559_s26 + $0x50] sm:$0xf] }
  0x1b   : > { %1155 = vst [vmem:[%s1564_s27 + $0x8] sm:$0xf] %v1154_v16  ;;  %1157 = vst [vmem:[%s1564_s27 + $0x14] sm:$0xf] %v1156_v17  ;;  %v1160_v19 = vld [vmem:[%s1559_s26 + $0x74] sm:$0xf] }
  0x1c   : > { %v1162_v20 = vld [vmem:[%s1559_s26 + $0x98] sm:$0xf]  ;;  %1159 = vst [vmem:[%s1564_s27 + $0x20] sm:$0xf] %v1158_v18  ;;  %1161 = vst [vmem:[%s1564_s27 + $0x2c] sm:$0xf] %v1160_v19 }
  0x1d   : > { %1163 = vst [vmem:[%s1564_s27 + $0x38] sm:$0xf] %v1162_v20  ;;  %v1164_v21 = vld [vmem:[%s1559_s26 + $0xbc] sm:$0xf]  ;;  %v1166_v22 = vld [vmem:[%s1559_s26 + $0xe0] sm:$0xf] }
  0x1e   : > { %v1168_v23 = vld [vmem:[%s1559_s26 + $0x104] sm:$0xf]  ;;  %1165 = vst [vmem:[%s1564_s27 + $0x44] sm:$0xf] %v1164_v21  ;;  %1167 = vst [vmem:[%s1564_s27 + $0x50] sm:$0xf] %v1166_v22 }
  0x1f   : > { %1169 = vst [vmem:[%s1564_s27 + $0x5c] sm:$0xf] %v1168_v23  ;;  %v1170_v24 = vld [vmem:[%s1559_s26 + $0x128] sm:$0xf]  ;;  %v1172_v25 = vld [vmem:[%s1559_s26 + $0x14c] sm:$0xf] }
  0x20   : > { %v1174_v26 = vld [vmem:[%s1559_s26 + $0x170] sm:$0xf]  ;;  %1171 = vst [vmem:[%s1564_s27 + $0x68] sm:$0xf] %v1170_v24  ;;  %1173 = vst [vmem:[%s1564_s27 + $0x74] sm:$0xf] %v1172_v25 }
  0x21   : > { %1175 = vst [vmem:[%s1564_s27 + $0x80] sm:$0xf] %v1174_v26  ;;  %v1176_v27 = vld [vmem:[%s1559_s26 + $0x194] sm:$0xf]  ;;  %v1178_v28 = vld [vmem:[%s1559_s26 + $0x1b8] sm:$0xf] }
  0x22   : > { %v1180_v29 = vld [vmem:[%s1559_s26 + $0x1dc] sm:$0xf]  ;;  %1177 = vst [vmem:[%s1564_s27 + $0x8c] sm:$0xf] %v1176_v27  ;;  %1179 = vst [vmem:[%s1564_s27 + $0x98] sm:$0xf] %v1178_v28 }
  0x23   : > { %1181 = vst [vmem:[%s1564_s27 + $0xa4] sm:$0xf] %v1180_v29  ;;  %v1182_v30 = vld [vmem:[%s1559_s26 + $0x200] sm:$0xf]  ;;  %v1184_v31 = vld [vmem:[%s1559_s26 + $0x224] sm:$0xf] }
  0x24   : > { %1183 = vst [vmem:[%s1564_s27 + $0xb0] sm:$0xf] %v1182_v30  ;;  %1185 = vst [vmem:[%s1564_s27 + $0xbc] sm:$0xf] %v1184_v31 }
  0x25 PF: > { %p1186_p6 = scmp.ge.s32.totalorder %s1493_s16, 1  ;;  %p277_p7 = scmp.lt.s32.totalorder %s1493_s16, 4 }
  0x27   : > { %p278_p8 = pnand %p1186_p6, %p277_p7 }
  0x28   : > { %s284_s28 = sand.u32 (!%p278_p8), 1, %s1477_s12   ;;  %s323_s29 = smul.u32 (!%p278_p8), 48, %s1485_s14 }
  0x29   : > { %281 = sbr.rel (%p278_p8) target bundleno = 381 (0x17d), region = 54  ;;  %p1188_p10 = scmp.ne.s32.totalorder (!%p278_p8), %s1485_s14, 0 }
  0x2a   : > { %s1357_s30 = smul.u32 (!%p278_p8), 192, %s284_s28  ;;  %p324_p9 = scmp.lt.s32.totalorder (!%p278_p8), %s323_s29, 143 }
  0x2c   : > { %s1636_s8 = scalar_lea.vmem (!%p278_p8), [#allocation3], %s1357_s30 }
  0x30   : > { %s1765_s29 = smov (!%p324_p9, %s323_s29), 143  ;;  %348 = sbr.rel (%p1188_p10) target bundleno = 58 (0x3a), region = 62 }
  0x31   : > { %s1187_s4 = sshll.u32 %s1765_s29, 2  ;;  %v1495_v32 = vmov (!%p1188_p10), 0.0  }
  0x32   : > { %s1634_s7 = scalar_lea.vmem %s1755_s1, %s1187_s4  ;;  %349 = vst [vmem:[#allocation2] sm:$0xff] (!%p1188_p10), %v1495_v32  ;;  %350 = vst [vmem:[#allocation2 + $0x8] sm:$0xff] (!%p1188_p10), %v1495_v32 }
  0x33   : > { %351 = vst [vmem:[#allocation2 + $0x10] sm:$0xff] (!%p1188_p10), %v1495_v32  ;;  %352 = vst [vmem:[#allocation2 + $0x18] sm:$0xff] (!%p1188_p10), %v1495_v32 }
  0x34   : > { %353 = vst [vmem:[#allocation2 + $0x20] sm:$0xff] (!%p1188_p10), %v1495_v32  ;;  %354 = vst [vmem:[#allocation2 + $0x28] sm:$0xff] (!%p1188_p10), %v1495_v32 }
  0x35   : > { %355 = vst [vmem:[#allocation2 + $0x30] sm:$0xff] (!%p1188_p10), %v1495_v32  ;;  %356 = vst [vmem:[#allocation2 + $0x38] sm:$0xff] (!%p1188_p10), %v1495_v32 }
  0x36   : > { %357 = vst [vmem:[#allocation2 + $0x40] sm:$0xff] (!%p1188_p10), %v1495_v32  ;;  %358 = vst [vmem:[#allocation2 + $0x48] sm:$0xff] (!%p1188_p10), %v1495_v32 }
  0x37   : > { %359 = vst [vmem:[#allocation2 + $0x50] sm:$0xff] %v1495_v32  ;;  %360 = vst [vmem:[#allocation2 + $0x58] sm:$0xff] %v1495_v32 }
  0x38   : > { %361 = vst [vmem:[#allocation2 + $0x60] sm:$0xff] %v1495_v32  ;;  %362 = vst [vmem:[#allocation2 + $0x68] sm:$0xff] %v1495_v32 }
  0x39   : > { %363 = vst [vmem:[#allocation2 + $0x70] sm:$0xff] %v1495_v32  ;;  %364 = vst [vmem:[#allocation2 + $0x78] sm:$0xff] %v1495_v32 }
  0x3a PF: > { %v1399_v33 = vld [vmem:[%s1634_s7 + $0x40] sm:$0xff]   ;;  %v1402_v36 = vld [vmem:[%s1634_s7 + $0x48] sm:$0xff]   ;;  %v1405_v39 = vld [vmem:[%s1634_s7 + $0x50] sm:$0xff]   ;;  %p1237_p11 = scmp.ne.s32.totalorder %s1485_s14, 2 }
  0x3b   : > { %v1400_v34 = vld [vmem:[%s1634_s7] sm:$0xff]   ;;  %1244 = vmatprep.subr.bf16.mxu0 %v1399_v33  ;;  %v1403_v37 = vld [vmem:[%s1634_s7 + $0x8] sm:$0xff]   ;;  %v1406_v40 = vld [vmem:[%s1634_s7 + $0x10] sm:$0xff]  }
  0x3c   : > { %v1401_v35 = vld [vmem:[%s1634_s7 + $0x80] sm:$0xff]   ;;  %1245 = vmatpush3.bf16.msra.mxu0 %v1400_v34  ;;  %v1404_v38 = vld [vmem:[%s1634_s7 + $0x88] sm:$0xff]   ;;  %v1407_v41 = vld [vmem:[%s1634_s7 + $0x90] sm:$0xff]  }
  0x3d   : > { %1324 = vmatprep.subr.bf16.mxu1 %v1401_v35  ;;  %1246 = vmatprep.subr.bf16.mxu0 %v1402_v36  ;;  %v1408_v42 = vld [vmem:[%s1634_s7 + $0x58] sm:$0xff]   ;;  %v1411_v45 = vld [vmem:[%s1634_s7 + $0x60] sm:$0xff]   ;;  %v1414_v48 = vld [vmem:[%s1634_s7 + $0x68] sm:$0xff]  }
  0x3e   : > { %1325 = vmatpush3.bf16.msra.mxu1 %v1401_v35  ;;  %v1409_v43 = vld [vmem:[%s1634_s7 + $0x18] sm:$0xff]   ;;  %v1413_v46 = vld [vmem:[%s1634_s7 + $0xa0] sm:$0xff]   ;;  %v1416_v49 = vld [vmem:[%s1634_s7 + $0xa8] sm:$0xff]  }
  0x3f   : > { %1326 = vmatprep.subr.bf16.mxu1 %v1404_v38  ;;  %v1410_v44 = vld [vmem:[%s1634_s7 + $0x98] sm:$0xff]   ;;  %v1412_v47 = vld [vmem:[%s1634_s7 + $0x20] sm:$0xff]   ;;  %v1415_v50 = vld [vmem:[%s1634_s7 + $0x28] sm:$0xff]  }
  0x40   : > { %1247 = vmatpush3.bf16.msra.mxu0 %v1403_v37  ;;  %v1417_v51 = vld [vmem:[%s1634_s7 + $0x70] sm:$0xff]   ;;  %v1420_v54 = vld [vmem:[%s1634_s7 + $0x78] sm:$0xff]   ;;  %v1423_v59 = vld [vmem:[%s1636_s8] ss:$12 sps:$4 sm:$0xff]  }
  0x41   : > { %1248 = vmatprep.subr.bf16.mxu0 %v1405_v39  ;;  %v1418_v52 = vld [vmem:[%s1634_s7 + $0x30] sm:$0xff]   ;;  %v1422_v55 = vld [vmem:[%s1634_s7 + $0xb8] sm:$0xff]   ;;  %v1427_v61 = vld [vmem:[%s1636_s8 + $0x20] ss:$12 sps:$4 sm:$0xff]  }
  0x42   : > { %1327 = vmatpush3.bf16.msra.mxu1 %v1404_v38  ;;  %v1419_v53 = vld [vmem:[%s1634_s7 + $0xb0] sm:$0xff]   ;;  %v1421_v58 = vld [vmem:[%s1634_s7 + $0x38] sm:$0xff]   ;;  %v1443_v5 = vld [vmem:[%s1636_s8 + $0x80] ss:$12 sps:$4 sm:$0xff]  }
  0x43   : > { %1328 = vmatprep.subr.bf16.mxu1 %v1407_v41  ;;  %v1425_v56 = vld [vmem:[%s1636_s8 + $0x4] ss:$12 sps:$4 sm:$0xff]   ;;  %v1426_v57 = vld [vmem:[%s1636_s8 + $0x8] ss:$12 sps:$4 sm:$0xff]   ;;  %v1436_v4 = vld [vmem:[%s1636_s8 + $0x4c] ss:$12 sps:$4 sm:$0xff]  }
  0x44   : > { %1249 = vmatpush3.bf16.msra.mxu0 %v1406_v40  ;;  %765 = vmatprep.mubr.bf16.mxu0 %v1425_v56  ;;  %v1428_v60 = vld [vmem:[%s1636_s8 + $0x1c] ss:$12 sps:$4 sm:$0xff]   ;;  %v1434_v62 = vld [vmem:[%s1636_s8 + $0x38] ss:$12 sps:$4 sm:$0xff]   ;;  %v1431_v0 = vld [vmem:[%s1636_s8 + $0x34] ss:$12 sps:$4 sm:$0xff]  }
  0x45   : > { %1250 = vmatprep.subr.bf16.mxu0 %v1408_v42  ;;  %1340 = vmatprep.mubr.bf16.mxu1 %v1426_v57  ;;  %v1430_v63 = vld [vmem:[%s1636_s8 + $0x18] ss:$12 sps:$4 sm:$0xff]   ;;  %v1435_v1 = vld [vmem:[%s1636_s8 + $0x50] ss:$12 sps:$4 sm:$0xff]   ;;  %v1442_v2 = vld [vmem:[%s1636_s8 + $0x68] ss:$12 sps:$4 sm:$0xff]  }
  0x46   : > { %1329 = vmatpush3.bf16.msra.mxu1 %v1407_v41  ;;  %v1433_v3 = vld [vmem:[%s1636_s8 + $0x30] ss:$12 sps:$4 sm:$0xff]   ;;  %v1450_v6 = vld [vmem:[%s1636_s8 + $0x98] ss:$12 sps:$4 sm:$0xff]   ;;  %v1438_v7 = vld [vmem:[%s1636_s8 + $0x48] ss:$12 sps:$4 sm:$0xff]  }
  0x47   : > { %1330 = vmatprep.subr.bf16.mxu1 %v1410_v44  ;;  %v1439_v8 = vld [vmem:[%s1636_s8 + $0x64] ss:$12 sps:$4 sm:$0xff]   ;;  %v1441_v10 = vld [vmem:[%s1636_s8 + $0x60] ss:$12 sps:$4 sm:$0xff]   ;;  %v1444_v11 = vld [vmem:[%s1636_s8 + $0x7c] ss:$12 sps:$4 sm:$0xff]  }
  0x48   : > { %1251 = vmatpush3.bf16.msra.mxu0 %v1409_v43  ;;  %v1451_v9 = vld [vmem:[%s1636_s8 + $0xb0] ss:$12 sps:$4 sm:$0xff]   ;;  %v1446_v12 = vld [vmem:[%s1636_s8 + $0x78] ss:$12 sps:$4 sm:$0xff]   ;;  %v1447_v13 = vld [vmem:[%s1636_s8 + $0x94] ss:$12 sps:$4 sm:$0xff]  }
  0x49   : > { %1252 = vmatprep.subr.bf16.mxu0 %v1411_v45  ;;  %v1449_v14 = vld [vmem:[%s1636_s8 + $0x90] ss:$12 sps:$4 sm:$0xff]   ;;  %v1452_v15 = vld [vmem:[%s1636_s8 + $0xac] ss:$12 sps:$4 sm:$0xff]   ;;  %v1454_v16 = vld [vmem:[%s1636_s8 + $0xa8] ss:$12 sps:$4 sm:$0xff]  }
  0x4a   : > { %1331 = vmatpush3.bf16.msra.mxu1 %v1410_v44  ;;  %v365_v23 = vld [vmem:[#allocation2] sm:$0xff]  ;;  %v366_v28 = vld [vmem:[#allocation2 + $0x8] sm:$0xff]  ;;  %v367_v38 = vld [vmem:[#allocation2 + $0x10] sm:$0xff] }
  0x4b   : > { %1332 = vmatprep.subr.bf16.mxu1 %v1413_v46  ;;  %v368_v44 = vld [vmem:[#allocation2 + $0x18] sm:$0xff] }
  0x4c   : > { %1253 = vmatpush3.bf16.msra.mxu0 %v1412_v47 }
  0x4d   : > { %1254 = vmatprep.subr.bf16.mxu0 %v1414_v48 }
  0x4e   : > { %1333 = vmatpush3.bf16.msra.mxu1 %v1413_v46 }
  0x4f   : > { %1334 = vmatprep.subr.bf16.mxu1 %v1416_v49 }
  0x50   : > { %1255 = vmatpush3.bf16.msra.mxu0 %v1415_v50 }
  0x51   : > { %1256 = vmatprep.subr.bf16.mxu0 %v1417_v51 }
  0x52   : > { %1335 = vmatpush3.bf16.msra.mxu1 %v1416_v49 }
  0x53   : > { %1336 = vmatprep.subr.bf16.mxu1 %v1419_v53 }
  0x54   : > { %1257 = vmatpush3.bf16.msra.mxu0 %v1418_v52 }
  0x55   : > { %1258 = vmatprep.subr.bf16.mxu0 %v1420_v54 }
  0x56   : > { %1337 = vmatpush3.bf16.msra.mxu1 %v1419_v53 }
  0x57   : > { %1338 = vmatprep.subr.bf16.mxu1 %v1422_v55 }
  0x58   : > { %1259 = vmatpush3.bf16.msra.mxu0 %v1421_v58 }
  0x5a   : > { %1339 = vmatpush3.bf16.msra.mxu1 %v1422_v55  ;;  %v369_v55 = vld [vmem:[#allocation2 + $0x20] sm:$0xff] }
  0x5b   : > { %766 = vmatmul.mubr.bf16.vlgmr.msra.gmra.mrb[0].mxu0 %v1423_v59 }
  0x5c   : > { %773 = vmatprep.mubr.bf16.mxu0 %v1428_v60  ;;  %v370_v60 = vld [vmem:[#allocation2 + $0x28] sm:$0xff] }
  0x5d   : > { %1341 = vmatmul.mubr.bf16.vlgmr.msra.gmra.mrb[0].mxu1 %v1427_v61 }
  0x5e   : > { %1344 = vmatprep.mubr.bf16.mxu1 %v1434_v62 }
  0x63   : > { %774 = vmatmul.mubr.bf16.gmra.mrb[4].mxu0 %v1430_v63 }
  0x64   : > { %781 = vmatprep.mubr.bf16.mxu0 %v1431_v0 }
  0x65   : > { %1345 = vmatmul.mubr.bf16.gmra.mrb[4].mxu1 %v1435_v1 }
  0x66   : > { %1348 = vmatprep.mubr.bf16.mxu1 %v1442_v2 }
  0x6b   : > { %782 = vmatmul.mubr.bf16.gmra.mrb[8].mxu0 %v1433_v3 }
  0x6c   : > { %789 = vmatprep.mubr.bf16.mxu0 %v1436_v4 }
  0x6d   : > { %1349 = vmatmul.mubr.bf16.gmra.mrb[8].mxu1 %v1443_v5 }
  0x6e   : > { %1352 = vmatprep.mubr.bf16.mxu1 %v1450_v6  ;;  %v371_v6 = vld [vmem:[#allocation2 + $0x30] sm:$0xff] }
  0x73   : > { %790 = vmatmul.mubr.bf16.gmra.mrb[12].mxu0 %v1438_v7 }
  0x74   : > { %797 = vmatprep.mubr.bf16.mxu0 %v1439_v8 }
  0x75   : > { %1353 = vmatmul.mubr.bf16.gmra.mrb[12].mxu1 %v1451_v9 }
  0x7b   : > { %798 = vmatmul.mubr.bf16.gmra.mrb[16].mxu0 %v1441_v10 }
  0x7c   : > { %805 = vmatprep.mubr.bf16.mxu0 %v1444_v11 }
  0x83   : > { %806 = vmatmul.mubr.bf16.gmra.mrb[20].mxu0 %v1446_v12  ;;  %v372_v12 = vld [vmem:[#allocation2 + $0x38] sm:$0xff] }
  0x84   : > { %813 = vmatprep.mubr.bf16.mxu0 %v1447_v13 }
  0x8b   : > { %814 = vmatmul.mubr.bf16.gmra.mrb[24].mxu0 %v1449_v14 }
  0x8c   : > { %821 = vmatprep.mubr.bf16.mxu0 %v1452_v15 }
  0x93   : > { %822 = vmatmul.mubr.bf16.gmra.mrb[28].mxu0 %v1454_v16 }
 0x12e   : > { %v1260_v17 = vpop.f32.mrb[0].mxu0 }
 0x12f   : > { %v1261_v18 = vpop.f32.mrb[1].mxu0 }
 0x130   : > { %v1262_v19 = vadd.f32 %v1261_v18, %v1260_v17  ;;  %v1263_v20 = vpop.f32.mrb[2].mxu0  ;;  %v1342_v21 = vpop.f32.mrb[0].mxu1 }
 0x131   : > { %v1264_v22 = vpop.f32.mrb[3].mxu0  ;;  %v864_v24 = vpop.f32.mrb[1].mxu1 }
 0x132   : > { %v1265_v25 = vadd.f32 %v1264_v22, %v1263_v20  ;;  %v865_v26 = vadd.f32 %v1262_v19, %v864_v24  ;;  %v1343_v27 = vpop.f32.mrb[2].mxu1  ;;  %v373_v22 = vld [vmem:[#allocation2 + $0x40] sm:$0xff] }
 0x133   : > { %v867_v29 = vpop.f32.mrb[3].mxu1 }
 0x134   : > { %v927_v30 = vadd.f32 %v865_v26, %v365_v23  ;;  %v868_v31 = vadd.f32 %v1265_v25, %v867_v29  ;;  %v374_v25 = vld [vmem:[#allocation2 + $0x48] sm:$0xff] }
 0x136   : > { %943 = vst [vmem:[#allocation2] sm:$0xff] %v927_v30  ;;  %v928_v32 = vadd.f32 %v868_v31, %v366_v28  ;;  %v1266_v33 = vpop.f32.mrb[4].mxu0 }
 0x137   : > { %v1267_v34 = vpop.f32.mrb[5].mxu0 }
 0x138   : > { %944 = vst [vmem:[#allocation2 + $0x8] sm:$0xff] %v928_v32  ;;  %v1268_v35 = vadd.f32 %v1267_v34, %v1266_v33  ;;  %v1269_v36 = vpop.f32.mrb[6].mxu0  ;;  %v1346_v37 = vpop.f32.mrb[4].mxu1  ;;  %v375_v33 = vld [vmem:[#allocation2 + $0x50] sm:$0xff] }
 0x139   : > { %v1270_v39 = vpop.f32.mrb[7].mxu0  ;;  %v880_v40 = vpop.f32.mrb[5].mxu1 }
 0x13a   : > { %v873_v41 = vadd.f32 %v1342_v21, %v1268_v35  ;;  %v1271_v42 = vadd.f32 %v1270_v39, %v1269_v36  ;;  %v1347_v43 = vpop.f32.mrb[6].mxu1 }
 0x13b   : > { %v883_v45 = vpop.f32.mrb[7].mxu1 }
 0x13c   : > { %v929_v46 = vadd.f32 %v873_v41, %v367_v38  ;;  %v876_v47 = vadd.f32 %v1343_v27, %v1271_v42 }
 0x13e   : > { %945 = vst [vmem:[#allocation2 + $0x10] sm:$0xff] %v929_v46  ;;  %v930_v48 = vadd.f32 %v876_v47, %v368_v44  ;;  %v1272_v49 = vpop.f32.mrb[8].mxu0  ;;  %v377_v46 = vld [vmem:[#allocation2 + $0x60] sm:$0xff] }
 0x13f   : > { %v1273_v50 = vpop.f32.mrb[9].mxu0 }
 0x140   : > { %946 = vst [vmem:[#allocation2 + $0x18] sm:$0xff] %v930_v48  ;;  %v1274_v51 = vadd.f32 %v1273_v50, %v1272_v49  ;;  %v1275_v52 = vpop.f32.mrb[10].mxu0  ;;  %v1350_v53 = vpop.f32.mrb[8].mxu1  ;;  %v378_v49 = vld [vmem:[#allocation2 + $0x68] sm:$0xff] }
 0x141   : > { %v1276_v54 = vpop.f32.mrb[11].mxu0  ;;  %v896_v56 = vpop.f32.mrb[9].mxu1 }
 0x142   : > { %v1277_v57 = vadd.f32 %v1276_v54, %v1275_v52  ;;  %v881_v58 = vadd.f32 %v1274_v51, %v880_v40  ;;  %v1351_v59 = vpop.f32.mrb[10].mxu1 }
 0x143   : > { %v899_v61 = vpop.f32.mrb[11].mxu1 }
 0x144   : > { %v931_v62 = vadd.f32 %v881_v58, %v369_v55  ;;  %v884_v63 = vadd.f32 %v1277_v57, %v883_v45  ;;  %v379_v57 = vld [vmem:[#allocation2 + $0x70] sm:$0xff] }
 0x146   : > { %947 = vst [vmem:[#allocation2 + $0x20] sm:$0xff] %v931_v62  ;;  %v932_v0 = vadd.f32 %v884_v63, %v370_v60  ;;  %v1278_v1 = vpop.f32.mrb[12].mxu0 }
 0x147   : > { %v1279_v2 = vpop.f32.mrb[13].mxu0 }
 0x148   : > { %948 = vst [vmem:[#allocation2 + $0x28] sm:$0xff] %v932_v0  ;;  %v1280_v3 = vadd.f32 %v1279_v2, %v1278_v1  ;;  %v1281_v4 = vpop.f32.mrb[14].mxu0  ;;  %v1354_v5 = vpop.f32.mrb[12].mxu1  ;;  %v963_v1 = vld [vmem:[#allocation2] sm:$0xff] (!%p1237_p11) }
 0x149   : > { %v1282_v7 = vpop.f32.mrb[15].mxu0  ;;  %v912_v8 = vpop.f32.mrb[13].mxu1  ;;  %v1238_v2 = vld [vmem:[%s1756_s2] ss:$0 sm:$0xff] (!%p1237_p11) }
 0x14a   : > { %v889_v9 = vadd.f32 %v1346_v37, %v1280_v3  ;;  %v1283_v10 = vadd.f32 %v1282_v7, %v1281_v4  ;;  %v1355_v11 = vpop.f32.mrb[14].mxu1  ;;  %v376_v37 = vld [vmem:[#allocation2 + $0x58] sm:$0xff]  ;;  %v964_v3 = vld [vmem:[#allocation2 + $0x8] sm:$0xff] (!%p1237_p11)  ;;  %v986_v4 = vadd.f32 (!%p1237_p11), %v1238_v2, %v963_v1  ;;  %v965_v7 = vld [vmem:[#allocation2 + $0x10] sm:$0xff] (!%p1237_p11) }
 0x14b   : > { %v915_v13 = vpop.f32.mrb[15].mxu1 }
 0x14c   : > { %v933_v14 = vadd.f32 %v889_v9, %v371_v6  ;;  %v892_v15 = vadd.f32 %v1347_v43, %v1283_v10  ;;  %v987_v6 = vadd.f32 (!%p1237_p11), %v1238_v2, %v964_v3  ;;  %v988_v9 = vadd.f32 (!%p1237_p11), %v1238_v2, %v965_v7 }
 0x14e   : > { %949 = vst [vmem:[#allocation2 + $0x30] sm:$0xff] %v933_v14  ;;  %v934_v16 = vadd.f32 %v892_v15, %v372_v12  ;;  %v1284_v17 = vpop.f32.mrb[16].mxu0  ;;  %v1002_v15 = vmax.f32 (!%p1237_p11), %v986_v4, 0.0 }
 0x14f   : > { %v1285_v18 = vpop.f32.mrb[17].mxu0  ;;  %v968_v12 = vld [vmem:[#allocation2 + $0x28] sm:$0xff] (!%p1237_p11) }
 0x150   : > { %950 = vst [vmem:[#allocation2 + $0x38] sm:$0xff] %v934_v16  ;;  %v1286_v19 = vadd.f32 %v1285_v18, %v1284_v17  ;;  %v1287_v20 = vpop.f32.mrb[18].mxu0  ;;  %v1003_v16 = vmax.f32 (!%p1237_p11), %v987_v6, 0.0  ;;  %v991_v17 = vadd.f32 (!%p1237_p11), %v1238_v2, %v968_v12  ;;  %1018 = vst [vmem:[%s1757_s3] sm:$0xff] (!%p1237_p11), %v1002_v15 }
 0x151   : > { %v1288_v21 = vpop.f32.mrb[19].mxu0 }
 0x152   : > { %v1289_v23 = vadd.f32 %v1288_v21, %v1287_v20  ;;  %v897_v24 = vadd.f32 %v1286_v19, %v896_v56  ;;  %1019 = vst [vmem:[%s1757_s3 + $0x8] sm:$0xff] (!%p1237_p11), %v1003_v16 }
 0x154   : > { %v935_v26 = vadd.f32 %v897_v24, %v373_v22  ;;  %v900_v27 = vadd.f32 %v1289_v23, %v899_v61  ;;  %v380_v61 = vld [vmem:[#allocation2 + $0x78] sm:$0xff]  ;;  %v1004_v22 = vmax.f32 (!%p1237_p11), %v988_v9, 0.0 }
 0x156   : > { %951 = vst [vmem:[#allocation2 + $0x40] sm:$0xff] %v935_v26  ;;  %v936_v28 = vadd.f32 %v900_v27, %v374_v25  ;;  %v1290_v29 = vpop.f32.mrb[20].mxu0  ;;  %1020 = vst [vmem:[%s1757_s3 + $0x10] sm:$0xff] (!%p1237_p11), %v1004_v22 }
 0x157   : > { %v1291_v30 = vpop.f32.mrb[21].mxu0  ;;  %v970_v14 = vld [vmem:[#allocation2 + $0x38] sm:$0xff] (!%p1237_p11) }
 0x158   : > { %952 = vst [vmem:[#allocation2 + $0x48] sm:$0xff] %v936_v28  ;;  %v1292_v31 = vadd.f32 %v1291_v30, %v1290_v29  ;;  %v1293_v32 = vpop.f32.mrb[22].mxu0  ;;  %v993_v25 = vadd.f32 (!%p1237_p11), %v1238_v2, %v970_v14  ;;  %v1007_v29 = vmax.f32 (!%p1237_p11), %v991_v17, 0.0 }
 0x159   : > { %v1294_v34 = vpop.f32.mrb[23].mxu0 }
 0x15a   : > { %v905_v35 = vadd.f32 %v1350_v53, %v1292_v31  ;;  %v1295_v36 = vadd.f32 %v1294_v34, %v1293_v32  ;;  %1023 = vst [vmem:[%s1757_s3 + $0x28] sm:$0xff] (!%p1237_p11), %v1007_v29 }
 0x15c   : > { %v937_v38 = vadd.f32 %v905_v35, %v375_v33  ;;  %v908_v39 = vadd.f32 %v1351_v59, %v1295_v36  ;;  %v1009_v35 = vmax.f32 (!%p1237_p11), %v993_v25, 0.0 }
 0x15d   : > { %v971_v19 = vld [vmem:[#allocation2 + $0x40] sm:$0xff] (!%p1237_p11) }
 0x15e   : > { %953 = vst [vmem:[#allocation2 + $0x50] sm:$0xff] %v937_v38  ;;  %v938_v40 = vadd.f32 %v908_v39, %v376_v37  ;;  %v1296_v41 = vpop.f32.mrb[24].mxu0  ;;  %v994_v31 = vadd.f32 (!%p1237_p11), %v1238_v2, %v971_v19  ;;  %1025 = vst [vmem:[%s1757_s3 + $0x38] sm:$0xff] (!%p1237_p11), %v1009_v35 }
 0x15f   : > { %v1297_v42 = vpop.f32.mrb[25].mxu0  ;;  %v972_v20 = vld [vmem:[#allocation2 + $0x48] sm:$0xff] (!%p1237_p11) }
 0x160   : > { %954 = vst [vmem:[#allocation2 + $0x58] sm:$0xff] %v938_v40  ;;  %v1298_v43 = vadd.f32 %v1297_v42, %v1296_v41  ;;  %v1299_v44 = vpop.f32.mrb[26].mxu0  ;;  %v995_v32 = vadd.f32 (!%p1237_p11), %v1238_v2, %v972_v20  ;;  %v1010_v39 = vmax.f32 (!%p1237_p11), %v994_v31, 0.0 }
 0x161   : > { %v1300_v45 = vpop.f32.mrb[27].mxu0 }
 0x162   : > { %v1301_v47 = vadd.f32 %v1300_v45, %v1299_v44  ;;  %v913_v48 = vadd.f32 %v1298_v43, %v912_v8  ;;  %v967_v8 = vld [vmem:[#allocation2 + $0x20] sm:$0xff] (!%p1237_p11)  ;;  %v1011_v40 = vmax.f32 (!%p1237_p11), %v995_v32, 0.0  ;;  %1026 = vst [vmem:[%s1757_s3 + $0x40] sm:$0xff] (!%p1237_p11), %v1010_v39 }
 0x164   : > { %v939_v50 = vadd.f32 %v913_v48, %v377_v46  ;;  %v916_v51 = vadd.f32 %v1301_v47, %v915_v13  ;;  %v969_v13 = vld [vmem:[#allocation2 + $0x30] sm:$0xff] (!%p1237_p11)  ;;  %1027 = vst [vmem:[%s1757_s3 + $0x48] sm:$0xff] (!%p1237_p11), %v1011_v40 }
 0x165   : > { %v992_v18 = vadd.f32 (!%p1237_p11), %v1238_v2, %v969_v13  ;;  %v973_v21 = vld [vmem:[#allocation2 + $0x50] sm:$0xff] (!%p1237_p11) }
 0x166   : > { %955 = vst [vmem:[#allocation2 + $0x60] sm:$0xff] %v939_v50  ;;  %v940_v52 = vadd.f32 %v916_v51, %v378_v49  ;;  %v1302_v53 = vpop.f32.mrb[28].mxu0  ;;  %v996_v36 = vadd.f32 (!%p1237_p11), %v1238_v2, %v973_v21 }
 0x167   : > { %v1303_v54 = vpop.f32.mrb[29].mxu0  ;;  %v974_v26 = vld [vmem:[#allocation2 + $0x58] sm:$0xff] (!%p1237_p11)  ;;  %v1008_v30 = vmax.f32 (!%p1237_p11), %v992_v18, 0.0 }
 0x168   : > { %956 = vst [vmem:[#allocation2 + $0x68] sm:$0xff] %v940_v52  ;;  %v1304_v55 = vadd.f32 %v1303_v54, %v1302_v53  ;;  %v1305_v56 = vpop.f32.mrb[30].mxu0  ;;  %v997_v37 = vadd.f32 (!%p1237_p11), %v1238_v2, %v974_v26  ;;  %v1012_v43 = vmax.f32 (!%p1237_p11), %v996_v36, 0.0 }
 0x169   : > { %v1306_v58 = vpop.f32.mrb[31].mxu0  ;;  %1024 = vst [vmem:[%s1757_s3 + $0x30] sm:$0xff] (!%p1237_p11), %v1008_v30 }
 0x16a   : > { %v921_v59 = vadd.f32 %v1354_v5, %v1304_v55  ;;  %v1307_v60 = vadd.f32 %v1306_v58, %v1305_v56  ;;  %962 = sbr.rel (%p1237_p11) target bundleno = 381 (0x17d), region = 66  ;;  %v966_v5 = vld [vmem:[#allocation2 + $0x18] sm:$0xff] (!%p1237_p11)  ;;  %v1013_v44 = vmax.f32 (!%p1237_p11), %v997_v37, 0.0  ;;  %1028 = vst [vmem:[%s1757_s3 + $0x50] sm:$0xff] (!%p1237_p11), %v1012_v43 }
 0x16b   : > { %v989_v10 = vadd.f32 (!%p1237_p11), %v1238_v2, %v966_v5 }
 0x16c   : > { %v941_v62 = vadd.f32 %v921_v59, %v379_v57  ;;  %v924_v63 = vadd.f32 %v1355_v11, %v1307_v60  ;;  %v990_v11 = vadd.f32 (!%p1237_p11), %v1238_v2, %v967_v8  ;;  %1029 = vst [vmem:[%s1757_s3 + $0x58] sm:$0xff] (!%p1237_p11), %v1013_v44 }
 0x16d   : > { %v1005_v23 = vmax.f32 (!%p1237_p11), %v989_v10, 0.0  ;;  %v975_v27 = vld [vmem:[#allocation2 + $0x60] sm:$0xff] (!%p1237_p11) }
 0x16e   : > { %957 = vst [vmem:[#allocation2 + $0x70] sm:$0xff] %v941_v62  ;;  %v942_v0 = vadd.f32 %v924_v63, %v380_v61  ;;  %v1006_v24 = vmax.f32 (!%p1237_p11), %v990_v11, 0.0  ;;  %v998_v38 = vadd.f32 (!%p1237_p11), %v1238_v2, %v975_v27 }
 0x16f   : > { %v976_v28 = vld [vmem:[#allocation2 + $0x68] sm:$0xff] (!%p1237_p11)  ;;  %1021 = vst [vmem:[%s1757_s3 + $0x18] sm:$0xff] (!%p1237_p11), %v1005_v23 }
 0x170   : > { %958 = vst [vmem:[#allocation2 + $0x78] sm:$0xff] %v942_v0  ;;  %1022 = vst [vmem:[%s1757_s3 + $0x20] sm:$0xff] (!%p1237_p11), %v1006_v24  ;;  %v999_v41 = vadd.f32 (!%p1237_p11), %v1238_v2, %v976_v28  ;;  %v1014_v45 = vmax.f32 (!%p1237_p11), %v998_v38, 0.0 }
 0x172   : > { %v1015_v47 = vmax.f32 %v999_v41, 0.0  ;;  %1030 = vst [vmem:[%s1757_s3 + $0x60] sm:$0xff] %v1014_v45 }
 0x174   : > { %1031 = vst [vmem:[%s1757_s3 + $0x68] sm:$0xff] %v1015_v47 }
 0x175   : > { %v977_v33 = vld [vmem:[#allocation2 + $0x70] sm:$0xff] }
 0x176   : > { %v1000_v42 = vadd.f32 %v1238_v2, %v977_v33 }
 0x177   : > { %v978_v34 = vld [vmem:[#allocation2 + $0x78] sm:$0xff] }
 0x178   : > { %v1001_v46 = vadd.f32 %v1238_v2, %v978_v34  ;;  %v1016_v48 = vmax.f32 %v1000_v42, 0.0 }
 0x17a   : > { %v1017_v49 = vmax.f32 %v1001_v46, 0.0  ;;  %1032 = vst [vmem:[%s1757_s3 + $0x70] sm:$0xff] %v1016_v48 }
 0x17c   : > { %1033 = vst [vmem:[%s1757_s3 + $0x78] sm:$0xff] %v1017_v49 }
 0x17d PF: > { %s13_s16 = sadd.s32 1, %s1493_s16   ;;  %s1758_s12 = smov %s1481_s13 }
 0x17e   : > { %p10_p12 = scmp.ge.s32.totalorder %s13_s16, 5   ;;  %s1759_s13 = smov %s1551_s20 }
 0x17f   : > { %s1760_s14 = smov %s1489_s15  ;;  %s1761_s15 = smov %s1763_s17 }
 0x180   :  { %12 = sbr.rel (!%p10_p12) target bundleno = 3 (0x3), region = 113 }

// kernel: feature_extractor_forward.31
= control target key start
LH: loop header
LB: loop body
LE: loop exit
PB: predicated region body
PF: predicated region fallthrough
CT: control target
= control target key end

     0   :  { %s114_s0 = inlined_call_operand.vmem [shape: f32[4,32,128], index: 0, kind: input, shape index: {}]   ;;  %s115_s1 = inlined_call_operand.vmem [shape: f32[32,128], index: 1, kind: output, shape index: {}]  }
   0x1   :  { %v8_v0 = vld [vmem:[%s114_s0] sm:$0xff]  ;;  %v9_v4 = vld [vmem:[%s114_s0 + $0x8] sm:$0xff]  ;;  %v10_v9 = vld [vmem:[%s114_s0 + $0x10] sm:$0xff] }
   0x2   :  { %v12_v1 = vld [vmem:[%s114_s0 + $0x20] sm:$0xff]  ;;  %v13_v5 = vld [vmem:[%s114_s0 + $0x28] sm:$0xff]  ;;  %v14_v12 = vld [vmem:[%s114_s0 + $0x30] sm:$0xff] }
   0x3   :  { %v16_v2 = vld [vmem:[%s114_s0 + $0x40] sm:$0xff]  ;;  %v24_v3 = vmax.f32 %v8_v0, %v12_v1  ;;  %v17_v7 = vld [vmem:[%s114_s0 + $0x48] sm:$0xff]  ;;  %v27_v8 = vmax.f32 %v9_v4, %v13_v5  ;;  %v18_v13 = vld [vmem:[%s114_s0 + $0x50] sm:$0xff]  ;;  %v30_v15 = vmax.f32 %v10_v9, %v14_v12 }
   0x4   :  { %v20_v6 = vld [vmem:[%s114_s0 + $0x60] sm:$0xff]  ;;  %v21_v11 = vld [vmem:[%s114_s0 + $0x68] sm:$0xff]  ;;  %v11_v16 = vld [vmem:[%s114_s0 + $0x18] sm:$0xff] }
   0x5   :  { %v25_v10 = vmax.f32 %v24_v3, %v16_v2  ;;  %v28_v14 = vmax.f32 %v27_v8, %v17_v7  ;;  %v15_v17 = vld [vmem:[%s114_s0 + $0x38] sm:$0xff]  ;;  %v22_v20 = vld [vmem:[%s114_s0 + $0x70] sm:$0xff]  ;;  %v31_v23 = vmax.f32 %v30_v15, %v18_v13 }
   0x6   :  { %v19_v18 = vld [vmem:[%s114_s0 + $0x58] sm:$0xff]  ;;  %v33_v21 = vmax.f32 %v11_v16, %v15_v17 }
   0x7   :  { %v26_v19 = vmax.f32 %v25_v10, %v20_v6  ;;  %v29_v22 = vmax.f32 %v28_v14, %v21_v11  ;;  %v23_v24 = vld [vmem:[%s114_s0 + $0x78] sm:$0xff]  ;;  %v32_v26 = vmax.f32 %v31_v23, %v22_v20 }
   0x8   :  { %v34_v25 = vmax.f32 %v33_v21, %v19_v18 }
   0x9   :  { %36 = vst [vmem:[%s115_s1] sm:$0xff] %v26_v19  ;;  %37 = vst [vmem:[%s115_s1 + $0x8] sm:$0xff] %v29_v22 }
   0xa   :  { %v35_v27 = vmax.f32 %v34_v25, %v23_v24  ;;  %38 = vst [vmem:[%s115_s1 + $0x10] sm:$0xff] %v32_v26 }
   0xc   :  { %39 = vst [vmem:[%s115_s1 + $0x18] sm:$0xff] %v35_v27 }

// kernel: feature_extractor_forward.32
= control target key start
LH: loop header
LB: loop body
LE: loop exit
PB: predicated region body
PF: predicated region fallthrough
CT: control target
= control target key end

     0   :  { %s1232_s12 = smov 0   ;;  %s1234_s13 = smov 0   ;;  %s1386_s0 = inlined_call_operand.vmem [shape: bf16[32,1152], index: 0, kind: input, shape index: {}]   ;;  %s1387_s1 = inlined_call_operand.vmem [shape: bf16[1152,256], index: 1, kind: input, shape index: {}]   ;;  %s1388_s2 = inlined_call_operand.vmem [shape: f32[1,256], index: 2, kind: input, shape index: {}]   ;;  %s1389_s3 = inlined_call_operand.vmem [shape: f32[32,256], index: 3, kind: output, shape index: {}]  }
   0x1   :  { %s1236_s14 = smov 0   ;;  %s1238_s15 = smov 0  }
   0x2   :  { %s1240_s16 = smov 0  }
   0x3 LB: > { %s25_s17 = sadd.s32 1, %s1204_s15  ;;  %p48_p1 = scmp.ne.s32.totalorder %s1196_s13, %s1192_s12  ;;  %s1208_s16 = sphi %s1240_s16, %s13_s16   ;;  %s1204_s15 = sphi %s1238_s15, %s1393_s15   ;;  %s1200_s14 = sphi %s1236_s14, %s1392_s14   ;;  %s1196_s13 = sphi %s1234_s13, %s1391_s13   ;;  %s1192_s12 = sphi %s1232_s12, %s1390_s12  }
   0x4   : > { %p26_p0 = scmp.ge.s32.totalorder %s25_s17, 3  ;;  %p49_p2 = scmp.eq.s32.totalorder %s1208_s16, 0 }
   0x5   : > { %s41_s19 = sadd.s32 1, %s1196_s13  ;;  %p963_p5 = scmp.ge.s32.totalorder %s1208_s16, 3 }
   0x6   : > { %s1395_s17 = smov (%p26_p0, %s25_s17), 0  ;;  %p50_p3 = por %p49_p2, %p48_p1 }
   0x7   : > { %s37_s18 = ssub.s32 %s1204_s15, %s1395_s17  ;;  %164 = sbr.rel (%p963_p5) target bundleno = 23 (0x17), region = 20 }
   0x8   : > { %p39_p4 = scmp.eq.s32.totalorder %s37_s18, 0 }
   0xa   : > { %s1267_s20 = scalar_select %p39_p4, %s1196_s13, %s41_s19  }
   0xe   : > { %167 = sbr.rel (!%p50_p3) target bundleno = 23 (0x17), region = 24  ;;  %s169_s21 = sand.u32 (%p50_p3), 1, %s1196_s13  }
   0xf   : > { %s1036_s22 = smul.u32 (%p50_p3), 12, %s1204_s15 }
  0x10   : > { %s1046_s23 = smul.u32 (%p50_p3), 48, %s169_s21 }
  0x11   : > { %s177_s26 = scalar_lea.vmem (%p50_p3), %s1386_s0, %s1036_s22 }
  0x12   : > { %v192_v0 = vld [vmem:[%s177_s26] sm:$0xff] (%p50_p3)  ;;  %v196_v2 = vld [vmem:[%s177_s26 + $0x48] sm:$0xff] (%p50_p3)  ;;  %s171_s27 = scalar_lea.vmem (%p50_p3), [#allocation3], %s1046_s23  ;;  %v969_v6 = vld [vmem:[%s177_s26 + $0x50] sm:$0xf] (%p50_p3) }
  0x13   : > { %v194_v1 = vld [vmem:[%s177_s26 + $0x24] sm:$0xff] (%p50_p3)  ;;  %193 = vst [vmem:[%s171_s27] sm:$0xff] (%p50_p3), %v192_v0  ;;  %197 = vst [vmem:[%s171_s27 + $0x18] sm:$0xff] (%p50_p3), %v196_v2  ;;  %v198_v3 = vld [vmem:[%s177_s26 + $0x6c] sm:$0xff] (%p50_p3) }
  0x14   : > { %195 = vst [vmem:[%s171_s27 + $0xc] sm:$0xff] (%p50_p3), %v194_v1  ;;  %v965_v4 = vld [vmem:[%s177_s26 + $0x8] sm:$0xf] (%p50_p3)  ;;  %v967_v5 = vld [vmem:[%s177_s26 + $0x2c] sm:$0xf] (%p50_p3)  ;;  %199 = vst [vmem:[%s171_s27 + $0x24] sm:$0xff] (%p50_p3), %v198_v3 }
  0x15   : > { %966 = vst [vmem:[%s171_s27 + $0x8] sm:$0xf] %v965_v4  ;;  %968 = vst [vmem:[%s171_s27 + $0x14] sm:$0xf] %v967_v5  ;;  %v971_v7 = vld [vmem:[%s177_s26 + $0x74] sm:$0xf] }
  0x16   : > { %970 = vst [vmem:[%s171_s27 + $0x20] sm:$0xf] %v969_v6  ;;  %972 = vst [vmem:[%s171_s27 + $0x2c] sm:$0xf] %v971_v7 }
  0x17 PF: > { %p973_p6 = scmp.ge.s32.totalorder %s1208_s16, 1  ;;  %p234_p7 = scmp.lt.s32.totalorder %s1208_s16, 4 }
  0x19   : > { %p235_p8 = pnand %p973_p6, %p234_p7 }
  0x1a   : > { %s241_s28 = sand.u32 (!%p235_p8), 1, %s1192_s12   ;;  %s285_s29 = smul.u32 (!%p235_p8), 48, %s1200_s14 }
  0x1b   : > { %238 = sbr.rel (%p235_p8) target bundleno = 346 (0x15a), region = 54  ;;  %p976_p10 = scmp.ne.s32.totalorder (!%p235_p8), %s1200_s14, 0 }
  0x1c   : > { %s1047_s30 = smul.u32 (!%p235_p8), 48, %s241_s28  ;;  %p287_p9 = scmp.lt.s32.totalorder (!%p235_p8), %s285_s29, 143 }
  0x1e   : > { %s1284_s8 = scalar_lea.vmem (!%p235_p8), [#allocation3], %s1047_s30 }
  0x22   : > { %s1397_s29 = smov (!%p287_p9, %s285_s29), 143  ;;  %318 = sbr.rel (%p976_p10) target bundleno = 41 (0x29), region = 62 }
  0x23   : > { %s1037_s4 = sshll.u32 %s1397_s29, 3  ;;  %v1210_v8 = vmov (!%p976_p10), 0.0  }
  0x24   : > { %s1282_s7 = scalar_lea.vmem %s1387_s1, %s1037_s4  ;;  %319 = vst [vmem:[#allocation2] sm:$0xff] (!%p976_p10), %v1210_v8  ;;  %320 = vst [vmem:[#allocation2 + $0x8] sm:$0xff] (!%p976_p10), %v1210_v8 }
  0x25   : > { %321 = vst [vmem:[#allocation2 + $0x10] sm:$0xff] (!%p976_p10), %v1210_v8  ;;  %322 = vst [vmem:[#allocation2 + $0x18] sm:$0xff] (!%p976_p10), %v1210_v8 }
  0x26   : > { %323 = vst [vmem:[#allocation2 + $0x20] sm:$0xff] (!%p976_p10), %v1210_v8  ;;  %324 = vst [vmem:[#allocation2 + $0x28] sm:$0xff] (!%p976_p10), %v1210_v8 }
  0x27   : > { %325 = vst [vmem:[#allocation2 + $0x30] sm:$0xff] (!%p976_p10), %v1210_v8  ;;  %326 = vst [vmem:[#allocation2 + $0x38] sm:$0xff] (!%p976_p10), %v1210_v8 }
  0x29 PF: > { %v1090_v9 = vld [vmem:[%s1282_s7 + $0x4] ss:$8 sps:$4 sm:$0xff]   ;;  %v1092_v10 = vld [vmem:[%s1282_s7] ss:$8 sps:$4 sm:$0xff]   ;;  %v1211_v11 = vmov 0   ;;  %p1031_p11 = scmp.ne.s32.totalorder %s1200_s14, 2 }
  0x2a   : > { %748 = vmatprep.mubr.bf16.mxu0 %v1211_v11  ;;  %663 = vmatprep.subr.bf16.mxu1 %v1090_v9  ;;  %v1093_v12 = vld [vmem:[%s1282_s7 + $0x14] ss:$8 sps:$4 sm:$0xff]   ;;  %v1095_v13 = vld [vmem:[%s1282_s7 + $0x10] ss:$8 sps:$4 sm:$0xff]   ;;  %v1096_v14 = vld [vmem:[%s1282_s7 + $0x24] ss:$8 sps:$4 sm:$0xff]  }
  0x2b   : > { %664 = vmatpush1.bf16.msra.mxu1 %v1092_v10  ;;  %v1098_v15 = vld [vmem:[%s1282_s7 + $0x20] ss:$8 sps:$4 sm:$0xff]   ;;  %v1099_v16 = vld [vmem:[%s1282_s7 + $0x34] ss:$8 sps:$4 sm:$0xff]   ;;  %v1101_v17 = vld [vmem:[%s1282_s7 + $0x30] ss:$8 sps:$4 sm:$0xff]  }
  0x2c   : > { %665 = vmatprep.subr.bf16.mxu1 %v1093_v12  ;;  %v1114_v18 = vld [vmem:[%s1282_s7 + $0x104] ss:$8 sps:$4 sm:$0xff]   ;;  %v1116_v19 = vld [vmem:[%s1282_s7 + $0x100] ss:$8 sps:$4 sm:$0xff]   ;;  %v1120_v21 = vld [vmem:[%s1282_s7 + $0x114] ss:$8 sps:$4 sm:$0xff]  }
  0x2d   : > { %v1102_v20 = vld [vmem:[%s1282_s7 + $0x44] ss:$8 sps:$4 sm:$0xff]   ;;  %716 = vmatprep.subr.bf16.mxu0 %v1114_v18  ;;  %v1122_v22 = vld [vmem:[%s1282_s7 + $0x110] ss:$8 sps:$4 sm:$0xff]   ;;  %v1104_v23 = vld [vmem:[%s1282_s7 + $0x40] ss:$8 sps:$4 sm:$0xff]  }
  0x2e   : > { %717 = vmatpush1.bf16.msra.mxu0 %v1116_v19  ;;  %v1105_v24 = vld [vmem:[%s1282_s7 + $0x54] ss:$8 sps:$4 sm:$0xff]   ;;  %v1126_v25 = vld [vmem:[%s1282_s7 + $0x124] ss:$8 sps:$4 sm:$0xff]   ;;  %v1128_v26 = vld [vmem:[%s1282_s7 + $0x120] ss:$8 sps:$4 sm:$0xff]  }
  0x2f   : > { %666 = vmatpush1.bf16.msra.mxu1 %v1095_v13  ;;  %718 = vmatprep.subr.bf16.mxu0 %v1120_v21  ;;  %v1107_v27 = vld [vmem:[%s1282_s7 + $0x50] ss:$8 sps:$4 sm:$0xff]   ;;  %v1132_v28 = vld [vmem:[%s1282_s7 + $0x134] ss:$8 sps:$4 sm:$0xff]   ;;  %v1108_v29 = vld [vmem:[%s1282_s7 + $0x64] ss:$8 sps:$4 sm:$0xff]  }
  0x30   : > { %667 = vmatprep.subr.bf16.mxu1 %v1096_v14  ;;  %v1134_v30 = vld [vmem:[%s1282_s7 + $0x130] ss:$8 sps:$4 sm:$0xff]   ;;  %v1110_v31 = vld [vmem:[%s1282_s7 + $0x60] ss:$8 sps:$4 sm:$0xff]   ;;  %v1138_v32 = vld [vmem:[%s1282_s7 + $0x144] ss:$8 sps:$4 sm:$0xff]  }
  0x31   : > { %v1111_v33 = vld [vmem:[%s1282_s7 + $0x74] ss:$8 sps:$4 sm:$0xff]   ;;  %v1140_v34 = vld [vmem:[%s1282_s7 + $0x140] ss:$8 sps:$4 sm:$0xff]   ;;  %v1113_v35 = vld [vmem:[%s1282_s7 + $0x70] ss:$8 sps:$4 sm:$0xff]  }
  0x32   : > { %719 = vmatpush1.bf16.msra.mxu0 %v1122_v22  ;;  %v1144_v36 = vld [vmem:[%s1282_s7 + $0x154] ss:$8 sps:$4 sm:$0xff]   ;;  %v1117_v37 = vld [vmem:[%s1282_s7 + $0x84] ss:$8 sps:$4 sm:$0xff]   ;;  %v1146_v38 = vld [vmem:[%s1282_s7 + $0x150] ss:$8 sps:$4 sm:$0xff]  }
  0x33   : > { %668 = vmatpush1.bf16.msra.mxu1 %v1098_v15  ;;  %720 = vmatprep.subr.bf16.mxu0 %v1126_v25  ;;  %v1119_v39 = vld [vmem:[%s1282_s7 + $0x80] ss:$8 sps:$4 sm:$0xff]   ;;  %v1150_v40 = vld [vmem:[%s1282_s7 + $0x164] ss:$8 sps:$4 sm:$0xff]   ;;  %v1123_v41 = vld [vmem:[%s1282_s7 + $0x94] ss:$8 sps:$4 sm:$0xff]  }
  0x34   : > { %669 = vmatprep.subr.bf16.mxu1 %v1099_v16  ;;  %v1125_v42 = vld [vmem:[%s1282_s7 + $0x90] ss:$8 sps:$4 sm:$0xff]   ;;  %v1152_v43 = vld [vmem:[%s1282_s7 + $0x160] ss:$8 sps:$4 sm:$0xff]   ;;  %v1156_v45 = vld [vmem:[%s1282_s7 + $0x174] ss:$8 sps:$4 sm:$0xff]  }
  0x35   : > { %v1165_v44 = vld [vmem:[%s1284_s8 + $0x4] ss:$12 sps:$4 sm:$0xff]   ;;  %v1162_v50 = vld [vmem:[%s1284_s8 + $0x8] ss:$12 sps:$4 sm:$0xff]   ;;  %v1166_v55 = vld [vmem:[%s1284_s8 + $0x20] ss:$12 sps:$4 sm:$0xff]  }
  0x36   : > { %721 = vmatpush1.bf16.msra.mxu0 %v1128_v26  ;;  %v1129_v46 = vld [vmem:[%s1282_s7 + $0xa4] ss:$8 sps:$4 sm:$0xff]   ;;  %695 = vmatprep.mubr.bf16.mxu1 %v1165_v44  ;;  %v1158_v47 = vld [vmem:[%s1282_s7 + $0x170] ss:$8 sps:$4 sm:$0xff]   ;;  %v1131_v48 = vld [vmem:[%s1282_s7 + $0xa0] ss:$8 sps:$4 sm:$0xff]  }
  0x37   : > { %670 = vmatpush1.bf16.msra.mxu1 %v1101_v17  ;;  %722 = vmatprep.subr.bf16.mxu0 %v1132_v28  ;;  %v1135_v49 = vld [vmem:[%s1282_s7 + $0xb4] ss:$8 sps:$4 sm:$0xff]   ;;  %v1137_v51 = vld [vmem:[%s1282_s7 + $0xb0] ss:$8 sps:$4 sm:$0xff]   ;;  %v1141_v52 = vld [vmem:[%s1282_s7 + $0xc4] ss:$8 sps:$4 sm:$0xff]  }
  0x38   : > { %671 = vmatprep.subr.bf16.mxu1 %v1102_v20  ;;  %v1143_v53 = vld [vmem:[%s1282_s7 + $0xc0] ss:$8 sps:$4 sm:$0xff]   ;;  %v1147_v54 = vld [vmem:[%s1282_s7 + $0xd4] ss:$8 sps:$4 sm:$0xff]   ;;  %v1149_v56 = vld [vmem:[%s1282_s7 + $0xd0] ss:$8 sps:$4 sm:$0xff]  }
  0x39   : > { %v1153_v57 = vld [vmem:[%s1282_s7 + $0xe4] ss:$8 sps:$4 sm:$0xff]   ;;  %v1155_v58 = vld [vmem:[%s1282_s7 + $0xe0] ss:$8 sps:$4 sm:$0xff]   ;;  %v1159_v59 = vld [vmem:[%s1282_s7 + $0xf4] ss:$8 sps:$4 sm:$0xff]  }
  0x3a   : > { %723 = vmatpush1.bf16.msra.mxu0 %v1134_v30  ;;  %v1161_v60 = vld [vmem:[%s1282_s7 + $0xf0] ss:$8 sps:$4 sm:$0xff]   ;;  %v327_v8 = vld [vmem:[#allocation2] sm:$0xff] }
  0x3b   : > { %672 = vmatpush1.bf16.msra.mxu1 %v1104_v23  ;;  %724 = vmatprep.subr.bf16.mxu0 %v1138_v32  ;;  %v1163_v61 = vld [vmem:[%s1284_s8] ss:$12 sps:$4 sm:$0xff]   ;;  %v1167_v62 = vld [vmem:[%s1284_s8 + $0x1c] ss:$12 sps:$4 sm:$0xff]   ;;  %v1169_v63 = vld [vmem:[%s1284_s8 + $0x18] ss:$12 sps:$4 sm:$0xff]  }
  0x3c   : > { %673 = vmatprep.subr.bf16.mxu1 %v1105_v24  ;;  %v329_v14 = vld [vmem:[#allocation2 + $0x10] sm:$0xff]  ;;  %v330_v18 = vld [vmem:[#allocation2 + $0x18] sm:$0xff]  ;;  %v331_v24 = vld [vmem:[#allocation2 + $0x20] sm:$0xff] }
  0x3d   : > { %v333_v30 = vld [vmem:[#allocation2 + $0x30] sm:$0xff] }
  0x3e   : > { %725 = vmatpush1.bf16.msra.mxu0 %v1140_v34  ;;  %v334_v34 = vld [vmem:[#allocation2 + $0x38] sm:$0xff] }
  0x3f   : > { %674 = vmatpush1.bf16.msra.mxu1 %v1107_v27  ;;  %726 = vmatprep.subr.bf16.mxu0 %v1144_v36  ;;  %v332_v27 = vld [vmem:[#allocation2 + $0x28] sm:$0xff] }
  0x40   : > { %675 = vmatprep.subr.bf16.mxu1 %v1108_v29 }
  0x42   : > { %727 = vmatpush1.bf16.msra.mxu0 %v1146_v38 }
  0x43   : > { %676 = vmatpush1.bf16.msra.mxu1 %v1110_v31  ;;  %728 = vmatprep.subr.bf16.mxu0 %v1150_v40  ;;  %v799_v40 = vlaneseq (!%p1031_p11) }
  0x44   : > { %677 = vmatprep.subr.bf16.mxu1 %v1111_v33 }
  0x46   : > { %729 = vmatpush1.bf16.msra.mxu0 %v1152_v43 }
  0x47   : > { %678 = vmatpush1.bf16.msra.mxu1 %v1113_v35  ;;  %730 = vmatprep.subr.bf16.mxu0 %v1156_v45 }
  0x48   : > { %679 = vmatprep.subr.bf16.mxu1 %v1117_v37 }
  0x4a   : > { %731 = vmatpush1.bf16.msra.mxu0 %v1158_v47 }
  0x4b   : > { %680 = vmatpush1.bf16.msra.mxu1 %v1119_v39 }
  0x4c   : > { %681 = vmatprep.subr.bf16.mxu1 %v1123_v41  ;;  %v800_v41 = vshrl.u32 (!%p1031_p11), %v799_v40, 7 }
  0x4d   : > { %749 = vmatmul.mubr.bf16.vlgmr.msra.gmra.mrb[0].mxu0 %v1162_v50 }
  0x4e   : > { %758 = vmatprep.mubr.bf16.mxu0 %v1211_v11  ;;  %v328_v11 = vld [vmem:[#allocation2 + $0x8] sm:$0xff]  ;;  %v801_v44 = vsub.s32 (!%p1031_p11), 0, %v800_v41 }
  0x4f   : > { %682 = vmatpush1.bf16.msra.mxu1 %v1125_v42  ;;  %v797_v42 = vld [vmem:[%s1388_s2] sm:$0x3] (!%p1031_p11) }
  0x50   : > { %683 = vmatprep.subr.bf16.mxu1 %v1129_v46  ;;  %v805_v46 = vsub.s32 (!%p1031_p11), 1, %v800_v41  ;;  %v802_v50 = vrot.slane (!%p1031_p11), %v797_v42, %v801_v44 }
  0x53   : > { %684 = vmatpush1.bf16.msra.mxu1 %v1131_v48 }
  0x54   : > { %685 = vmatprep.subr.bf16.mxu1 %v1135_v49 }
  0x55   : > { %759 = vmatmul.mubr.bf16.gmra.mrb[4].mxu0 %v1166_v55 }
  0x57   : > { %686 = vmatpush1.bf16.msra.mxu1 %v1137_v51  ;;  %v806_v51 = vrot.slane (!%p1031_p11), %v797_v42, %v805_v46 }
  0x58   : > { %687 = vmatprep.subr.bf16.mxu1 %v1141_v52 }
  0x5b   : > { %688 = vmatpush1.bf16.msra.mxu1 %v1143_v53 }
  0x5c   : > { %689 = vmatprep.subr.bf16.mxu1 %v1147_v54 }
  0x5f   : > { %690 = vmatpush1.bf16.msra.mxu1 %v1149_v56 }
  0x60   : > { %691 = vmatprep.subr.bf16.mxu1 %v1153_v57 }
  0x63   : > { %692 = vmatpush1.bf16.msra.mxu1 %v1155_v58 }
  0x64   : > { %693 = vmatprep.subr.bf16.mxu1 %v1159_v59 }
  0x67   : > { %694 = vmatpush1.bf16.msra.mxu1 %v1161_v60 }
  0x6a   : > { %696 = vmatmul.mubr.bf16.vlgmr.msra.gmra.mrb[0].mxu1 %v1163_v61 }
  0x6b   : > { %705 = vmatprep.mubr.bf16.mxu1 %v1167_v62 }
  0x72   : > { %706 = vmatmul.mubr.bf16.gmra.mrb[4].mxu1 %v1169_v63 }
 0x120   : > { %v750_v0 = vpop.f32.mrb[0].mxu0 }
 0x121   : > { %v752_v1 = vpop.f32.mrb[1].mxu0 }
 0x122   : > { %v754_v2 = vpop.f32.mrb[2].mxu0 }
 0x123   : > { %v756_v3 = vpop.f32.mrb[3].mxu0 }
 0x128   : > { %v760_v4 = vpop.f32.mrb[4].mxu0 }
 0x129   : > { %v762_v5 = vpop.f32.mrb[5].mxu0 }
 0x12a   : > { %v764_v6 = vpop.f32.mrb[6].mxu0 }
 0x12b   : > { %v766_v7 = vpop.f32.mrb[7].mxu0 }
 0x13d   : > { %v697_v9 = vpop.f32.mrb[0].mxu1 }
 0x13e   : > { %v751_v10 = vadd.f32 %v750_v0, %v697_v9  ;;  %v699_v12 = vpop.f32.mrb[1].mxu1 }
 0x13f   : > { %v753_v13 = vadd.f32 %v752_v1, %v699_v12  ;;  %v701_v15 = vpop.f32.mrb[2].mxu1 }
 0x140   : > { %v769_v16 = vadd.f32 %v751_v10, %v327_v8  ;;  %v755_v17 = vadd.f32 %v754_v2, %v701_v15  ;;  %v703_v19 = vpop.f32.mrb[3].mxu1 }
 0x141   : > { %v770_v20 = vadd.f32 %v753_v13, %v328_v11  ;;  %v757_v21 = vadd.f32 %v756_v3, %v703_v19 }
 0x142   : > { %777 = vst [vmem:[#allocation2] sm:$0xff] %v769_v16  ;;  %v771_v22 = vadd.f32 %v755_v17, %v329_v14 }
 0x143   : > { %778 = vst [vmem:[#allocation2 + $0x8] sm:$0xff] %v770_v20  ;;  %v772_v23 = vadd.f32 %v757_v21, %v330_v18 }
 0x144   : > { %779 = vst [vmem:[#allocation2 + $0x10] sm:$0xff] %v771_v22 }
 0x145   : > { %780 = vst [vmem:[#allocation2 + $0x18] sm:$0xff] %v772_v23  ;;  %v707_v25 = vpop.f32.mrb[4].mxu1 }
 0x146   : > { %v761_v26 = vadd.f32 %v760_v4, %v707_v25  ;;  %v709_v28 = vpop.f32.mrb[5].mxu1 }
 0x147   : > { %v763_v29 = vadd.f32 %v762_v5, %v709_v28  ;;  %v711_v31 = vpop.f32.mrb[6].mxu1  ;;  %788 = sbr.rel (%p1031_p11) target bundleno = 346 (0x15a), region = 66 }
 0x148   : > { %v773_v32 = vadd.f32 %v761_v26, %v331_v24  ;;  %v765_v33 = vadd.f32 %v764_v6, %v711_v31  ;;  %v713_v35 = vpop.f32.mrb[7].mxu1 }
 0x149   : > { %v774_v36 = vadd.f32 %v763_v29, %v332_v27  ;;  %v767_v37 = vadd.f32 %v766_v7, %v713_v35  ;;  %v789_v43 = vld [vmem:[#allocation2] sm:$0xff] (!%p1031_p11) }
 0x14a   : > { %781 = vst [vmem:[#allocation2 + $0x20] sm:$0xff] %v773_v32  ;;  %v775_v38 = vadd.f32 %v765_v33, %v333_v30  ;;  %v790_v45 = vld [vmem:[#allocation2 + $0x8] sm:$0xff] (!%p1031_p11)  ;;  %v809_v55 = vadd.f32 (!%p1031_p11), %v802_v50, %v789_v43 }
 0x14b   : > { %782 = vst [vmem:[#allocation2 + $0x28] sm:$0xff] %v774_v36  ;;  %v776_v39 = vadd.f32 %v767_v37, %v334_v34  ;;  %v791_v47 = vld [vmem:[#allocation2 + $0x10] sm:$0xff] (!%p1031_p11)  ;;  %v810_v56 = vadd.f32 (!%p1031_p11), %v806_v51, %v790_v45 }
 0x14c   : > { %783 = vst [vmem:[#allocation2 + $0x30] sm:$0xff] %v775_v38  ;;  %v792_v48 = vld [vmem:[#allocation2 + $0x18] sm:$0xff] (!%p1031_p11)  ;;  %v811_v57 = vadd.f32 (!%p1031_p11), %v802_v50, %v791_v47  ;;  %v817_v63 = vmax.f32 (!%p1031_p11), %v809_v55, 0.0 }
 0x14d   : > { %784 = vst [vmem:[#allocation2 + $0x38] sm:$0xff] %v776_v39  ;;  %v812_v58 = vadd.f32 (!%p1031_p11), %v806_v51, %v792_v48  ;;  %v818_v0 = vmax.f32 (!%p1031_p11), %v810_v56, 0.0 }
 0x14e   : > { %v819_v1 = vmax.f32 %v811_v57, 0.0  ;;  %825 = vst [vmem:[%s1389_s3] sm:$0xff] %v817_v63 }
 0x14f   : > { %v820_v2 = vmax.f32 %v812_v58, 0.0  ;;  %826 = vst [vmem:[%s1389_s3 + $0x8] sm:$0xff] %v818_v0 }
 0x150   : > { %827 = vst [vmem:[%s1389_s3 + $0x10] sm:$0xff] %v819_v1 }
 0x151   : > { %v793_v49 = vld [vmem:[#allocation2 + $0x20] sm:$0xff]  ;;  %828 = vst [vmem:[%s1389_s3 + $0x18] sm:$0xff] %v820_v2 }
 0x152   : > { %v794_v52 = vld [vmem:[#allocation2 + $0x28] sm:$0xff]  ;;  %v813_v59 = vadd.f32 %v802_v50, %v793_v49 }
 0x153   : > { %v795_v53 = vld [vmem:[#allocation2 + $0x30] sm:$0xff]  ;;  %v814_v60 = vadd.f32 %v806_v51, %v794_v52 }
 0x154   : > { %v796_v54 = vld [vmem:[#allocation2 + $0x38] sm:$0xff]  ;;  %v815_v61 = vadd.f32 %v802_v50, %v795_v53  ;;  %v821_v3 = vmax.f32 %v813_v59, 0.0 }
 0x155   : > { %v816_v62 = vadd.f32 %v806_v51, %v796_v54  ;;  %v822_v4 = vmax.f32 %v814_v60, 0.0 }
 0x156   : > { %v823_v5 = vmax.f32 %v815_v61, 0.0  ;;  %829 = vst [vmem:[%s1389_s3 + $0x20] sm:$0xff] %v821_v3 }
 0x157   : > { %v824_v6 = vmax.f32 %v816_v62, 0.0  ;;  %830 = vst [vmem:[%s1389_s3 + $0x28] sm:$0xff] %v822_v4 }
 0x158   : > { %831 = vst [vmem:[%s1389_s3 + $0x30] sm:$0xff] %v823_v5 }
 0x159   : > { %832 = vst [vmem:[%s1389_s3 + $0x38] sm:$0xff] %v824_v6 }
 0x15a PF: > { %s13_s16 = sadd.s32 1, %s1208_s16   ;;  %s1390_s12 = smov %s1196_s13 }
 0x15b   : > { %p10_p12 = scmp.ge.s32.totalorder %s13_s16, 5   ;;  %s1391_s13 = smov %s1267_s20 }
 0x15c   : > { %s1392_s14 = smov %s1204_s15  ;;  %s1393_s15 = smov %s1395_s17 }
 0x15d   :  { %12 = sbr.rel (!%p10_p12) target bundleno = 3 (0x3), region = 113 }

// kernel: feature_extractor_forward.33
= control target key start
LH: loop header
LB: loop body
LE: loop exit
PB: predicated region body
PF: predicated region fallthrough
CT: control target
= control target key end

     0   :  { %s1232_s12 = smov 0   ;;  %s1234_s13 = smov 0   ;;  %s1386_s0 = inlined_call_operand.vmem [shape: bf16[32,2304], index: 0, kind: input, shape index: {}]   ;;  %s1387_s1 = inlined_call_operand.vmem [shape: bf16[2304,256], index: 1, kind: input, shape index: {}]   ;;  %s1388_s2 = inlined_call_operand.vmem [shape: f32[1,256], index: 2, kind: input, shape index: {}]   ;;  %s1389_s3 = inlined_call_operand.vmem [shape: f32[32,256], index: 3, kind: output, shape index: {}]  }
   0x1   :  { %s1236_s14 = smov 0   ;;  %s1238_s15 = smov 0  }
   0x2   :  { %s1240_s16 = smov 0  }
   0x3 LB: > { %s25_s17 = sadd.s32 1, %s1204_s15  ;;  %p48_p1 = scmp.ne.s32.totalorder %s1196_s13, %s1192_s12  ;;  %s1208_s16 = sphi %s1240_s16, %s13_s16   ;;  %s1204_s15 = sphi %s1238_s15, %s1393_s15   ;;  %s1200_s14 = sphi %s1236_s14, %s1392_s14   ;;  %s1196_s13 = sphi %s1234_s13, %s1391_s13   ;;  %s1192_s12 = sphi %s1232_s12, %s1390_s12  }
   0x4   : > { %p26_p0 = scmp.ge.s32.totalorder %s25_s17, 6  ;;  %p49_p2 = scmp.eq.s32.totalorder %s1208_s16, 0 }
   0x5   : > { %s41_s19 = sadd.s32 1, %s1196_s13  ;;  %p963_p5 = scmp.ge.s32.totalorder %s1208_s16, 6 }
   0x6   : > { %s1395_s17 = smov (%p26_p0, %s25_s17), 0  ;;  %p50_p3 = por %p49_p2, %p48_p1 }
   0x7   : > { %s37_s18 = ssub.s32 %s1204_s15, %s1395_s17  ;;  %164 = sbr.rel (%p963_p5) target bundleno = 23 (0x17), region = 20 }
   0x8   : > { %p39_p4 = scmp.eq.s32.totalorder %s37_s18, 0 }
   0xa   : > { %s1267_s20 = scalar_select %p39_p4, %s1196_s13, %s41_s19  }
   0xe   : > { %167 = sbr.rel (!%p50_p3) target bundleno = 23 (0x17), region = 24  ;;  %s169_s21 = sand.u32 (%p50_p3), 1, %s1196_s13  }
   0xf   : > { %s1036_s22 = smul.u32 (%p50_p3), 12, %s1204_s15 }
  0x10   : > { %s1046_s23 = smul.u32 (%p50_p3), 48, %s169_s21 }
  0x11   : > { %s177_s26 = scalar_lea.vmem (%p50_p3), %s1386_s0, %s1036_s22 }
  0x12   : > { %v192_v0 = vld [vmem:[%s177_s26] sm:$0xff] (%p50_p3)  ;;  %v194_v1 = vld [vmem:[%s177_s26 + $0x48] sm:$0xff] (%p50_p3)  ;;  %v196_v2 = vld [vmem:[%s177_s26 + $0x90] sm:$0xff] (%p50_p3)  ;;  %s171_s27 = scalar_lea.vmem (%p50_p3), [#allocation3], %s1046_s23 }
  0x13   : > { %193 = vst [vmem:[%s171_s27] sm:$0xff] (%p50_p3), %v192_v0  ;;  %195 = vst [vmem:[%s171_s27 + $0xc] sm:$0xff] (%p50_p3), %v194_v1  ;;  %v198_v3 = vld [vmem:[%s177_s26 + $0xd8] sm:$0xff] (%p50_p3)  ;;  %v965_v4 = vld [vmem:[%s177_s26 + $0x8] sm:$0xf] (%p50_p3) }
  0x14   : > { %197 = vst [vmem:[%s171_s27 + $0x18] sm:$0xff] (%p50_p3), %v196_v2  ;;  %v967_v5 = vld [vmem:[%s177_s26 + $0x50] sm:$0xf] (%p50_p3)  ;;  %199 = vst [vmem:[%s171_s27 + $0x24] sm:$0xff] (%p50_p3), %v198_v3  ;;  %v969_v6 = vld [vmem:[%s177_s26 + $0x98] sm:$0xf] (%p50_p3) }
  0x15   : > { %966 = vst [vmem:[%s171_s27 + $0x8] sm:$0xf] %v965_v4  ;;  %968 = vst [vmem:[%s171_s27 + $0x14] sm:$0xf] %v967_v5  ;;  %v971_v7 = vld [vmem:[%s177_s26 + $0xe0] sm:$0xf] }
  0x16   : > { %970 = vst [vmem:[%s171_s27 + $0x20] sm:$0xf] %v969_v6  ;;  %972 = vst [vmem:[%s171_s27 + $0x2c] sm:$0xf] %v971_v7 }
  0x17 PF: > { %p973_p6 = scmp.ge.s32.totalorder %s1208_s16, 1  ;;  %p234_p7 = scmp.lt.s32.totalorder %s1208_s16, 7 }
  0x19   : > { %p235_p8 = pnand %p973_p6, %p234_p7 }
  0x1a   : > { %s241_s28 = sand.u32 (!%p235_p8), 1, %s1192_s12   ;;  %s285_s29 = smul.u32 (!%p235_p8), 48, %s1200_s14 }
  0x1b   : > { %238 = sbr.rel (%p235_p8) target bundleno = 346 (0x15a), region = 54  ;;  %p976_p10 = scmp.ne.s32.totalorder (!%p235_p8), %s1200_s14, 0 }
  0x1c   : > { %s1047_s30 = smul.u32 (!%p235_p8), 48, %s241_s28  ;;  %p287_p9 = scmp.lt.s32.totalorder (!%p235_p8), %s285_s29, 287 }
  0x1e   : > { %s1284_s8 = scalar_lea.vmem (!%p235_p8), [#allocation3], %s1047_s30 }
  0x22   : > { %s1397_s29 = smov (!%p287_p9, %s285_s29), 287  ;;  %318 = sbr.rel (%p976_p10) target bundleno = 41 (0x29), region = 62 }
  0x23   : > { %s1037_s4 = sshll.u32 %s1397_s29, 3  ;;  %v1210_v8 = vmov (!%p976_p10), 0.0  }
  0x24   : > { %s1282_s7 = scalar_lea.vmem %s1387_s1, %s1037_s4  ;;  %319 = vst [vmem:[#allocation2] sm:$0xff] (!%p976_p10), %v1210_v8  ;;  %320 = vst [vmem:[#allocation2 + $0x8] sm:$0xff] (!%p976_p10), %v1210_v8 }
  0x25   : > { %321 = vst [vmem:[#allocation2 + $0x10] sm:$0xff] (!%p976_p10), %v1210_v8  ;;  %322 = vst [vmem:[#allocation2 + $0x18] sm:$0xff] (!%p976_p10), %v1210_v8 }
  0x26   : > { %323 = vst [vmem:[#allocation2 + $0x20] sm:$0xff] (!%p976_p10), %v1210_v8  ;;  %324 = vst [vmem:[#allocation2 + $0x28] sm:$0xff] (!%p976_p10), %v1210_v8 }
  0x27   : > { %325 = vst [vmem:[#allocation2 + $0x30] sm:$0xff] (!%p976_p10), %v1210_v8  ;;  %326 = vst [vmem:[#allocation2 + $0x38] sm:$0xff] (!%p976_p10), %v1210_v8 }
  0x29 PF: > { %v1090_v9 = vld [vmem:[%s1282_s7 + $0x4] ss:$8 sps:$4 sm:$0xff]   ;;  %v1092_v10 = vld [vmem:[%s1282_s7] ss:$8 sps:$4 sm:$0xff]   ;;  %v1211_v11 = vmov 0   ;;  %p1031_p11 = scmp.ne.s32.totalorder %s1200_s14, 5 }
  0x2a   : > { %748 = vmatprep.mubr.bf16.mxu0 %v1211_v11  ;;  %663 = vmatprep.subr.bf16.mxu1 %v1090_v9  ;;  %v1093_v12 = vld [vmem:[%s1282_s7 + $0x14] ss:$8 sps:$4 sm:$0xff]   ;;  %v1095_v13 = vld [vmem:[%s1282_s7 + $0x10] ss:$8 sps:$4 sm:$0xff]   ;;  %v1096_v14 = vld [vmem:[%s1282_s7 + $0x24] ss:$8 sps:$4 sm:$0xff]  }
  0x2b   : > { %664 = vmatpush1.bf16.msra.mxu1 %v1092_v10  ;;  %v1098_v15 = vld [vmem:[%s1282_s7 + $0x20] ss:$8 sps:$4 sm:$0xff]   ;;  %v1099_v16 = vld [vmem:[%s1282_s7 + $0x34] ss:$8 sps:$4 sm:$0xff]   ;;  %v1101_v17 = vld [vmem:[%s1282_s7 + $0x30] ss:$8 sps:$4 sm:$0xff]  }
  0x2c   : > { %665 = vmatprep.subr.bf16.mxu1 %v1093_v12  ;;  %v1114_v18 = vld [vmem:[%s1282_s7 + $0x104] ss:$8 sps:$4 sm:$0xff]   ;;  %v1116_v19 = vld [vmem:[%s1282_s7 + $0x100] ss:$8 sps:$4 sm:$0xff]   ;;  %v1120_v21 = vld [vmem:[%s1282_s7 + $0x114] ss:$8 sps:$4 sm:$0xff]  }
  0x2d   : > { %v1102_v20 = vld [vmem:[%s1282_s7 + $0x44] ss:$8 sps:$4 sm:$0xff]   ;;  %716 = vmatprep.subr.bf16.mxu0 %v1114_v18  ;;  %v1122_v22 = vld [vmem:[%s1282_s7 + $0x110] ss:$8 sps:$4 sm:$0xff]   ;;  %v1104_v23 = vld [vmem:[%s1282_s7 + $0x40] ss:$8 sps:$4 sm:$0xff]  }
  0x2e   : > { %717 = vmatpush1.bf16.msra.mxu0 %v1116_v19  ;;  %v1105_v24 = vld [vmem:[%s1282_s7 + $0x54] ss:$8 sps:$4 sm:$0xff]   ;;  %v1126_v25 = vld [vmem:[%s1282_s7 + $0x124] ss:$8 sps:$4 sm:$0xff]   ;;  %v1128_v26 = vld [vmem:[%s1282_s7 + $0x120] ss:$8 sps:$4 sm:$0xff]  }
  0x2f   : > { %666 = vmatpush1.bf16.msra.mxu1 %v1095_v13  ;;  %718 = vmatprep.subr.bf16.mxu0 %v1120_v21  ;;  %v1107_v27 = vld [vmem:[%s1282_s7 + $0x50] ss:$8 sps:$4 sm:$0xff]   ;;  %v1132_v28 = vld [vmem:[%s1282_s7 + $0x134] ss:$8 sps:$4 sm:$0xff]   ;;  %v1108_v29 = vld [vmem:[%s1282_s7 + $0x64] ss:$8 sps:$4 sm:$0xff]  }
  0x30   : > { %667 = vmatprep.subr.bf16.mxu1 %v1096_v14  ;;  %v1134_v30 = vld [vmem:[%s1282_s7 + $0x130] ss:$8 sps:$4 sm:$0xff]   ;;  %v1110_v31 = vld [vmem:[%s1282_s7 + $0x60] ss:$8 sps:$4 sm:$0xff]   ;;  %v1138_v32 = vld [vmem:[%s1282_s7 + $0x144] ss:$8 sps:$4 sm:$0xff]  }
  0x31   : > { %v1111_v33 = vld [vmem:[%s1282_s7 + $0x74] ss:$8 sps:$4 sm:$0xff]   ;;  %v1140_v34 = vld [vmem:[%s1282_s7 + $0x140] ss:$8 sps:$4 sm:$0xff]   ;;  %v1113_v35 = vld [vmem:[%s1282_s7 + $0x70] ss:$8 sps:$4 sm:$0xff]  }
  0x32   : > { %719 = vmatpush1.bf16.msra.mxu0 %v1122_v22  ;;  %v1144_v36 = vld [vmem:[%s1282_s7 + $0x154] ss:$8 sps:$4 sm:$0xff]   ;;  %v1117_v37 = vld [vmem:[%s1282_s7 + $0x84] ss:$8 sps:$4 sm:$0xff]   ;;  %v1146_v38 = vld [vmem:[%s1282_s7 + $0x150] ss:$8 sps:$4 sm:$0xff]  }
  0x33   : > { %668 = vmatpush1.bf16.msra.mxu1 %v1098_v15  ;;  %720 = vmatprep.subr.bf16.mxu0 %v1126_v25  ;;  %v1119_v39 = vld [vmem:[%s1282_s7 + $0x80] ss:$8 sps:$4 sm:$0xff]   ;;  %v1150_v40 = vld [vmem:[%s1282_s7 + $0x164] ss:$8 sps:$4 sm:$0xff]   ;;  %v1123_v41 = vld [vmem:[%s1282_s7 + $0x94] ss:$8 sps:$4 sm:$0xff]  }
  0x34   : > { %669 = vmatprep.subr.bf16.mxu1 %v1099_v16  ;;  %v1125_v42 = vld [vmem:[%s1282_s7 + $0x90] ss:$8 sps:$4 sm:$0xff]   ;;  %v1152_v43 = vld [vmem:[%s1282_s7 + $0x160] ss:$8 sps:$4 sm:$0xff]   ;;  %v1156_v45 = vld [vmem:[%s1282_s7 + $0x174] ss:$8 sps:$4 sm:$0xff]  }
  0x35   : > { %v1165_v44 = vld [vmem:[%s1284_s8 + $0x4] ss:$12 sps:$4 sm:$0xff]   ;;  %v1162_v50 = vld [vmem:[%s1284_s8 + $0x8] ss:$12 sps:$4 sm:$0xff]   ;;  %v1166_v55 = vld [vmem:[%s1284_s8 + $0x20] ss:$12 sps:$4 sm:$0xff]  }
  0x36   : > { %721 = vmatpush1.bf16.msra.mxu0 %v1128_v26  ;;  %v1129_v46 = vld [vmem:[%s1282_s7 + $0xa4] ss:$8 sps:$4 sm:$0xff]   ;;  %695 = vmatprep.mubr.bf16.mxu1 %v1165_v44  ;;  %v1158_v47 = vld [vmem:[%s1282_s7 + $0x170] ss:$8 sps:$4 sm:$0xff]   ;;  %v1131_v48 = vld [vmem:[%s1282_s7 + $0xa0] ss:$8 sps:$4 sm:$0xff]  }
  0x37   : > { %670 = vmatpush1.bf16.msra.mxu1 %v1101_v17  ;;  %722 = vmatprep.subr.bf16.mxu0 %v1132_v28  ;;  %v1135_v49 = vld [vmem:[%s1282_s7 + $0xb4] ss:$8 sps:$4 sm:$0xff]   ;;  %v1137_v51 = vld [vmem:[%s1282_s7 + $0xb0] ss:$8 sps:$4 sm:$0xff]   ;;  %v1141_v52 = vld [vmem:[%s1282_s7 + $0xc4] ss:$8 sps:$4 sm:$0xff]  }
  0x38   : > { %671 = vmatprep.subr.bf16.mxu1 %v1102_v20  ;;  %v1143_v53 = vld [vmem:[%s1282_s7 + $0xc0] ss:$8 sps:$4 sm:$0xff]   ;;  %v1147_v54 = vld [vmem:[%s1282_s7 + $0xd4] ss:$8 sps:$4 sm:$0xff]   ;;  %v1149_v56 = vld [vmem:[%s1282_s7 + $0xd0] ss:$8 sps:$4 sm:$0xff]  }
  0x39   : > { %v1153_v57 = vld [vmem:[%s1282_s7 + $0xe4] ss:$8 sps:$4 sm:$0xff]   ;;  %v1155_v58 = vld [vmem:[%s1282_s7 + $0xe0] ss:$8 sps:$4 sm:$0xff]   ;;  %v1159_v59 = vld [vmem:[%s1282_s7 + $0xf4] ss:$8 sps:$4 sm:$0xff]  }
  0x3a   : > { %723 = vmatpush1.bf16.msra.mxu0 %v1134_v30  ;;  %v1161_v60 = vld [vmem:[%s1282_s7 + $0xf0] ss:$8 sps:$4 sm:$0xff]   ;;  %v327_v8 = vld [vmem:[#allocation2] sm:$0xff] }
  0x3b   : > { %672 = vmatpush1.bf16.msra.mxu1 %v1104_v23  ;;  %724 = vmatprep.subr.bf16.mxu0 %v1138_v32  ;;  %v1163_v61 = vld [vmem:[%s1284_s8] ss:$12 sps:$4 sm:$0xff]   ;;  %v1167_v62 = vld [vmem:[%s1284_s8 + $0x1c] ss:$12 sps:$4 sm:$0xff]   ;;  %v1169_v63 = vld [vmem:[%s1284_s8 + $0x18] ss:$12 sps:$4 sm:$0xff]  }
  0x3c   : > { %673 = vmatprep.subr.bf16.mxu1 %v1105_v24  ;;  %v329_v14 = vld [vmem:[#allocation2 + $0x10] sm:$0xff]  ;;  %v330_v18 = vld [vmem:[#allocation2 + $0x18] sm:$0xff]  ;;  %v331_v24 = vld [vmem:[#allocation2 + $0x20] sm:$0xff] }
  0x3d   : > { %v333_v30 = vld [vmem:[#allocation2 + $0x30] sm:$0xff] }
  0x3e   : > { %725 = vmatpush1.bf16.msra.mxu0 %v1140_v34  ;;  %v334_v34 = vld [vmem:[#allocation2 + $0x38] sm:$0xff] }
  0x3f   : > { %674 = vmatpush1.bf16.msra.mxu1 %v1107_v27  ;;  %726 = vmatprep.subr.bf16.mxu0 %v1144_v36  ;;  %v332_v27 = vld [vmem:[#allocation2 + $0x28] sm:$0xff] }
  0x40   : > { %675 = vmatprep.subr.bf16.mxu1 %v1108_v29 }
  0x42   : > { %727 = vmatpush1.bf16.msra.mxu0 %v1146_v38 }
  0x43   : > { %676 = vmatpush1.bf16.msra.mxu1 %v1110_v31  ;;  %728 = vmatprep.subr.bf16.mxu0 %v1150_v40  ;;  %v799_v40 = vlaneseq (!%p1031_p11) }
  0x44   : > { %677 = vmatprep.subr.bf16.mxu1 %v1111_v33 }
  0x46   : > { %729 = vmatpush1.bf16.msra.mxu0 %v1152_v43 }
  0x47   : > { %678 = vmatpush1.bf16.msra.mxu1 %v1113_v35  ;;  %730 = vmatprep.subr.bf16.mxu0 %v1156_v45 }
  0x48   : > { %679 = vmatprep.subr.bf16.mxu1 %v1117_v37 }
  0x4a   : > { %731 = vmatpush1.bf16.msra.mxu0 %v1158_v47 }
  0x4b   : > { %680 = vmatpush1.bf16.msra.mxu1 %v1119_v39 }
  0x4c   : > { %681 = vmatprep.subr.bf16.mxu1 %v1123_v41  ;;  %v800_v41 = vshrl.u32 (!%p1031_p11), %v799_v40, 7 }
  0x4d   : > { %749 = vmatmul.mubr.bf16.vlgmr.msra.gmra.mrb[0].mxu0 %v1162_v50 }
  0x4e   : > { %758 = vmatprep.mubr.bf16.mxu0 %v1211_v11  ;;  %v328_v11 = vld [vmem:[#allocation2 + $0x8] sm:$0xff]  ;;  %v801_v44 = vsub.s32 (!%p1031_p11), 0, %v800_v41 }
  0x4f   : > { %682 = vmatpush1.bf16.msra.mxu1 %v1125_v42  ;;  %v797_v42 = vld [vmem:[%s1388_s2] sm:$0x3] (!%p1031_p11) }
  0x50   : > { %683 = vmatprep.subr.bf16.mxu1 %v1129_v46  ;;  %v805_v46 = vsub.s32 (!%p1031_p11), 1, %v800_v41  ;;  %v802_v50 = vrot.slane (!%p1031_p11), %v797_v42, %v801_v44 }
  0x53   : > { %684 = vmatpush1.bf16.msra.mxu1 %v1131_v48 }
  0x54   : > { %685 = vmatprep.subr.bf16.mxu1 %v1135_v49 }
  0x55   : > { %759 = vmatmul.mubr.bf16.gmra.mrb[4].mxu0 %v1166_v55 }
  0x57   : > { %686 = vmatpush1.bf16.msra.mxu1 %v1137_v51  ;;  %v806_v51 = vrot.slane (!%p1031_p11), %v797_v42, %v805_v46 }
  0x58   : > { %687 = vmatprep.subr.bf16.mxu1 %v1141_v52 }
  0x5b   : > { %688 = vmatpush1.bf16.msra.mxu1 %v1143_v53 }
  0x5c   : > { %689 = vmatprep.subr.bf16.mxu1 %v1147_v54 }
  0x5f   : > { %690 = vmatpush1.bf16.msra.mxu1 %v1149_v56 }
  0x60   : > { %691 = vmatprep.subr.bf16.mxu1 %v1153_v57 }
  0x63   : > { %692 = vmatpush1.bf16.msra.mxu1 %v1155_v58 }
  0x64   : > { %693 = vmatprep.subr.bf16.mxu1 %v1159_v59 }
  0x67   : > { %694 = vmatpush1.bf16.msra.mxu1 %v1161_v60 }
  0x6a   : > { %696 = vmatmul.mubr.bf16.vlgmr.msra.gmra.mrb[0].mxu1 %v1163_v61 }
  0x6b   : > { %705 = vmatprep.mubr.bf16.mxu1 %v1167_v62 }
  0x72   : > { %706 = vmatmul.mubr.bf16.gmra.mrb[4].mxu1 %v1169_v63 }
 0x120   : > { %v750_v0 = vpop.f32.mrb[0].mxu0 }
 0x121   : > { %v752_v1 = vpop.f32.mrb[1].mxu0 }
 0x122   : > { %v754_v2 = vpop.f32.mrb[2].mxu0 }
 0x123   : > { %v756_v3 = vpop.f32.mrb[3].mxu0 }
 0x128   : > { %v760_v4 = vpop.f32.mrb[4].mxu0 }
 0x129   : > { %v762_v5 = vpop.f32.mrb[5].mxu0 }
 0x12a   : > { %v764_v6 = vpop.f32.mrb[6].mxu0 }
 0x12b   : > { %v766_v7 = vpop.f32.mrb[7].mxu0 }
 0x13d   : > { %v697_v9 = vpop.f32.mrb[0].mxu1 }
 0x13e   : > { %v751_v10 = vadd.f32 %v750_v0, %v697_v9  ;;  %v699_v12 = vpop.f32.mrb[1].mxu1 }
 0x13f   : > { %v753_v13 = vadd.f32 %v752_v1, %v699_v12  ;;  %v701_v15 = vpop.f32.mrb[2].mxu1 }
 0x140   : > { %v769_v16 = vadd.f32 %v751_v10, %v327_v8  ;;  %v755_v17 = vadd.f32 %v754_v2, %v701_v15  ;;  %v703_v19 = vpop.f32.mrb[3].mxu1 }
 0x141   : > { %v770_v20 = vadd.f32 %v753_v13, %v328_v11  ;;  %v757_v21 = vadd.f32 %v756_v3, %v703_v19 }
 0x142   : > { %777 = vst [vmem:[#allocation2] sm:$0xff] %v769_v16  ;;  %v771_v22 = vadd.f32 %v755_v17, %v329_v14 }
 0x143   : > { %778 = vst [vmem:[#allocation2 + $0x8] sm:$0xff] %v770_v20  ;;  %v772_v23 = vadd.f32 %v757_v21, %v330_v18 }
 0x144   : > { %779 = vst [vmem:[#allocation2 + $0x10] sm:$0xff] %v771_v22 }
 0x145   : > { %780 = vst [vmem:[#allocation2 + $0x18] sm:$0xff] %v772_v23  ;;  %v707_v25 = vpop.f32.mrb[4].mxu1 }
 0x146   : > { %v761_v26 = vadd.f32 %v760_v4, %v707_v25  ;;  %v709_v28 = vpop.f32.mrb[5].mxu1 }
 0x147   : > { %v763_v29 = vadd.f32 %v762_v5, %v709_v28  ;;  %v711_v31 = vpop.f32.mrb[6].mxu1  ;;  %788 = sbr.rel (%p1031_p11) target bundleno = 346 (0x15a), region = 66 }
 0x148   : > { %v773_v32 = vadd.f32 %v761_v26, %v331_v24  ;;  %v765_v33 = vadd.f32 %v764_v6, %v711_v31  ;;  %v713_v35 = vpop.f32.mrb[7].mxu1 }
 0x149   : > { %v774_v36 = vadd.f32 %v763_v29, %v332_v27  ;;  %v767_v37 = vadd.f32 %v766_v7, %v713_v35  ;;  %v789_v43 = vld [vmem:[#allocation2] sm:$0xff] (!%p1031_p11) }
 0x14a   : > { %781 = vst [vmem:[#allocation2 + $0x20] sm:$0xff] %v773_v32  ;;  %v775_v38 = vadd.f32 %v765_v33, %v333_v30  ;;  %v790_v45 = vld [vmem:[#allocation2 + $0x8] sm:$0xff] (!%p1031_p11)  ;;  %v809_v55 = vadd.f32 (!%p1031_p11), %v802_v50, %v789_v43 }
 0x14b   : > { %782 = vst [vmem:[#allocation2 + $0x28] sm:$0xff] %v774_v36  ;;  %v776_v39 = vadd.f32 %v767_v37, %v334_v34  ;;  %v791_v47 = vld [vmem:[#allocation2 + $0x10] sm:$0xff] (!%p1031_p11)  ;;  %v810_v56 = vadd.f32 (!%p1031_p11), %v806_v51, %v790_v45 }
 0x14c   : > { %783 = vst [vmem:[#allocation2 + $0x30] sm:$0xff] %v775_v38  ;;  %v792_v48 = vld [vmem:[#allocation2 + $0x18] sm:$0xff] (!%p1031_p11)  ;;  %v811_v57 = vadd.f32 (!%p1031_p11), %v802_v50, %v791_v47  ;;  %v817_v63 = vmax.f32 (!%p1031_p11), %v809_v55, 0.0 }
 0x14d   : > { %784 = vst [vmem:[#allocation2 + $0x38] sm:$0xff] %v776_v39  ;;  %v812_v58 = vadd.f32 (!%p1031_p11), %v806_v51, %v792_v48  ;;  %v818_v0 = vmax.f32 (!%p1031_p11), %v810_v56, 0.0 }
 0x14e   : > { %v819_v1 = vmax.f32 %v811_v57, 0.0  ;;  %825 = vst [vmem:[%s1389_s3] sm:$0xff] %v817_v63 }
 0x14f   : > { %v820_v2 = vmax.f32 %v812_v58, 0.0  ;;  %826 = vst [vmem:[%s1389_s3 + $0x8] sm:$0xff] %v818_v0 }
 0x150   : > { %827 = vst [vmem:[%s1389_s3 + $0x10] sm:$0xff] %v819_v1 }
 0x151   : > { %v793_v49 = vld [vmem:[#allocation2 + $0x20] sm:$0xff]  ;;  %828 = vst [vmem:[%s1389_s3 + $0x18] sm:$0xff] %v820_v2 }
 0x152   : > { %v794_v52 = vld [vmem:[#allocation2 + $0x28] sm:$0xff]  ;;  %v813_v59 = vadd.f32 %v802_v50, %v793_v49 }
 0x153   : > { %v795_v53 = vld [vmem:[#allocation2 + $0x30] sm:$0xff]  ;;  %v814_v60 = vadd.f32 %v806_v51, %v794_v52 }
 0x154   : > { %v796_v54 = vld [vmem:[#allocation2 + $0x38] sm:$0xff]  ;;  %v815_v61 = vadd.f32 %v802_v50, %v795_v53  ;;  %v821_v3 = vmax.f32 %v813_v59, 0.0 }
 0x155   : > { %v816_v62 = vadd.f32 %v806_v51, %v796_v54  ;;  %v822_v4 = vmax.f32 %v814_v60, 0.0 }
 0x156   : > { %v823_v5 = vmax.f32 %v815_v61, 0.0  ;;  %829 = vst [vmem:[%s1389_s3 + $0x20] sm:$0xff] %v821_v3 }
 0x157   : > { %v824_v6 = vmax.f32 %v816_v62, 0.0  ;;  %830 = vst [vmem:[%s1389_s3 + $0x28] sm:$0xff] %v822_v4 }
 0x158   : > { %831 = vst [vmem:[%s1389_s3 + $0x30] sm:$0xff] %v823_v5 }
 0x159   : > { %832 = vst [vmem:[%s1389_s3 + $0x38] sm:$0xff] %v824_v6 }
 0x15a PF: > { %s13_s16 = sadd.s32 1, %s1208_s16   ;;  %s1390_s12 = smov %s1196_s13 }
 0x15b   : > { %p10_p12 = scmp.ge.s32.totalorder %s13_s16, 8   ;;  %s1391_s13 = smov %s1267_s20 }
 0x15c   : > { %s1392_s14 = smov %s1204_s15  ;;  %s1393_s15 = smov %s1395_s17 }
 0x15d   :  { %12 = sbr.rel (!%p10_p12) target bundleno = 3 (0x3), region = 113 }

// kernel: feature_extractor_forward.35
= control target key start
LH: loop header
LB: loop body
LE: loop exit
PB: predicated region body
PF: predicated region fallthrough
CT: control target
= control target key end

     0   :  { %s68_s0 = inlined_call_operand.vmem [shape: f32[4,8,256], index: 0, kind: input, shape index: {}]   ;;  %s69_s1 = inlined_call_operand.vmem [shape: f32[8,256], index: 1, kind: output, shape index: {}]  }
   0x1   :  { %v8_v0 = vld [vmem:[%s68_s0] sm:$0xff]  ;;  %v10_v1 = vld [vmem:[%s68_s0 + $0x10] sm:$0xff]  ;;  %v9_v5 = vld [vmem:[%s68_s0 + $0x8] sm:$0xff] }
   0x2   :  { %v12_v2 = vld [vmem:[%s68_s0 + $0x20] sm:$0xff]  ;;  %v14_v3 = vld [vmem:[%s68_s0 + $0x30] sm:$0xff]  ;;  %v11_v6 = vld [vmem:[%s68_s0 + $0x18] sm:$0xff] }
   0x3   :  { %v16_v4 = vmax.f32 %v8_v0, %v12_v2  ;;  %v17_v7 = vmax.f32 %v10_v1, %v14_v3  ;;  %v13_v8 = vld [vmem:[%s68_s0 + $0x28] sm:$0xff]  ;;  %v15_v9 = vld [vmem:[%s68_s0 + $0x38] sm:$0xff] }
   0x4   :  { %v19_v10 = vmax.f32 %v9_v5, %v13_v8  ;;  %v20_v11 = vmax.f32 %v11_v6, %v15_v9 }
   0x5   :  { %v18_v12 = vmax.f32 %v16_v4, %v17_v7 }
   0x6   :  { %v21_v13 = vmax.f32 %v19_v10, %v20_v11 }
   0x7   :  { %22 = vst [vmem:[%s69_s1] sm:$0xff] %v18_v12 }
   0x8   :  { %23 = vst [vmem:[%s69_s1 + $0x8] sm:$0xff] %v21_v13 }

// kernel: feature_extractor_forward.36
= control target key start
LH: loop header
LB: loop body
LE: loop exit
PB: predicated region body
PF: predicated region fallthrough
CT: control target
= control target key end

     0   :  { %s1310_s12 = smov 0   ;;  %s1312_s13 = smov 0   ;;  %s1574_s0 = inlined_call_operand.vmem [shape: bf16[8,2304], index: 0, kind: input, shape index: {}]   ;;  %s1575_s1 = inlined_call_operand.vmem [shape: bf16[2304,512], index: 1, kind: input, shape index: {}]   ;;  %s1576_s2 = inlined_call_operand.vmem [shape: f32[1,512], index: 2, kind: input, shape index: {}]   ;;  %s1577_s3 = inlined_call_operand.vmem [shape: f32[8,512], index: 3, kind: output, shape index: {}]  }
   0x1   :  { %s1314_s14 = smov 0   ;;  %s1316_s15 = smov 0  }
   0x2   :  { %s1318_s16 = smov 0   ;;  %s1320_s17 = smov 0  }
   0x3   :  { %s1322_s18 = smov 0  }
   0x4 LB: > { %s25_s19 = sadd.s32 1, %s1278_s16  ;;  %s28_s20 = sadd.s32 1, %s1282_s17  ;;  %s1286_s18 = sphi %s1322_s18, %s13_s18   ;;  %s1282_s17 = sphi %s1320_s17, %s1583_s17   ;;  %s1278_s16 = sphi %s1318_s16, %s1582_s16   ;;  %s1274_s15 = sphi %s1316_s15, %s1581_s15   ;;  %s1270_s14 = sphi %s1314_s14, %s1580_s14   ;;  %s1266_s13 = sphi %s1312_s13, %s1579_s13   ;;  %s1262_s12 = sphi %s1310_s12, %s1578_s12  }
   0x5   : > { %p26_p0 = scmp.ge.s32.totalorder %s25_s19, 6  ;;  %p76_p1 = scmp.ne.s32.totalorder %s1266_s13, %s1262_s12 }
   0x6   : > { %p77_p2 = scmp.eq.s32.totalorder %s1286_s18, 0  ;;  %s69_s24 = sadd.s32 1, %s1266_s13 }
   0x7   : > { %s1585_s19 = smov (%p26_p0, %s25_s19), 0  ;;  %s1587_s20 = smov (!%p26_p0, %s28_s20), %s1282_s17 }
   0x8   : > { %p78_p3 = por %p77_p2, %p76_p1  ;;  %p30_p4 = scmp.ge.s32.totalorder %s1587_s20, 2 }
   0x9   : > { %s64_s21 = ssub.s32 %s1278_s16, %s1585_s19  ;;  %p1032_p6 = scmp.ge.s32.totalorder %s1286_s18, 12 }
   0xa   : > { %s1589_s20 = smov (%p30_p4, %s1587_s20), 0 }
   0xb   : > { %s65_s22 = ssub.s32 %s1282_s17, %s1589_s20  ;;  %156 = sbr.rel (%p1032_p6) target bundleno = 50 (0x32), region = 16 }
   0xc   : > { %s66_s23 = sor.u32 %s65_s22, %s64_s21 }
   0xd   : > { %p67_p5 = scmp.eq.s32.totalorder %s66_s23, 0 }
   0xf   : > { %s1361_s25 = scalar_select %p67_p5, %s1266_s13, %s69_s24  }
  0x12   : > { %172 = sbr.rel (!%p78_p3) target bundleno = 50 (0x32), region = 24  ;;  %s174_s26 = sand.u32 (%p78_p3), 1, %s1266_s13  }
  0x13   : > { %s1097_s27 = smul.u32 (%p78_p3), 384, %s174_s26  ;;  %s1033_s28 = sshll.u32 (%p78_p3), %s1282_s17, 1 }
  0x14   : > { %s1096_s29 = smul.u32 (%p78_p3), 192, %s1278_s16 }
  0x15   : > { %s1375_s8 = scalar_lea.vmem (%p78_p3), [#allocation3], %s1097_s27 }
  0x16   : > { %s180_s30 = sadd.s32 (%p78_p3), %s1096_s29, %s1033_s28 }
  0x17   : > { %s1035_s4 = sshll.u32 (%p78_p3), %s180_s30, 2 }
  0x18   : > { %s1370_s7 = scalar_lea.vmem (%p78_p3), %s1575_s1, %s1035_s4 }
  0x19   : > { %v304_v0 = vld [vmem:[%s1370_s7] sm:$0xff]  ;;  %v306_v1 = vld [vmem:[%s1370_s7 + $0x10] sm:$0xff] }
  0x1a   : > { %v308_v2 = vld [vmem:[%s1370_s7 + $0x20] sm:$0xff]  ;;  %305 = vst [vmem:[%s1375_s8] sm:$0xff] %v304_v0  ;;  %307 = vst [vmem:[%s1375_s8 + $0x8] sm:$0xff] %v306_v1  ;;  %v310_v3 = vld [vmem:[%s1370_s7 + $0x30] sm:$0xff] }
  0x1b   : > { %309 = vst [vmem:[%s1375_s8 + $0x10] sm:$0xff] %v308_v2  ;;  %v312_v4 = vld [vmem:[%s1370_s7 + $0x40] sm:$0xff]  ;;  %v314_v5 = vld [vmem:[%s1370_s7 + $0x50] sm:$0xff]  ;;  %311 = vst [vmem:[%s1375_s8 + $0x18] sm:$0xff] %v310_v3 }
  0x1c   : > { %313 = vst [vmem:[%s1375_s8 + $0x20] sm:$0xff] %v312_v4  ;;  %315 = vst [vmem:[%s1375_s8 + $0x28] sm:$0xff] %v314_v5  ;;  %v316_v6 = vld [vmem:[%s1370_s7 + $0x60] sm:$0xff]  ;;  %v318_v7 = vld [vmem:[%s1370_s7 + $0x70] sm:$0xff] }
  0x1d   : > { %v320_v8 = vld [vmem:[%s1370_s7 + $0x80] sm:$0xff]  ;;  %317 = vst [vmem:[%s1375_s8 + $0x30] sm:$0xff] %v316_v6  ;;  %319 = vst [vmem:[%s1375_s8 + $0x38] sm:$0xff] %v318_v7  ;;  %v322_v9 = vld [vmem:[%s1370_s7 + $0x90] sm:$0xff] }
  0x1e   : > { %321 = vst [vmem:[%s1375_s8 + $0x40] sm:$0xff] %v320_v8  ;;  %v324_v10 = vld [vmem:[%s1370_s7 + $0xa0] sm:$0xff]  ;;  %v326_v11 = vld [vmem:[%s1370_s7 + $0xb0] sm:$0xff]  ;;  %323 = vst [vmem:[%s1375_s8 + $0x48] sm:$0xff] %v322_v9 }
  0x1f   : > { %325 = vst [vmem:[%s1375_s8 + $0x50] sm:$0xff] %v324_v10  ;;  %327 = vst [vmem:[%s1375_s8 + $0x58] sm:$0xff] %v326_v11  ;;  %v328_v12 = vld [vmem:[%s1370_s7 + $0xc0] sm:$0xff]  ;;  %v330_v13 = vld [vmem:[%s1370_s7 + $0xd0] sm:$0xff] }
  0x20   : > { %v332_v14 = vld [vmem:[%s1370_s7 + $0xe0] sm:$0xff]  ;;  %329 = vst [vmem:[%s1375_s8 + $0x60] sm:$0xff] %v328_v12  ;;  %331 = vst [vmem:[%s1375_s8 + $0x68] sm:$0xff] %v330_v13  ;;  %v334_v15 = vld [vmem:[%s1370_s7 + $0xf0] sm:$0xff] }
  0x21   : > { %333 = vst [vmem:[%s1375_s8 + $0x70] sm:$0xff] %v332_v14  ;;  %v336_v16 = vld [vmem:[%s1370_s7 + $0x100] sm:$0xff]  ;;  %v338_v17 = vld [vmem:[%s1370_s7 + $0x110] sm:$0xff]  ;;  %335 = vst [vmem:[%s1375_s8 + $0x78] sm:$0xff] %v334_v15 }
  0x22   : > { %337 = vst [vmem:[%s1375_s8 + $0x80] sm:$0xff] %v336_v16  ;;  %339 = vst [vmem:[%s1375_s8 + $0x88] sm:$0xff] %v338_v17  ;;  %v340_v18 = vld [vmem:[%s1370_s7 + $0x120] sm:$0xff]  ;;  %v342_v19 = vld [vmem:[%s1370_s7 + $0x130] sm:$0xff] }
  0x23   : > { %v344_v20 = vld [vmem:[%s1370_s7 + $0x140] sm:$0xff]  ;;  %341 = vst [vmem:[%s1375_s8 + $0x90] sm:$0xff] %v340_v18  ;;  %343 = vst [vmem:[%s1375_s8 + $0x98] sm:$0xff] %v342_v19  ;;  %v346_v21 = vld [vmem:[%s1370_s7 + $0x150] sm:$0xff] }
  0x24   : > { %345 = vst [vmem:[%s1375_s8 + $0xa0] sm:$0xff] %v344_v20  ;;  %v348_v22 = vld [vmem:[%s1370_s7 + $0x160] sm:$0xff]  ;;  %v350_v23 = vld [vmem:[%s1370_s7 + $0x170] sm:$0xff]  ;;  %347 = vst [vmem:[%s1375_s8 + $0xa8] sm:$0xff] %v346_v21 }
  0x25   : > { %349 = vst [vmem:[%s1375_s8 + $0xb0] sm:$0xff] %v348_v22  ;;  %351 = vst [vmem:[%s1375_s8 + $0xb8] sm:$0xff] %v350_v23  ;;  %v352_v24 = vld [vmem:[%s1370_s7 + $0x180] sm:$0xff]  ;;  %v354_v25 = vld [vmem:[%s1370_s7 + $0x190] sm:$0xff] }
  0x26   : > { %v356_v26 = vld [vmem:[%s1370_s7 + $0x1a0] sm:$0xff]  ;;  %353 = vst [vmem:[%s1375_s8 + $0xc0] sm:$0xff] %v352_v24  ;;  %355 = vst [vmem:[%s1375_s8 + $0xc8] sm:$0xff] %v354_v25  ;;  %v358_v27 = vld [vmem:[%s1370_s7 + $0x1b0] sm:$0xff] }
  0x27   : > { %357 = vst [vmem:[%s1375_s8 + $0xd0] sm:$0xff] %v356_v26  ;;  %v360_v28 = vld [vmem:[%s1370_s7 + $0x1c0] sm:$0xff]  ;;  %v362_v29 = vld [vmem:[%s1370_s7 + $0x1d0] sm:$0xff]  ;;  %359 = vst [vmem:[%s1375_s8 + $0xd8] sm:$0xff] %v358_v27 }
  0x28   : > { %361 = vst [vmem:[%s1375_s8 + $0xe0] sm:$0xff] %v360_v28  ;;  %363 = vst [vmem:[%s1375_s8 + $0xe8] sm:$0xff] %v362_v29  ;;  %v364_v30 = vld [vmem:[%s1370_s7 + $0x1e0] sm:$0xff]  ;;  %v366_v31 = vld [vmem:[%s1370_s7 + $0x1f0] sm:$0xff] }
  0x29   : > { %v368_v32 = vld [vmem:[%s1370_s7 + $0x200] sm:$0xff]  ;;  %365 = vst [vmem:[%s1375_s8 + $0xf0] sm:$0xff] %v364_v30  ;;  %367 = vst [vmem:[%s1375_s8 + $0xf8] sm:$0xff] %v366_v31  ;;  %v370_v33 = vld [vmem:[%s1370_s7 + $0x210] sm:$0xff] }
  0x2a   : > { %369 = vst [vmem:[%s1375_s8 + $0x100] sm:$0xff] %v368_v32  ;;  %v372_v34 = vld [vmem:[%s1370_s7 + $0x220] sm:$0xff]  ;;  %v374_v35 = vld [vmem:[%s1370_s7 + $0x230] sm:$0xff]  ;;  %371 = vst [vmem:[%s1375_s8 + $0x108] sm:$0xff] %v370_v33 }
  0x2b   : > { %373 = vst [vmem:[%s1375_s8 + $0x110] sm:$0xff] %v372_v34  ;;  %375 = vst [vmem:[%s1375_s8 + $0x118] sm:$0xff] %v374_v35  ;;  %v376_v36 = vld [vmem:[%s1370_s7 + $0x240] sm:$0xff]  ;;  %v378_v37 = vld [vmem:[%s1370_s7 + $0x250] sm:$0xff] }
  0x2c   : > { %v380_v38 = vld [vmem:[%s1370_s7 + $0x260] sm:$0xff]  ;;  %377 = vst [vmem:[%s1375_s8 + $0x120] sm:$0xff] %v376_v36  ;;  %379 = vst [vmem:[%s1375_s8 + $0x128] sm:$0xff] %v378_v37  ;;  %v382_v39 = vld [vmem:[%s1370_s7 + $0x270] sm:$0xff] }
  0x2d   : > { %381 = vst [vmem:[%s1375_s8 + $0x130] sm:$0xff] %v380_v38  ;;  %v384_v40 = vld [vmem:[%s1370_s7 + $0x280] sm:$0xff]  ;;  %v386_v41 = vld [vmem:[%s1370_s7 + $0x290] sm:$0xff]  ;;  %383 = vst [vmem:[%s1375_s8 + $0x138] sm:$0xff] %v382_v39 }
  0x2e   : > { %385 = vst [vmem:[%s1375_s8 + $0x140] sm:$0xff] %v384_v40  ;;  %387 = vst [vmem:[%s1375_s8 + $0x148] sm:$0xff] %v386_v41  ;;  %v388_v42 = vld [vmem:[%s1370_s7 + $0x2a0] sm:$0xff]  ;;  %v390_v43 = vld [vmem:[%s1370_s7 + $0x2b0] sm:$0xff] }
  0x2f   : > { %v392_v44 = vld [vmem:[%s1370_s7 + $0x2c0] sm:$0xff]  ;;  %389 = vst [vmem:[%s1375_s8 + $0x150] sm:$0xff] %v388_v42  ;;  %391 = vst [vmem:[%s1375_s8 + $0x158] sm:$0xff] %v390_v43  ;;  %v394_v45 = vld [vmem:[%s1370_s7 + $0x2d0] sm:$0xff] }
  0x30   : > { %393 = vst [vmem:[%s1375_s8 + $0x160] sm:$0xff] %v392_v44  ;;  %v396_v46 = vld [vmem:[%s1370_s7 + $0x2e0] sm:$0xff]  ;;  %v398_v47 = vld [vmem:[%s1370_s7 + $0x2f0] sm:$0xff]  ;;  %395 = vst [vmem:[%s1375_s8 + $0x168] sm:$0xff] %v394_v45 }
  0x31   : > { %397 = vst [vmem:[%s1375_s8 + $0x170] sm:$0xff] %v396_v46  ;;  %399 = vst [vmem:[%s1375_s8 + $0x178] sm:$0xff] %v398_v47 }
  0x32 PF: > { %p1036_p7 = scmp.ge.s32.totalorder %s1286_s18, 1  ;;  %p412_p8 = scmp.lt.s32.totalorder %s1286_s18, 13 }
  0x34   : > { %p413_p9 = pnand %p1036_p7, %p412_p8 }
  0x35   : > { %s419_s9 = sand.u32 (!%p413_p9), 1, %s1262_s12   ;;  %s459_s10 = smul.u32 (!%p413_p9), 3, %s1270_s14 }
  0x36   : > { %416 = sbr.rel (%p413_p9) target bundleno = 366 (0x16e), region = 66  ;;  %s1038_s21 = sshll.u32 (!%p413_p9), %s1274_s15, 1 }
  0x37   : > { %s1098_s11 = smul.u32 (!%p413_p9), 384, %s419_s9  ;;  %p462_p10 = scmp.lt.s32.totalorder (!%p413_p9), %s459_s10, 17 }
  0x38   : > { %p472_p11 = scmp.lt.s32.totalorder (!%p413_p9), %s1038_s21, 3  ;;  %p1041_p12 = scmp.ne.s32.totalorder (!%p413_p9), %s1270_s14, 0 }
  0x39   : > { %s1492_s5 = scalar_lea.vmem (!%p413_p9), [#allocation3], %s1098_s11 }
  0x3d   : > { %s1591_s10 = smov (!%p462_p10, %s459_s10), 17  ;;  %s1593_s21 = smov (!%p472_p11, %s1038_s21), 3 }
  0x3e   : > { %s1037_s22 = sshll.u32 %s1591_s10, 2  ;;  %s474_s12 = scalar_lea.vmem %s1576_s2, %s1593_s21  ;;  %v1288_v48 = vmov (!%p1041_p12), 0.0  }
  0x3f   : > { %s1480_s26 = scalar_lea.vmem %s1574_s0, %s1037_s22  ;;  %s1040_s29 = sshll.u32 %s1593_s21, 3  ;;  %491 = vst [vmem:[#allocation2] sm:$0xff] (!%p1041_p12), %v1288_v48  ;;  %492 = vst [vmem:[#allocation2 + $0x8] sm:$0xff] (!%p1041_p12), %v1288_v48 }
  0x40   : > { %s1490_s4 = scalar_lea.vmem %s1577_s3, %s1040_s29  ;;  %490 = sbr.rel (%p1041_p12) target bundleno = 71 (0x47), region = 74 }
  0x47 PF: > { %v1157_v49 = vld [vmem:[%s1492_s5 + $0x4] ss:$8 sps:$4 sm:$0xff]   ;;  %v1159_v50 = vld [vmem:[%s1492_s5] ss:$8 sps:$4 sm:$0xff]   ;;  %v1289_v51 = vmov 0   ;;  %v495_v18 = vld [vmem:[%s1480_s26] sm:$0xff] }
  0x48   : > { %869 = vmatprep.mubr.bf16.mxu1 %v1289_v51  ;;  %796 = vmatprep.subr.bf16.mxu0 %v1157_v49  ;;  %v1160_v52 = vld [vmem:[%s1492_s5 + $0x14] ss:$8 sps:$4 sm:$0xff]   ;;  %v1162_v53 = vld [vmem:[%s1492_s5 + $0x10] ss:$8 sps:$4 sm:$0xff]   ;;  %v1163_v54 = vld [vmem:[%s1492_s5 + $0x24] ss:$8 sps:$4 sm:$0xff]   ;;  %v1043_v19 = vcombine.high %v495_v18, %v495_v18  ;;  %v1042_v37 = vcombine.low %v495_v18, %v495_v18 }
  0x49   : > { %797 = vmatpush1.bf16.msra.mxu0 %v1159_v50  ;;  %v1165_v55 = vld [vmem:[%s1492_s5 + $0x20] ss:$8 sps:$4 sm:$0xff]   ;;  %v1166_v56 = vld [vmem:[%s1492_s5 + $0x34] ss:$8 sps:$4 sm:$0xff]   ;;  %v1168_v57 = vld [vmem:[%s1492_s5 + $0x30] ss:$8 sps:$4 sm:$0xff]  }
  0x4a   : > { %798 = vmatprep.subr.bf16.mxu0 %v1160_v52  ;;  %v1181_v58 = vld [vmem:[%s1492_s5 + $0x104] ss:$8 sps:$4 sm:$0xff]   ;;  %v1183_v59 = vld [vmem:[%s1492_s5 + $0x100] ss:$8 sps:$4 sm:$0xff]   ;;  %v1187_v61 = vld [vmem:[%s1492_s5 + $0x114] ss:$8 sps:$4 sm:$0xff]   ;;  %828 = vmatprep.mubr.bf16.mxu0 %v1043_v19 }
  0x4b   : > { %v1169_v60 = vld [vmem:[%s1492_s5 + $0x44] ss:$8 sps:$4 sm:$0xff]   ;;  %837 = vmatprep.subr.bf16.mxu1 %v1181_v58  ;;  %v1189_v62 = vld [vmem:[%s1492_s5 + $0x110] ss:$8 sps:$4 sm:$0xff]   ;;  %v1171_v63 = vld [vmem:[%s1492_s5 + $0x40] ss:$8 sps:$4 sm:$0xff]  }
  0x4c   : > { %838 = vmatpush1.bf16.msra.mxu1 %v1183_v59  ;;  %v1172_v0 = vld [vmem:[%s1492_s5 + $0x54] ss:$8 sps:$4 sm:$0xff]   ;;  %v1193_v1 = vld [vmem:[%s1492_s5 + $0x124] ss:$8 sps:$4 sm:$0xff]   ;;  %v1195_v2 = vld [vmem:[%s1492_s5 + $0x120] ss:$8 sps:$4 sm:$0xff]  }
  0x4d   : > { %799 = vmatpush1.bf16.msra.mxu0 %v1162_v53  ;;  %839 = vmatprep.subr.bf16.mxu1 %v1187_v61  ;;  %v1174_v3 = vld [vmem:[%s1492_s5 + $0x50] ss:$8 sps:$4 sm:$0xff]   ;;  %v1199_v4 = vld [vmem:[%s1492_s5 + $0x134] ss:$8 sps:$4 sm:$0xff]   ;;  %v1175_v5 = vld [vmem:[%s1492_s5 + $0x64] ss:$8 sps:$4 sm:$0xff]  }
  0x4e   : > { %800 = vmatprep.subr.bf16.mxu0 %v1163_v54  ;;  %v1201_v6 = vld [vmem:[%s1492_s5 + $0x130] ss:$8 sps:$4 sm:$0xff]   ;;  %v1177_v7 = vld [vmem:[%s1492_s5 + $0x60] ss:$8 sps:$4 sm:$0xff]   ;;  %v1205_v8 = vld [vmem:[%s1492_s5 + $0x144] ss:$8 sps:$4 sm:$0xff]  }
  0x4f   : > { %v1178_v9 = vld [vmem:[%s1492_s5 + $0x74] ss:$8 sps:$4 sm:$0xff]   ;;  %v1207_v10 = vld [vmem:[%s1492_s5 + $0x140] ss:$8 sps:$4 sm:$0xff]   ;;  %v1180_v11 = vld [vmem:[%s1492_s5 + $0x70] ss:$8 sps:$4 sm:$0xff]  }
  0x50   : > { %840 = vmatpush1.bf16.msra.mxu1 %v1189_v62  ;;  %v1211_v12 = vld [vmem:[%s1492_s5 + $0x154] ss:$8 sps:$4 sm:$0xff]   ;;  %v1184_v13 = vld [vmem:[%s1492_s5 + $0x84] ss:$8 sps:$4 sm:$0xff]   ;;  %v1213_v14 = vld [vmem:[%s1492_s5 + $0x150] ss:$8 sps:$4 sm:$0xff]  }
  0x51   : > { %801 = vmatpush1.bf16.msra.mxu0 %v1165_v55  ;;  %841 = vmatprep.subr.bf16.mxu1 %v1193_v1  ;;  %v1186_v15 = vld [vmem:[%s1492_s5 + $0x80] ss:$8 sps:$4 sm:$0xff]   ;;  %v1217_v16 = vld [vmem:[%s1492_s5 + $0x164] ss:$8 sps:$4 sm:$0xff]   ;;  %v1190_v17 = vld [vmem:[%s1492_s5 + $0x94] ss:$8 sps:$4 sm:$0xff]  }
  0x52   : > { %802 = vmatprep.subr.bf16.mxu0 %v1166_v56  ;;  %v1219_v20 = vld [vmem:[%s1492_s5 + $0x160] ss:$8 sps:$4 sm:$0xff]   ;;  %v1192_v21 = vld [vmem:[%s1492_s5 + $0x90] ss:$8 sps:$4 sm:$0xff]   ;;  %v1223_v22 = vld [vmem:[%s1492_s5 + $0x174] ss:$8 sps:$4 sm:$0xff]  }
  0x53   : > { %v1196_v23 = vld [vmem:[%s1492_s5 + $0xa4] ss:$8 sps:$4 sm:$0xff]   ;;  %v1225_v24 = vld [vmem:[%s1492_s5 + $0x170] ss:$8 sps:$4 sm:$0xff]   ;;  %v1198_v25 = vld [vmem:[%s1492_s5 + $0xa0] ss:$8 sps:$4 sm:$0xff]  }
  0x54   : > { %842 = vmatpush1.bf16.msra.mxu1 %v1195_v2  ;;  %v1202_v26 = vld [vmem:[%s1492_s5 + $0xb4] ss:$8 sps:$4 sm:$0xff]   ;;  %v1229_v27 = vld [vmem:[%s1480_s26 + $0x8] ss:$0 sps:$4 sm:$0xff]   ;;  %v1208_v29 = vld [vmem:[%s1492_s5 + $0xc4] ss:$8 sps:$4 sm:$0xff]  }
  0x55   : > { %803 = vmatpush1.bf16.msra.mxu0 %v1168_v57  ;;  %843 = vmatprep.subr.bf16.mxu1 %v1199_v4  ;;  %v1204_v28 = vld [vmem:[%s1492_s5 + $0xb0] ss:$8 sps:$4 sm:$0xff]   ;;  %v1210_v30 = vld [vmem:[%s1492_s5 + $0xc0] ss:$8 sps:$4 sm:$0xff]   ;;  %v1214_v31 = vld [vmem:[%s1492_s5 + $0xd4] ss:$8 sps:$4 sm:$0xff]  }
  0x56   : > { %804 = vmatprep.subr.bf16.mxu0 %v1169_v60  ;;  %v1216_v32 = vld [vmem:[%s1492_s5 + $0xd0] ss:$8 sps:$4 sm:$0xff]   ;;  %v1220_v33 = vld [vmem:[%s1492_s5 + $0xe4] ss:$8 sps:$4 sm:$0xff]   ;;  %v1222_v34 = vld [vmem:[%s1492_s5 + $0xe0] ss:$8 sps:$4 sm:$0xff]  }
  0x57   : > { %v1226_v35 = vld [vmem:[%s1492_s5 + $0xf4] ss:$8 sps:$4 sm:$0xff]   ;;  %v1228_v36 = vld [vmem:[%s1492_s5 + $0xf0] ss:$8 sps:$4 sm:$0xff]   ;;  %p1093_p13 = scmp.ne.s32.totalorder %s1270_s14, 5 }
  0x58   : > { %844 = vmatpush1.bf16.msra.mxu1 %v1201_v6  ;;  %v493_v42 = vld [vmem:[#allocation2] sm:$0xff]  ;;  %v494_v45 = vld [vmem:[#allocation2 + $0x8] sm:$0xff]  ;;  %v890_v52 = vlaneseq (!%p1093_p13) }
  0x59   : > { %805 = vmatpush1.bf16.msra.mxu0 %v1171_v63  ;;  %845 = vmatprep.subr.bf16.mxu1 %v1205_v8  ;;  %v888_v54 = vld [vmem:[%s474_s12] sm:$0x3] (!%p1093_p13) }
  0x5a   : > { %806 = vmatprep.subr.bf16.mxu0 %v1172_v0  ;;  %v891_v53 = vshrl.u32 (!%p1093_p13), %v890_v52, 7 }
  0x5c   : > { %846 = vmatpush1.bf16.msra.mxu1 %v1207_v10  ;;  %v892_v55 = vsub.s32 (!%p1093_p13), 0, %v891_v53  ;;  %v896_v56 = vsub.s32 (!%p1093_p13), 1, %v891_v53 }
  0x5d   : > { %807 = vmatpush1.bf16.msra.mxu0 %v1174_v3  ;;  %847 = vmatprep.subr.bf16.mxu1 %v1211_v12 }
  0x5e   : > { %808 = vmatprep.subr.bf16.mxu0 %v1175_v5  ;;  %v893_v59 = vrot.slane (!%p1093_p13), %v888_v54, %v892_v55  ;;  %v897_v60 = vrot.slane (!%p1093_p13), %v888_v54, %v896_v56 }
  0x60   : > { %848 = vmatpush1.bf16.msra.mxu1 %v1213_v14 }
  0x61   : > { %809 = vmatpush1.bf16.msra.mxu0 %v1177_v7  ;;  %849 = vmatprep.subr.bf16.mxu1 %v1217_v16 }
  0x62   : > { %810 = vmatprep.subr.bf16.mxu0 %v1178_v9 }
  0x64   : > { %850 = vmatpush1.bf16.msra.mxu1 %v1219_v20 }
  0x65   : > { %811 = vmatpush1.bf16.msra.mxu0 %v1180_v11  ;;  %851 = vmatprep.subr.bf16.mxu1 %v1223_v22 }
  0x66   : > { %812 = vmatprep.subr.bf16.mxu0 %v1184_v13 }
  0x68   : > { %852 = vmatpush1.bf16.msra.mxu1 %v1225_v24 }
  0x69   : > { %813 = vmatpush1.bf16.msra.mxu0 %v1186_v15 }
  0x6a   : > { %814 = vmatprep.subr.bf16.mxu0 %v1190_v17 }
  0x6b   : > { %870 = vmatmul.mubr.bf16.vlgmr.msra.gmra.mrb[0].mxu1 %v1229_v27 }
  0x6d   : > { %815 = vmatpush1.bf16.msra.mxu0 %v1192_v21 }
  0x6e   : > { %816 = vmatprep.subr.bf16.mxu0 %v1196_v23 }
  0x71   : > { %817 = vmatpush1.bf16.msra.mxu0 %v1198_v25 }
  0x72   : > { %818 = vmatprep.subr.bf16.mxu0 %v1202_v26 }
  0x75   : > { %819 = vmatpush1.bf16.msra.mxu0 %v1204_v28 }
  0x76   : > { %820 = vmatprep.subr.bf16.mxu0 %v1208_v29 }
  0x79   : > { %821 = vmatpush1.bf16.msra.mxu0 %v1210_v30 }
  0x7a   : > { %822 = vmatprep.subr.bf16.mxu0 %v1214_v31 }
  0x7d   : > { %823 = vmatpush1.bf16.msra.mxu0 %v1216_v32 }
  0x7e   : > { %824 = vmatprep.subr.bf16.mxu0 %v1220_v33 }
  0x81   : > { %825 = vmatpush1.bf16.msra.mxu0 %v1222_v34 }
  0x82   : > { %826 = vmatprep.subr.bf16.mxu0 %v1226_v35 }
  0x85   : > { %827 = vmatpush1.bf16.msra.mxu0 %v1228_v36 }
  0x88   : > { %829 = vmatmul.mubr.bf16.vlgmr.msra.gmra.mrb[0].mxu0 %v1042_v37 }
 0x13e   : > { %v871_v38 = vpop.f32.mrb[0].mxu1 }
 0x13f   : > { %v873_v39 = vpop.f32.mrb[1].mxu1 }
 0x140   : > { %v875_v40 = vpop.f32.mrb[2].mxu1 }
 0x141   : > { %v876_v41 = vpop.f32.mrb[3].mxu1 }
 0x15b   : > { %v830_v43 = vpop.f32.mrb[0].mxu0  ;;  %885 = sbr.rel (%p1093_p13) target bundleno = 366 (0x16e), region = 78 }
 0x15c   : > { %v872_v44 = vadd.f32 %v871_v38, %v830_v43  ;;  %v832_v46 = vpop.f32.mrb[1].mxu0 }
 0x15d   : > { %v874_v47 = vadd.f32 %v873_v39, %v832_v46  ;;  %v834_v48 = vpop.f32.mrb[2].mxu0 }
 0x15e   : > { %v878_v49 = vadd.f32 %v872_v44, %v493_v42  ;;  %v835_v50 = vpop.f32.mrb[3].mxu0 }
 0x15f   : > { %v879_v51 = vadd.f32 %v874_v47, %v494_v45 }
 0x160   : > { %880 = vst [vmem:[#allocation2] sm:$0xff] %v878_v49 }
 0x161   : > { %881 = vst [vmem:[#allocation2 + $0x8] sm:$0xff] %v879_v51 }
 0x167   : > { %v886_v57 = vld [vmem:[#allocation2] sm:$0xff] }
 0x168   : > { %v887_v58 = vld [vmem:[#allocation2 + $0x8] sm:$0xff]  ;;  %v900_v61 = vadd.f32 %v893_v59, %v886_v57 }
 0x169   : > { %v901_v62 = vadd.f32 %v897_v60, %v887_v58 }
 0x16a   : > { %v902_v63 = vmax.f32 %v900_v61, 0.0 }
 0x16b   : > { %v903_v0 = vmax.f32 %v901_v62, 0.0 }
 0x16c   : > { %904 = vst [vmem:[%s1490_s4] sm:$0xff] %v902_v63 }
 0x16d   : > { %905 = vst [vmem:[%s1490_s4 + $0x8] sm:$0xff] %v903_v0 }
 0x16e PF: > { %s13_s18 = sadd.s32 1, %s1286_s18   ;;  %s1578_s12 = smov %s1266_s13 }
 0x16f   : > { %p10_p0 = scmp.ge.s32.totalorder %s13_s18, 14   ;;  %s1579_s13 = smov %s1361_s25 }
 0x170   : > { %s1580_s14 = smov %s1278_s16  ;;  %s1581_s15 = smov %s1282_s17 }
 0x171   : > { %s1582_s16 = smov %s1585_s19  ;;  %s1583_s17 = smov %s1589_s20 }
 0x172   :  { %12 = sbr.rel (!%p10_p0) target bundleno = 4 (0x4), region = 119 }

// kernel: feature_extractor_forward.37
= control target key start
LH: loop header
LB: loop body
LE: loop exit
PB: predicated region body
PF: predicated region fallthrough
CT: control target
= control target key end

     0   :  { %s1514_s12 = smov 0   ;;  %s1516_s13 = smov 0   ;;  %s1826_s0 = inlined_call_operand.vmem [shape: bf16[8,4608], index: 0, kind: input, shape index: {}]   ;;  %s1827_s1 = inlined_call_operand.vmem [shape: bf16[4608,512], index: 1, kind: input, shape index: {}]   ;;  %s1828_s2 = inlined_call_operand.vmem [shape: f32[1,512], index: 2, kind: input, shape index: {}]   ;;  %s1829_s3 = inlined_call_operand.vmem [shape: f32[8,512], index: 3, kind: output, shape index: {}]  }
   0x1   :  { %s1518_s14 = smov 0   ;;  %s1520_s15 = smov 0  }
   0x2   :  { %s1522_s16 = smov 0   ;;  %s1524_s17 = smov 0  }
   0x3   :  { %s1526_s18 = smov 0  }
   0x4 LB: > { %s25_s19 = sadd.s32 1, %s1483_s16  ;;  %s28_s20 = sadd.s32 1, %s1487_s17  ;;  %s1491_s18 = sphi %s1526_s18, %s13_s18   ;;  %s1487_s17 = sphi %s1524_s17, %s1835_s17   ;;  %s1483_s16 = sphi %s1522_s16, %s1834_s16   ;;  %s1479_s15 = sphi %s1520_s15, %s1833_s15   ;;  %s1475_s14 = sphi %s1518_s14, %s1832_s14   ;;  %s1471_s13 = sphi %s1516_s13, %s1831_s13   ;;  %s1467_s12 = sphi %s1514_s12, %s1830_s12  }
   0x5   : > { %p26_p0 = scmp.ge.s32.totalorder %s25_s19, 9  ;;  %p76_p1 = scmp.ne.s32.totalorder %s1471_s13, %s1467_s12 }
   0x6   : > { %p77_p2 = scmp.eq.s32.totalorder %s1491_s18, 0  ;;  %s69_s24 = sadd.s32 1, %s1471_s13 }
   0x7   : > { %s1837_s19 = smov (%p26_p0, %s25_s19), 0  ;;  %s1839_s20 = smov (!%p26_p0, %s28_s20), %s1487_s17 }
   0x8   : > { %p78_p3 = por %p77_p2, %p76_p1  ;;  %p30_p4 = scmp.ge.s32.totalorder %s1839_s20, 2 }
   0x9   : > { %s64_s21 = ssub.s32 %s1483_s16, %s1837_s19  ;;  %p1194_p6 = scmp.ge.s32.totalorder %s1491_s18, 18 }
   0xa   : > { %s1841_s20 = smov (%p30_p4, %s1839_s20), 0 }
   0xb   : > { %s65_s22 = ssub.s32 %s1487_s17, %s1841_s20  ;;  %156 = sbr.rel (%p1194_p6) target bundleno = 57 (0x39), region = 16 }
   0xc   : > { %s66_s23 = sor.u32 %s65_s22, %s64_s21 }
   0xd   : > { %p67_p5 = scmp.eq.s32.totalorder %s66_s23, 0 }
   0xf   : > { %s1565_s25 = scalar_select %p67_p5, %s1471_s13, %s69_s24  }
  0x12   : > { %172 = sbr.rel (!%p78_p3) target bundleno = 57 (0x39), region = 24  ;;  %s174_s26 = sand.u32 (%p78_p3), 1, %s1471_s13  }
  0x13   : > { %s1197_s27 = sshll.u32 (%p78_p3), %s1487_s17, 1  ;;  %s1195_s28 = sshll.u32 (%p78_p3), %s174_s26, 9 }
  0x14   : > { %s1279_s29 = sshll.u32 (%p78_p3), %s1483_s16, 8  ;;  %s1579_s8 = scalar_lea.vmem (%p78_p3), [#allocation3], %s1195_s28 }
  0x15   : > { %s180_s30 = sadd.s32 (%p78_p3), %s1279_s29, %s1197_s27 }
  0x16   : > { %s1199_s4 = sshll.u32 (%p78_p3), %s180_s30, 2 }
  0x17   : > { %s1574_s7 = scalar_lea.vmem (%p78_p3), %s1827_s1, %s1199_s4 }
  0x18   : > { %v336_v0 = vld [vmem:[%s1574_s7] sm:$0xff] (%p78_p3)  ;;  %v338_v1 = vld [vmem:[%s1574_s7 + $0x10] sm:$0xff] (%p78_p3) }
  0x19   : > { %v340_v2 = vld [vmem:[%s1574_s7 + $0x20] sm:$0xff]  ;;  %337 = vst [vmem:[%s1579_s8] sm:$0xff] %v336_v0  ;;  %339 = vst [vmem:[%s1579_s8 + $0x8] sm:$0xff] %v338_v1  ;;  %v342_v3 = vld [vmem:[%s1574_s7 + $0x30] sm:$0xff] }
  0x1a   : > { %341 = vst [vmem:[%s1579_s8 + $0x10] sm:$0xff] %v340_v2  ;;  %v344_v4 = vld [vmem:[%s1574_s7 + $0x40] sm:$0xff]  ;;  %v346_v5 = vld [vmem:[%s1574_s7 + $0x50] sm:$0xff]  ;;  %343 = vst [vmem:[%s1579_s8 + $0x18] sm:$0xff] %v342_v3 }
  0x1b   : > { %345 = vst [vmem:[%s1579_s8 + $0x20] sm:$0xff] %v344_v4  ;;  %347 = vst [vmem:[%s1579_s8 + $0x28] sm:$0xff] %v346_v5  ;;  %v348_v6 = vld [vmem:[%s1574_s7 + $0x60] sm:$0xff]  ;;  %v350_v7 = vld [vmem:[%s1574_s7 + $0x70] sm:$0xff] }
  0x1c   : > { %v352_v8 = vld [vmem:[%s1574_s7 + $0x80] sm:$0xff]  ;;  %349 = vst [vmem:[%s1579_s8 + $0x30] sm:$0xff] %v348_v6  ;;  %351 = vst [vmem:[%s1579_s8 + $0x38] sm:$0xff] %v350_v7  ;;  %v354_v9 = vld [vmem:[%s1574_s7 + $0x90] sm:$0xff] }
  0x1d   : > { %353 = vst [vmem:[%s1579_s8 + $0x40] sm:$0xff] %v352_v8  ;;  %v356_v10 = vld [vmem:[%s1574_s7 + $0xa0] sm:$0xff]  ;;  %v358_v11 = vld [vmem:[%s1574_s7 + $0xb0] sm:$0xff]  ;;  %355 = vst [vmem:[%s1579_s8 + $0x48] sm:$0xff] %v354_v9 }
  0x1e   : > { %357 = vst [vmem:[%s1579_s8 + $0x50] sm:$0xff] %v356_v10  ;;  %359 = vst [vmem:[%s1579_s8 + $0x58] sm:$0xff] %v358_v11  ;;  %v360_v12 = vld [vmem:[%s1574_s7 + $0xc0] sm:$0xff]  ;;  %v362_v13 = vld [vmem:[%s1574_s7 + $0xd0] sm:$0xff] }
  0x1f   : > { %v364_v14 = vld [vmem:[%s1574_s7 + $0xe0] sm:$0xff]  ;;  %361 = vst [vmem:[%s1579_s8 + $0x60] sm:$0xff] %v360_v12  ;;  %363 = vst [vmem:[%s1579_s8 + $0x68] sm:$0xff] %v362_v13  ;;  %v366_v15 = vld [vmem:[%s1574_s7 + $0xf0] sm:$0xff] }
  0x20   : > { %365 = vst [vmem:[%s1579_s8 + $0x70] sm:$0xff] %v364_v14  ;;  %v368_v16 = vld [vmem:[%s1574_s7 + $0x100] sm:$0xff]  ;;  %v370_v17 = vld [vmem:[%s1574_s7 + $0x110] sm:$0xff]  ;;  %367 = vst [vmem:[%s1579_s8 + $0x78] sm:$0xff] %v366_v15 }
  0x21   : > { %369 = vst [vmem:[%s1579_s8 + $0x80] sm:$0xff] %v368_v16  ;;  %371 = vst [vmem:[%s1579_s8 + $0x88] sm:$0xff] %v370_v17  ;;  %v372_v18 = vld [vmem:[%s1574_s7 + $0x120] sm:$0xff]  ;;  %v374_v19 = vld [vmem:[%s1574_s7 + $0x130] sm:$0xff] }
  0x22   : > { %v376_v20 = vld [vmem:[%s1574_s7 + $0x140] sm:$0xff]  ;;  %373 = vst [vmem:[%s1579_s8 + $0x90] sm:$0xff] %v372_v18  ;;  %375 = vst [vmem:[%s1579_s8 + $0x98] sm:$0xff] %v374_v19  ;;  %v378_v21 = vld [vmem:[%s1574_s7 + $0x150] sm:$0xff] }
  0x23   : > { %377 = vst [vmem:[%s1579_s8 + $0xa0] sm:$0xff] %v376_v20  ;;  %v380_v22 = vld [vmem:[%s1574_s7 + $0x160] sm:$0xff]  ;;  %v382_v23 = vld [vmem:[%s1574_s7 + $0x170] sm:$0xff]  ;;  %379 = vst [vmem:[%s1579_s8 + $0xa8] sm:$0xff] %v378_v21 }
  0x24   : > { %381 = vst [vmem:[%s1579_s8 + $0xb0] sm:$0xff] %v380_v22  ;;  %383 = vst [vmem:[%s1579_s8 + $0xb8] sm:$0xff] %v382_v23  ;;  %v384_v24 = vld [vmem:[%s1574_s7 + $0x180] sm:$0xff]  ;;  %v386_v25 = vld [vmem:[%s1574_s7 + $0x190] sm:$0xff] }
  0x25   : > { %v388_v26 = vld [vmem:[%s1574_s7 + $0x1a0] sm:$0xff]  ;;  %385 = vst [vmem:[%s1579_s8 + $0xc0] sm:$0xff] %v384_v24  ;;  %387 = vst [vmem:[%s1579_s8 + $0xc8] sm:$0xff] %v386_v25  ;;  %v390_v27 = vld [vmem:[%s1574_s7 + $0x1b0] sm:$0xff] }
  0x26   : > { %389 = vst [vmem:[%s1579_s8 + $0xd0] sm:$0xff] %v388_v26  ;;  %v392_v28 = vld [vmem:[%s1574_s7 + $0x1c0] sm:$0xff]  ;;  %v394_v29 = vld [vmem:[%s1574_s7 + $0x1d0] sm:$0xff]  ;;  %391 = vst [vmem:[%s1579_s8 + $0xd8] sm:$0xff] %v390_v27 }
  0x27   : > { %393 = vst [vmem:[%s1579_s8 + $0xe0] sm:$0xff] %v392_v28  ;;  %395 = vst [vmem:[%s1579_s8 + $0xe8] sm:$0xff] %v394_v29  ;;  %v396_v30 = vld [vmem:[%s1574_s7 + $0x1e0] sm:$0xff]  ;;  %v398_v31 = vld [vmem:[%s1574_s7 + $0x1f0] sm:$0xff] }
  0x28   : > { %v400_v32 = vld [vmem:[%s1574_s7 + $0x200] sm:$0xff]  ;;  %397 = vst [vmem:[%s1579_s8 + $0xf0] sm:$0xff] %v396_v30  ;;  %399 = vst [vmem:[%s1579_s8 + $0xf8] sm:$0xff] %v398_v31  ;;  %v402_v33 = vld [vmem:[%s1574_s7 + $0x210] sm:$0xff] }
  0x29   : > { %401 = vst [vmem:[%s1579_s8 + $0x100] sm:$0xff] %v400_v32  ;;  %v404_v34 = vld [vmem:[%s1574_s7 + $0x220] sm:$0xff]  ;;  %v406_v35 = vld [vmem:[%s1574_s7 + $0x230] sm:$0xff]  ;;  %403 = vst [vmem:[%s1579_s8 + $0x108] sm:$0xff] %v402_v33 }
  0x2a   : > { %405 = vst [vmem:[%s1579_s8 + $0x110] sm:$0xff] %v404_v34  ;;  %407 = vst [vmem:[%s1579_s8 + $0x118] sm:$0xff] %v406_v35  ;;  %v408_v36 = vld [vmem:[%s1574_s7 + $0x240] sm:$0xff]  ;;  %v410_v37 = vld [vmem:[%s1574_s7 + $0x250] sm:$0xff] }
  0x2b   : > { %v412_v38 = vld [vmem:[%s1574_s7 + $0x260] sm:$0xff]  ;;  %409 = vst [vmem:[%s1579_s8 + $0x120] sm:$0xff] %v408_v36  ;;  %411 = vst [vmem:[%s1579_s8 + $0x128] sm:$0xff] %v410_v37  ;;  %v414_v39 = vld [vmem:[%s1574_s7 + $0x270] sm:$0xff] }
  0x2c   : > { %413 = vst [vmem:[%s1579_s8 + $0x130] sm:$0xff] %v412_v38  ;;  %v416_v40 = vld [vmem:[%s1574_s7 + $0x280] sm:$0xff]  ;;  %v418_v41 = vld [vmem:[%s1574_s7 + $0x290] sm:$0xff]  ;;  %415 = vst [vmem:[%s1579_s8 + $0x138] sm:$0xff] %v414_v39 }
  0x2d   : > { %417 = vst [vmem:[%s1579_s8 + $0x140] sm:$0xff] %v416_v40  ;;  %419 = vst [vmem:[%s1579_s8 + $0x148] sm:$0xff] %v418_v41  ;;  %v420_v42 = vld [vmem:[%s1574_s7 + $0x2a0] sm:$0xff]  ;;  %v422_v43 = vld [vmem:[%s1574_s7 + $0x2b0] sm:$0xff] }
  0x2e   : > { %v424_v44 = vld [vmem:[%s1574_s7 + $0x2c0] sm:$0xff]  ;;  %421 = vst [vmem:[%s1579_s8 + $0x150] sm:$0xff] %v420_v42  ;;  %423 = vst [vmem:[%s1579_s8 + $0x158] sm:$0xff] %v422_v43  ;;  %v426_v45 = vld [vmem:[%s1574_s7 + $0x2d0] sm:$0xff] }
  0x2f   : > { %425 = vst [vmem:[%s1579_s8 + $0x160] sm:$0xff] %v424_v44  ;;  %v428_v46 = vld [vmem:[%s1574_s7 + $0x2e0] sm:$0xff]  ;;  %v430_v47 = vld [vmem:[%s1574_s7 + $0x2f0] sm:$0xff]  ;;  %427 = vst [vmem:[%s1579_s8 + $0x168] sm:$0xff] %v426_v45 }
  0x30   : > { %429 = vst [vmem:[%s1579_s8 + $0x170] sm:$0xff] %v428_v46  ;;  %431 = vst [vmem:[%s1579_s8 + $0x178] sm:$0xff] %v430_v47  ;;  %v432_v48 = vld [vmem:[%s1574_s7 + $0x300] sm:$0xff]  ;;  %v434_v49 = vld [vmem:[%s1574_s7 + $0x310] sm:$0xff] }
  0x31   : > { %v436_v50 = vld [vmem:[%s1574_s7 + $0x320] sm:$0xff]  ;;  %433 = vst [vmem:[%s1579_s8 + $0x180] sm:$0xff] %v432_v48  ;;  %435 = vst [vmem:[%s1579_s8 + $0x188] sm:$0xff] %v434_v49  ;;  %v438_v51 = vld [vmem:[%s1574_s7 + $0x330] sm:$0xff] }
  0x32   : > { %437 = vst [vmem:[%s1579_s8 + $0x190] sm:$0xff] %v436_v50  ;;  %v440_v52 = vld [vmem:[%s1574_s7 + $0x340] sm:$0xff]  ;;  %v442_v53 = vld [vmem:[%s1574_s7 + $0x350] sm:$0xff]  ;;  %439 = vst [vmem:[%s1579_s8 + $0x198] sm:$0xff] %v438_v51 }
  0x33   : > { %441 = vst [vmem:[%s1579_s8 + $0x1a0] sm:$0xff] %v440_v52  ;;  %443 = vst [vmem:[%s1579_s8 + $0x1a8] sm:$0xff] %v442_v53  ;;  %v444_v54 = vld [vmem:[%s1574_s7 + $0x360] sm:$0xff]  ;;  %v446_v55 = vld [vmem:[%s1574_s7 + $0x370] sm:$0xff] }
  0x34   : > { %v448_v56 = vld [vmem:[%s1574_s7 + $0x380] sm:$0xff]  ;;  %445 = vst [vmem:[%s1579_s8 + $0x1b0] sm:$0xff] %v444_v54  ;;  %447 = vst [vmem:[%s1579_s8 + $0x1b8] sm:$0xff] %v446_v55  ;;  %v450_v57 = vld [vmem:[%s1574_s7 + $0x390] sm:$0xff] }
  0x35   : > { %449 = vst [vmem:[%s1579_s8 + $0x1c0] sm:$0xff] %v448_v56  ;;  %v452_v58 = vld [vmem:[%s1574_s7 + $0x3a0] sm:$0xff]  ;;  %v454_v59 = vld [vmem:[%s1574_s7 + $0x3b0] sm:$0xff]  ;;  %451 = vst [vmem:[%s1579_s8 + $0x1c8] sm:$0xff] %v450_v57 }
  0x36   : > { %453 = vst [vmem:[%s1579_s8 + $0x1d0] sm:$0xff] %v452_v58  ;;  %455 = vst [vmem:[%s1579_s8 + $0x1d8] sm:$0xff] %v454_v59  ;;  %v456_v60 = vld [vmem:[%s1574_s7 + $0x3c0] sm:$0xff]  ;;  %v458_v61 = vld [vmem:[%s1574_s7 + $0x3d0] sm:$0xff] }
  0x37   : > { %v460_v62 = vld [vmem:[%s1574_s7 + $0x3e0] sm:$0xff]  ;;  %457 = vst [vmem:[%s1579_s8 + $0x1e0] sm:$0xff] %v456_v60  ;;  %459 = vst [vmem:[%s1579_s8 + $0x1e8] sm:$0xff] %v458_v61  ;;  %v462_v63 = vld [vmem:[%s1574_s7 + $0x3f0] sm:$0xff] }
  0x38   : > { %461 = vst [vmem:[%s1579_s8 + $0x1f0] sm:$0xff] %v460_v62  ;;  %463 = vst [vmem:[%s1579_s8 + $0x1f8] sm:$0xff] %v462_v63 }
  0x39 PF: > { %p1200_p7 = scmp.ge.s32.totalorder %s1491_s18, 1  ;;  %p476_p8 = scmp.lt.s32.totalorder %s1491_s18, 19 }
  0x3b   : > { %p477_p9 = pnand %p1200_p7, %p476_p8 }
  0x3c   : > { %s483_s9 = sand.u32 (!%p477_p9), 1, %s1467_s12   ;;  %s1202_s10 = sshll.u32 (!%p477_p9), %s1475_s14, 2 }
  0x3d   : > { %480 = sbr.rel (%p477_p9) target bundleno = 374 (0x176), region = 66  ;;  %s1201_s11 = sshll.u32 (!%p477_p9), %s483_s9, 9 }
  0x3e   : > { %p526_p10 = scmp.lt.s32.totalorder (!%p477_p9), %s1202_s10, 35  ;;  %s1204_s21 = sshll.u32 (!%p477_p9), %s1479_s15, 1 }
  0x3f   : > { %p536_p11 = scmp.lt.s32.totalorder (!%p477_p9), %s1204_s21, 3  ;;  %s1728_s5 = scalar_lea.vmem (!%p477_p9), [#allocation3], %s1201_s11 }
  0x40   : > { %p1207_p12 = scmp.ne.s32.totalorder (!%p477_p9), %s1475_s14, 0 }
  0x44   : > { %s1843_s10 = smov (!%p526_p10, %s1202_s10), 35  ;;  %s1845_s21 = smov (!%p536_p11, %s1204_s21), 3 }
  0x45   : > { %s1203_s22 = sshll.u32 %s1843_s10, 2  ;;  %s538_s12 = scalar_lea.vmem %s1828_s2, %s1845_s21  ;;  %v1493_v0 = vmov (!%p1207_p12), 0.0  }
  0x46   : > { %s1714_s26 = scalar_lea.vmem %s1826_s0, %s1203_s22  ;;  %s1206_s29 = sshll.u32 %s1845_s21, 3  ;;  %554 = vst [vmem:[#allocation2] sm:$0xff] (!%p1207_p12), %v1493_v0  ;;  %555 = vst [vmem:[#allocation2 + $0x8] sm:$0xff] (!%p1207_p12), %v1493_v0 }
  0x47   : > { %s1726_s15 = scalar_lea.vmem %s1829_s3, %s1206_s29  ;;  %553 = sbr.rel (%p1207_p12) target bundleno = 78 (0x4e), region = 74 }
  0x4e PF: > { %v1337_v1 = vld [vmem:[%s1728_s5 + $0x4] ss:$8 sps:$4 sm:$0xff]   ;;  %v1341_v3 = vld [vmem:[%s1728_s5] ss:$8 sps:$4 sm:$0xff]   ;;  %v1343_v5 = vld [vmem:[%s1728_s5 + $0x14] ss:$8 sps:$4 sm:$0xff]  }
  0x4f   : > { %v1339_v2 = vld [vmem:[%s1728_s5 + $0x104] ss:$8 sps:$4 sm:$0xff]   ;;  %958 = vmatprep.subr.bf16.mxu0 %v1337_v1  ;;  %v1342_v4 = vld [vmem:[%s1728_s5 + $0x100] ss:$8 sps:$4 sm:$0xff]   ;;  %v1345_v6 = vld [vmem:[%s1728_s5 + $0x114] ss:$8 sps:$4 sm:$0xff]  }
  0x50   : > { %999 = vmatprep.subr.bf16.mxu1 %v1339_v2  ;;  %959 = vmatpush1.bf16.msra.mxu0 %v1341_v3  ;;  %v1347_v7 = vld [vmem:[%s1728_s5 + $0x10] ss:$8 sps:$4 sm:$0xff]   ;;  %v1349_v9 = vld [vmem:[%s1728_s5 + $0x24] ss:$8 sps:$4 sm:$0xff]   ;;  %v1353_v11 = vld [vmem:[%s1728_s5 + $0x20] ss:$8 sps:$4 sm:$0xff]  }
  0x51   : > { %1000 = vmatpush1.bf16.msra.mxu1 %v1342_v4  ;;  %960 = vmatprep.subr.bf16.mxu0 %v1343_v5  ;;  %v1348_v8 = vld [vmem:[%s1728_s5 + $0x110] ss:$8 sps:$4 sm:$0xff]   ;;  %v1351_v10 = vld [vmem:[%s1728_s5 + $0x124] ss:$8 sps:$4 sm:$0xff]   ;;  %v1354_v12 = vld [vmem:[%s1728_s5 + $0x120] ss:$8 sps:$4 sm:$0xff]  }
  0x52   : > { %1001 = vmatprep.subr.bf16.mxu1 %v1345_v6  ;;  %v1355_v13 = vld [vmem:[%s1728_s5 + $0x34] ss:$8 sps:$4 sm:$0xff]   ;;  %v1359_v15 = vld [vmem:[%s1728_s5 + $0x30] ss:$8 sps:$4 sm:$0xff]   ;;  %v1361_v17 = vld [vmem:[%s1728_s5 + $0x44] ss:$8 sps:$4 sm:$0xff]  }
  0x53   : > { %v1357_v14 = vld [vmem:[%s1728_s5 + $0x134] ss:$8 sps:$4 sm:$0xff]   ;;  %v1360_v16 = vld [vmem:[%s1728_s5 + $0x130] ss:$8 sps:$4 sm:$0xff]   ;;  %v1363_v18 = vld [vmem:[%s1728_s5 + $0x144] ss:$8 sps:$4 sm:$0xff]  }
  0x54   : > { %961 = vmatpush1.bf16.msra.mxu0 %v1347_v7  ;;  %v1365_v19 = vld [vmem:[%s1728_s5 + $0x40] ss:$8 sps:$4 sm:$0xff]   ;;  %v1367_v21 = vld [vmem:[%s1728_s5 + $0x54] ss:$8 sps:$4 sm:$0xff]   ;;  %v1371_v23 = vld [vmem:[%s1728_s5 + $0x50] ss:$8 sps:$4 sm:$0xff]  }
  0x55   : > { %1002 = vmatpush1.bf16.msra.mxu1 %v1348_v8  ;;  %962 = vmatprep.subr.bf16.mxu0 %v1349_v9  ;;  %v1366_v20 = vld [vmem:[%s1728_s5 + $0x140] ss:$8 sps:$4 sm:$0xff]   ;;  %v1369_v22 = vld [vmem:[%s1728_s5 + $0x154] ss:$8 sps:$4 sm:$0xff]   ;;  %v1372_v24 = vld [vmem:[%s1728_s5 + $0x150] ss:$8 sps:$4 sm:$0xff]  }
  0x56   : > { %1003 = vmatprep.subr.bf16.mxu1 %v1351_v10  ;;  %v1373_v25 = vld [vmem:[%s1728_s5 + $0x64] ss:$8 sps:$4 sm:$0xff]   ;;  %v1377_v27 = vld [vmem:[%s1728_s5 + $0x60] ss:$8 sps:$4 sm:$0xff]   ;;  %v1379_v29 = vld [vmem:[%s1728_s5 + $0x74] ss:$8 sps:$4 sm:$0xff]  }
  0x57   : > { %v1375_v26 = vld [vmem:[%s1728_s5 + $0x164] ss:$8 sps:$4 sm:$0xff]   ;;  %v1378_v28 = vld [vmem:[%s1728_s5 + $0x160] ss:$8 sps:$4 sm:$0xff]   ;;  %v1381_v30 = vld [vmem:[%s1728_s5 + $0x174] ss:$8 sps:$4 sm:$0xff]  }
  0x58   : > { %963 = vmatpush1.bf16.msra.mxu0 %v1353_v11  ;;  %v1383_v31 = vld [vmem:[%s1728_s5 + $0x70] ss:$8 sps:$4 sm:$0xff]   ;;  %v1385_v33 = vld [vmem:[%s1728_s5 + $0x84] ss:$8 sps:$4 sm:$0xff]   ;;  %v1389_v35 = vld [vmem:[%s1728_s5 + $0x80] ss:$8 sps:$4 sm:$0xff]  }
  0x59   : > { %1004 = vmatpush1.bf16.msra.mxu1 %v1354_v12  ;;  %964 = vmatprep.subr.bf16.mxu0 %v1355_v13  ;;  %v1384_v32 = vld [vmem:[%s1728_s5 + $0x170] ss:$8 sps:$4 sm:$0xff]   ;;  %v1387_v34 = vld [vmem:[%s1728_s5 + $0x184] ss:$8 sps:$4 sm:$0xff]   ;;  %v1390_v36 = vld [vmem:[%s1728_s5 + $0x180] ss:$8 sps:$4 sm:$0xff]  }
  0x5a   : > { %1005 = vmatprep.subr.bf16.mxu1 %v1357_v14  ;;  %v1391_v37 = vld [vmem:[%s1728_s5 + $0x94] ss:$8 sps:$4 sm:$0xff]   ;;  %v1395_v39 = vld [vmem:[%s1728_s5 + $0x90] ss:$8 sps:$4 sm:$0xff]   ;;  %v1397_v41 = vld [vmem:[%s1728_s5 + $0xa4] ss:$8 sps:$4 sm:$0xff]  }
  0x5b   : > { %v1393_v38 = vld [vmem:[%s1728_s5 + $0x194] ss:$8 sps:$4 sm:$0xff]   ;;  %v1396_v40 = vld [vmem:[%s1728_s5 + $0x190] ss:$8 sps:$4 sm:$0xff]   ;;  %v1399_v42 = vld [vmem:[%s1728_s5 + $0x1a4] ss:$8 sps:$4 sm:$0xff]  }
  0x5c   : > { %965 = vmatpush1.bf16.msra.mxu0 %v1359_v15  ;;  %v1401_v43 = vld [vmem:[%s1728_s5 + $0xa0] ss:$8 sps:$4 sm:$0xff]   ;;  %v1403_v45 = vld [vmem:[%s1728_s5 + $0xb4] ss:$8 sps:$4 sm:$0xff]   ;;  %v1407_v50 = vld [vmem:[%s1728_s5 + $0xb0] ss:$8 sps:$4 sm:$0xff]  }
  0x5d   : > { %1006 = vmatpush1.bf16.msra.mxu1 %v1360_v16  ;;  %966 = vmatprep.subr.bf16.mxu0 %v1361_v17  ;;  %v1402_v44 = vld [vmem:[%s1728_s5 + $0x1a0] ss:$8 sps:$4 sm:$0xff]   ;;  %v1405_v46 = vld [vmem:[%s1728_s5 + $0x1b4] ss:$8 sps:$4 sm:$0xff]   ;;  %v1408_v51 = vld [vmem:[%s1728_s5 + $0x1b0] ss:$8 sps:$4 sm:$0xff]  }
  0x5e   : > { %1007 = vmatprep.subr.bf16.mxu1 %v1363_v18  ;;  %v558_v47 = vld [vmem:[%s1714_s26] sm:$0xff]  ;;  %v559_v49 = vld [vmem:[%s1714_s26 + $0x8] sm:$0xff]  ;;  %v1409_v53 = vld [vmem:[%s1728_s5 + $0xc4] ss:$8 sps:$4 sm:$0xff]   ;;  %p1276_p13 = scmp.ne.s32.totalorder %s1475_s14, 8 }
  0x5f   : > { %v1209_v48 = vcombine.high %v558_v47, %v558_v47  ;;  %v1211_v52 = vcombine.high %v559_v49, %v559_v49  ;;  %v1411_v54 = vld [vmem:[%s1728_s5 + $0x1c4] ss:$8 sps:$4 sm:$0xff]   ;;  %v1413_v55 = vld [vmem:[%s1728_s5 + $0xc0] ss:$8 sps:$4 sm:$0xff]   ;;  %v1415_v57 = vld [vmem:[%s1728_s5 + $0xd4] ss:$8 sps:$4 sm:$0xff]   ;;  %v1208_v5 = vcombine.low %v558_v47, %v558_v47  ;;  %v1210_v6 = vcombine.low %v559_v49, %v559_v49 }
  0x60   : > { %967 = vmatpush1.bf16.msra.mxu0 %v1365_v19  ;;  %v1414_v56 = vld [vmem:[%s1728_s5 + $0x1c0] ss:$8 sps:$4 sm:$0xff]   ;;  %v1417_v58 = vld [vmem:[%s1728_s5 + $0x1d4] ss:$8 sps:$4 sm:$0xff]   ;;  %v1419_v59 = vld [vmem:[%s1728_s5 + $0xd0] ss:$8 sps:$4 sm:$0xff]  }
  0x61   : > { %1008 = vmatpush1.bf16.msra.mxu1 %v1366_v20  ;;  %968 = vmatprep.subr.bf16.mxu0 %v1367_v21  ;;  %v1420_v60 = vld [vmem:[%s1728_s5 + $0x1d0] ss:$8 sps:$4 sm:$0xff]   ;;  %v1421_v61 = vld [vmem:[%s1728_s5 + $0xe4] ss:$8 sps:$4 sm:$0xff]   ;;  %v1425_v63 = vld [vmem:[%s1728_s5 + $0xe0] ss:$8 sps:$4 sm:$0xff]   ;;  %v1052_v21 = vlaneseq (!%p1276_p13) }
  0x62   : > { %1009 = vmatprep.subr.bf16.mxu1 %v1369_v22  ;;  %990 = vmatprep.mubr.bf16.mxu0 %v1209_v48  ;;  %v1423_v62 = vld [vmem:[%s1728_s5 + $0x1e4] ss:$8 sps:$4 sm:$0xff]   ;;  %v1426_v0 = vld [vmem:[%s1728_s5 + $0x1e0] ss:$8 sps:$4 sm:$0xff]   ;;  %v1427_v1 = vld [vmem:[%s1728_s5 + $0xf4] ss:$8 sps:$4 sm:$0xff]  }
  0x63   : > { %1031 = vmatprep.mubr.bf16.mxu1 %v1211_v52  ;;  %v1429_v2 = vld [vmem:[%s1728_s5 + $0x1f4] ss:$8 sps:$4 sm:$0xff]   ;;  %v1431_v3 = vld [vmem:[%s1728_s5 + $0xf0] ss:$8 sps:$4 sm:$0xff]   ;;  %v1053_v22 = vshrl.u32 (!%p1276_p13), %v1052_v21, 7 }
  0x64   : > { %969 = vmatpush1.bf16.msra.mxu0 %v1371_v23  ;;  %v1432_v4 = vld [vmem:[%s1728_s5 + $0x1f0] ss:$8 sps:$4 sm:$0xff]  }
  0x65   : > { %1010 = vmatpush1.bf16.msra.mxu1 %v1372_v24  ;;  %970 = vmatprep.subr.bf16.mxu0 %v1373_v25  ;;  %v556_v8 = vld [vmem:[#allocation2] sm:$0xff]  ;;  %v557_v12 = vld [vmem:[#allocation2 + $0x8] sm:$0xff]  ;;  %v1054_v24 = vsub.s32 (!%p1276_p13), 0, %v1053_v22  ;;  %v1058_v25 = vsub.s32 (!%p1276_p13), 1, %v1053_v22 }
  0x66   : > { %1011 = vmatprep.subr.bf16.mxu1 %v1375_v26  ;;  %v1050_v23 = vld [vmem:[%s538_s12] sm:$0x3] (!%p1276_p13) }
  0x68   : > { %971 = vmatpush1.bf16.msra.mxu0 %v1377_v27 }
  0x69   : > { %1012 = vmatpush1.bf16.msra.mxu1 %v1378_v28  ;;  %972 = vmatprep.subr.bf16.mxu0 %v1379_v29  ;;  %v1055_v28 = vrot.slane (!%p1276_p13), %v1050_v23, %v1054_v24  ;;  %v1059_v29 = vrot.slane (!%p1276_p13), %v1050_v23, %v1058_v25 }
  0x6a   : > { %1013 = vmatprep.subr.bf16.mxu1 %v1381_v30 }
  0x6c   : > { %973 = vmatpush1.bf16.msra.mxu0 %v1383_v31 }
  0x6d   : > { %1014 = vmatpush1.bf16.msra.mxu1 %v1384_v32  ;;  %974 = vmatprep.subr.bf16.mxu0 %v1385_v33 }
  0x6e   : > { %1015 = vmatprep.subr.bf16.mxu1 %v1387_v34 }
  0x70   : > { %975 = vmatpush1.bf16.msra.mxu0 %v1389_v35 }
  0x71   : > { %1016 = vmatpush1.bf16.msra.mxu1 %v1390_v36  ;;  %976 = vmatprep.subr.bf16.mxu0 %v1391_v37 }
  0x72   : > { %1017 = vmatprep.subr.bf16.mxu1 %v1393_v38 }
  0x74   : > { %977 = vmatpush1.bf16.msra.mxu0 %v1395_v39 }
  0x75   : > { %1018 = vmatpush1.bf16.msra.mxu1 %v1396_v40  ;;  %978 = vmatprep.subr.bf16.mxu0 %v1397_v41 }
  0x76   : > { %1019 = vmatprep.subr.bf16.mxu1 %v1399_v42 }
  0x78   : > { %979 = vmatpush1.bf16.msra.mxu0 %v1401_v43 }
  0x79   : > { %1020 = vmatpush1.bf16.msra.mxu1 %v1402_v44  ;;  %980 = vmatprep.subr.bf16.mxu0 %v1403_v45 }
  0x7a   : > { %1021 = vmatprep.subr.bf16.mxu1 %v1405_v46 }
  0x7c   : > { %981 = vmatpush1.bf16.msra.mxu0 %v1407_v50 }
  0x7d   : > { %1022 = vmatpush1.bf16.msra.mxu1 %v1408_v51  ;;  %982 = vmatprep.subr.bf16.mxu0 %v1409_v53 }
  0x7e   : > { %1023 = vmatprep.subr.bf16.mxu1 %v1411_v54 }
  0x80   : > { %983 = vmatpush1.bf16.msra.mxu0 %v1413_v55 }
  0x81   : > { %1024 = vmatpush1.bf16.msra.mxu1 %v1414_v56  ;;  %984 = vmatprep.subr.bf16.mxu0 %v1415_v57 }
  0x82   : > { %1025 = vmatprep.subr.bf16.mxu1 %v1417_v58 }
  0x84   : > { %985 = vmatpush1.bf16.msra.mxu0 %v1419_v59 }
  0x85   : > { %1026 = vmatpush1.bf16.msra.mxu1 %v1420_v60  ;;  %986 = vmatprep.subr.bf16.mxu0 %v1421_v61 }
  0x86   : > { %1027 = vmatprep.subr.bf16.mxu1 %v1423_v62 }
  0x88   : > { %987 = vmatpush1.bf16.msra.mxu0 %v1425_v63 }
  0x89   : > { %1028 = vmatpush1.bf16.msra.mxu1 %v1426_v0  ;;  %988 = vmatprep.subr.bf16.mxu0 %v1427_v1 }
  0x8a   : > { %1029 = vmatprep.subr.bf16.mxu1 %v1429_v2 }
  0x8c   : > { %989 = vmatpush1.bf16.msra.mxu0 %v1431_v3 }
  0x8d   : > { %1030 = vmatpush1.bf16.msra.mxu1 %v1432_v4 }
  0x8f   : > { %991 = vmatmul.mubr.bf16.vlgmr.msra.gmra.mrb[0].mxu0 %v1208_v5 }
  0x90   : > { %1032 = vmatmul.mubr.bf16.vlgmr.msra.gmra.mrb[0].mxu1 %v1210_v6 }
 0x162   : > { %v992_v7 = vpop.f32.mrb[0].mxu0 }
 0x163   : > { %v1033_v9 = vpop.f32.mrb[0].mxu1  ;;  %v994_v11 = vpop.f32.mrb[1].mxu0  ;;  %1047 = sbr.rel (%p1276_p13) target bundleno = 374 (0x176), region = 78 }
 0x164   : > { %v1034_v10 = vadd.f32 %v1033_v9, %v992_v7  ;;  %v1035_v13 = vpop.f32.mrb[1].mxu1  ;;  %v996_v15 = vpop.f32.mrb[2].mxu0 }
 0x165   : > { %v1036_v14 = vadd.f32 %v1035_v13, %v994_v11  ;;  %v1037_v16 = vpop.f32.mrb[2].mxu1  ;;  %v997_v18 = vpop.f32.mrb[3].mxu0 }
 0x166   : > { %v1040_v17 = vadd.f32 %v1034_v10, %v556_v8  ;;  %v1038_v19 = vpop.f32.mrb[3].mxu1 }
 0x167   : > { %v1041_v20 = vadd.f32 %v1036_v14, %v557_v12 }
 0x168   : > { %1042 = vst [vmem:[#allocation2] sm:$0xff] %v1040_v17 }
 0x169   : > { %1043 = vst [vmem:[#allocation2 + $0x8] sm:$0xff] %v1041_v20 }
 0x16f   : > { %v1048_v26 = vld [vmem:[#allocation2] sm:$0xff] }
 0x170   : > { %v1049_v27 = vld [vmem:[#allocation2 + $0x8] sm:$0xff]  ;;  %v1062_v30 = vadd.f32 %v1055_v28, %v1048_v26 }
 0x171   : > { %v1063_v31 = vadd.f32 %v1059_v29, %v1049_v27 }
 0x172   : > { %v1064_v32 = vmax.f32 %v1062_v30, 0.0 }
 0x173   : > { %v1065_v33 = vmax.f32 %v1063_v31, 0.0 }
 0x174   : > { %1066 = vst [vmem:[%s1726_s15] sm:$0xff] %v1064_v32 }
 0x175   : > { %1067 = vst [vmem:[%s1726_s15 + $0x8] sm:$0xff] %v1065_v33 }
 0x176 PF: > { %s13_s18 = sadd.s32 1, %s1491_s18   ;;  %s1830_s12 = smov %s1471_s13 }
 0x177   : > { %p10_p0 = scmp.ge.s32.totalorder %s13_s18, 20   ;;  %s1831_s13 = smov %s1565_s25 }
 0x178   : > { %s1832_s14 = smov %s1483_s16  ;;  %s1833_s15 = smov %s1487_s17 }
 0x179   : > { %s1834_s16 = smov %s1837_s19  ;;  %s1835_s17 = smov %s1841_s20 }
 0x17a   :  { %12 = sbr.rel (!%p10_p0) target bundleno = 4 (0x4), region = 119 }

// kernel: feature_extractor_forward.39
= control target key start
LH: loop header
LB: loop body
LE: loop exit
PB: predicated region body
PF: predicated region fallthrough
CT: control target
= control target key end

     0   :  { %s1165_s12 = smov 0   ;;  %s1167_s13 = smov 0   ;;  %s1283_s0 = inlined_call_operand.vmem [shape: bf16[8,4608], index: 0, kind: input, shape index: {}]   ;;  %s1284_s1 = inlined_call_operand.vmem [shape: bf16[4608,256], index: 1, kind: input, shape index: {}]   ;;  %s1285_s2 = inlined_call_operand.vmem [shape: f32[1,256], index: 2, kind: input, shape index: {}]   ;;  %s1286_s3 = inlined_call_operand.vmem [shape: f32[8,256], index: 3, kind: output, shape index: {}]  }
   0x1   :  { %s1169_s14 = smov 0  }
   0x2 LB: > { %s25_s15 = sadd.s32 1, %s1138_s13  ;;  %p914_p0 = scmp.ge.s32.totalorder %s1142_s14, 1  ;;  %s1142_s14 = sphi %s1169_s14, %s13_s14   ;;  %s1138_s13 = sphi %s1167_s13, %s1288_s13   ;;  %s1134_s12 = sphi %s1165_s12, %s1287_s12  }
   0x3   : > { %p26_p1 = scmp.ge.s32.totalorder %s25_s15, 9  ;;  %p194_p2 = scmp.lt.s32.totalorder %s1142_s14, 10 }
   0x5   : > { %s1290_s15 = smov (%p26_p1, %s25_s15), 0  ;;  %p195_p3 = pnand %p914_p0, %p194_p2 }
   0x6   : > { %s915_s16 = sshll.u32 (!%p195_p3), %s1134_s12, 2  ;;  %s917_s17 = sshll.u32 (!%p195_p3), %s1134_s12, 6 }
   0x7   : > { %198 = sbr.rel (%p195_p3) target bundleno = 318 (0x13e), region = 32  ;;  %p243_p4 = scmp.lt.s32.totalorder (!%p195_p3), %s915_s16, 35 }
   0x8   : > { %p252_p5 = scmp.lt.s32.totalorder (!%p195_p3), %s917_s17, 575  ;;  %p920_p6 = scmp.ne.s32.totalorder (!%p195_p3), %s1134_s12, 0 }
   0xe   : > { %s1292_s16 = smov (!%p243_p4, %s915_s16), 35  ;;  %s1294_s17 = smov (!%p252_p5, %s917_s17), 575 }
   0xf   : > { %s916_s18 = sshll.u32 %s1292_s16, 2  ;;  %s994_s22 = sshll.u32 %s1294_s17, 3  ;;  %v1144_v0 = vmov (!%p920_p6), 0.0  }
  0x10   : > { %s1190_s21 = scalar_lea.vmem %s1283_s0, %s916_s18  ;;  %s1195_s25 = scalar_lea.vmem %s1284_s1, %s994_s22  ;;  %281 = vst [vmem:[#allocation2] sm:$0xff] (!%p920_p6), %v1144_v0  ;;  %282 = vst [vmem:[#allocation2 + $0x8] sm:$0xff] (!%p920_p6), %v1144_v0 }
  0x11   : > { %280 = sbr.rel (%p920_p6) target bundleno = 24 (0x18), region = 36 }
  0x18 PF: > { %v1020_v1 = vld [vmem:[%s1195_s25 + $0x4] ss:$8 sps:$4 sm:$0xff]   ;;  %v1024_v3 = vld [vmem:[%s1195_s25] ss:$8 sps:$4 sm:$0xff]   ;;  %v1026_v5 = vld [vmem:[%s1195_s25 + $0x14] ss:$8 sps:$4 sm:$0xff]  }
  0x19   : > { %v1022_v2 = vld [vmem:[%s1195_s25 + $0x104] ss:$8 sps:$4 sm:$0xff]   ;;  %685 = vmatprep.subr.bf16.mxu0 %v1020_v1  ;;  %v1025_v4 = vld [vmem:[%s1195_s25 + $0x100] ss:$8 sps:$4 sm:$0xff]   ;;  %v1028_v6 = vld [vmem:[%s1195_s25 + $0x114] ss:$8 sps:$4 sm:$0xff]  }
  0x1a   : > { %726 = vmatprep.subr.bf16.mxu1 %v1022_v2  ;;  %686 = vmatpush1.bf16.msra.mxu0 %v1024_v3  ;;  %v1030_v7 = vld [vmem:[%s1195_s25 + $0x10] ss:$8 sps:$4 sm:$0xff]   ;;  %v1032_v9 = vld [vmem:[%s1195_s25 + $0x24] ss:$8 sps:$4 sm:$0xff]   ;;  %v1036_v11 = vld [vmem:[%s1195_s25 + $0x20] ss:$8 sps:$4 sm:$0xff]  }
  0x1b   : > { %727 = vmatpush1.bf16.msra.mxu1 %v1025_v4  ;;  %687 = vmatprep.subr.bf16.mxu0 %v1026_v5  ;;  %v1031_v8 = vld [vmem:[%s1195_s25 + $0x110] ss:$8 sps:$4 sm:$0xff]   ;;  %v1034_v10 = vld [vmem:[%s1195_s25 + $0x124] ss:$8 sps:$4 sm:$0xff]   ;;  %v1037_v12 = vld [vmem:[%s1195_s25 + $0x120] ss:$8 sps:$4 sm:$0xff]  }
  0x1c   : > { %728 = vmatprep.subr.bf16.mxu1 %v1028_v6  ;;  %v1038_v13 = vld [vmem:[%s1195_s25 + $0x34] ss:$8 sps:$4 sm:$0xff]   ;;  %v1042_v15 = vld [vmem:[%s1195_s25 + $0x30] ss:$8 sps:$4 sm:$0xff]   ;;  %v1044_v17 = vld [vmem:[%s1195_s25 + $0x44] ss:$8 sps:$4 sm:$0xff]  }
  0x1d   : > { %v1040_v14 = vld [vmem:[%s1195_s25 + $0x134] ss:$8 sps:$4 sm:$0xff]   ;;  %v1043_v16 = vld [vmem:[%s1195_s25 + $0x130] ss:$8 sps:$4 sm:$0xff]   ;;  %v1046_v18 = vld [vmem:[%s1195_s25 + $0x144] ss:$8 sps:$4 sm:$0xff]  }
  0x1e   : > { %688 = vmatpush1.bf16.msra.mxu0 %v1030_v7  ;;  %v1048_v19 = vld [vmem:[%s1195_s25 + $0x40] ss:$8 sps:$4 sm:$0xff]   ;;  %v1050_v21 = vld [vmem:[%s1195_s25 + $0x54] ss:$8 sps:$4 sm:$0xff]   ;;  %v1054_v23 = vld [vmem:[%s1195_s25 + $0x50] ss:$8 sps:$4 sm:$0xff]  }
  0x1f   : > { %729 = vmatpush1.bf16.msra.mxu1 %v1031_v8  ;;  %689 = vmatprep.subr.bf16.mxu0 %v1032_v9  ;;  %v1049_v20 = vld [vmem:[%s1195_s25 + $0x140] ss:$8 sps:$4 sm:$0xff]   ;;  %v1052_v22 = vld [vmem:[%s1195_s25 + $0x154] ss:$8 sps:$4 sm:$0xff]   ;;  %v1055_v24 = vld [vmem:[%s1195_s25 + $0x150] ss:$8 sps:$4 sm:$0xff]  }
  0x20   : > { %730 = vmatprep.subr.bf16.mxu1 %v1034_v10  ;;  %v1056_v25 = vld [vmem:[%s1195_s25 + $0x64] ss:$8 sps:$4 sm:$0xff]   ;;  %v1060_v27 = vld [vmem:[%s1195_s25 + $0x60] ss:$8 sps:$4 sm:$0xff]   ;;  %v1062_v29 = vld [vmem:[%s1195_s25 + $0x74] ss:$8 sps:$4 sm:$0xff]  }
  0x21   : > { %v1058_v26 = vld [vmem:[%s1195_s25 + $0x164] ss:$8 sps:$4 sm:$0xff]   ;;  %v1061_v28 = vld [vmem:[%s1195_s25 + $0x160] ss:$8 sps:$4 sm:$0xff]   ;;  %v1064_v30 = vld [vmem:[%s1195_s25 + $0x174] ss:$8 sps:$4 sm:$0xff]  }
  0x22   : > { %690 = vmatpush1.bf16.msra.mxu0 %v1036_v11  ;;  %v1066_v31 = vld [vmem:[%s1195_s25 + $0x70] ss:$8 sps:$4 sm:$0xff]   ;;  %v1068_v33 = vld [vmem:[%s1195_s25 + $0x84] ss:$8 sps:$4 sm:$0xff]   ;;  %v1072_v35 = vld [vmem:[%s1195_s25 + $0x80] ss:$8 sps:$4 sm:$0xff]  }
  0x23   : > { %731 = vmatpush1.bf16.msra.mxu1 %v1037_v12  ;;  %691 = vmatprep.subr.bf16.mxu0 %v1038_v13  ;;  %v1067_v32 = vld [vmem:[%s1195_s25 + $0x170] ss:$8 sps:$4 sm:$0xff]   ;;  %v1070_v34 = vld [vmem:[%s1195_s25 + $0x184] ss:$8 sps:$4 sm:$0xff]   ;;  %v1073_v36 = vld [vmem:[%s1195_s25 + $0x180] ss:$8 sps:$4 sm:$0xff]  }
  0x24   : > { %732 = vmatprep.subr.bf16.mxu1 %v1040_v14  ;;  %v1074_v37 = vld [vmem:[%s1195_s25 + $0x94] ss:$8 sps:$4 sm:$0xff]   ;;  %v1078_v39 = vld [vmem:[%s1195_s25 + $0x90] ss:$8 sps:$4 sm:$0xff]   ;;  %v1080_v41 = vld [vmem:[%s1195_s25 + $0xa4] ss:$8 sps:$4 sm:$0xff]  }
  0x25   : > { %v1076_v38 = vld [vmem:[%s1195_s25 + $0x194] ss:$8 sps:$4 sm:$0xff]   ;;  %v1079_v40 = vld [vmem:[%s1195_s25 + $0x190] ss:$8 sps:$4 sm:$0xff]   ;;  %v1082_v42 = vld [vmem:[%s1195_s25 + $0x1a4] ss:$8 sps:$4 sm:$0xff]  }
  0x26   : > { %692 = vmatpush1.bf16.msra.mxu0 %v1042_v15  ;;  %v1084_v43 = vld [vmem:[%s1195_s25 + $0xa0] ss:$8 sps:$4 sm:$0xff]   ;;  %v1086_v45 = vld [vmem:[%s1195_s25 + $0xb4] ss:$8 sps:$4 sm:$0xff]   ;;  %v1090_v50 = vld [vmem:[%s1195_s25 + $0xb0] ss:$8 sps:$4 sm:$0xff]  }
  0x27   : > { %733 = vmatpush1.bf16.msra.mxu1 %v1043_v16  ;;  %693 = vmatprep.subr.bf16.mxu0 %v1044_v17  ;;  %v1085_v44 = vld [vmem:[%s1195_s25 + $0x1a0] ss:$8 sps:$4 sm:$0xff]   ;;  %v1088_v46 = vld [vmem:[%s1195_s25 + $0x1b4] ss:$8 sps:$4 sm:$0xff]   ;;  %v1091_v51 = vld [vmem:[%s1195_s25 + $0x1b0] ss:$8 sps:$4 sm:$0xff]  }
  0x28   : > { %734 = vmatprep.subr.bf16.mxu1 %v1046_v18  ;;  %v285_v47 = vld [vmem:[%s1190_s21] sm:$0xff]  ;;  %v286_v49 = vld [vmem:[%s1190_s21 + $0x8] sm:$0xff]  ;;  %v1098_v57 = vld [vmem:[%s1195_s25 + $0xd4] ss:$8 sps:$4 sm:$0xff]   ;;  %p989_p7 = scmp.ne.s32.totalorder %s1134_s12, 8 }
  0x29   : > { %v922_v48 = vcombine.high %v285_v47, %v285_v47  ;;  %v924_v52 = vcombine.high %v286_v49, %v286_v49  ;;  %v1092_v53 = vld [vmem:[%s1195_s25 + $0xc4] ss:$8 sps:$4 sm:$0xff]   ;;  %v1096_v55 = vld [vmem:[%s1195_s25 + $0xc0] ss:$8 sps:$4 sm:$0xff]   ;;  %v1100_v58 = vld [vmem:[%s1195_s25 + $0x1d4] ss:$8 sps:$4 sm:$0xff]   ;;  %v921_v5 = vcombine.low %v285_v47, %v285_v47  ;;  %v923_v6 = vcombine.low %v286_v49, %v286_v49 }
  0x2a   : > { %694 = vmatpush1.bf16.msra.mxu0 %v1048_v19  ;;  %v1094_v54 = vld [vmem:[%s1195_s25 + $0x1c4] ss:$8 sps:$4 sm:$0xff]   ;;  %v1097_v56 = vld [vmem:[%s1195_s25 + $0x1c0] ss:$8 sps:$4 sm:$0xff]   ;;  %v1102_v59 = vld [vmem:[%s1195_s25 + $0xd0] ss:$8 sps:$4 sm:$0xff]  }
  0x2b   : > { %735 = vmatpush1.bf16.msra.mxu1 %v1049_v20  ;;  %695 = vmatprep.subr.bf16.mxu0 %v1050_v21  ;;  %v1103_v60 = vld [vmem:[%s1195_s25 + $0x1d0] ss:$8 sps:$4 sm:$0xff]   ;;  %v1104_v61 = vld [vmem:[%s1195_s25 + $0xe4] ss:$8 sps:$4 sm:$0xff]   ;;  %v1108_v63 = vld [vmem:[%s1195_s25 + $0xe0] ss:$8 sps:$4 sm:$0xff]   ;;  %v779_v21 = vlaneseq (!%p989_p7) }
  0x2c   : > { %736 = vmatprep.subr.bf16.mxu1 %v1052_v22  ;;  %717 = vmatprep.mubr.bf16.mxu0 %v922_v48  ;;  %v1106_v62 = vld [vmem:[%s1195_s25 + $0x1e4] ss:$8 sps:$4 sm:$0xff]   ;;  %v1109_v0 = vld [vmem:[%s1195_s25 + $0x1e0] ss:$8 sps:$4 sm:$0xff]   ;;  %v1110_v1 = vld [vmem:[%s1195_s25 + $0xf4] ss:$8 sps:$4 sm:$0xff]  }
  0x2d   : > { %758 = vmatprep.mubr.bf16.mxu1 %v924_v52  ;;  %v1112_v2 = vld [vmem:[%s1195_s25 + $0x1f4] ss:$8 sps:$4 sm:$0xff]   ;;  %v1114_v3 = vld [vmem:[%s1195_s25 + $0xf0] ss:$8 sps:$4 sm:$0xff]   ;;  %v283_v8 = vld [vmem:[#allocation2] sm:$0xff]  ;;  %v780_v22 = vshrl.u32 (!%p989_p7), %v779_v21, 7 }
  0x2e   : > { %696 = vmatpush1.bf16.msra.mxu0 %v1054_v23  ;;  %v1115_v4 = vld [vmem:[%s1195_s25 + $0x1f0] ss:$8 sps:$4 sm:$0xff]   ;;  %v284_v12 = vld [vmem:[#allocation2 + $0x8] sm:$0xff]  ;;  %v777_v23 = vld [vmem:[%s1285_s2] sm:$0x3] (!%p989_p7) }
  0x2f   : > { %737 = vmatpush1.bf16.msra.mxu1 %v1055_v24  ;;  %697 = vmatprep.subr.bf16.mxu0 %v1056_v25  ;;  %v781_v24 = vsub.s32 (!%p989_p7), 0, %v780_v22  ;;  %v785_v25 = vsub.s32 (!%p989_p7), 1, %v780_v22 }
  0x30   : > { %738 = vmatprep.subr.bf16.mxu1 %v1058_v26 }
  0x32   : > { %698 = vmatpush1.bf16.msra.mxu0 %v1060_v27 }
  0x33   : > { %739 = vmatpush1.bf16.msra.mxu1 %v1061_v28  ;;  %699 = vmatprep.subr.bf16.mxu0 %v1062_v29  ;;  %v782_v28 = vrot.slane (!%p989_p7), %v777_v23, %v781_v24  ;;  %v786_v29 = vrot.slane (!%p989_p7), %v777_v23, %v785_v25 }
  0x34   : > { %740 = vmatprep.subr.bf16.mxu1 %v1064_v30 }
  0x36   : > { %700 = vmatpush1.bf16.msra.mxu0 %v1066_v31 }
  0x37   : > { %741 = vmatpush1.bf16.msra.mxu1 %v1067_v32  ;;  %701 = vmatprep.subr.bf16.mxu0 %v1068_v33 }
  0x38   : > { %742 = vmatprep.subr.bf16.mxu1 %v1070_v34 }
  0x3a   : > { %702 = vmatpush1.bf16.msra.mxu0 %v1072_v35 }
  0x3b   : > { %743 = vmatpush1.bf16.msra.mxu1 %v1073_v36  ;;  %703 = vmatprep.subr.bf16.mxu0 %v1074_v37 }
  0x3c   : > { %744 = vmatprep.subr.bf16.mxu1 %v1076_v38 }
  0x3e   : > { %704 = vmatpush1.bf16.msra.mxu0 %v1078_v39 }
  0x3f   : > { %745 = vmatpush1.bf16.msra.mxu1 %v1079_v40  ;;  %705 = vmatprep.subr.bf16.mxu0 %v1080_v41 }
  0x40   : > { %746 = vmatprep.subr.bf16.mxu1 %v1082_v42 }
  0x42   : > { %706 = vmatpush1.bf16.msra.mxu0 %v1084_v43 }
  0x43   : > { %747 = vmatpush1.bf16.msra.mxu1 %v1085_v44  ;;  %707 = vmatprep.subr.bf16.mxu0 %v1086_v45 }
  0x44   : > { %748 = vmatprep.subr.bf16.mxu1 %v1088_v46 }
  0x46   : > { %708 = vmatpush1.bf16.msra.mxu0 %v1090_v50 }
  0x47   : > { %749 = vmatpush1.bf16.msra.mxu1 %v1091_v51  ;;  %709 = vmatprep.subr.bf16.mxu0 %v1092_v53 }
  0x48   : > { %750 = vmatprep.subr.bf16.mxu1 %v1094_v54 }
  0x4a   : > { %710 = vmatpush1.bf16.msra.mxu0 %v1096_v55 }
  0x4b   : > { %751 = vmatpush1.bf16.msra.mxu1 %v1097_v56  ;;  %711 = vmatprep.subr.bf16.mxu0 %v1098_v57 }
  0x4c   : > { %752 = vmatprep.subr.bf16.mxu1 %v1100_v58 }
  0x4e   : > { %712 = vmatpush1.bf16.msra.mxu0 %v1102_v59 }
  0x4f   : > { %753 = vmatpush1.bf16.msra.mxu1 %v1103_v60  ;;  %713 = vmatprep.subr.bf16.mxu0 %v1104_v61 }
  0x50   : > { %754 = vmatprep.subr.bf16.mxu1 %v1106_v62 }
  0x52   : > { %714 = vmatpush1.bf16.msra.mxu0 %v1108_v63 }
  0x53   : > { %755 = vmatpush1.bf16.msra.mxu1 %v1109_v0  ;;  %715 = vmatprep.subr.bf16.mxu0 %v1110_v1 }
  0x54   : > { %756 = vmatprep.subr.bf16.mxu1 %v1112_v2 }
  0x56   : > { %716 = vmatpush1.bf16.msra.mxu0 %v1114_v3 }
  0x57   : > { %757 = vmatpush1.bf16.msra.mxu1 %v1115_v4 }
  0x59   : > { %718 = vmatmul.mubr.bf16.vlgmr.msra.gmra.mrb[0].mxu0 %v921_v5 }
  0x5a   : > { %759 = vmatmul.mubr.bf16.vlgmr.msra.gmra.mrb[0].mxu1 %v923_v6 }
 0x12c   : > { %v719_v7 = vpop.f32.mrb[0].mxu0 }
 0x12d   : > { %v760_v9 = vpop.f32.mrb[0].mxu1  ;;  %v721_v11 = vpop.f32.mrb[1].mxu0  ;;  %774 = sbr.rel (%p989_p7) target bundleno = 318 (0x13e), region = 40 }
 0x12e   : > { %v761_v10 = vadd.f32 %v760_v9, %v719_v7  ;;  %v762_v13 = vpop.f32.mrb[1].mxu1  ;;  %v723_v15 = vpop.f32.mrb[2].mxu0 }
 0x12f   : > { %v763_v14 = vadd.f32 %v762_v13, %v721_v11  ;;  %v764_v16 = vpop.f32.mrb[2].mxu1  ;;  %v724_v18 = vpop.f32.mrb[3].mxu0 }
 0x130   : > { %v767_v17 = vadd.f32 %v761_v10, %v283_v8  ;;  %v765_v19 = vpop.f32.mrb[3].mxu1 }
 0x131   : > { %v768_v20 = vadd.f32 %v763_v14, %v284_v12 }
 0x132   : > { %769 = vst [vmem:[#allocation2] sm:$0xff] %v767_v17 }
 0x133   : > { %770 = vst [vmem:[#allocation2 + $0x8] sm:$0xff] %v768_v20 }
 0x139   : > { %v775_v26 = vld [vmem:[#allocation2] sm:$0xff] }
 0x13a   : > { %v776_v27 = vld [vmem:[#allocation2 + $0x8] sm:$0xff]  ;;  %v789_v30 = vadd.f32 %v782_v28, %v775_v26 }
 0x13b   : > { %v790_v31 = vadd.f32 %v786_v29, %v776_v27 }
 0x13c   : > { %791 = vst [vmem:[%s1286_s3] sm:$0xff] %v789_v30 }
 0x13d   : > { %792 = vst [vmem:[%s1286_s3 + $0x8] sm:$0xff] %v790_v31 }
 0x13e PF: > { %s13_s14 = sadd.s32 1, %s1142_s14   ;;  %s1287_s12 = smov %s1138_s13 }
 0x13f   : > { %p10_p8 = scmp.ge.s32.totalorder %s13_s14, 11   ;;  %s1288_s13 = smov %s1290_s15 }
 0x141   :  { %12 = sbr.rel (!%p10_p8) target bundleno = 2 (0x2), region = 76 }

// kernel: feature_extractor_forward.40
= control target key start
LH: loop header
LB: loop body
LE: loop exit
PB: predicated region body
PF: predicated region fallthrough
CT: control target
= control target key end

     0   :  { %v14_v0 = vlaneseq  ;;  %v104_v6 = vmov 0.0   ;;  %v105_v11 = vmov 1966171168   ;;  %s157_s0 = inlined_call_operand.vmem [shape: f32[8,256], index: 0, kind: input, shape index: {}]   ;;  %s158_s1 = inlined_call_operand.vmem [shape: f32[1,256], index: 1, kind: output, shape index: {0}]   ;;  %s159_s2 = inlined_call_operand.vmem [shape: f32[1,256], index: 2, kind: output, shape index: {1}]  }
   0x1   :  { %v20_v1 = vld [vmem:[%s157_s0] sm:$0xff]  ;;  %v21_v2 = vld [vmem:[%s157_s0 + $0x8] sm:$0xff]  ;;  %v39_v12 = vunpack.c.l.s4 %v105_v11 }
   0x2   :  { %vm127_vm0 = vcmp.lt.s32.totalorder %v14_v0, 256  ;;  %v23_v4 = vrot.slane %v20_v1, 4  ;;  %v29_v5 = vrot.slane %v21_v2, 4  ;;  %v60_v7 = vmul.f32 %v20_v1, %v20_v1 }
   0x3   :  { %18 = vst.msk [vmem:[%s158_s1] sm:$0x3] %vm127_vm0, %v104_v6  ;;  %19 = vst.msk [vmem:[%s159_s2] sm:$0x3] %vm127_vm0, %v104_v6  ;;  %v61_v8 = vmul.f32 %v21_v2, %v21_v2  ;;  %v40_v21 = vunpack.c.0.s8 %v39_v12  ;;  %v42_v22 = vshrl.u32 %v14_v0, 7 }
   0x4   :  { %v24_v9 = vadd.f32 %v23_v4, %v20_v1  ;;  %v30_v10 = vadd.f32 %v29_v5, %v21_v2  ;;  %v62_v13 = vrot.slane %v60_v7, 4 }
   0x5   :  { %v68_v14 = vrot.slane %v61_v8, 4  ;;  %v43_v31 = vsub.s32 %v40_v21, %v42_v22 }
   0x6   :  { %v25_v15 = vrot.slane %v24_v9, 2  ;;  %v31_v16 = vrot.slane %v30_v10, 2  ;;  %v63_v17 = vadd.f32 %v62_v13, %v60_v7 }
   0x7   :  { %v69_v18 = vadd.f32 %v68_v14, %v61_v8 }
   0x8   :  { %v26_v19 = vadd.f32 %v25_v15, %v24_v9  ;;  %v32_v20 = vadd.f32 %v31_v16, %v30_v10  ;;  %v64_v23 = vrot.slane %v63_v17, 2 }
   0x9   :  { %v70_v24 = vrot.slane %v69_v18, 2 }
   0xa   :  { %v27_v25 = vrot.slane %v26_v19, 1  ;;  %v33_v26 = vrot.slane %v32_v20, 1  ;;  %v65_v27 = vadd.f32 %v64_v23, %v63_v17  ;;  %v22_v38 = vld [vmem:[%s158_s1] sm:$0x3] }
   0xb   :  { %v71_v28 = vadd.f32 %v70_v24, %v69_v18  ;;  %v59_v43 = vld [vmem:[%s159_s2] sm:$0x3] }
   0xc   :  { %v28_v29 = vadd.f32 %v27_v25, %v26_v19  ;;  %v34_v30 = vadd.f32 %v33_v26, %v32_v20  ;;  %v66_v32 = vrot.slane %v65_v27, 1 }
   0xd   :  { %v72_v33 = vrot.slane %v71_v28, 1 }
   0xe   :  { %v37_v34 = vcombine.low %v28_v29, %v34_v30  ;;  %v67_v35 = vadd.f32 %v66_v32, %v65_v27 }
   0xf   :  { %v73_v36 = vadd.f32 %v72_v33, %v71_v28 }
  0x10   :  { %v44_v37 = vrot.slane %v37_v34, %v43_v31 }
  0x11   :  { %v76_v39 = vcombine.low %v67_v35, %v73_v36 }
  0x12   :  { %v51_v40 = vrot.slane %v44_v37, %v43_v31 }
  0x13   :  { %v83_v41 = vrot.slane %v76_v39, %v43_v31 }
  0x14   :  { %v53_v42 = vadd.f32 %v51_v40, %v22_v38 }
  0x15   :  { %v90_v44 = vrot.slane %v83_v41, %v43_v31 }
  0x16   :  { %58 = vst.msk [vmem:[%s158_s1] sm:$0x3] %vm127_vm0, %v53_v42 }
  0x17   :  { %v92_v45 = vadd.f32 %v90_v44, %v59_v43 }
  0x19   :  { %93 = vst.msk [vmem:[%s159_s2] sm:$0x3] %vm127_vm0, %v92_v45 }

// kernel: feature_extractor_forward.41
= control target key start
LH: loop header
LB: loop body
LE: loop exit
PB: predicated region body
PF: predicated region fallthrough
CT: control target
= control target key end

     0   :  { %v18_v0 = vlaneseq  ;;  %s90_s1 = inlined_call_operand.vmem [shape: f32[1,256], index: 1, kind: input, shape index: {}]   ;;  %s91_s2 = inlined_call_operand.vmem [shape: f32[1,256], index: 2, kind: input, shape index: {}]   ;;  %s92_s0 = inlined_call_operand.vmem [shape: f32[8,256], index: 0, kind: input, shape index: {}]   ;;  %s93_s3 = inlined_call_operand.vmem [shape: f32[8,256], index: 3, kind: output, shape index: {}]  }
   0x1   :  { %v16_v2 = vld [vmem:[%s90_s1] sm:$0x3]  ;;  %v15_v7 = vld [vmem:[%s92_s0 + $0x8] sm:$0xff] }
   0x2   :  { %v19_v1 = vshrl.u32 %v18_v0, 7  ;;  %v30_v3 = vld [vmem:[%s91_s2] sm:$0x3] }
   0x3   :  { %v14_v6 = vld [vmem:[%s92_s0] sm:$0xff] }
   0x4   :  { %v20_v4 = vsub.s32 0, %v19_v1  ;;  %v24_v5 = vsub.s32 1, %v19_v1 }
   0x6   :  { %v21_v8 = vrot.slane %v16_v2, %v20_v4  ;;  %v35_v9 = vrot.slane %v30_v3, %v20_v4  ;;  %v25_v10 = vrot.slane %v16_v2, %v24_v5  ;;  %v39_v11 = vrot.slane %v30_v3, %v24_v5 }
   0x8   :  { %v28_v12 = vmul.f32 %v21_v8, %v14_v6  ;;  %v29_v13 = vmul.f32 %v25_v10, %v15_v7 }
   0xa   :  { %v42_v14 = vadd.f32 %v35_v9, %v28_v12  ;;  %v43_v15 = vadd.f32 %v39_v11, %v29_v13 }
   0xc   :  { %v44_v16 = vmax.f32 %v42_v14, 0.0  ;;  %v45_v17 = vmax.f32 %v43_v15, 0.0 }
   0xe   :  { %46 = vst [vmem:[%s93_s3] sm:$0xff] %v44_v16  ;;  %47 = vst [vmem:[%s93_s3 + $0x8] sm:$0xff] %v45_v17 }

// kernel: feature_extractor_forward.42
= control target key start
LH: loop header
LB: loop body
LE: loop exit
PB: predicated region body
PF: predicated region fallthrough
CT: control target
= control target key end

     0   :  { %s114_s0 = inlined_call_operand.vmem [shape: f32[4,8,512], index: 0, kind: input, shape index: {}]   ;;  %s115_s1 = inlined_call_operand.vmem [shape: f32[8,512], index: 1, kind: output, shape index: {}]  }
   0x1   :  { %v8_v0 = vld [vmem:[%s114_s0] sm:$0xff]  ;;  %v9_v4 = vld [vmem:[%s114_s0 + $0x8] sm:$0xff]  ;;  %v10_v9 = vld [vmem:[%s114_s0 + $0x10] sm:$0xff] }
   0x2   :  { %v12_v1 = vld [vmem:[%s114_s0 + $0x20] sm:$0xff]  ;;  %v13_v5 = vld [vmem:[%s114_s0 + $0x28] sm:$0xff]  ;;  %v14_v12 = vld [vmem:[%s114_s0 + $0x30] sm:$0xff] }
   0x3   :  { %v16_v2 = vld [vmem:[%s114_s0 + $0x40] sm:$0xff]  ;;  %v24_v3 = vmax.f32 %v8_v0, %v12_v1  ;;  %v17_v7 = vld [vmem:[%s114_s0 + $0x48] sm:$0xff]  ;;  %v27_v8 = vmax.f32 %v9_v4, %v13_v5  ;;  %v18_v13 = vld [vmem:[%s114_s0 + $0x50] sm:$0xff]  ;;  %v30_v15 = vmax.f32 %v10_v9, %v14_v12 }
   0x4   :  { %v20_v6 = vld [vmem:[%s114_s0 + $0x60] sm:$0xff]  ;;  %v21_v11 = vld [vmem:[%s114_s0 + $0x68] sm:$0xff]  ;;  %v11_v16 = vld [vmem:[%s114_s0 + $0x18] sm:$0xff] }
   0x5   :  { %v25_v10 = vmax.f32 %v24_v3, %v16_v2  ;;  %v28_v14 = vmax.f32 %v27_v8, %v17_v7  ;;  %v15_v17 = vld [vmem:[%s114_s0 + $0x38] sm:$0xff]  ;;  %v22_v20 = vld [vmem:[%s114_s0 + $0x70] sm:$0xff]  ;;  %v31_v23 = vmax.f32 %v30_v15, %v18_v13 }
   0x6   :  { %v19_v18 = vld [vmem:[%s114_s0 + $0x58] sm:$0xff]  ;;  %v33_v21 = vmax.f32 %v11_v16, %v15_v17 }
   0x7   :  { %v26_v19 = vmax.f32 %v25_v10, %v20_v6  ;;  %v29_v22 = vmax.f32 %v28_v14, %v21_v11  ;;  %v23_v24 = vld [vmem:[%s114_s0 + $0x78] sm:$0xff]  ;;  %v32_v26 = vmax.f32 %v31_v23, %v22_v20 }
   0x8   :  { %v34_v25 = vmax.f32 %v33_v21, %v19_v18 }
   0x9   :  { %36 = vst [vmem:[%s115_s1] sm:$0xff] %v26_v19  ;;  %37 = vst [vmem:[%s115_s1 + $0x8] sm:$0xff] %v29_v22 }
   0xa   :  { %v35_v27 = vmax.f32 %v34_v25, %v23_v24  ;;  %38 = vst [vmem:[%s115_s1 + $0x10] sm:$0xff] %v32_v26 }
   0xc   :  { %39 = vst [vmem:[%s115_s1 + $0x18] sm:$0xff] %v35_v27 }

// kernel: feature_extractor_forward.46
= control target key start
LH: loop header
LB: loop body
LE: loop exit
PB: predicated region body
PF: predicated region fallthrough
CT: control target
= control target key end

     0   :  { %s214_s0 = inlined_call_operand.vmem [shape: f32[9,8,512], index: 0, kind: input, shape index: {}]   ;;  %s215_s1 = inlined_call_operand.vmem [shape: f32[8,512], index: 1, kind: output, shape index: {}]  }
   0x1   :  { %v8_v0 = vld [vmem:[%s214_s0] sm:$0xff]  ;;  %v9_v6 = vld [vmem:[%s214_s0 + $0x8] sm:$0xff]  ;;  %v10_v15 = vld [vmem:[%s214_s0 + $0x10] sm:$0xff] }
   0x2   :  { %v12_v1 = vld [vmem:[%s214_s0 + $0x20] sm:$0xff]  ;;  %v13_v7 = vld [vmem:[%s214_s0 + $0x28] sm:$0xff]  ;;  %v14_v16 = vld [vmem:[%s214_s0 + $0x30] sm:$0xff] }
   0x3   :  { %v16_v2 = vld [vmem:[%s214_s0 + $0x40] sm:$0xff]  ;;  %v44_v3 = vmax.f32 %v8_v0, %v12_v1  ;;  %v17_v8 = vld [vmem:[%s214_s0 + $0x48] sm:$0xff]  ;;  %v52_v10 = vmax.f32 %v9_v6, %v13_v7  ;;  %v18_v17 = vld [vmem:[%s214_s0 + $0x50] sm:$0xff]  ;;  %v60_v20 = vmax.f32 %v10_v15, %v14_v16 }
   0x4   :  { %v20_v4 = vld [vmem:[%s214_s0 + $0x60] sm:$0xff]  ;;  %v21_v13 = vld [vmem:[%s214_s0 + $0x68] sm:$0xff]  ;;  %v22_v24 = vld [vmem:[%s214_s0 + $0x70] sm:$0xff] }
   0x5   :  { %v45_v5 = vmax.f32 %v44_v3, %v16_v2  ;;  %v24_v9 = vld [vmem:[%s214_s0 + $0x80] sm:$0xff]  ;;  %v53_v14 = vmax.f32 %v52_v10, %v17_v8  ;;  %v25_v19 = vld [vmem:[%s214_s0 + $0x88] sm:$0xff]  ;;  %v61_v26 = vmax.f32 %v60_v20, %v18_v17  ;;  %v11_v27 = vld [vmem:[%s214_s0 + $0x18] sm:$0xff] }
   0x6   :  { %v28_v11 = vld [vmem:[%s214_s0 + $0xa0] sm:$0xff]  ;;  %v29_v22 = vld [vmem:[%s214_s0 + $0xa8] sm:$0xff]  ;;  %v15_v28 = vld [vmem:[%s214_s0 + $0x38] sm:$0xff] }
   0x7   :  { %v46_v12 = vmax.f32 %v45_v5, %v20_v4  ;;  %v32_v21 = vld [vmem:[%s214_s0 + $0xc0] sm:$0xff]  ;;  %v54_v23 = vmax.f32 %v53_v14, %v21_v13  ;;  %v19_v29 = vld [vmem:[%s214_s0 + $0x58] sm:$0xff]  ;;  %v26_v32 = vld [vmem:[%s214_s0 + $0x90] sm:$0xff]  ;;  %v68_v33 = vmax.f32 %v11_v27, %v15_v28  ;;  %v62_v36 = vmax.f32 %v61_v26, %v22_v24 }
   0x8   :  { %v36_v30 = vld [vmem:[%s214_s0 + $0xe0] sm:$0xff]  ;;  %v33_v35 = vld [vmem:[%s214_s0 + $0xc8] sm:$0xff]  ;;  %v23_v37 = vld [vmem:[%s214_s0 + $0x78] sm:$0xff] }
   0x9   :  { %v47_v18 = vmax.f32 %v46_v12, %v24_v9  ;;  %v55_v31 = vmax.f32 %v54_v23, %v25_v19  ;;  %v40_v38 = vld [vmem:[%s214_s0 + $0x100] sm:$0xff]  ;;  %v30_v40 = vld [vmem:[%s214_s0 + $0xb0] sm:$0xff]  ;;  %v69_v41 = vmax.f32 %v68_v33, %v19_v29  ;;  %v37_v43 = vld [vmem:[%s214_s0 + $0xe8] sm:$0xff]  ;;  %v63_v44 = vmax.f32 %v62_v36, %v26_v32 }
   0xa   :  { %v27_v45 = vld [vmem:[%s214_s0 + $0x98] sm:$0xff]  ;;  %v34_v47 = vld [vmem:[%s214_s0 + $0xd0] sm:$0xff]  ;;  %v41_v50 = vld [vmem:[%s214_s0 + $0x108] sm:$0xff] }
   0xb   :  { %v48_v25 = vmax.f32 %v47_v18, %v28_v11  ;;  %v56_v39 = vmax.f32 %v55_v31, %v29_v22  ;;  %v70_v48 = vmax.f32 %v69_v41, %v23_v37  ;;  %v64_v51 = vmax.f32 %v63_v44, %v30_v40  ;;  %v31_v52 = vld [vmem:[%s214_s0 + $0xb8] sm:$0xff]  ;;  %v38_v54 = vld [vmem:[%s214_s0 + $0xf0] sm:$0xff] }
   0xc   :  { %v35_v57 = vld [vmem:[%s214_s0 + $0xd8] sm:$0xff]  ;;  %v42_v59 = vld [vmem:[%s214_s0 + $0x110] sm:$0xff] }
   0xd   :  { %v49_v34 = vmax.f32 %v48_v25, %v32_v21  ;;  %v57_v46 = vmax.f32 %v56_v39, %v33_v35  ;;  %v71_v55 = vmax.f32 %v70_v48, %v27_v45  ;;  %v65_v56 = vmax.f32 %v64_v51, %v34_v47  ;;  %v39_v62 = vld [vmem:[%s214_s0 + $0xf8] sm:$0xff] }
   0xe   :  { %v43_v1 = vld [vmem:[%s214_s0 + $0x118] sm:$0xff] }
   0xf   :  { %v50_v42 = vmax.f32 %v49_v34, %v36_v30  ;;  %v58_v53 = vmax.f32 %v57_v46, %v37_v43  ;;  %v72_v60 = vmax.f32 %v71_v55, %v31_v52  ;;  %v66_v61 = vmax.f32 %v65_v56, %v38_v54 }
  0x11   :  { %v51_v49 = vmax.f32 %v50_v42, %v40_v38  ;;  %v59_v58 = vmax.f32 %v58_v53, %v41_v50  ;;  %v73_v63 = vmax.f32 %v72_v60, %v35_v57  ;;  %v67_v0 = vmax.f32 %v66_v61, %v42_v59 }
  0x13   :  { %76 = vst [vmem:[%s215_s1] sm:$0xff] %v51_v49  ;;  %77 = vst [vmem:[%s215_s1 + $0x8] sm:$0xff] %v59_v58  ;;  %v74_v2 = vmax.f32 %v73_v63, %v39_v62 }
  0x14   :  { %78 = vst [vmem:[%s215_s1 + $0x10] sm:$0xff] %v67_v0 }
  0x15   :  { %v75_v3 = vmax.f32 %v74_v2, %v43_v1 }
  0x17   :  { %79 = vst [vmem:[%s215_s1 + $0x18] sm:$0xff] %v75_v3 }

// kernel: feature_extractor_forward.47
= control target key start
LH: loop header
LB: loop body
LE: loop exit
PB: predicated region body
PF: predicated region fallthrough
CT: control target
= control target key end

     0   :  { %s1514_s12 = smov 0   ;;  %s1516_s13 = smov 0   ;;  %s1826_s0 = inlined_call_operand.vmem [shape: bf16[8,4608], index: 0, kind: input, shape index: {}]   ;;  %s1827_s1 = inlined_call_operand.vmem [shape: bf16[4608,1024], index: 1, kind: input, shape index: {}]   ;;  %s1828_s2 = inlined_call_operand.vmem [shape: f32[1,1024], index: 2, kind: input, shape index: {}]   ;;  %s1829_s3 = inlined_call_operand.vmem [shape: f32[8,1024], index: 3, kind: output, shape index: {}]  }
   0x1   :  { %s1518_s14 = smov 0   ;;  %s1520_s15 = smov 0  }
   0x2   :  { %s1522_s16 = smov 0   ;;  %s1524_s17 = smov 0  }
   0x3   :  { %s1526_s18 = smov 0  }
   0x4 LB: > { %s25_s19 = sadd.s32 1, %s1483_s16  ;;  %s28_s20 = sadd.s32 1, %s1487_s17  ;;  %s1491_s18 = sphi %s1526_s18, %s13_s18   ;;  %s1487_s17 = sphi %s1524_s17, %s1835_s17   ;;  %s1483_s16 = sphi %s1522_s16, %s1834_s16   ;;  %s1479_s15 = sphi %s1520_s15, %s1833_s15   ;;  %s1475_s14 = sphi %s1518_s14, %s1832_s14   ;;  %s1471_s13 = sphi %s1516_s13, %s1831_s13   ;;  %s1467_s12 = sphi %s1514_s12, %s1830_s12  }
   0x5   : > { %p26_p0 = scmp.ge.s32.totalorder %s25_s19, 9  ;;  %p76_p1 = scmp.ne.s32.totalorder %s1471_s13, %s1467_s12 }
   0x6   : > { %p77_p2 = scmp.eq.s32.totalorder %s1491_s18, 0  ;;  %s69_s24 = sadd.s32 1, %s1471_s13 }
   0x7   : > { %s1837_s19 = smov (%p26_p0, %s25_s19), 0  ;;  %s1839_s20 = smov (!%p26_p0, %s28_s20), %s1487_s17 }
   0x8   : > { %p78_p3 = por %p77_p2, %p76_p1  ;;  %p30_p4 = scmp.ge.s32.totalorder %s1839_s20, 4 }
   0x9   : > { %s64_s21 = ssub.s32 %s1483_s16, %s1837_s19  ;;  %p1194_p6 = scmp.ge.s32.totalorder %s1491_s18, 36 }
   0xa   : > { %s1841_s20 = smov (%p30_p4, %s1839_s20), 0 }
   0xb   : > { %s65_s22 = ssub.s32 %s1487_s17, %s1841_s20  ;;  %156 = sbr.rel (%p1194_p6) target bundleno = 89 (0x59), region = 16 }
   0xc   : > { %s66_s23 = sor.u32 %s65_s22, %s64_s21 }
   0xd   : > { %p67_p5 = scmp.eq.s32.totalorder %s66_s23, 0 }
   0xf   : > { %s1565_s25 = scalar_select %p67_p5, %s1471_s13, %s69_s24  }
  0x12   : > { %172 = sbr.rel (!%p78_p3) target bundleno = 89 (0x59), region = 24  ;;  %s174_s26 = sand.u32 (%p78_p3), 1, %s1471_s13  }
  0x13   : > { %s1197_s27 = sshll.u32 (%p78_p3), %s1487_s17, 1  ;;  %s1195_s28 = sshll.u32 (%p78_p3), %s174_s26, 9 }
  0x14   : > { %s1279_s29 = sshll.u32 (%p78_p3), %s1483_s16, 9  ;;  %s1579_s8 = scalar_lea.vmem (%p78_p3), [#allocation3], %s1195_s28 }
  0x15   : > { %s180_s30 = sadd.s32 (%p78_p3), %s1279_s29, %s1197_s27 }
  0x16   : > { %s1199_s4 = sshll.u32 (%p78_p3), %s180_s30, 2 }
  0x17   : > { %s1574_s7 = scalar_lea.vmem (%p78_p3), %s1827_s1, %s1199_s4 }
  0x18   : > { %v336_v0 = vld [vmem:[%s1574_s7] sm:$0xff] (%p78_p3) }
  0x19   : > { %v338_v1 = vld [vmem:[%s1574_s7 + $0x20] sm:$0xff]  ;;  %337 = vst [vmem:[%s1579_s8] sm:$0xff] %v336_v0 }
  0x1a   : > { %v340_v2 = vld [vmem:[%s1574_s7 + $0x40] sm:$0xff]  ;;  %339 = vst [vmem:[%s1579_s8 + $0x8] sm:$0xff] %v338_v1 }
  0x1b   : > { %341 = vst [vmem:[%s1579_s8 + $0x10] sm:$0xff] %v340_v2  ;;  %v342_v3 = vld [vmem:[%s1574_s7 + $0x60] sm:$0xff] }
  0x1c   : > { %v344_v4 = vld [vmem:[%s1574_s7 + $0x80] sm:$0xff]  ;;  %343 = vst [vmem:[%s1579_s8 + $0x18] sm:$0xff] %v342_v3 }
  0x1d   : > { %v346_v5 = vld [vmem:[%s1574_s7 + $0xa0] sm:$0xff]  ;;  %345 = vst [vmem:[%s1579_s8 + $0x20] sm:$0xff] %v344_v4 }
  0x1e   : > { %347 = vst [vmem:[%s1579_s8 + $0x28] sm:$0xff] %v346_v5  ;;  %v348_v6 = vld [vmem:[%s1574_s7 + $0xc0] sm:$0xff] }
  0x1f   : > { %v350_v7 = vld [vmem:[%s1574_s7 + $0xe0] sm:$0xff]  ;;  %349 = vst [vmem:[%s1579_s8 + $0x30] sm:$0xff] %v348_v6 }
  0x20   : > { %v352_v8 = vld [vmem:[%s1574_s7 + $0x100] sm:$0xff]  ;;  %351 = vst [vmem:[%s1579_s8 + $0x38] sm:$0xff] %v350_v7 }
  0x21   : > { %353 = vst [vmem:[%s1579_s8 + $0x40] sm:$0xff] %v352_v8  ;;  %v354_v9 = vld [vmem:[%s1574_s7 + $0x120] sm:$0xff] }
  0x22   : > { %v356_v10 = vld [vmem:[%s1574_s7 + $0x140] sm:$0xff]  ;;  %355 = vst [vmem:[%s1579_s8 + $0x48] sm:$0xff] %v354_v9 }
  0x23   : > { %v358_v11 = vld [vmem:[%s1574_s7 + $0x160] sm:$0xff]  ;;  %357 = vst [vmem:[%s1579_s8 + $0x50] sm:$0xff] %v356_v10 }
  0x24   : > { %359 = vst [vmem:[%s1579_s8 + $0x58] sm:$0xff] %v358_v11  ;;  %v360_v12 = vld [vmem:[%s1574_s7 + $0x180] sm:$0xff] }
  0x25   : > { %v362_v13 = vld [vmem:[%s1574_s7 + $0x1a0] sm:$0xff]  ;;  %361 = vst [vmem:[%s1579_s8 + $0x60] sm:$0xff] %v360_v12 }
  0x26   : > { %v364_v14 = vld [vmem:[%s1574_s7 + $0x1c0] sm:$0xff]  ;;  %363 = vst [vmem:[%s1579_s8 + $0x68] sm:$0xff] %v362_v13 }
  0x27   : > { %365 = vst [vmem:[%s1579_s8 + $0x70] sm:$0xff] %v364_v14  ;;  %v366_v15 = vld [vmem:[%s1574_s7 + $0x1e0] sm:$0xff] }
  0x28   : > { %v368_v16 = vld [vmem:[%s1574_s7 + $0x200] sm:$0xff]  ;;  %367 = vst [vmem:[%s1579_s8 + $0x78] sm:$0xff] %v366_v15 }
  0x29   : > { %v370_v17 = vld [vmem:[%s1574_s7 + $0x220] sm:$0xff]  ;;  %369 = vst [vmem:[%s1579_s8 + $0x80] sm:$0xff] %v368_v16 }
  0x2a   : > { %371 = vst [vmem:[%s1579_s8 + $0x88] sm:$0xff] %v370_v17  ;;  %v372_v18 = vld [vmem:[%s1574_s7 + $0x240] sm:$0xff] }
  0x2b   : > { %v374_v19 = vld [vmem:[%s1574_s7 + $0x260] sm:$0xff]  ;;  %373 = vst [vmem:[%s1579_s8 + $0x90] sm:$0xff] %v372_v18 }
  0x2c   : > { %v376_v20 = vld [vmem:[%s1574_s7 + $0x280] sm:$0xff]  ;;  %375 = vst [vmem:[%s1579_s8 + $0x98] sm:$0xff] %v374_v19 }
  0x2d   : > { %377 = vst [vmem:[%s1579_s8 + $0xa0] sm:$0xff] %v376_v20  ;;  %v378_v21 = vld [vmem:[%s1574_s7 + $0x2a0] sm:$0xff] }
  0x2e   : > { %v380_v22 = vld [vmem:[%s1574_s7 + $0x2c0] sm:$0xff]  ;;  %379 = vst [vmem:[%s1579_s8 + $0xa8] sm:$0xff] %v378_v21 }
  0x2f   : > { %v382_v23 = vld [vmem:[%s1574_s7 + $0x2e0] sm:$0xff]  ;;  %381 = vst [vmem:[%s1579_s8 + $0xb0] sm:$0xff] %v380_v22 }
  0x30   : > { %383 = vst [vmem:[%s1579_s8 + $0xb8] sm:$0xff] %v382_v23  ;;  %v384_v24 = vld [vmem:[%s1574_s7 + $0x300] sm:$0xff] }
  0x31   : > { %v386_v25 = vld [vmem:[%s1574_s7 + $0x320] sm:$0xff]  ;;  %385 = vst [vmem:[%s1579_s8 + $0xc0] sm:$0xff] %v384_v24 }
  0x32   : > { %v388_v26 = vld [vmem:[%s1574_s7 + $0x340] sm:$0xff]  ;;  %387 = vst [vmem:[%s1579_s8 + $0xc8] sm:$0xff] %v386_v25 }
  0x33   : > { %389 = vst [vmem:[%s1579_s8 + $0xd0] sm:$0xff] %v388_v26  ;;  %v390_v27 = vld [vmem:[%s1574_s7 + $0x360] sm:$0xff] }
  0x34   : > { %v392_v28 = vld [vmem:[%s1574_s7 + $0x380] sm:$0xff]  ;;  %391 = vst [vmem:[%s1579_s8 + $0xd8] sm:$0xff] %v390_v27 }
  0x35   : > { %v394_v29 = vld [vmem:[%s1574_s7 + $0x3a0] sm:$0xff]  ;;  %393 = vst [vmem:[%s1579_s8 + $0xe0] sm:$0xff] %v392_v28 }
  0x36   : > { %395 = vst [vmem:[%s1579_s8 + $0xe8] sm:$0xff] %v394_v29  ;;  %v396_v30 = vld [vmem:[%s1574_s7 + $0x3c0] sm:$0xff] }
  0x37   : > { %v398_v31 = vld [vmem:[%s1574_s7 + $0x3e0] sm:$0xff]  ;;  %397 = vst [vmem:[%s1579_s8 + $0xf0] sm:$0xff] %v396_v30 }
  0x38   : > { %v400_v32 = vld [vmem:[%s1574_s7 + $0x400] sm:$0xff]  ;;  %399 = vst [vmem:[%s1579_s8 + $0xf8] sm:$0xff] %v398_v31 }
  0x39   : > { %401 = vst [vmem:[%s1579_s8 + $0x100] sm:$0xff] %v400_v32  ;;  %v402_v33 = vld [vmem:[%s1574_s7 + $0x420] sm:$0xff] }
  0x3a   : > { %v404_v34 = vld [vmem:[%s1574_s7 + $0x440] sm:$0xff]  ;;  %403 = vst [vmem:[%s1579_s8 + $0x108] sm:$0xff] %v402_v33 }
  0x3b   : > { %v406_v35 = vld [vmem:[%s1574_s7 + $0x460] sm:$0xff]  ;;  %405 = vst [vmem:[%s1579_s8 + $0x110] sm:$0xff] %v404_v34 }
  0x3c   : > { %407 = vst [vmem:[%s1579_s8 + $0x118] sm:$0xff] %v406_v35  ;;  %v408_v36 = vld [vmem:[%s1574_s7 + $0x480] sm:$0xff] }
  0x3d   : > { %v410_v37 = vld [vmem:[%s1574_s7 + $0x4a0] sm:$0xff]  ;;  %409 = vst [vmem:[%s1579_s8 + $0x120] sm:$0xff] %v408_v36 }
  0x3e   : > { %v412_v38 = vld [vmem:[%s1574_s7 + $0x4c0] sm:$0xff]  ;;  %411 = vst [vmem:[%s1579_s8 + $0x128] sm:$0xff] %v410_v37 }
  0x3f   : > { %413 = vst [vmem:[%s1579_s8 + $0x130] sm:$0xff] %v412_v38  ;;  %v414_v39 = vld [vmem:[%s1574_s7 + $0x4e0] sm:$0xff] }
  0x40   : > { %v416_v40 = vld [vmem:[%s1574_s7 + $0x500] sm:$0xff]  ;;  %415 = vst [vmem:[%s1579_s8 + $0x138] sm:$0xff] %v414_v39 }
  0x41   : > { %v418_v41 = vld [vmem:[%s1574_s7 + $0x520] sm:$0xff]  ;;  %417 = vst [vmem:[%s1579_s8 + $0x140] sm:$0xff] %v416_v40 }
  0x42   : > { %419 = vst [vmem:[%s1579_s8 + $0x148] sm:$0xff] %v418_v41  ;;  %v420_v42 = vld [vmem:[%s1574_s7 + $0x540] sm:$0xff] }
  0x43   : > { %v422_v43 = vld [vmem:[%s1574_s7 + $0x560] sm:$0xff]  ;;  %421 = vst [vmem:[%s1579_s8 + $0x150] sm:$0xff] %v420_v42 }
  0x44   : > { %v424_v44 = vld [vmem:[%s1574_s7 + $0x580] sm:$0xff]  ;;  %423 = vst [vmem:[%s1579_s8 + $0x158] sm:$0xff] %v422_v43 }
  0x45   : > { %425 = vst [vmem:[%s1579_s8 + $0x160] sm:$0xff] %v424_v44  ;;  %v426_v45 = vld [vmem:[%s1574_s7 + $0x5a0] sm:$0xff] }
  0x46   : > { %v428_v46 = vld [vmem:[%s1574_s7 + $0x5c0] sm:$0xff]  ;;  %427 = vst [vmem:[%s1579_s8 + $0x168] sm:$0xff] %v426_v45 }
  0x47   : > { %v430_v47 = vld [vmem:[%s1574_s7 + $0x5e0] sm:$0xff]  ;;  %429 = vst [vmem:[%s1579_s8 + $0x170] sm:$0xff] %v428_v46 }
  0x48   : > { %431 = vst [vmem:[%s1579_s8 + $0x178] sm:$0xff] %v430_v47  ;;  %v432_v48 = vld [vmem:[%s1574_s7 + $0x600] sm:$0xff] }
  0x49   : > { %v434_v49 = vld [vmem:[%s1574_s7 + $0x620] sm:$0xff]  ;;  %433 = vst [vmem:[%s1579_s8 + $0x180] sm:$0xff] %v432_v48 }
  0x4a   : > { %v436_v50 = vld [vmem:[%s1574_s7 + $0x640] sm:$0xff]  ;;  %435 = vst [vmem:[%s1579_s8 + $0x188] sm:$0xff] %v434_v49 }
  0x4b   : > { %437 = vst [vmem:[%s1579_s8 + $0x190] sm:$0xff] %v436_v50  ;;  %v438_v51 = vld [vmem:[%s1574_s7 + $0x660] sm:$0xff] }
  0x4c   : > { %v440_v52 = vld [vmem:[%s1574_s7 + $0x680] sm:$0xff]  ;;  %439 = vst [vmem:[%s1579_s8 + $0x198] sm:$0xff] %v438_v51 }
  0x4d   : > { %v442_v53 = vld [vmem:[%s1574_s7 + $0x6a0] sm:$0xff]  ;;  %441 = vst [vmem:[%s1579_s8 + $0x1a0] sm:$0xff] %v440_v52 }
  0x4e   : > { %443 = vst [vmem:[%s1579_s8 + $0x1a8] sm:$0xff] %v442_v53  ;;  %v444_v54 = vld [vmem:[%s1574_s7 + $0x6c0] sm:$0xff] }
  0x4f   : > { %v446_v55 = vld [vmem:[%s1574_s7 + $0x6e0] sm:$0xff]  ;;  %445 = vst [vmem:[%s1579_s8 + $0x1b0] sm:$0xff] %v444_v54 }
  0x50   : > { %v448_v56 = vld [vmem:[%s1574_s7 + $0x700] sm:$0xff]  ;;  %447 = vst [vmem:[%s1579_s8 + $0x1b8] sm:$0xff] %v446_v55 }
  0x51   : > { %449 = vst [vmem:[%s1579_s8 + $0x1c0] sm:$0xff] %v448_v56  ;;  %v450_v57 = vld [vmem:[%s1574_s7 + $0x720] sm:$0xff] }
  0x52   : > { %v452_v58 = vld [vmem:[%s1574_s7 + $0x740] sm:$0xff]  ;;  %451 = vst [vmem:[%s1579_s8 + $0x1c8] sm:$0xff] %v450_v57 }
  0x53   : > { %v454_v59 = vld [vmem:[%s1574_s7 + $0x760] sm:$0xff]  ;;  %453 = vst [vmem:[%s1579_s8 + $0x1d0] sm:$0xff] %v452_v58 }
  0x54   : > { %455 = vst [vmem:[%s1579_s8 + $0x1d8] sm:$0xff] %v454_v59  ;;  %v456_v60 = vld [vmem:[%s1574_s7 + $0x780] sm:$0xff] }
  0x55   : > { %v458_v61 = vld [vmem:[%s1574_s7 + $0x7a0] sm:$0xff]  ;;  %457 = vst [vmem:[%s1579_s8 + $0x1e0] sm:$0xff] %v456_v60 }
  0x56   : > { %v460_v62 = vld [vmem:[%s1574_s7 + $0x7c0] sm:$0xff]  ;;  %459 = vst [vmem:[%s1579_s8 + $0x1e8] sm:$0xff] %v458_v61 }
  0x57   : > { %461 = vst [vmem:[%s1579_s8 + $0x1f0] sm:$0xff] %v460_v62  ;;  %v462_v63 = vld [vmem:[%s1574_s7 + $0x7e0] sm:$0xff] }
  0x58   : > { %463 = vst [vmem:[%s1579_s8 + $0x1f8] sm:$0xff] %v462_v63 }
  0x59 PF: > { %p1200_p7 = scmp.ge.s32.totalorder %s1491_s18, 1  ;;  %p476_p8 = scmp.lt.s32.totalorder %s1491_s18, 37 }
  0x5b   : > { %p477_p9 = pnand %p1200_p7, %p476_p8 }
  0x5c   : > { %s483_s9 = sand.u32 (!%p477_p9), 1, %s1467_s12   ;;  %s1202_s10 = sshll.u32 (!%p477_p9), %s1475_s14, 2 }
  0x5d   : > { %480 = sbr.rel (%p477_p9) target bundleno = 406 (0x196), region = 66  ;;  %s1201_s11 = sshll.u32 (!%p477_p9), %s483_s9, 9 }
  0x5e   : > { %p526_p10 = scmp.lt.s32.totalorder (!%p477_p9), %s1202_s10, 35  ;;  %s1204_s21 = sshll.u32 (!%p477_p9), %s1479_s15, 1 }
  0x5f   : > { %p536_p11 = scmp.lt.s32.totalorder (!%p477_p9), %s1204_s21, 7  ;;  %s1728_s5 = scalar_lea.vmem (!%p477_p9), [#allocation3], %s1201_s11 }
  0x60   : > { %p1207_p12 = scmp.ne.s32.totalorder (!%p477_p9), %s1475_s14, 0 }
  0x64   : > { %s1843_s10 = smov (!%p526_p10, %s1202_s10), 35  ;;  %s1845_s21 = smov (!%p536_p11, %s1204_s21), 7 }
  0x65   : > { %s1203_s22 = sshll.u32 %s1843_s10, 2  ;;  %s538_s12 = scalar_lea.vmem %s1828_s2, %s1845_s21  ;;  %v1493_v0 = vmov (!%p1207_p12), 0.0  }
  0x66   : > { %s1714_s26 = scalar_lea.vmem %s1826_s0, %s1203_s22  ;;  %s1206_s29 = sshll.u32 %s1845_s21, 3  ;;  %554 = vst [vmem:[#allocation2] sm:$0xff] (!%p1207_p12), %v1493_v0  ;;  %555 = vst [vmem:[#allocation2 + $0x8] sm:$0xff] (!%p1207_p12), %v1493_v0 }
  0x67   : > { %s1726_s15 = scalar_lea.vmem %s1829_s3, %s1206_s29  ;;  %553 = sbr.rel (%p1207_p12) target bundleno = 110 (0x6e), region = 74 }
  0x6e PF: > { %v1337_v1 = vld [vmem:[%s1728_s5 + $0x4] ss:$8 sps:$4 sm:$0xff]   ;;  %v1341_v3 = vld [vmem:[%s1728_s5] ss:$8 sps:$4 sm:$0xff]   ;;  %v1343_v5 = vld [vmem:[%s1728_s5 + $0x14] ss:$8 sps:$4 sm:$0xff]  }
  0x6f   : > { %v1339_v2 = vld [vmem:[%s1728_s5 + $0x104] ss:$8 sps:$4 sm:$0xff]   ;;  %958 = vmatprep.subr.bf16.mxu0 %v1337_v1  ;;  %v1342_v4 = vld [vmem:[%s1728_s5 + $0x100] ss:$8 sps:$4 sm:$0xff]   ;;  %v1345_v6 = vld [vmem:[%s1728_s5 + $0x114] ss:$8 sps:$4 sm:$0xff]  }
  0x70   : > { %999 = vmatprep.subr.bf16.mxu1 %v1339_v2  ;;  %959 = vmatpush1.bf16.msra.mxu0 %v1341_v3  ;;  %v1347_v7 = vld [vmem:[%s1728_s5 + $0x10] ss:$8 sps:$4 sm:$0xff]   ;;  %v1349_v9 = vld [vmem:[%s1728_s5 + $0x24] ss:$8 sps:$4 sm:$0xff]   ;;  %v1353_v11 = vld [vmem:[%s1728_s5 + $0x20] ss:$8 sps:$4 sm:$0xff]  }
  0x71   : > { %1000 = vmatpush1.bf16.msra.mxu1 %v1342_v4  ;;  %960 = vmatprep.subr.bf16.mxu0 %v1343_v5  ;;  %v1348_v8 = vld [vmem:[%s1728_s5 + $0x110] ss:$8 sps:$4 sm:$0xff]   ;;  %v1351_v10 = vld [vmem:[%s1728_s5 + $0x124] ss:$8 sps:$4 sm:$0xff]   ;;  %v1354_v12 = vld [vmem:[%s1728_s5 + $0x120] ss:$8 sps:$4 sm:$0xff]  }
  0x72   : > { %1001 = vmatprep.subr.bf16.mxu1 %v1345_v6  ;;  %v1355_v13 = vld [vmem:[%s1728_s5 + $0x34] ss:$8 sps:$4 sm:$0xff]   ;;  %v1359_v15 = vld [vmem:[%s1728_s5 + $0x30] ss:$8 sps:$4 sm:$0xff]   ;;  %v1361_v17 = vld [vmem:[%s1728_s5 + $0x44] ss:$8 sps:$4 sm:$0xff]  }
  0x73   : > { %v1357_v14 = vld [vmem:[%s1728_s5 + $0x134] ss:$8 sps:$4 sm:$0xff]   ;;  %v1360_v16 = vld [vmem:[%s1728_s5 + $0x130] ss:$8 sps:$4 sm:$0xff]   ;;  %v1363_v18 = vld [vmem:[%s1728_s5 + $0x144] ss:$8 sps:$4 sm:$0xff]  }
  0x74   : > { %961 = vmatpush1.bf16.msra.mxu0 %v1347_v7  ;;  %v1365_v19 = vld [vmem:[%s1728_s5 + $0x40] ss:$8 sps:$4 sm:$0xff]   ;;  %v1367_v21 = vld [vmem:[%s1728_s5 + $0x54] ss:$8 sps:$4 sm:$0xff]   ;;  %v1371_v23 = vld [vmem:[%s1728_s5 + $0x50] ss:$8 sps:$4 sm:$0xff]  }
  0x75   : > { %1002 = vmatpush1.bf16.msra.mxu1 %v1348_v8  ;;  %962 = vmatprep.subr.bf16.mxu0 %v1349_v9  ;;  %v1366_v20 = vld [vmem:[%s1728_s5 + $0x140] ss:$8 sps:$4 sm:$0xff]   ;;  %v1369_v22 = vld [vmem:[%s1728_s5 + $0x154] ss:$8 sps:$4 sm:$0xff]   ;;  %v1372_v24 = vld [vmem:[%s1728_s5 + $0x150] ss:$8 sps:$4 sm:$0xff]  }
  0x76   : > { %1003 = vmatprep.subr.bf16.mxu1 %v1351_v10  ;;  %v1373_v25 = vld [vmem:[%s1728_s5 + $0x64] ss:$8 sps:$4 sm:$0xff]   ;;  %v1377_v27 = vld [vmem:[%s1728_s5 + $0x60] ss:$8 sps:$4 sm:$0xff]   ;;  %v1379_v29 = vld [vmem:[%s1728_s5 + $0x74] ss:$8 sps:$4 sm:$0xff]  }
  0x77   : > { %v1375_v26 = vld [vmem:[%s1728_s5 + $0x164] ss:$8 sps:$4 sm:$0xff]   ;;  %v1378_v28 = vld [vmem:[%s1728_s5 + $0x160] ss:$8 sps:$4 sm:$0xff]   ;;  %v1381_v30 = vld [vmem:[%s1728_s5 + $0x174] ss:$8 sps:$4 sm:$0xff]  }
  0x78   : > { %963 = vmatpush1.bf16.msra.mxu0 %v1353_v11  ;;  %v1383_v31 = vld [vmem:[%s1728_s5 + $0x70] ss:$8 sps:$4 sm:$0xff]   ;;  %v1385_v33 = vld [vmem:[%s1728_s5 + $0x84] ss:$8 sps:$4 sm:$0xff]   ;;  %v1389_v35 = vld [vmem:[%s1728_s5 + $0x80] ss:$8 sps:$4 sm:$0xff]  }
  0x79   : > { %1004 = vmatpush1.bf16.msra.mxu1 %v1354_v12  ;;  %964 = vmatprep.subr.bf16.mxu0 %v1355_v13  ;;  %v1384_v32 = vld [vmem:[%s1728_s5 + $0x170] ss:$8 sps:$4 sm:$0xff]   ;;  %v1387_v34 = vld [vmem:[%s1728_s5 + $0x184] ss:$8 sps:$4 sm:$0xff]   ;;  %v1390_v36 = vld [vmem:[%s1728_s5 + $0x180] ss:$8 sps:$4 sm:$0xff]  }
  0x7a   : > { %1005 = vmatprep.subr.bf16.mxu1 %v1357_v14  ;;  %v1391_v37 = vld [vmem:[%s1728_s5 + $0x94] ss:$8 sps:$4 sm:$0xff]   ;;  %v1395_v39 = vld [vmem:[%s1728_s5 + $0x90] ss:$8 sps:$4 sm:$0xff]   ;;  %v1397_v41 = vld [vmem:[%s1728_s5 + $0xa4] ss:$8 sps:$4 sm:$0xff]  }
  0x7b   : > { %v1393_v38 = vld [vmem:[%s1728_s5 + $0x194] ss:$8 sps:$4 sm:$0xff]   ;;  %v1396_v40 = vld [vmem:[%s1728_s5 + $0x190] ss:$8 sps:$4 sm:$0xff]   ;;  %v1399_v42 = vld [vmem:[%s1728_s5 + $0x1a4] ss:$8 sps:$4 sm:$0xff]  }
  0x7c   : > { %965 = vmatpush1.bf16.msra.mxu0 %v1359_v15  ;;  %v1401_v43 = vld [vmem:[%s1728_s5 + $0xa0] ss:$8 sps:$4 sm:$0xff]   ;;  %v1403_v45 = vld [vmem:[%s1728_s5 + $0xb4] ss:$8 sps:$4 sm:$0xff]   ;;  %v1407_v50 = vld [vmem:[%s1728_s5 + $0xb0] ss:$8 sps:$4 sm:$0xff]  }
  0x7d   : > { %1006 = vmatpush1.bf16.msra.mxu1 %v1360_v16  ;;  %966 = vmatprep.subr.bf16.mxu0 %v1361_v17  ;;  %v1402_v44 = vld [vmem:[%s1728_s5 + $0x1a0] ss:$8 sps:$4 sm:$0xff]   ;;  %v1405_v46 = vld [vmem:[%s1728_s5 + $0x1b4] ss:$8 sps:$4 sm:$0xff]   ;;  %v1408_v51 = vld [vmem:[%s1728_s5 + $0x1b0] ss:$8 sps:$4 sm:$0xff]  }
  0x7e   : > { %1007 = vmatprep.subr.bf16.mxu1 %v1363_v18  ;;  %v558_v47 = vld [vmem:[%s1714_s26] sm:$0xff]  ;;  %v559_v49 = vld [vmem:[%s1714_s26 + $0x8] sm:$0xff]  ;;  %v1409_v53 = vld [vmem:[%s1728_s5 + $0xc4] ss:$8 sps:$4 sm:$0xff]   ;;  %p1276_p13 = scmp.ne.s32.totalorder %s1475_s14, 8 }
  0x7f   : > { %v1209_v48 = vcombine.high %v558_v47, %v558_v47  ;;  %v1211_v52 = vcombine.high %v559_v49, %v559_v49  ;;  %v1411_v54 = vld [vmem:[%s1728_s5 + $0x1c4] ss:$8 sps:$4 sm:$0xff]   ;;  %v1413_v55 = vld [vmem:[%s1728_s5 + $0xc0] ss:$8 sps:$4 sm:$0xff]   ;;  %v1415_v57 = vld [vmem:[%s1728_s5 + $0xd4] ss:$8 sps:$4 sm:$0xff]   ;;  %v1208_v5 = vcombine.low %v558_v47, %v558_v47  ;;  %v1210_v6 = vcombine.low %v559_v49, %v559_v49 }
  0x80   : > { %967 = vmatpush1.bf16.msra.mxu0 %v1365_v19  ;;  %v1414_v56 = vld [vmem:[%s1728_s5 + $0x1c0] ss:$8 sps:$4 sm:$0xff]   ;;  %v1417_v58 = vld [vmem:[%s1728_s5 + $0x1d4] ss:$8 sps:$4 sm:$0xff]   ;;  %v1419_v59 = vld [vmem:[%s1728_s5 + $0xd0] ss:$8 sps:$4 sm:$0xff]  }
  0x81   : > { %1008 = vmatpush1.bf16.msra.mxu1 %v1366_v20  ;;  %968 = vmatprep.subr.bf16.mxu0 %v1367_v21  ;;  %v1420_v60 = vld [vmem:[%s1728_s5 + $0x1d0] ss:$8 sps:$4 sm:$0xff]   ;;  %v1421_v61 = vld [vmem:[%s1728_s5 + $0xe4] ss:$8 sps:$4 sm:$0xff]   ;;  %v1425_v63 = vld [vmem:[%s1728_s5 + $0xe0] ss:$8 sps:$4 sm:$0xff]   ;;  %v1052_v21 = vlaneseq (!%p1276_p13) }
  0x82   : > { %1009 = vmatprep.subr.bf16.mxu1 %v1369_v22  ;;  %990 = vmatprep.mubr.bf16.mxu0 %v1209_v48  ;;  %v1423_v62 = vld [vmem:[%s1728_s5 + $0x1e4] ss:$8 sps:$4 sm:$0xff]   ;;  %v1426_v0 = vld [vmem:[%s1728_s5 + $0x1e0] ss:$8 sps:$4 sm:$0xff]   ;;  %v1427_v1 = vld [vmem:[%s1728_s5 + $0xf4] ss:$8 sps:$4 sm:$0xff]  }
  0x83   : > { %1031 = vmatprep.mubr.bf16.mxu1 %v1211_v52  ;;  %v1429_v2 = vld [vmem:[%s1728_s5 + $0x1f4] ss:$8 sps:$4 sm:$0xff]   ;;  %v1431_v3 = vld [vmem:[%s1728_s5 + $0xf0] ss:$8 sps:$4 sm:$0xff]   ;;  %v1053_v22 = vshrl.u32 (!%p1276_p13), %v1052_v21, 7 }
  0x84   : > { %969 = vmatpush1.bf16.msra.mxu0 %v1371_v23  ;;  %v1432_v4 = vld [vmem:[%s1728_s5 + $0x1f0] ss:$8 sps:$4 sm:$0xff]  }
  0x85   : > { %1010 = vmatpush1.bf16.msra.mxu1 %v1372_v24  ;;  %970 = vmatprep.subr.bf16.mxu0 %v1373_v25  ;;  %v556_v8 = vld [vmem:[#allocation2] sm:$0xff]  ;;  %v557_v12 = vld [vmem:[#allocation2 + $0x8] sm:$0xff]  ;;  %v1054_v24 = vsub.s32 (!%p1276_p13), 0, %v1053_v22  ;;  %v1058_v25 = vsub.s32 (!%p1276_p13), 1, %v1053_v22 }
  0x86   : > { %1011 = vmatprep.subr.bf16.mxu1 %v1375_v26  ;;  %v1050_v23 = vld [vmem:[%s538_s12] sm:$0x3] (!%p1276_p13) }
  0x88   : > { %971 = vmatpush1.bf16.msra.mxu0 %v1377_v27 }
  0x89   : > { %1012 = vmatpush1.bf16.msra.mxu1 %v1378_v28  ;;  %972 = vmatprep.subr.bf16.mxu0 %v1379_v29  ;;  %v1055_v28 = vrot.slane (!%p1276_p13), %v1050_v23, %v1054_v24  ;;  %v1059_v29 = vrot.slane (!%p1276_p13), %v1050_v23, %v1058_v25 }
  0x8a   : > { %1013 = vmatprep.subr.bf16.mxu1 %v1381_v30 }
  0x8c   : > { %973 = vmatpush1.bf16.msra.mxu0 %v1383_v31 }
  0x8d   : > { %1014 = vmatpush1.bf16.msra.mxu1 %v1384_v32  ;;  %974 = vmatprep.subr.bf16.mxu0 %v1385_v33 }
  0x8e   : > { %1015 = vmatprep.subr.bf16.mxu1 %v1387_v34 }
  0x90   : > { %975 = vmatpush1.bf16.msra.mxu0 %v1389_v35 }
  0x91   : > { %1016 = vmatpush1.bf16.msra.mxu1 %v1390_v36  ;;  %976 = vmatprep.subr.bf16.mxu0 %v1391_v37 }
  0x92   : > { %1017 = vmatprep.subr.bf16.mxu1 %v1393_v38 }
  0x94   : > { %977 = vmatpush1.bf16.msra.mxu0 %v1395_v39 }
  0x95   : > { %1018 = vmatpush1.bf16.msra.mxu1 %v1396_v40  ;;  %978 = vmatprep.subr.bf16.mxu0 %v1397_v41 }
  0x96   : > { %1019 = vmatprep.subr.bf16.mxu1 %v1399_v42 }
  0x98   : > { %979 = vmatpush1.bf16.msra.mxu0 %v1401_v43 }
  0x99   : > { %1020 = vmatpush1.bf16.msra.mxu1 %v1402_v44  ;;  %980 = vmatprep.subr.bf16.mxu0 %v1403_v45 }
  0x9a   : > { %1021 = vmatprep.subr.bf16.mxu1 %v1405_v46 }
  0x9c   : > { %981 = vmatpush1.bf16.msra.mxu0 %v1407_v50 }
  0x9d   : > { %1022 = vmatpush1.bf16.msra.mxu1 %v1408_v51  ;;  %982 = vmatprep.subr.bf16.mxu0 %v1409_v53 }
  0x9e   : > { %1023 = vmatprep.subr.bf16.mxu1 %v1411_v54 }
  0xa0   : > { %983 = vmatpush1.bf16.msra.mxu0 %v1413_v55 }
  0xa1   : > { %1024 = vmatpush1.bf16.msra.mxu1 %v1414_v56  ;;  %984 = vmatprep.subr.bf16.mxu0 %v1415_v57 }
  0xa2   : > { %1025 = vmatprep.subr.bf16.mxu1 %v1417_v58 }
  0xa4   : > { %985 = vmatpush1.bf16.msra.mxu0 %v1419_v59 }
  0xa5   : > { %1026 = vmatpush1.bf16.msra.mxu1 %v1420_v60  ;;  %986 = vmatprep.subr.bf16.mxu0 %v1421_v61 }
  0xa6   : > { %1027 = vmatprep.subr.bf16.mxu1 %v1423_v62 }
  0xa8   : > { %987 = vmatpush1.bf16.msra.mxu0 %v1425_v63 }
  0xa9   : > { %1028 = vmatpush1.bf16.msra.mxu1 %v1426_v0  ;;  %988 = vmatprep.subr.bf16.mxu0 %v1427_v1 }
  0xaa   : > { %1029 = vmatprep.subr.bf16.mxu1 %v1429_v2 }
  0xac   : > { %989 = vmatpush1.bf16.msra.mxu0 %v1431_v3 }
  0xad   : > { %1030 = vmatpush1.bf16.msra.mxu1 %v1432_v4 }
  0xaf   : > { %991 = vmatmul.mubr.bf16.vlgmr.msra.gmra.mrb[0].mxu0 %v1208_v5 }
  0xb0   : > { %1032 = vmatmul.mubr.bf16.vlgmr.msra.gmra.mrb[0].mxu1 %v1210_v6 }
 0x182   : > { %v992_v7 = vpop.f32.mrb[0].mxu0 }
 0x183   : > { %v1033_v9 = vpop.f32.mrb[0].mxu1  ;;  %v994_v11 = vpop.f32.mrb[1].mxu0  ;;  %1047 = sbr.rel (%p1276_p13) target bundleno = 406 (0x196), region = 78 }
 0x184   : > { %v1034_v10 = vadd.f32 %v1033_v9, %v992_v7  ;;  %v1035_v13 = vpop.f32.mrb[1].mxu1  ;;  %v996_v15 = vpop.f32.mrb[2].mxu0 }
 0x185   : > { %v1036_v14 = vadd.f32 %v1035_v13, %v994_v11  ;;  %v1037_v16 = vpop.f32.mrb[2].mxu1  ;;  %v997_v18 = vpop.f32.mrb[3].mxu0 }
 0x186   : > { %v1040_v17 = vadd.f32 %v1034_v10, %v556_v8  ;;  %v1038_v19 = vpop.f32.mrb[3].mxu1 }
 0x187   : > { %v1041_v20 = vadd.f32 %v1036_v14, %v557_v12 }
 0x188   : > { %1042 = vst [vmem:[#allocation2] sm:$0xff] %v1040_v17 }
 0x189   : > { %1043 = vst [vmem:[#allocation2 + $0x8] sm:$0xff] %v1041_v20 }
 0x18f   : > { %v1048_v26 = vld [vmem:[#allocation2] sm:$0xff] }
 0x190   : > { %v1049_v27 = vld [vmem:[#allocation2 + $0x8] sm:$0xff]  ;;  %v1062_v30 = vadd.f32 %v1055_v28, %v1048_v26 }
 0x191   : > { %v1063_v31 = vadd.f32 %v1059_v29, %v1049_v27 }
 0x192   : > { %v1064_v32 = vmax.f32 %v1062_v30, 0.0 }
 0x193   : > { %v1065_v33 = vmax.f32 %v1063_v31, 0.0 }
 0x194   : > { %1066 = vst [vmem:[%s1726_s15] sm:$0xff] %v1064_v32 }
 0x195   : > { %1067 = vst [vmem:[%s1726_s15 + $0x8] sm:$0xff] %v1065_v33 }
 0x196 PF: > { %s13_s18 = sadd.s32 1, %s1491_s18   ;;  %s1830_s12 = smov %s1471_s13 }
 0x197   : > { %p10_p0 = scmp.ge.s32.totalorder %s13_s18, 38   ;;  %s1831_s13 = smov %s1565_s25 }
 0x198   : > { %s1832_s14 = smov %s1483_s16  ;;  %s1833_s15 = smov %s1487_s17 }
 0x199   : > { %s1834_s16 = smov %s1837_s19  ;;  %s1835_s17 = smov %s1841_s20 }
 0x19a   :  { %12 = sbr.rel (!%p10_p0) target bundleno = 4 (0x4), region = 119 }

// kernel: feature_extractor_forward.48
= control target key start
LH: loop header
LB: loop body
LE: loop exit
PB: predicated region body
PF: predicated region fallthrough
CT: control target
= control target key end

     0   :  { %s1514_s12 = smov 0   ;;  %s1516_s13 = smov 0   ;;  %s1826_s0 = inlined_call_operand.vmem [shape: bf16[8,1024], index: 0, kind: input, shape index: {}]   ;;  %s1827_s1 = inlined_call_operand.vmem [shape: bf16[1024,1024], index: 1, kind: input, shape index: {}]   ;;  %s1828_s2 = inlined_call_operand.vmem [shape: f32[1,1024], index: 2, kind: input, shape index: {}]   ;;  %s1829_s3 = inlined_call_operand.vmem [shape: f32[8,1024], index: 3, kind: output, shape index: {}]  }
   0x1   :  { %s1518_s14 = smov 0   ;;  %s1520_s15 = smov 0  }
   0x2   :  { %s1522_s16 = smov 0   ;;  %s1524_s17 = smov 0  }
   0x3   :  { %s1526_s18 = smov 0  }
   0x4 LB: > { %s25_s19 = sadd.s32 1, %s1483_s16  ;;  %s28_s20 = sadd.s32 1, %s1487_s17  ;;  %s1491_s18 = sphi %s1526_s18, %s13_s18   ;;  %s1487_s17 = sphi %s1524_s17, %s1835_s17   ;;  %s1483_s16 = sphi %s1522_s16, %s1834_s16   ;;  %s1479_s15 = sphi %s1520_s15, %s1833_s15   ;;  %s1475_s14 = sphi %s1518_s14, %s1832_s14   ;;  %s1471_s13 = sphi %s1516_s13, %s1831_s13   ;;  %s1467_s12 = sphi %s1514_s12, %s1830_s12  }
   0x5   : > { %p26_p0 = scmp.ge.s32.totalorder %s25_s19, 2  ;;  %p76_p1 = scmp.ne.s32.totalorder %s1471_s13, %s1467_s12 }
   0x6   : > { %p77_p2 = scmp.eq.s32.totalorder %s1491_s18, 0  ;;  %s69_s24 = sadd.s32 1, %s1471_s13 }
   0x7   : > { %s1837_s19 = smov (%p26_p0, %s25_s19), 0  ;;  %s1839_s20 = smov (!%p26_p0, %s28_s20), %s1487_s17 }
   0x8   : > { %p78_p3 = por %p77_p2, %p76_p1  ;;  %p30_p4 = scmp.ge.s32.totalorder %s1839_s20, 4 }
   0x9   : > { %s64_s21 = ssub.s32 %s1483_s16, %s1837_s19  ;;  %p1194_p6 = scmp.ge.s32.totalorder %s1491_s18, 8 }
   0xa   : > { %s1841_s20 = smov (%p30_p4, %s1839_s20), 0 }
   0xb   : > { %s65_s22 = ssub.s32 %s1487_s17, %s1841_s20  ;;  %156 = sbr.rel (%p1194_p6) target bundleno = 89 (0x59), region = 16 }
   0xc   : > { %s66_s23 = sor.u32 %s65_s22, %s64_s21 }
   0xd   : > { %p67_p5 = scmp.eq.s32.totalorder %s66_s23, 0 }
   0xf   : > { %s1565_s25 = scalar_select %p67_p5, %s1471_s13, %s69_s24  }
  0x12   : > { %172 = sbr.rel (!%p78_p3) target bundleno = 89 (0x59), region = 24  ;;  %s174_s26 = sand.u32 (%p78_p3), 1, %s1471_s13  }
  0x13   : > { %s1197_s27 = sshll.u32 (%p78_p3), %s1487_s17, 1  ;;  %s1195_s28 = sshll.u32 (%p78_p3), %s174_s26, 9 }
  0x14   : > { %s1279_s29 = sshll.u32 (%p78_p3), %s1483_s16, 9  ;;  %s1579_s8 = scalar_lea.vmem (%p78_p3), [#allocation3], %s1195_s28 }
  0x15   : > { %s180_s30 = sadd.s32 (%p78_p3), %s1279_s29, %s1197_s27 }
  0x16   : > { %s1199_s4 = sshll.u32 (%p78_p3), %s180_s30, 2 }
  0x17   : > { %s1574_s7 = scalar_lea.vmem (%p78_p3), %s1827_s1, %s1199_s4 }
  0x18   : > { %v336_v0 = vld [vmem:[%s1574_s7] sm:$0xff] (%p78_p3) }
  0x19   : > { %v338_v1 = vld [vmem:[%s1574_s7 + $0x20] sm:$0xff]  ;;  %337 = vst [vmem:[%s1579_s8] sm:$0xff] %v336_v0 }
  0x1a   : > { %v340_v2 = vld [vmem:[%s1574_s7 + $0x40] sm:$0xff]  ;;  %339 = vst [vmem:[%s1579_s8 + $0x8] sm:$0xff] %v338_v1 }
  0x1b   : > { %341 = vst [vmem:[%s1579_s8 + $0x10] sm:$0xff] %v340_v2  ;;  %v342_v3 = vld [vmem:[%s1574_s7 + $0x60] sm:$0xff] }
  0x1c   : > { %v344_v4 = vld [vmem:[%s1574_s7 + $0x80] sm:$0xff]  ;;  %343 = vst [vmem:[%s1579_s8 + $0x18] sm:$0xff] %v342_v3 }
  0x1d   : > { %v346_v5 = vld [vmem:[%s1574_s7 + $0xa0] sm:$0xff]  ;;  %345 = vst [vmem:[%s1579_s8 + $0x20] sm:$0xff] %v344_v4 }
  0x1e   : > { %347 = vst [vmem:[%s1579_s8 + $0x28] sm:$0xff] %v346_v5  ;;  %v348_v6 = vld [vmem:[%s1574_s7 + $0xc0] sm:$0xff] }
  0x1f   : > { %v350_v7 = vld [vmem:[%s1574_s7 + $0xe0] sm:$0xff]  ;;  %349 = vst [vmem:[%s1579_s8 + $0x30] sm:$0xff] %v348_v6 }
  0x20   : > { %v352_v8 = vld [vmem:[%s1574_s7 + $0x100] sm:$0xff]  ;;  %351 = vst [vmem:[%s1579_s8 + $0x38] sm:$0xff] %v350_v7 }
  0x21   : > { %353 = vst [vmem:[%s1579_s8 + $0x40] sm:$0xff] %v352_v8  ;;  %v354_v9 = vld [vmem:[%s1574_s7 + $0x120] sm:$0xff] }
  0x22   : > { %v356_v10 = vld [vmem:[%s1574_s7 + $0x140] sm:$0xff]  ;;  %355 = vst [vmem:[%s1579_s8 + $0x48] sm:$0xff] %v354_v9 }
  0x23   : > { %v358_v11 = vld [vmem:[%s1574_s7 + $0x160] sm:$0xff]  ;;  %357 = vst [vmem:[%s1579_s8 + $0x50] sm:$0xff] %v356_v10 }
  0x24   : > { %359 = vst [vmem:[%s1579_s8 + $0x58] sm:$0xff] %v358_v11  ;;  %v360_v12 = vld [vmem:[%s1574_s7 + $0x180] sm:$0xff] }
  0x25   : > { %v362_v13 = vld [vmem:[%s1574_s7 + $0x1a0] sm:$0xff]  ;;  %361 = vst [vmem:[%s1579_s8 + $0x60] sm:$0xff] %v360_v12 }
  0x26   : > { %v364_v14 = vld [vmem:[%s1574_s7 + $0x1c0] sm:$0xff]  ;;  %363 = vst [vmem:[%s1579_s8 + $0x68] sm:$0xff] %v362_v13 }
  0x27   : > { %365 = vst [vmem:[%s1579_s8 + $0x70] sm:$0xff] %v364_v14  ;;  %v366_v15 = vld [vmem:[%s1574_s7 + $0x1e0] sm:$0xff] }
  0x28   : > { %v368_v16 = vld [vmem:[%s1574_s7 + $0x200] sm:$0xff]  ;;  %367 = vst [vmem:[%s1579_s8 + $0x78] sm:$0xff] %v366_v15 }
  0x29   : > { %v370_v17 = vld [vmem:[%s1574_s7 + $0x220] sm:$0xff]  ;;  %369 = vst [vmem:[%s1579_s8 + $0x80] sm:$0xff] %v368_v16 }
  0x2a   : > { %371 = vst [vmem:[%s1579_s8 + $0x88] sm:$0xff] %v370_v17  ;;  %v372_v18 = vld [vmem:[%s1574_s7 + $0x240] sm:$0xff] }
  0x2b   : > { %v374_v19 = vld [vmem:[%s1574_s7 + $0x260] sm:$0xff]  ;;  %373 = vst [vmem:[%s1579_s8 + $0x90] sm:$0xff] %v372_v18 }
  0x2c   : > { %v376_v20 = vld [vmem:[%s1574_s7 + $0x280] sm:$0xff]  ;;  %375 = vst [vmem:[%s1579_s8 + $0x98] sm:$0xff] %v374_v19 }
  0x2d   : > { %377 = vst [vmem:[%s1579_s8 + $0xa0] sm:$0xff] %v376_v20  ;;  %v378_v21 = vld [vmem:[%s1574_s7 + $0x2a0] sm:$0xff] }
  0x2e   : > { %v380_v22 = vld [vmem:[%s1574_s7 + $0x2c0] sm:$0xff]  ;;  %379 = vst [vmem:[%s1579_s8 + $0xa8] sm:$0xff] %v378_v21 }
  0x2f   : > { %v382_v23 = vld [vmem:[%s1574_s7 + $0x2e0] sm:$0xff]  ;;  %381 = vst [vmem:[%s1579_s8 + $0xb0] sm:$0xff] %v380_v22 }
  0x30   : > { %383 = vst [vmem:[%s1579_s8 + $0xb8] sm:$0xff] %v382_v23  ;;  %v384_v24 = vld [vmem:[%s1574_s7 + $0x300] sm:$0xff] }
  0x31   : > { %v386_v25 = vld [vmem:[%s1574_s7 + $0x320] sm:$0xff]  ;;  %385 = vst [vmem:[%s1579_s8 + $0xc0] sm:$0xff] %v384_v24 }
  0x32   : > { %v388_v26 = vld [vmem:[%s1574_s7 + $0x340] sm:$0xff]  ;;  %387 = vst [vmem:[%s1579_s8 + $0xc8] sm:$0xff] %v386_v25 }
  0x33   : > { %389 = vst [vmem:[%s1579_s8 + $0xd0] sm:$0xff] %v388_v26  ;;  %v390_v27 = vld [vmem:[%s1574_s7 + $0x360] sm:$0xff] }
  0x34   : > { %v392_v28 = vld [vmem:[%s1574_s7 + $0x380] sm:$0xff]  ;;  %391 = vst [vmem:[%s1579_s8 + $0xd8] sm:$0xff] %v390_v27 }
  0x35   : > { %v394_v29 = vld [vmem:[%s1574_s7 + $0x3a0] sm:$0xff]  ;;  %393 = vst [vmem:[%s1579_s8 + $0xe0] sm:$0xff] %v392_v28 }
  0x36   : > { %395 = vst [vmem:[%s1579_s8 + $0xe8] sm:$0xff] %v394_v29  ;;  %v396_v30 = vld [vmem:[%s1574_s7 + $0x3c0] sm:$0xff] }
  0x37   : > { %v398_v31 = vld [vmem:[%s1574_s7 + $0x3e0] sm:$0xff]  ;;  %397 = vst [vmem:[%s1579_s8 + $0xf0] sm:$0xff] %v396_v30 }
  0x38   : > { %v400_v32 = vld [vmem:[%s1574_s7 + $0x400] sm:$0xff]  ;;  %399 = vst [vmem:[%s1579_s8 + $0xf8] sm:$0xff] %v398_v31 }
  0x39   : > { %401 = vst [vmem:[%s1579_s8 + $0x100] sm:$0xff] %v400_v32  ;;  %v402_v33 = vld [vmem:[%s1574_s7 + $0x420] sm:$0xff] }
  0x3a   : > { %v404_v34 = vld [vmem:[%s1574_s7 + $0x440] sm:$0xff]  ;;  %403 = vst [vmem:[%s1579_s8 + $0x108] sm:$0xff] %v402_v33 }
  0x3b   : > { %v406_v35 = vld [vmem:[%s1574_s7 + $0x460] sm:$0xff]  ;;  %405 = vst [vmem:[%s1579_s8 + $0x110] sm:$0xff] %v404_v34 }
  0x3c   : > { %407 = vst [vmem:[%s1579_s8 + $0x118] sm:$0xff] %v406_v35  ;;  %v408_v36 = vld [vmem:[%s1574_s7 + $0x480] sm:$0xff] }
  0x3d   : > { %v410_v37 = vld [vmem:[%s1574_s7 + $0x4a0] sm:$0xff]  ;;  %409 = vst [vmem:[%s1579_s8 + $0x120] sm:$0xff] %v408_v36 }
  0x3e   : > { %v412_v38 = vld [vmem:[%s1574_s7 + $0x4c0] sm:$0xff]  ;;  %411 = vst [vmem:[%s1579_s8 + $0x128] sm:$0xff] %v410_v37 }
  0x3f   : > { %413 = vst [vmem:[%s1579_s8 + $0x130] sm:$0xff] %v412_v38  ;;  %v414_v39 = vld [vmem:[%s1574_s7 + $0x4e0] sm:$0xff] }
  0x40   : > { %v416_v40 = vld [vmem:[%s1574_s7 + $0x500] sm:$0xff]  ;;  %415 = vst [vmem:[%s1579_s8 + $0x138] sm:$0xff] %v414_v39 }
  0x41   : > { %v418_v41 = vld [vmem:[%s1574_s7 + $0x520] sm:$0xff]  ;;  %417 = vst [vmem:[%s1579_s8 + $0x140] sm:$0xff] %v416_v40 }
  0x42   : > { %419 = vst [vmem:[%s1579_s8 + $0x148] sm:$0xff] %v418_v41  ;;  %v420_v42 = vld [vmem:[%s1574_s7 + $0x540] sm:$0xff] }
  0x43   : > { %v422_v43 = vld [vmem:[%s1574_s7 + $0x560] sm:$0xff]  ;;  %421 = vst [vmem:[%s1579_s8 + $0x150] sm:$0xff] %v420_v42 }
  0x44   : > { %v424_v44 = vld [vmem:[%s1574_s7 + $0x580] sm:$0xff]  ;;  %423 = vst [vmem:[%s1579_s8 + $0x158] sm:$0xff] %v422_v43 }
  0x45   : > { %425 = vst [vmem:[%s1579_s8 + $0x160] sm:$0xff] %v424_v44  ;;  %v426_v45 = vld [vmem:[%s1574_s7 + $0x5a0] sm:$0xff] }
  0x46   : > { %v428_v46 = vld [vmem:[%s1574_s7 + $0x5c0] sm:$0xff]  ;;  %427 = vst [vmem:[%s1579_s8 + $0x168] sm:$0xff] %v426_v45 }
  0x47   : > { %v430_v47 = vld [vmem:[%s1574_s7 + $0x5e0] sm:$0xff]  ;;  %429 = vst [vmem:[%s1579_s8 + $0x170] sm:$0xff] %v428_v46 }
  0x48   : > { %431 = vst [vmem:[%s1579_s8 + $0x178] sm:$0xff] %v430_v47  ;;  %v432_v48 = vld [vmem:[%s1574_s7 + $0x600] sm:$0xff] }
  0x49   : > { %v434_v49 = vld [vmem:[%s1574_s7 + $0x620] sm:$0xff]  ;;  %433 = vst [vmem:[%s1579_s8 + $0x180] sm:$0xff] %v432_v48 }
  0x4a   : > { %v436_v50 = vld [vmem:[%s1574_s7 + $0x640] sm:$0xff]  ;;  %435 = vst [vmem:[%s1579_s8 + $0x188] sm:$0xff] %v434_v49 }
  0x4b   : > { %437 = vst [vmem:[%s1579_s8 + $0x190] sm:$0xff] %v436_v50  ;;  %v438_v51 = vld [vmem:[%s1574_s7 + $0x660] sm:$0xff] }
  0x4c   : > { %v440_v52 = vld [vmem:[%s1574_s7 + $0x680] sm:$0xff]  ;;  %439 = vst [vmem:[%s1579_s8 + $0x198] sm:$0xff] %v438_v51 }
  0x4d   : > { %v442_v53 = vld [vmem:[%s1574_s7 + $0x6a0] sm:$0xff]  ;;  %441 = vst [vmem:[%s1579_s8 + $0x1a0] sm:$0xff] %v440_v52 }
  0x4e   : > { %443 = vst [vmem:[%s1579_s8 + $0x1a8] sm:$0xff] %v442_v53  ;;  %v444_v54 = vld [vmem:[%s1574_s7 + $0x6c0] sm:$0xff] }
  0x4f   : > { %v446_v55 = vld [vmem:[%s1574_s7 + $0x6e0] sm:$0xff]  ;;  %445 = vst [vmem:[%s1579_s8 + $0x1b0] sm:$0xff] %v444_v54 }
  0x50   : > { %v448_v56 = vld [vmem:[%s1574_s7 + $0x700] sm:$0xff]  ;;  %447 = vst [vmem:[%s1579_s8 + $0x1b8] sm:$0xff] %v446_v55 }
  0x51   : > { %449 = vst [vmem:[%s1579_s8 + $0x1c0] sm:$0xff] %v448_v56  ;;  %v450_v57 = vld [vmem:[%s1574_s7 + $0x720] sm:$0xff] }
  0x52   : > { %v452_v58 = vld [vmem:[%s1574_s7 + $0x740] sm:$0xff]  ;;  %451 = vst [vmem:[%s1579_s8 + $0x1c8] sm:$0xff] %v450_v57 }
  0x53   : > { %v454_v59 = vld [vmem:[%s1574_s7 + $0x760] sm:$0xff]  ;;  %453 = vst [vmem:[%s1579_s8 + $0x1d0] sm:$0xff] %v452_v58 }
  0x54   : > { %455 = vst [vmem:[%s1579_s8 + $0x1d8] sm:$0xff] %v454_v59  ;;  %v456_v60 = vld [vmem:[%s1574_s7 + $0x780] sm:$0xff] }
  0x55   : > { %v458_v61 = vld [vmem:[%s1574_s7 + $0x7a0] sm:$0xff]  ;;  %457 = vst [vmem:[%s1579_s8 + $0x1e0] sm:$0xff] %v456_v60 }
  0x56   : > { %v460_v62 = vld [vmem:[%s1574_s7 + $0x7c0] sm:$0xff]  ;;  %459 = vst [vmem:[%s1579_s8 + $0x1e8] sm:$0xff] %v458_v61 }
  0x57   : > { %461 = vst [vmem:[%s1579_s8 + $0x1f0] sm:$0xff] %v460_v62  ;;  %v462_v63 = vld [vmem:[%s1574_s7 + $0x7e0] sm:$0xff] }
  0x58   : > { %463 = vst [vmem:[%s1579_s8 + $0x1f8] sm:$0xff] %v462_v63 }
  0x59 PF: > { %p1200_p7 = scmp.ge.s32.totalorder %s1491_s18, 1  ;;  %p476_p8 = scmp.lt.s32.totalorder %s1491_s18, 9 }
  0x5b   : > { %p477_p9 = pnand %p1200_p7, %p476_p8 }
  0x5c   : > { %s483_s9 = sand.u32 (!%p477_p9), 1, %s1467_s12   ;;  %s1202_s10 = sshll.u32 (!%p477_p9), %s1475_s14, 2 }
  0x5d   : > { %480 = sbr.rel (%p477_p9) target bundleno = 406 (0x196), region = 66  ;;  %s1201_s11 = sshll.u32 (!%p477_p9), %s483_s9, 9 }
  0x5e   : > { %p526_p10 = scmp.lt.s32.totalorder (!%p477_p9), %s1202_s10, 7  ;;  %s1204_s21 = sshll.u32 (!%p477_p9), %s1479_s15, 1 }
  0x5f   : > { %p536_p11 = scmp.lt.s32.totalorder (!%p477_p9), %s1204_s21, 7  ;;  %s1728_s5 = scalar_lea.vmem (!%p477_p9), [#allocation3], %s1201_s11 }
  0x60   : > { %p1207_p12 = scmp.ne.s32.totalorder (!%p477_p9), %s1475_s14, 0 }
  0x64   : > { %s1843_s10 = smov (!%p526_p10, %s1202_s10), 7  ;;  %s1845_s21 = smov (!%p536_p11, %s1204_s21), 7 }
  0x65   : > { %s1203_s22 = sshll.u32 %s1843_s10, 2  ;;  %s538_s12 = scalar_lea.vmem %s1828_s2, %s1845_s21  ;;  %v1493_v0 = vmov (!%p1207_p12), 0.0  }
  0x66   : > { %s1714_s26 = scalar_lea.vmem %s1826_s0, %s1203_s22  ;;  %s1206_s29 = sshll.u32 %s1845_s21, 3  ;;  %554 = vst [vmem:[#allocation2] sm:$0xff] (!%p1207_p12), %v1493_v0  ;;  %555 = vst [vmem:[#allocation2 + $0x8] sm:$0xff] (!%p1207_p12), %v1493_v0 }
  0x67   : > { %s1726_s15 = scalar_lea.vmem %s1829_s3, %s1206_s29  ;;  %553 = sbr.rel (%p1207_p12) target bundleno = 110 (0x6e), region = 74 }
  0x6e PF: > { %v1337_v1 = vld [vmem:[%s1728_s5 + $0x4] ss:$8 sps:$4 sm:$0xff]   ;;  %v1341_v3 = vld [vmem:[%s1728_s5] ss:$8 sps:$4 sm:$0xff]   ;;  %v1343_v5 = vld [vmem:[%s1728_s5 + $0x14] ss:$8 sps:$4 sm:$0xff]  }
  0x6f   : > { %v1339_v2 = vld [vmem:[%s1728_s5 + $0x104] ss:$8 sps:$4 sm:$0xff]   ;;  %958 = vmatprep.subr.bf16.mxu0 %v1337_v1  ;;  %v1342_v4 = vld [vmem:[%s1728_s5 + $0x100] ss:$8 sps:$4 sm:$0xff]   ;;  %v1345_v6 = vld [vmem:[%s1728_s5 + $0x114] ss:$8 sps:$4 sm:$0xff]  }
  0x70   : > { %999 = vmatprep.subr.bf16.mxu1 %v1339_v2  ;;  %959 = vmatpush1.bf16.msra.mxu0 %v1341_v3  ;;  %v1347_v7 = vld [vmem:[%s1728_s5 + $0x10] ss:$8 sps:$4 sm:$0xff]   ;;  %v1349_v9 = vld [vmem:[%s1728_s5 + $0x24] ss:$8 sps:$4 sm:$0xff]   ;;  %v1353_v11 = vld [vmem:[%s1728_s5 + $0x20] ss:$8 sps:$4 sm:$0xff]  }
  0x71   : > { %1000 = vmatpush1.bf16.msra.mxu1 %v1342_v4  ;;  %960 = vmatprep.subr.bf16.mxu0 %v1343_v5  ;;  %v1348_v8 = vld [vmem:[%s1728_s5 + $0x110] ss:$8 sps:$4 sm:$0xff]   ;;  %v1351_v10 = vld [vmem:[%s1728_s5 + $0x124] ss:$8 sps:$4 sm:$0xff]   ;;  %v1354_v12 = vld [vmem:[%s1728_s5 + $0x120] ss:$8 sps:$4 sm:$0xff]  }
  0x72   : > { %1001 = vmatprep.subr.bf16.mxu1 %v1345_v6  ;;  %v1355_v13 = vld [vmem:[%s1728_s5 + $0x34] ss:$8 sps:$4 sm:$0xff]   ;;  %v1359_v15 = vld [vmem:[%s1728_s5 + $0x30] ss:$8 sps:$4 sm:$0xff]   ;;  %v1361_v17 = vld [vmem:[%s1728_s5 + $0x44] ss:$8 sps:$4 sm:$0xff]  }
  0x73   : > { %v1357_v14 = vld [vmem:[%s1728_s5 + $0x134] ss:$8 sps:$4 sm:$0xff]   ;;  %v1360_v16 = vld [vmem:[%s1728_s5 + $0x130] ss:$8 sps:$4 sm:$0xff]   ;;  %v1363_v18 = vld [vmem:[%s1728_s5 + $0x144] ss:$8 sps:$4 sm:$0xff]  }
  0x74   : > { %961 = vmatpush1.bf16.msra.mxu0 %v1347_v7  ;;  %v1365_v19 = vld [vmem:[%s1728_s5 + $0x40] ss:$8 sps:$4 sm:$0xff]   ;;  %v1367_v21 = vld [vmem:[%s1728_s5 + $0x54] ss:$8 sps:$4 sm:$0xff]   ;;  %v1371_v23 = vld [vmem:[%s1728_s5 + $0x50] ss:$8 sps:$4 sm:$0xff]  }
  0x75   : > { %1002 = vmatpush1.bf16.msra.mxu1 %v1348_v8  ;;  %962 = vmatprep.subr.bf16.mxu0 %v1349_v9  ;;  %v1366_v20 = vld [vmem:[%s1728_s5 + $0x140] ss:$8 sps:$4 sm:$0xff]   ;;  %v1369_v22 = vld [vmem:[%s1728_s5 + $0x154] ss:$8 sps:$4 sm:$0xff]   ;;  %v1372_v24 = vld [vmem:[%s1728_s5 + $0x150] ss:$8 sps:$4 sm:$0xff]  }
  0x76   : > { %1003 = vmatprep.subr.bf16.mxu1 %v1351_v10  ;;  %v1373_v25 = vld [vmem:[%s1728_s5 + $0x64] ss:$8 sps:$4 sm:$0xff]   ;;  %v1377_v27 = vld [vmem:[%s1728_s5 + $0x60] ss:$8 sps:$4 sm:$0xff]   ;;  %v1379_v29 = vld [vmem:[%s1728_s5 + $0x74] ss:$8 sps:$4 sm:$0xff]  }
  0x77   : > { %v1375_v26 = vld [vmem:[%s1728_s5 + $0x164] ss:$8 sps:$4 sm:$0xff]   ;;  %v1378_v28 = vld [vmem:[%s1728_s5 + $0x160] ss:$8 sps:$4 sm:$0xff]   ;;  %v1381_v30 = vld [vmem:[%s1728_s5 + $0x174] ss:$8 sps:$4 sm:$0xff]  }
  0x78   : > { %963 = vmatpush1.bf16.msra.mxu0 %v1353_v11  ;;  %v1383_v31 = vld [vmem:[%s1728_s5 + $0x70] ss:$8 sps:$4 sm:$0xff]   ;;  %v1385_v33 = vld [vmem:[%s1728_s5 + $0x84] ss:$8 sps:$4 sm:$0xff]   ;;  %v1389_v35 = vld [vmem:[%s1728_s5 + $0x80] ss:$8 sps:$4 sm:$0xff]  }
  0x79   : > { %1004 = vmatpush1.bf16.msra.mxu1 %v1354_v12  ;;  %964 = vmatprep.subr.bf16.mxu0 %v1355_v13  ;;  %v1384_v32 = vld [vmem:[%s1728_s5 + $0x170] ss:$8 sps:$4 sm:$0xff]   ;;  %v1387_v34 = vld [vmem:[%s1728_s5 + $0x184] ss:$8 sps:$4 sm:$0xff]   ;;  %v1390_v36 = vld [vmem:[%s1728_s5 + $0x180] ss:$8 sps:$4 sm:$0xff]  }
  0x7a   : > { %1005 = vmatprep.subr.bf16.mxu1 %v1357_v14  ;;  %v1391_v37 = vld [vmem:[%s1728_s5 + $0x94] ss:$8 sps:$4 sm:$0xff]   ;;  %v1395_v39 = vld [vmem:[%s1728_s5 + $0x90] ss:$8 sps:$4 sm:$0xff]   ;;  %v1397_v41 = vld [vmem:[%s1728_s5 + $0xa4] ss:$8 sps:$4 sm:$0xff]  }
  0x7b   : > { %v1393_v38 = vld [vmem:[%s1728_s5 + $0x194] ss:$8 sps:$4 sm:$0xff]   ;;  %v1396_v40 = vld [vmem:[%s1728_s5 + $0x190] ss:$8 sps:$4 sm:$0xff]   ;;  %v1399_v42 = vld [vmem:[%s1728_s5 + $0x1a4] ss:$8 sps:$4 sm:$0xff]  }
  0x7c   : > { %965 = vmatpush1.bf16.msra.mxu0 %v1359_v15  ;;  %v1401_v43 = vld [vmem:[%s1728_s5 + $0xa0] ss:$8 sps:$4 sm:$0xff]   ;;  %v1403_v45 = vld [vmem:[%s1728_s5 + $0xb4] ss:$8 sps:$4 sm:$0xff]   ;;  %v1407_v50 = vld [vmem:[%s1728_s5 + $0xb0] ss:$8 sps:$4 sm:$0xff]  }
  0x7d   : > { %1006 = vmatpush1.bf16.msra.mxu1 %v1360_v16  ;;  %966 = vmatprep.subr.bf16.mxu0 %v1361_v17  ;;  %v1402_v44 = vld [vmem:[%s1728_s5 + $0x1a0] ss:$8 sps:$4 sm:$0xff]   ;;  %v1405_v46 = vld [vmem:[%s1728_s5 + $0x1b4] ss:$8 sps:$4 sm:$0xff]   ;;  %v1408_v51 = vld [vmem:[%s1728_s5 + $0x1b0] ss:$8 sps:$4 sm:$0xff]  }
  0x7e   : > { %1007 = vmatprep.subr.bf16.mxu1 %v1363_v18  ;;  %v558_v47 = vld [vmem:[%s1714_s26] sm:$0xff]  ;;  %v559_v49 = vld [vmem:[%s1714_s26 + $0x8] sm:$0xff]  ;;  %v1409_v53 = vld [vmem:[%s1728_s5 + $0xc4] ss:$8 sps:$4 sm:$0xff]   ;;  %p1276_p13 = scmp.ne.s32.totalorder %s1475_s14, 1 }
  0x7f   : > { %v1209_v48 = vcombine.high %v558_v47, %v558_v47  ;;  %v1211_v52 = vcombine.high %v559_v49, %v559_v49  ;;  %v1411_v54 = vld [vmem:[%s1728_s5 + $0x1c4] ss:$8 sps:$4 sm:$0xff]   ;;  %v1413_v55 = vld [vmem:[%s1728_s5 + $0xc0] ss:$8 sps:$4 sm:$0xff]   ;;  %v1415_v57 = vld [vmem:[%s1728_s5 + $0xd4] ss:$8 sps:$4 sm:$0xff]   ;;  %v1208_v5 = vcombine.low %v558_v47, %v558_v47  ;;  %v1210_v6 = vcombine.low %v559_v49, %v559_v49 }
  0x80   : > { %967 = vmatpush1.bf16.msra.mxu0 %v1365_v19  ;;  %v1414_v56 = vld [vmem:[%s1728_s5 + $0x1c0] ss:$8 sps:$4 sm:$0xff]   ;;  %v1417_v58 = vld [vmem:[%s1728_s5 + $0x1d4] ss:$8 sps:$4 sm:$0xff]   ;;  %v1419_v59 = vld [vmem:[%s1728_s5 + $0xd0] ss:$8 sps:$4 sm:$0xff]  }
  0x81   : > { %1008 = vmatpush1.bf16.msra.mxu1 %v1366_v20  ;;  %968 = vmatprep.subr.bf16.mxu0 %v1367_v21  ;;  %v1420_v60 = vld [vmem:[%s1728_s5 + $0x1d0] ss:$8 sps:$4 sm:$0xff]   ;;  %v1421_v61 = vld [vmem:[%s1728_s5 + $0xe4] ss:$8 sps:$4 sm:$0xff]   ;;  %v1425_v63 = vld [vmem:[%s1728_s5 + $0xe0] ss:$8 sps:$4 sm:$0xff]   ;;  %v1052_v21 = vlaneseq (!%p1276_p13) }
  0x82   : > { %1009 = vmatprep.subr.bf16.mxu1 %v1369_v22  ;;  %990 = vmatprep.mubr.bf16.mxu0 %v1209_v48  ;;  %v1423_v62 = vld [vmem:[%s1728_s5 + $0x1e4] ss:$8 sps:$4 sm:$0xff]   ;;  %v1426_v0 = vld [vmem:[%s1728_s5 + $0x1e0] ss:$8 sps:$4 sm:$0xff]   ;;  %v1427_v1 = vld [vmem:[%s1728_s5 + $0xf4] ss:$8 sps:$4 sm:$0xff]  }
  0x83   : > { %1031 = vmatprep.mubr.bf16.mxu1 %v1211_v52  ;;  %v1429_v2 = vld [vmem:[%s1728_s5 + $0x1f4] ss:$8 sps:$4 sm:$0xff]   ;;  %v1431_v3 = vld [vmem:[%s1728_s5 + $0xf0] ss:$8 sps:$4 sm:$0xff]   ;;  %v1053_v22 = vshrl.u32 (!%p1276_p13), %v1052_v21, 7 }
  0x84   : > { %969 = vmatpush1.bf16.msra.mxu0 %v1371_v23  ;;  %v1432_v4 = vld [vmem:[%s1728_s5 + $0x1f0] ss:$8 sps:$4 sm:$0xff]  }
  0x85   : > { %1010 = vmatpush1.bf16.msra.mxu1 %v1372_v24  ;;  %970 = vmatprep.subr.bf16.mxu0 %v1373_v25  ;;  %v556_v8 = vld [vmem:[#allocation2] sm:$0xff]  ;;  %v557_v12 = vld [vmem:[#allocation2 + $0x8] sm:$0xff]  ;;  %v1054_v24 = vsub.s32 (!%p1276_p13), 0, %v1053_v22  ;;  %v1058_v25 = vsub.s32 (!%p1276_p13), 1, %v1053_v22 }
  0x86   : > { %1011 = vmatprep.subr.bf16.mxu1 %v1375_v26  ;;  %v1050_v23 = vld [vmem:[%s538_s12] sm:$0x3] (!%p1276_p13) }
  0x88   : > { %971 = vmatpush1.bf16.msra.mxu0 %v1377_v27 }
  0x89   : > { %1012 = vmatpush1.bf16.msra.mxu1 %v1378_v28  ;;  %972 = vmatprep.subr.bf16.mxu0 %v1379_v29  ;;  %v1055_v28 = vrot.slane (!%p1276_p13), %v1050_v23, %v1054_v24  ;;  %v1059_v29 = vrot.slane (!%p1276_p13), %v1050_v23, %v1058_v25 }
  0x8a   : > { %1013 = vmatprep.subr.bf16.mxu1 %v1381_v30 }
  0x8c   : > { %973 = vmatpush1.bf16.msra.mxu0 %v1383_v31 }
  0x8d   : > { %1014 = vmatpush1.bf16.msra.mxu1 %v1384_v32  ;;  %974 = vmatprep.subr.bf16.mxu0 %v1385_v33 }
  0x8e   : > { %1015 = vmatprep.subr.bf16.mxu1 %v1387_v34 }
  0x90   : > { %975 = vmatpush1.bf16.msra.mxu0 %v1389_v35 }
  0x91   : > { %1016 = vmatpush1.bf16.msra.mxu1 %v1390_v36  ;;  %976 = vmatprep.subr.bf16.mxu0 %v1391_v37 }
  0x92   : > { %1017 = vmatprep.subr.bf16.mxu1 %v1393_v38 }
  0x94   : > { %977 = vmatpush1.bf16.msra.mxu0 %v1395_v39 }
  0x95   : > { %1018 = vmatpush1.bf16.msra.mxu1 %v1396_v40  ;;  %978 = vmatprep.subr.bf16.mxu0 %v1397_v41 }
  0x96   : > { %1019 = vmatprep.subr.bf16.mxu1 %v1399_v42 }
  0x98   : > { %979 = vmatpush1.bf16.msra.mxu0 %v1401_v43 }
  0x99   : > { %1020 = vmatpush1.bf16.msra.mxu1 %v1402_v44  ;;  %980 = vmatprep.subr.bf16.mxu0 %v1403_v45 }
  0x9a   : > { %1021 = vmatprep.subr.bf16.mxu1 %v1405_v46 }
  0x9c   : > { %981 = vmatpush1.bf16.msra.mxu0 %v1407_v50 }
  0x9d   : > { %1022 = vmatpush1.bf16.msra.mxu1 %v1408_v51  ;;  %982 = vmatprep.subr.bf16.mxu0 %v1409_v53 }
  0x9e   : > { %1023 = vmatprep.subr.bf16.mxu1 %v1411_v54 }
  0xa0   : > { %983 = vmatpush1.bf16.msra.mxu0 %v1413_v55 }
  0xa1   : > { %1024 = vmatpush1.bf16.msra.mxu1 %v1414_v56  ;;  %984 = vmatprep.subr.bf16.mxu0 %v1415_v57 }
  0xa2   : > { %1025 = vmatprep.subr.bf16.mxu1 %v1417_v58 }
  0xa4   : > { %985 = vmatpush1.bf16.msra.mxu0 %v1419_v59 }
  0xa5   : > { %1026 = vmatpush1.bf16.msra.mxu1 %v1420_v60  ;;  %986 = vmatprep.subr.bf16.mxu0 %v1421_v61 }
  0xa6   : > { %1027 = vmatprep.subr.bf16.mxu1 %v1423_v62 }
  0xa8   : > { %987 = vmatpush1.bf16.msra.mxu0 %v1425_v63 }
  0xa9   : > { %1028 = vmatpush1.bf16.msra.mxu1 %v1426_v0  ;;  %988 = vmatprep.subr.bf16.mxu0 %v1427_v1 }
  0xaa   : > { %1029 = vmatprep.subr.bf16.mxu1 %v1429_v2 }
  0xac   : > { %989 = vmatpush1.bf16.msra.mxu0 %v1431_v3 }
  0xad   : > { %1030 = vmatpush1.bf16.msra.mxu1 %v1432_v4 }
  0xaf   : > { %991 = vmatmul.mubr.bf16.vlgmr.msra.gmra.mrb[0].mxu0 %v1208_v5 }
  0xb0   : > { %1032 = vmatmul.mubr.bf16.vlgmr.msra.gmra.mrb[0].mxu1 %v1210_v6 }
 0x182   : > { %v992_v7 = vpop.f32.mrb[0].mxu0 }
 0x183   : > { %v1033_v9 = vpop.f32.mrb[0].mxu1  ;;  %v994_v11 = vpop.f32.mrb[1].mxu0  ;;  %1047 = sbr.rel (%p1276_p13) target bundleno = 406 (0x196), region = 78 }
 0x184   : > { %v1034_v10 = vadd.f32 %v1033_v9, %v992_v7  ;;  %v1035_v13 = vpop.f32.mrb[1].mxu1  ;;  %v996_v15 = vpop.f32.mrb[2].mxu0 }
 0x185   : > { %v1036_v14 = vadd.f32 %v1035_v13, %v994_v11  ;;  %v1037_v16 = vpop.f32.mrb[2].mxu1  ;;  %v997_v18 = vpop.f32.mrb[3].mxu0 }
 0x186   : > { %v1040_v17 = vadd.f32 %v1034_v10, %v556_v8  ;;  %v1038_v19 = vpop.f32.mrb[3].mxu1 }
 0x187   : > { %v1041_v20 = vadd.f32 %v1036_v14, %v557_v12 }
 0x188   : > { %1042 = vst [vmem:[#allocation2] sm:$0xff] %v1040_v17 }
 0x189   : > { %1043 = vst [vmem:[#allocation2 + $0x8] sm:$0xff] %v1041_v20 }
 0x18f   : > { %v1048_v26 = vld [vmem:[#allocation2] sm:$0xff] }
 0x190   : > { %v1049_v27 = vld [vmem:[#allocation2 + $0x8] sm:$0xff]  ;;  %v1062_v30 = vadd.f32 %v1055_v28, %v1048_v26 }
 0x191   : > { %v1063_v31 = vadd.f32 %v1059_v29, %v1049_v27 }
 0x192   : > { %v1064_v32 = vmax.f32 %v1062_v30, 0.0 }
 0x193   : > { %v1065_v33 = vmax.f32 %v1063_v31, 0.0 }
 0x194   : > { %1066 = vst [vmem:[%s1726_s15] sm:$0xff] %v1064_v32 }
 0x195   : > { %1067 = vst [vmem:[%s1726_s15 + $0x8] sm:$0xff] %v1065_v33 }
 0x196 PF: > { %s13_s18 = sadd.s32 1, %s1491_s18   ;;  %s1830_s12 = smov %s1471_s13 }
 0x197   : > { %p10_p0 = scmp.ge.s32.totalorder %s13_s18, 10   ;;  %s1831_s13 = smov %s1565_s25 }
 0x198   : > { %s1832_s14 = smov %s1483_s16  ;;  %s1833_s15 = smov %s1487_s17 }
 0x199   : > { %s1834_s16 = smov %s1837_s19  ;;  %s1835_s17 = smov %s1841_s20 }
 0x19a   :  { %12 = sbr.rel (!%p10_p0) target bundleno = 4 (0x4), region = 119 }

// kernel: feature_extractor_forward.49
= control target key start
LH: loop header
LB: loop body
LE: loop exit
PB: predicated region body
PF: predicated region fallthrough
CT: control target
= control target key end

     0   :  { %s1512_s12 = smov 0   ;;  %s1514_s13 = smov 0   ;;  %s1824_s0 = inlined_call_operand.vmem [shape: bf16[8,1024], index: 0, kind: input, shape index: {}]   ;;  %s1825_s1 = inlined_call_operand.vmem [shape: bf16[1024,512], index: 1, kind: input, shape index: {}]   ;;  %s1826_s2 = inlined_call_operand.vmem [shape: f32[1,512], index: 2, kind: input, shape index: {}]   ;;  %s1827_s3 = inlined_call_operand.vmem [shape: f32[8,512], index: 3, kind: output, shape index: {}]  }
   0x1   :  { %s1516_s14 = smov 0   ;;  %s1518_s15 = smov 0  }
   0x2   :  { %s1520_s16 = smov 0   ;;  %s1522_s17 = smov 0  }
   0x3   :  { %s1524_s18 = smov 0  }
   0x4 LB: > { %s25_s19 = sadd.s32 1, %s1481_s16  ;;  %s28_s20 = sadd.s32 1, %s1485_s17  ;;  %s1489_s18 = sphi %s1524_s18, %s13_s18   ;;  %s1485_s17 = sphi %s1522_s17, %s1833_s17   ;;  %s1481_s16 = sphi %s1520_s16, %s1832_s16   ;;  %s1477_s15 = sphi %s1518_s15, %s1831_s15   ;;  %s1473_s14 = sphi %s1516_s14, %s1830_s14   ;;  %s1469_s13 = sphi %s1514_s13, %s1829_s13   ;;  %s1465_s12 = sphi %s1512_s12, %s1828_s12  }
   0x5   : > { %p26_p0 = scmp.ge.s32.totalorder %s25_s19, 2  ;;  %p76_p1 = scmp.ne.s32.totalorder %s1469_s13, %s1465_s12 }
   0x6   : > { %p77_p2 = scmp.eq.s32.totalorder %s1489_s18, 0  ;;  %s69_s24 = sadd.s32 1, %s1469_s13 }
   0x7   : > { %s1835_s19 = smov (%p26_p0, %s25_s19), 0  ;;  %s1837_s20 = smov (!%p26_p0, %s28_s20), %s1485_s17 }
   0x8   : > { %p78_p3 = por %p77_p2, %p76_p1  ;;  %p30_p4 = scmp.ge.s32.totalorder %s1837_s20, 2 }
   0x9   : > { %s64_s21 = ssub.s32 %s1481_s16, %s1835_s19  ;;  %p1192_p6 = scmp.ge.s32.totalorder %s1489_s18, 4 }
   0xa   : > { %s1839_s20 = smov (%p30_p4, %s1837_s20), 0 }
   0xb   : > { %s65_s22 = ssub.s32 %s1485_s17, %s1839_s20  ;;  %156 = sbr.rel (%p1192_p6) target bundleno = 57 (0x39), region = 16 }
   0xc   : > { %s66_s23 = sor.u32 %s65_s22, %s64_s21 }
   0xd   : > { %p67_p5 = scmp.eq.s32.totalorder %s66_s23, 0 }
   0xf   : > { %s1563_s25 = scalar_select %p67_p5, %s1469_s13, %s69_s24  }
  0x12   : > { %172 = sbr.rel (!%p78_p3) target bundleno = 57 (0x39), region = 24  ;;  %s174_s26 = sand.u32 (%p78_p3), 1, %s1469_s13  }
  0x13   : > { %s1195_s27 = sshll.u32 (%p78_p3), %s1485_s17, 1  ;;  %s1193_s28 = sshll.u32 (%p78_p3), %s174_s26, 9 }
  0x14   : > { %s1277_s29 = sshll.u32 (%p78_p3), %s1481_s16, 8  ;;  %s1577_s8 = scalar_lea.vmem (%p78_p3), [#allocation3], %s1193_s28 }
  0x15   : > { %s180_s30 = sadd.s32 (%p78_p3), %s1277_s29, %s1195_s27 }
  0x16   : > { %s1197_s4 = sshll.u32 (%p78_p3), %s180_s30, 2 }
  0x17   : > { %s1572_s7 = scalar_lea.vmem (%p78_p3), %s1825_s1, %s1197_s4 }
  0x18   : > { %v336_v0 = vld [vmem:[%s1572_s7] sm:$0xff] (%p78_p3)  ;;  %v338_v1 = vld [vmem:[%s1572_s7 + $0x10] sm:$0xff] (%p78_p3) }
  0x19   : > { %v340_v2 = vld [vmem:[%s1572_s7 + $0x20] sm:$0xff]  ;;  %337 = vst [vmem:[%s1577_s8] sm:$0xff] %v336_v0  ;;  %339 = vst [vmem:[%s1577_s8 + $0x8] sm:$0xff] %v338_v1  ;;  %v342_v3 = vld [vmem:[%s1572_s7 + $0x30] sm:$0xff] }
  0x1a   : > { %341 = vst [vmem:[%s1577_s8 + $0x10] sm:$0xff] %v340_v2  ;;  %v344_v4 = vld [vmem:[%s1572_s7 + $0x40] sm:$0xff]  ;;  %v346_v5 = vld [vmem:[%s1572_s7 + $0x50] sm:$0xff]  ;;  %343 = vst [vmem:[%s1577_s8 + $0x18] sm:$0xff] %v342_v3 }
  0x1b   : > { %345 = vst [vmem:[%s1577_s8 + $0x20] sm:$0xff] %v344_v4  ;;  %347 = vst [vmem:[%s1577_s8 + $0x28] sm:$0xff] %v346_v5  ;;  %v348_v6 = vld [vmem:[%s1572_s7 + $0x60] sm:$0xff]  ;;  %v350_v7 = vld [vmem:[%s1572_s7 + $0x70] sm:$0xff] }
  0x1c   : > { %v352_v8 = vld [vmem:[%s1572_s7 + $0x80] sm:$0xff]  ;;  %349 = vst [vmem:[%s1577_s8 + $0x30] sm:$0xff] %v348_v6  ;;  %351 = vst [vmem:[%s1577_s8 + $0x38] sm:$0xff] %v350_v7  ;;  %v354_v9 = vld [vmem:[%s1572_s7 + $0x90] sm:$0xff] }
  0x1d   : > { %353 = vst [vmem:[%s1577_s8 + $0x40] sm:$0xff] %v352_v8  ;;  %v356_v10 = vld [vmem:[%s1572_s7 + $0xa0] sm:$0xff]  ;;  %v358_v11 = vld [vmem:[%s1572_s7 + $0xb0] sm:$0xff]  ;;  %355 = vst [vmem:[%s1577_s8 + $0x48] sm:$0xff] %v354_v9 }
  0x1e   : > { %357 = vst [vmem:[%s1577_s8 + $0x50] sm:$0xff] %v356_v10  ;;  %359 = vst [vmem:[%s1577_s8 + $0x58] sm:$0xff] %v358_v11  ;;  %v360_v12 = vld [vmem:[%s1572_s7 + $0xc0] sm:$0xff]  ;;  %v362_v13 = vld [vmem:[%s1572_s7 + $0xd0] sm:$0xff] }
  0x1f   : > { %v364_v14 = vld [vmem:[%s1572_s7 + $0xe0] sm:$0xff]  ;;  %361 = vst [vmem:[%s1577_s8 + $0x60] sm:$0xff] %v360_v12  ;;  %363 = vst [vmem:[%s1577_s8 + $0x68] sm:$0xff] %v362_v13  ;;  %v366_v15 = vld [vmem:[%s1572_s7 + $0xf0] sm:$0xff] }
  0x20   : > { %365 = vst [vmem:[%s1577_s8 + $0x70] sm:$0xff] %v364_v14  ;;  %v368_v16 = vld [vmem:[%s1572_s7 + $0x100] sm:$0xff]  ;;  %v370_v17 = vld [vmem:[%s1572_s7 + $0x110] sm:$0xff]  ;;  %367 = vst [vmem:[%s1577_s8 + $0x78] sm:$0xff] %v366_v15 }
  0x21   : > { %369 = vst [vmem:[%s1577_s8 + $0x80] sm:$0xff] %v368_v16  ;;  %371 = vst [vmem:[%s1577_s8 + $0x88] sm:$0xff] %v370_v17  ;;  %v372_v18 = vld [vmem:[%s1572_s7 + $0x120] sm:$0xff]  ;;  %v374_v19 = vld [vmem:[%s1572_s7 + $0x130] sm:$0xff] }
  0x22   : > { %v376_v20 = vld [vmem:[%s1572_s7 + $0x140] sm:$0xff]  ;;  %373 = vst [vmem:[%s1577_s8 + $0x90] sm:$0xff] %v372_v18  ;;  %375 = vst [vmem:[%s1577_s8 + $0x98] sm:$0xff] %v374_v19  ;;  %v378_v21 = vld [vmem:[%s1572_s7 + $0x150] sm:$0xff] }
  0x23   : > { %377 = vst [vmem:[%s1577_s8 + $0xa0] sm:$0xff] %v376_v20  ;;  %v380_v22 = vld [vmem:[%s1572_s7 + $0x160] sm:$0xff]  ;;  %v382_v23 = vld [vmem:[%s1572_s7 + $0x170] sm:$0xff]  ;;  %379 = vst [vmem:[%s1577_s8 + $0xa8] sm:$0xff] %v378_v21 }
  0x24   : > { %381 = vst [vmem:[%s1577_s8 + $0xb0] sm:$0xff] %v380_v22  ;;  %383 = vst [vmem:[%s1577_s8 + $0xb8] sm:$0xff] %v382_v23  ;;  %v384_v24 = vld [vmem:[%s1572_s7 + $0x180] sm:$0xff]  ;;  %v386_v25 = vld [vmem:[%s1572_s7 + $0x190] sm:$0xff] }
  0x25   : > { %v388_v26 = vld [vmem:[%s1572_s7 + $0x1a0] sm:$0xff]  ;;  %385 = vst [vmem:[%s1577_s8 + $0xc0] sm:$0xff] %v384_v24  ;;  %387 = vst [vmem:[%s1577_s8 + $0xc8] sm:$0xff] %v386_v25  ;;  %v390_v27 = vld [vmem:[%s1572_s7 + $0x1b0] sm:$0xff] }
  0x26   : > { %389 = vst [vmem:[%s1577_s8 + $0xd0] sm:$0xff] %v388_v26  ;;  %v392_v28 = vld [vmem:[%s1572_s7 + $0x1c0] sm:$0xff]  ;;  %v394_v29 = vld [vmem:[%s1572_s7 + $0x1d0] sm:$0xff]  ;;  %391 = vst [vmem:[%s1577_s8 + $0xd8] sm:$0xff] %v390_v27 }
  0x27   : > { %393 = vst [vmem:[%s1577_s8 + $0xe0] sm:$0xff] %v392_v28  ;;  %395 = vst [vmem:[%s1577_s8 + $0xe8] sm:$0xff] %v394_v29  ;;  %v396_v30 = vld [vmem:[%s1572_s7 + $0x1e0] sm:$0xff]  ;;  %v398_v31 = vld [vmem:[%s1572_s7 + $0x1f0] sm:$0xff] }
  0x28   : > { %v400_v32 = vld [vmem:[%s1572_s7 + $0x200] sm:$0xff]  ;;  %397 = vst [vmem:[%s1577_s8 + $0xf0] sm:$0xff] %v396_v30  ;;  %399 = vst [vmem:[%s1577_s8 + $0xf8] sm:$0xff] %v398_v31  ;;  %v402_v33 = vld [vmem:[%s1572_s7 + $0x210] sm:$0xff] }
  0x29   : > { %401 = vst [vmem:[%s1577_s8 + $0x100] sm:$0xff] %v400_v32  ;;  %v404_v34 = vld [vmem:[%s1572_s7 + $0x220] sm:$0xff]  ;;  %v406_v35 = vld [vmem:[%s1572_s7 + $0x230] sm:$0xff]  ;;  %403 = vst [vmem:[%s1577_s8 + $0x108] sm:$0xff] %v402_v33 }
  0x2a   : > { %405 = vst [vmem:[%s1577_s8 + $0x110] sm:$0xff] %v404_v34  ;;  %407 = vst [vmem:[%s1577_s8 + $0x118] sm:$0xff] %v406_v35  ;;  %v408_v36 = vld [vmem:[%s1572_s7 + $0x240] sm:$0xff]  ;;  %v410_v37 = vld [vmem:[%s1572_s7 + $0x250] sm:$0xff] }
  0x2b   : > { %v412_v38 = vld [vmem:[%s1572_s7 + $0x260] sm:$0xff]  ;;  %409 = vst [vmem:[%s1577_s8 + $0x120] sm:$0xff] %v408_v36  ;;  %411 = vst [vmem:[%s1577_s8 + $0x128] sm:$0xff] %v410_v37  ;;  %v414_v39 = vld [vmem:[%s1572_s7 + $0x270] sm:$0xff] }
  0x2c   : > { %413 = vst [vmem:[%s1577_s8 + $0x130] sm:$0xff] %v412_v38  ;;  %v416_v40 = vld [vmem:[%s1572_s7 + $0x280] sm:$0xff]  ;;  %v418_v41 = vld [vmem:[%s1572_s7 + $0x290] sm:$0xff]  ;;  %415 = vst [vmem:[%s1577_s8 + $0x138] sm:$0xff] %v414_v39 }
  0x2d   : > { %417 = vst [vmem:[%s1577_s8 + $0x140] sm:$0xff] %v416_v40  ;;  %419 = vst [vmem:[%s1577_s8 + $0x148] sm:$0xff] %v418_v41  ;;  %v420_v42 = vld [vmem:[%s1572_s7 + $0x2a0] sm:$0xff]  ;;  %v422_v43 = vld [vmem:[%s1572_s7 + $0x2b0] sm:$0xff] }
  0x2e   : > { %v424_v44 = vld [vmem:[%s1572_s7 + $0x2c0] sm:$0xff]  ;;  %421 = vst [vmem:[%s1577_s8 + $0x150] sm:$0xff] %v420_v42  ;;  %423 = vst [vmem:[%s1577_s8 + $0x158] sm:$0xff] %v422_v43  ;;  %v426_v45 = vld [vmem:[%s1572_s7 + $0x2d0] sm:$0xff] }
  0x2f   : > { %425 = vst [vmem:[%s1577_s8 + $0x160] sm:$0xff] %v424_v44  ;;  %v428_v46 = vld [vmem:[%s1572_s7 + $0x2e0] sm:$0xff]  ;;  %v430_v47 = vld [vmem:[%s1572_s7 + $0x2f0] sm:$0xff]  ;;  %427 = vst [vmem:[%s1577_s8 + $0x168] sm:$0xff] %v426_v45 }
  0x30   : > { %429 = vst [vmem:[%s1577_s8 + $0x170] sm:$0xff] %v428_v46  ;;  %431 = vst [vmem:[%s1577_s8 + $0x178] sm:$0xff] %v430_v47  ;;  %v432_v48 = vld [vmem:[%s1572_s7 + $0x300] sm:$0xff]  ;;  %v434_v49 = vld [vmem:[%s1572_s7 + $0x310] sm:$0xff] }
  0x31   : > { %v436_v50 = vld [vmem:[%s1572_s7 + $0x320] sm:$0xff]  ;;  %433 = vst [vmem:[%s1577_s8 + $0x180] sm:$0xff] %v432_v48  ;;  %435 = vst [vmem:[%s1577_s8 + $0x188] sm:$0xff] %v434_v49  ;;  %v438_v51 = vld [vmem:[%s1572_s7 + $0x330] sm:$0xff] }
  0x32   : > { %437 = vst [vmem:[%s1577_s8 + $0x190] sm:$0xff] %v436_v50  ;;  %v440_v52 = vld [vmem:[%s1572_s7 + $0x340] sm:$0xff]  ;;  %v442_v53 = vld [vmem:[%s1572_s7 + $0x350] sm:$0xff]  ;;  %439 = vst [vmem:[%s1577_s8 + $0x198] sm:$0xff] %v438_v51 }
  0x33   : > { %441 = vst [vmem:[%s1577_s8 + $0x1a0] sm:$0xff] %v440_v52  ;;  %443 = vst [vmem:[%s1577_s8 + $0x1a8] sm:$0xff] %v442_v53  ;;  %v444_v54 = vld [vmem:[%s1572_s7 + $0x360] sm:$0xff]  ;;  %v446_v55 = vld [vmem:[%s1572_s7 + $0x370] sm:$0xff] }
  0x34   : > { %v448_v56 = vld [vmem:[%s1572_s7 + $0x380] sm:$0xff]  ;;  %445 = vst [vmem:[%s1577_s8 + $0x1b0] sm:$0xff] %v444_v54  ;;  %447 = vst [vmem:[%s1577_s8 + $0x1b8] sm:$0xff] %v446_v55  ;;  %v450_v57 = vld [vmem:[%s1572_s7 + $0x390] sm:$0xff] }
  0x35   : > { %449 = vst [vmem:[%s1577_s8 + $0x1c0] sm:$0xff] %v448_v56  ;;  %v452_v58 = vld [vmem:[%s1572_s7 + $0x3a0] sm:$0xff]  ;;  %v454_v59 = vld [vmem:[%s1572_s7 + $0x3b0] sm:$0xff]  ;;  %451 = vst [vmem:[%s1577_s8 + $0x1c8] sm:$0xff] %v450_v57 }
  0x36   : > { %453 = vst [vmem:[%s1577_s8 + $0x1d0] sm:$0xff] %v452_v58  ;;  %455 = vst [vmem:[%s1577_s8 + $0x1d8] sm:$0xff] %v454_v59  ;;  %v456_v60 = vld [vmem:[%s1572_s7 + $0x3c0] sm:$0xff]  ;;  %v458_v61 = vld [vmem:[%s1572_s7 + $0x3d0] sm:$0xff] }
  0x37   : > { %v460_v62 = vld [vmem:[%s1572_s7 + $0x3e0] sm:$0xff]  ;;  %457 = vst [vmem:[%s1577_s8 + $0x1e0] sm:$0xff] %v456_v60  ;;  %459 = vst [vmem:[%s1577_s8 + $0x1e8] sm:$0xff] %v458_v61  ;;  %v462_v63 = vld [vmem:[%s1572_s7 + $0x3f0] sm:$0xff] }
  0x38   : > { %461 = vst [vmem:[%s1577_s8 + $0x1f0] sm:$0xff] %v460_v62  ;;  %463 = vst [vmem:[%s1577_s8 + $0x1f8] sm:$0xff] %v462_v63 }
  0x39 PF: > { %p1198_p7 = scmp.ge.s32.totalorder %s1489_s18, 1  ;;  %p476_p8 = scmp.lt.s32.totalorder %s1489_s18, 5 }
  0x3b   : > { %p477_p9 = pnand %p1198_p7, %p476_p8 }
  0x3c   : > { %s483_s9 = sand.u32 (!%p477_p9), 1, %s1465_s12   ;;  %s1200_s10 = sshll.u32 (!%p477_p9), %s1473_s14, 2 }
  0x3d   : > { %480 = sbr.rel (%p477_p9) target bundleno = 372 (0x174), region = 66  ;;  %s1199_s11 = sshll.u32 (!%p477_p9), %s483_s9, 9 }
  0x3e   : > { %p526_p10 = scmp.lt.s32.totalorder (!%p477_p9), %s1200_s10, 7  ;;  %s1202_s21 = sshll.u32 (!%p477_p9), %s1477_s15, 1 }
  0x3f   : > { %p536_p11 = scmp.lt.s32.totalorder (!%p477_p9), %s1202_s21, 3  ;;  %s1726_s5 = scalar_lea.vmem (!%p477_p9), [#allocation3], %s1199_s11 }
  0x40   : > { %p1205_p12 = scmp.ne.s32.totalorder (!%p477_p9), %s1473_s14, 0 }
  0x44   : > { %s1841_s10 = smov (!%p526_p10, %s1200_s10), 7  ;;  %s1843_s21 = smov (!%p536_p11, %s1202_s21), 3 }
  0x45   : > { %s1201_s22 = sshll.u32 %s1841_s10, 2  ;;  %s538_s12 = scalar_lea.vmem %s1826_s2, %s1843_s21  ;;  %v1491_v0 = vmov (!%p1205_p12), 0.0  }
  0x46   : > { %s1712_s26 = scalar_lea.vmem %s1824_s0, %s1201_s22  ;;  %s1204_s29 = sshll.u32 %s1843_s21, 3  ;;  %554 = vst [vmem:[#allocation2] sm:$0xff] (!%p1205_p12), %v1491_v0  ;;  %555 = vst [vmem:[#allocation2 + $0x8] sm:$0xff] (!%p1205_p12), %v1491_v0 }
  0x47   : > { %s1724_s15 = scalar_lea.vmem %s1827_s3, %s1204_s29  ;;  %553 = sbr.rel (%p1205_p12) target bundleno = 78 (0x4e), region = 74 }
  0x4e PF: > { %v1335_v1 = vld [vmem:[%s1726_s5 + $0x4] ss:$8 sps:$4 sm:$0xff]   ;;  %v1339_v3 = vld [vmem:[%s1726_s5] ss:$8 sps:$4 sm:$0xff]   ;;  %v1341_v5 = vld [vmem:[%s1726_s5 + $0x14] ss:$8 sps:$4 sm:$0xff]  }
  0x4f   : > { %v1337_v2 = vld [vmem:[%s1726_s5 + $0x104] ss:$8 sps:$4 sm:$0xff]   ;;  %958 = vmatprep.subr.bf16.mxu0 %v1335_v1  ;;  %v1340_v4 = vld [vmem:[%s1726_s5 + $0x100] ss:$8 sps:$4 sm:$0xff]   ;;  %v1343_v6 = vld [vmem:[%s1726_s5 + $0x114] ss:$8 sps:$4 sm:$0xff]  }
  0x50   : > { %999 = vmatprep.subr.bf16.mxu1 %v1337_v2  ;;  %959 = vmatpush1.bf16.msra.mxu0 %v1339_v3  ;;  %v1345_v7 = vld [vmem:[%s1726_s5 + $0x10] ss:$8 sps:$4 sm:$0xff]   ;;  %v1347_v9 = vld [vmem:[%s1726_s5 + $0x24] ss:$8 sps:$4 sm:$0xff]   ;;  %v1351_v11 = vld [vmem:[%s1726_s5 + $0x20] ss:$8 sps:$4 sm:$0xff]  }
  0x51   : > { %1000 = vmatpush1.bf16.msra.mxu1 %v1340_v4  ;;  %960 = vmatprep.subr.bf16.mxu0 %v1341_v5  ;;  %v1346_v8 = vld [vmem:[%s1726_s5 + $0x110] ss:$8 sps:$4 sm:$0xff]   ;;  %v1349_v10 = vld [vmem:[%s1726_s5 + $0x124] ss:$8 sps:$4 sm:$0xff]   ;;  %v1352_v12 = vld [vmem:[%s1726_s5 + $0x120] ss:$8 sps:$4 sm:$0xff]  }
  0x52   : > { %1001 = vmatprep.subr.bf16.mxu1 %v1343_v6  ;;  %v1353_v13 = vld [vmem:[%s1726_s5 + $0x34] ss:$8 sps:$4 sm:$0xff]   ;;  %v1357_v15 = vld [vmem:[%s1726_s5 + $0x30] ss:$8 sps:$4 sm:$0xff]   ;;  %v1359_v17 = vld [vmem:[%s1726_s5 + $0x44] ss:$8 sps:$4 sm:$0xff]  }
  0x53   : > { %v1355_v14 = vld [vmem:[%s1726_s5 + $0x134] ss:$8 sps:$4 sm:$0xff]   ;;  %v1358_v16 = vld [vmem:[%s1726_s5 + $0x130] ss:$8 sps:$4 sm:$0xff]   ;;  %v1361_v18 = vld [vmem:[%s1726_s5 + $0x144] ss:$8 sps:$4 sm:$0xff]  }
  0x54   : > { %961 = vmatpush1.bf16.msra.mxu0 %v1345_v7  ;;  %v1363_v19 = vld [vmem:[%s1726_s5 + $0x40] ss:$8 sps:$4 sm:$0xff]   ;;  %v1365_v21 = vld [vmem:[%s1726_s5 + $0x54] ss:$8 sps:$4 sm:$0xff]   ;;  %v1369_v23 = vld [vmem:[%s1726_s5 + $0x50] ss:$8 sps:$4 sm:$0xff]  }
  0x55   : > { %1002 = vmatpush1.bf16.msra.mxu1 %v1346_v8  ;;  %962 = vmatprep.subr.bf16.mxu0 %v1347_v9  ;;  %v1364_v20 = vld [vmem:[%s1726_s5 + $0x140] ss:$8 sps:$4 sm:$0xff]   ;;  %v1367_v22 = vld [vmem:[%s1726_s5 + $0x154] ss:$8 sps:$4 sm:$0xff]   ;;  %v1370_v24 = vld [vmem:[%s1726_s5 + $0x150] ss:$8 sps:$4 sm:$0xff]  }
  0x56   : > { %1003 = vmatprep.subr.bf16.mxu1 %v1349_v10  ;;  %v1371_v25 = vld [vmem:[%s1726_s5 + $0x64] ss:$8 sps:$4 sm:$0xff]   ;;  %v1375_v27 = vld [vmem:[%s1726_s5 + $0x60] ss:$8 sps:$4 sm:$0xff]   ;;  %v1377_v29 = vld [vmem:[%s1726_s5 + $0x74] ss:$8 sps:$4 sm:$0xff]  }
  0x57   : > { %v1373_v26 = vld [vmem:[%s1726_s5 + $0x164] ss:$8 sps:$4 sm:$0xff]   ;;  %v1376_v28 = vld [vmem:[%s1726_s5 + $0x160] ss:$8 sps:$4 sm:$0xff]   ;;  %v1379_v30 = vld [vmem:[%s1726_s5 + $0x174] ss:$8 sps:$4 sm:$0xff]  }
  0x58   : > { %963 = vmatpush1.bf16.msra.mxu0 %v1351_v11  ;;  %v1381_v31 = vld [vmem:[%s1726_s5 + $0x70] ss:$8 sps:$4 sm:$0xff]   ;;  %v1383_v33 = vld [vmem:[%s1726_s5 + $0x84] ss:$8 sps:$4 sm:$0xff]   ;;  %v1387_v35 = vld [vmem:[%s1726_s5 + $0x80] ss:$8 sps:$4 sm:$0xff]  }
  0x59   : > { %1004 = vmatpush1.bf16.msra.mxu1 %v1352_v12  ;;  %964 = vmatprep.subr.bf16.mxu0 %v1353_v13  ;;  %v1382_v32 = vld [vmem:[%s1726_s5 + $0x170] ss:$8 sps:$4 sm:$0xff]   ;;  %v1385_v34 = vld [vmem:[%s1726_s5 + $0x184] ss:$8 sps:$4 sm:$0xff]   ;;  %v1388_v36 = vld [vmem:[%s1726_s5 + $0x180] ss:$8 sps:$4 sm:$0xff]  }
  0x5a   : > { %1005 = vmatprep.subr.bf16.mxu1 %v1355_v14  ;;  %v1389_v37 = vld [vmem:[%s1726_s5 + $0x94] ss:$8 sps:$4 sm:$0xff]   ;;  %v1393_v39 = vld [vmem:[%s1726_s5 + $0x90] ss:$8 sps:$4 sm:$0xff]   ;;  %v1395_v41 = vld [vmem:[%s1726_s5 + $0xa4] ss:$8 sps:$4 sm:$0xff]  }
  0x5b   : > { %v1391_v38 = vld [vmem:[%s1726_s5 + $0x194] ss:$8 sps:$4 sm:$0xff]   ;;  %v1394_v40 = vld [vmem:[%s1726_s5 + $0x190] ss:$8 sps:$4 sm:$0xff]   ;;  %v1397_v42 = vld [vmem:[%s1726_s5 + $0x1a4] ss:$8 sps:$4 sm:$0xff]  }
  0x5c   : > { %965 = vmatpush1.bf16.msra.mxu0 %v1357_v15  ;;  %v1399_v43 = vld [vmem:[%s1726_s5 + $0xa0] ss:$8 sps:$4 sm:$0xff]   ;;  %v1401_v45 = vld [vmem:[%s1726_s5 + $0xb4] ss:$8 sps:$4 sm:$0xff]   ;;  %v1405_v50 = vld [vmem:[%s1726_s5 + $0xb0] ss:$8 sps:$4 sm:$0xff]  }
  0x5d   : > { %1006 = vmatpush1.bf16.msra.mxu1 %v1358_v16  ;;  %966 = vmatprep.subr.bf16.mxu0 %v1359_v17  ;;  %v1400_v44 = vld [vmem:[%s1726_s5 + $0x1a0] ss:$8 sps:$4 sm:$0xff]   ;;  %v1403_v46 = vld [vmem:[%s1726_s5 + $0x1b4] ss:$8 sps:$4 sm:$0xff]   ;;  %v1406_v51 = vld [vmem:[%s1726_s5 + $0x1b0] ss:$8 sps:$4 sm:$0xff]  }
  0x5e   : > { %1007 = vmatprep.subr.bf16.mxu1 %v1361_v18  ;;  %v558_v47 = vld [vmem:[%s1712_s26] sm:$0xff]  ;;  %v559_v49 = vld [vmem:[%s1712_s26 + $0x8] sm:$0xff]  ;;  %v1407_v53 = vld [vmem:[%s1726_s5 + $0xc4] ss:$8 sps:$4 sm:$0xff]   ;;  %p1274_p13 = scmp.ne.s32.totalorder %s1473_s14, 1 }
  0x5f   : > { %v1207_v48 = vcombine.high %v558_v47, %v558_v47  ;;  %v1209_v52 = vcombine.high %v559_v49, %v559_v49  ;;  %v1409_v54 = vld [vmem:[%s1726_s5 + $0x1c4] ss:$8 sps:$4 sm:$0xff]   ;;  %v1411_v55 = vld [vmem:[%s1726_s5 + $0xc0] ss:$8 sps:$4 sm:$0xff]   ;;  %v1413_v57 = vld [vmem:[%s1726_s5 + $0xd4] ss:$8 sps:$4 sm:$0xff]   ;;  %v1206_v5 = vcombine.low %v558_v47, %v558_v47  ;;  %v1208_v6 = vcombine.low %v559_v49, %v559_v49 }
  0x60   : > { %967 = vmatpush1.bf16.msra.mxu0 %v1363_v19  ;;  %v1412_v56 = vld [vmem:[%s1726_s5 + $0x1c0] ss:$8 sps:$4 sm:$0xff]   ;;  %v1415_v58 = vld [vmem:[%s1726_s5 + $0x1d4] ss:$8 sps:$4 sm:$0xff]   ;;  %v1417_v59 = vld [vmem:[%s1726_s5 + $0xd0] ss:$8 sps:$4 sm:$0xff]  }
  0x61   : > { %1008 = vmatpush1.bf16.msra.mxu1 %v1364_v20  ;;  %968 = vmatprep.subr.bf16.mxu0 %v1365_v21  ;;  %v1418_v60 = vld [vmem:[%s1726_s5 + $0x1d0] ss:$8 sps:$4 sm:$0xff]   ;;  %v1419_v61 = vld [vmem:[%s1726_s5 + $0xe4] ss:$8 sps:$4 sm:$0xff]   ;;  %v1423_v63 = vld [vmem:[%s1726_s5 + $0xe0] ss:$8 sps:$4 sm:$0xff]   ;;  %v1052_v21 = vlaneseq (!%p1274_p13) }
  0x62   : > { %1009 = vmatprep.subr.bf16.mxu1 %v1367_v22  ;;  %990 = vmatprep.mubr.bf16.mxu0 %v1207_v48  ;;  %v1421_v62 = vld [vmem:[%s1726_s5 + $0x1e4] ss:$8 sps:$4 sm:$0xff]   ;;  %v1424_v0 = vld [vmem:[%s1726_s5 + $0x1e0] ss:$8 sps:$4 sm:$0xff]   ;;  %v1425_v1 = vld [vmem:[%s1726_s5 + $0xf4] ss:$8 sps:$4 sm:$0xff]  }
  0x63   : > { %1031 = vmatprep.mubr.bf16.mxu1 %v1209_v52  ;;  %v1427_v2 = vld [vmem:[%s1726_s5 + $0x1f4] ss:$8 sps:$4 sm:$0xff]   ;;  %v1429_v3 = vld [vmem:[%s1726_s5 + $0xf0] ss:$8 sps:$4 sm:$0xff]   ;;  %v1053_v22 = vshrl.u32 (!%p1274_p13), %v1052_v21, 7 }
  0x64   : > { %969 = vmatpush1.bf16.msra.mxu0 %v1369_v23  ;;  %v1430_v4 = vld [vmem:[%s1726_s5 + $0x1f0] ss:$8 sps:$4 sm:$0xff]  }
  0x65   : > { %1010 = vmatpush1.bf16.msra.mxu1 %v1370_v24  ;;  %970 = vmatprep.subr.bf16.mxu0 %v1371_v25  ;;  %v556_v8 = vld [vmem:[#allocation2] sm:$0xff]  ;;  %v557_v12 = vld [vmem:[#allocation2 + $0x8] sm:$0xff]  ;;  %v1054_v24 = vsub.s32 (!%p1274_p13), 0, %v1053_v22  ;;  %v1058_v25 = vsub.s32 (!%p1274_p13), 1, %v1053_v22 }
  0x66   : > { %1011 = vmatprep.subr.bf16.mxu1 %v1373_v26  ;;  %v1050_v23 = vld [vmem:[%s538_s12] sm:$0x3] (!%p1274_p13) }
  0x68   : > { %971 = vmatpush1.bf16.msra.mxu0 %v1375_v27 }
  0x69   : > { %1012 = vmatpush1.bf16.msra.mxu1 %v1376_v28  ;;  %972 = vmatprep.subr.bf16.mxu0 %v1377_v29  ;;  %v1055_v28 = vrot.slane (!%p1274_p13), %v1050_v23, %v1054_v24  ;;  %v1059_v29 = vrot.slane (!%p1274_p13), %v1050_v23, %v1058_v25 }
  0x6a   : > { %1013 = vmatprep.subr.bf16.mxu1 %v1379_v30 }
  0x6c   : > { %973 = vmatpush1.bf16.msra.mxu0 %v1381_v31 }
  0x6d   : > { %1014 = vmatpush1.bf16.msra.mxu1 %v1382_v32  ;;  %974 = vmatprep.subr.bf16.mxu0 %v1383_v33 }
  0x6e   : > { %1015 = vmatprep.subr.bf16.mxu1 %v1385_v34 }
  0x70   : > { %975 = vmatpush1.bf16.msra.mxu0 %v1387_v35 }
  0x71   : > { %1016 = vmatpush1.bf16.msra.mxu1 %v1388_v36  ;;  %976 = vmatprep.subr.bf16.mxu0 %v1389_v37 }
  0x72   : > { %1017 = vmatprep.subr.bf16.mxu1 %v1391_v38 }
  0x74   : > { %977 = vmatpush1.bf16.msra.mxu0 %v1393_v39 }
  0x75   : > { %1018 = vmatpush1.bf16.msra.mxu1 %v1394_v40  ;;  %978 = vmatprep.subr.bf16.mxu0 %v1395_v41 }
  0x76   : > { %1019 = vmatprep.subr.bf16.mxu1 %v1397_v42 }
  0x78   : > { %979 = vmatpush1.bf16.msra.mxu0 %v1399_v43 }
  0x79   : > { %1020 = vmatpush1.bf16.msra.mxu1 %v1400_v44  ;;  %980 = vmatprep.subr.bf16.mxu0 %v1401_v45 }
  0x7a   : > { %1021 = vmatprep.subr.bf16.mxu1 %v1403_v46 }
  0x7c   : > { %981 = vmatpush1.bf16.msra.mxu0 %v1405_v50 }
  0x7d   : > { %1022 = vmatpush1.bf16.msra.mxu1 %v1406_v51  ;;  %982 = vmatprep.subr.bf16.mxu0 %v1407_v53 }
  0x7e   : > { %1023 = vmatprep.subr.bf16.mxu1 %v1409_v54 }
  0x80   : > { %983 = vmatpush1.bf16.msra.mxu0 %v1411_v55 }
  0x81   : > { %1024 = vmatpush1.bf16.msra.mxu1 %v1412_v56  ;;  %984 = vmatprep.subr.bf16.mxu0 %v1413_v57 }
  0x82   : > { %1025 = vmatprep.subr.bf16.mxu1 %v1415_v58 }
  0x84   : > { %985 = vmatpush1.bf16.msra.mxu0 %v1417_v59 }
  0x85   : > { %1026 = vmatpush1.bf16.msra.mxu1 %v1418_v60  ;;  %986 = vmatprep.subr.bf16.mxu0 %v1419_v61 }
  0x86   : > { %1027 = vmatprep.subr.bf16.mxu1 %v1421_v62 }
  0x88   : > { %987 = vmatpush1.bf16.msra.mxu0 %v1423_v63 }
  0x89   : > { %1028 = vmatpush1.bf16.msra.mxu1 %v1424_v0  ;;  %988 = vmatprep.subr.bf16.mxu0 %v1425_v1 }
  0x8a   : > { %1029 = vmatprep.subr.bf16.mxu1 %v1427_v2 }
  0x8c   : > { %989 = vmatpush1.bf16.msra.mxu0 %v1429_v3 }
  0x8d   : > { %1030 = vmatpush1.bf16.msra.mxu1 %v1430_v4 }
  0x8f   : > { %991 = vmatmul.mubr.bf16.vlgmr.msra.gmra.mrb[0].mxu0 %v1206_v5 }
  0x90   : > { %1032 = vmatmul.mubr.bf16.vlgmr.msra.gmra.mrb[0].mxu1 %v1208_v6 }
 0x162   : > { %v992_v7 = vpop.f32.mrb[0].mxu0 }
 0x163   : > { %v1033_v9 = vpop.f32.mrb[0].mxu1  ;;  %v994_v11 = vpop.f32.mrb[1].mxu0  ;;  %1047 = sbr.rel (%p1274_p13) target bundleno = 372 (0x174), region = 78 }
 0x164   : > { %v1034_v10 = vadd.f32 %v1033_v9, %v992_v7  ;;  %v1035_v13 = vpop.f32.mrb[1].mxu1  ;;  %v996_v15 = vpop.f32.mrb[2].mxu0 }
 0x165   : > { %v1036_v14 = vadd.f32 %v1035_v13, %v994_v11  ;;  %v1037_v16 = vpop.f32.mrb[2].mxu1  ;;  %v997_v18 = vpop.f32.mrb[3].mxu0 }
 0x166   : > { %v1040_v17 = vadd.f32 %v1034_v10, %v556_v8  ;;  %v1038_v19 = vpop.f32.mrb[3].mxu1 }
 0x167   : > { %v1041_v20 = vadd.f32 %v1036_v14, %v557_v12 }
 0x168   : > { %1042 = vst [vmem:[#allocation2] sm:$0xff] %v1040_v17 }
 0x169   : > { %1043 = vst [vmem:[#allocation2 + $0x8] sm:$0xff] %v1041_v20 }
 0x16f   : > { %v1048_v26 = vld [vmem:[#allocation2] sm:$0xff] }
 0x170   : > { %v1049_v27 = vld [vmem:[#allocation2 + $0x8] sm:$0xff]  ;;  %v1062_v30 = vadd.f32 %v1055_v28, %v1048_v26 }
 0x171   : > { %v1063_v31 = vadd.f32 %v1059_v29, %v1049_v27 }
 0x172   : > { %1064 = vst [vmem:[%s1724_s15] sm:$0xff] %v1062_v30 }
 0x173   : > { %1065 = vst [vmem:[%s1724_s15 + $0x8] sm:$0xff] %v1063_v31 }
 0x174 PF: > { %s13_s18 = sadd.s32 1, %s1489_s18   ;;  %s1828_s12 = smov %s1469_s13 }
 0x175   : > { %p10_p0 = scmp.ge.s32.totalorder %s13_s18, 6   ;;  %s1829_s13 = smov %s1563_s25 }
 0x176   : > { %s1830_s14 = smov %s1481_s16  ;;  %s1831_s15 = smov %s1485_s17 }
 0x177   : > { %s1832_s16 = smov %s1835_s19  ;;  %s1833_s17 = smov %s1839_s20 }
 0x178   :  { %12 = sbr.rel (!%p10_p0) target bundleno = 4 (0x4), region = 119 }

// kernel: feature_extractor_forward.50
= control target key start
LH: loop header
LB: loop body
LE: loop exit
PB: predicated region body
PF: predicated region fallthrough
CT: control target
= control target key end

     0   :  { %v14_v0 = vlaneseq  ;;  %v154_v4 = vmov 1966171168   ;;  %v155_v11 = vmov 0.0   ;;  %s213_s0 = inlined_call_operand.vmem [shape: f32[8,512], index: 0, kind: input, shape index: {}]   ;;  %s214_s1 = inlined_call_operand.vmem [shape: f32[1,512], index: 1, kind: output, shape index: {0}]   ;;  %s215_s2 = inlined_call_operand.vmem [shape: f32[1,512], index: 2, kind: output, shape index: {1}]  }
   0x1   :  { %v20_v1 = vld [vmem:[%s213_s0] sm:$0xff]  ;;  %v21_v2 = vld [vmem:[%s213_s0 + $0x8] sm:$0xff]  ;;  %v22_v3 = vld [vmem:[%s213_s0 + $0x10] sm:$0xff]  ;;  %v56_v5 = vunpack.c.l.s4 %v154_v4 }
   0x2   :  { %vm180_vm0 = vcmp.lt.s32.totalorder %v14_v0, 512  ;;  %v23_v7 = vld [vmem:[%s213_s0 + $0x18] sm:$0xff]  ;;  %v25_v8 = vrot.slane %v20_v1, 4  ;;  %v31_v9 = vrot.slane %v21_v2, 4  ;;  %v37_v10 = vrot.slane %v22_v3, 4 }
   0x3   :  { %18 = vst.msk [vmem:[%s214_s1] sm:$0xf] %vm180_vm0, %v155_v11  ;;  %v43_v12 = vrot.slane %v23_v7, 4  ;;  %v57_v13 = vunpack.c.0.s8 %v56_v5  ;;  %v59_v14 = vshrl.u32 %v14_v0, 7  ;;  %19 = vst.msk [vmem:[%s215_s2] sm:$0xf] %vm180_vm0, %v155_v11  ;;  %v85_v15 = vmul.f32 %v20_v1, %v20_v1 }
   0x4   :  { %v26_v16 = vadd.f32 %v25_v8, %v20_v1  ;;  %v32_v17 = vadd.f32 %v31_v9, %v21_v2  ;;  %v38_v18 = vadd.f32 %v37_v10, %v22_v3  ;;  %v86_v19 = vmul.f32 %v21_v2, %v21_v2 }
   0x5   :  { %v44_v20 = vadd.f32 %v43_v12, %v23_v7  ;;  %v60_v21 = vsub.s32 %v57_v13, %v59_v14  ;;  %v87_v22 = vmul.f32 %v22_v3, %v22_v3  ;;  %v88_v23 = vmul.f32 %v23_v7, %v23_v7 }
   0x6   :  { %v27_v24 = vrot.slane %v26_v16, 2  ;;  %v33_v25 = vrot.slane %v32_v17, 2  ;;  %v39_v26 = vrot.slane %v38_v18, 2  ;;  %v89_v27 = vrot.slane %v85_v15, 4 }
   0x7   :  { %v45_v28 = vrot.slane %v44_v20, 2  ;;  %v95_v29 = vrot.slane %v86_v19, 4  ;;  %v101_v30 = vrot.slane %v87_v22, 4  ;;  %v107_v31 = vrot.slane %v88_v23, 4 }
   0x8   :  { %v28_v32 = vadd.f32 %v27_v24, %v26_v16  ;;  %v34_v33 = vadd.f32 %v33_v25, %v32_v17  ;;  %v40_v34 = vadd.f32 %v39_v26, %v38_v18  ;;  %v90_v35 = vadd.f32 %v89_v27, %v85_v15 }
   0x9   :  { %v46_v36 = vadd.f32 %v45_v28, %v44_v20  ;;  %v96_v37 = vadd.f32 %v95_v29, %v86_v19  ;;  %v102_v38 = vadd.f32 %v101_v30, %v87_v22  ;;  %v108_v39 = vadd.f32 %v107_v31, %v88_v23 }
   0xa   :  { %v29_v40 = vrot.slane %v28_v32, 1  ;;  %v35_v41 = vrot.slane %v34_v33, 1  ;;  %v41_v42 = vrot.slane %v40_v34, 1  ;;  %v91_v43 = vrot.slane %v90_v35, 2  ;;  %v24_v8 = vld [vmem:[%s214_s1] sm:$0xf] }
   0xb   :  { %v47_v44 = vrot.slane %v46_v36, 1  ;;  %v97_v45 = vrot.slane %v96_v37, 2  ;;  %v103_v46 = vrot.slane %v102_v38, 2  ;;  %v109_v47 = vrot.slane %v108_v39, 2  ;;  %v84_v14 = vld [vmem:[%s215_s2] sm:$0xf] }
   0xc   :  { %v30_v48 = vadd.f32 %v29_v40, %v28_v32  ;;  %v36_v49 = vadd.f32 %v35_v41, %v34_v33  ;;  %v42_v50 = vadd.f32 %v41_v42, %v40_v34  ;;  %v92_v51 = vadd.f32 %v91_v43, %v90_v35 }
   0xd   :  { %v48_v52 = vadd.f32 %v47_v44, %v46_v36  ;;  %v98_v53 = vadd.f32 %v97_v45, %v96_v37  ;;  %v104_v54 = vadd.f32 %v103_v46, %v102_v38  ;;  %v110_v55 = vadd.f32 %v109_v47, %v108_v39 }
   0xe   :  { %v53_v56 = vcombine.low %v30_v48, %v36_v49  ;;  %v93_v57 = vrot.slane %v92_v51, 1 }
   0xf   :  { %v54_v58 = vcombine.low %v42_v50, %v48_v52  ;;  %v99_v59 = vrot.slane %v98_v53, 1  ;;  %v105_v60 = vrot.slane %v104_v54, 1  ;;  %v111_v61 = vrot.slane %v110_v55, 1 }
  0x10   :  { %v61_v62 = vrot.slane %v53_v56, %v60_v21  ;;  %v94_v63 = vadd.f32 %v93_v57, %v92_v51 }
  0x11   :  { %v68_v0 = vrot.slane %v54_v58, %v60_v21  ;;  %v100_v1 = vadd.f32 %v99_v59, %v98_v53  ;;  %v106_v2 = vadd.f32 %v105_v60, %v104_v54  ;;  %v112_v3 = vadd.f32 %v111_v61, %v110_v55 }
  0x13   :  { %v69_v4 = vcombine.low %v61_v62, %v68_v0  ;;  %v117_v5 = vcombine.low %v94_v63, %v100_v1  ;;  %v118_v7 = vcombine.low %v106_v2, %v112_v3 }
  0x15   :  { %v76_v9 = vrot.slane %v69_v4, %v60_v21  ;;  %v125_v10 = vrot.slane %v117_v5, %v60_v21  ;;  %v132_v11 = vrot.slane %v118_v7, %v60_v21 }
  0x17   :  { %v78_v12 = vadd.f32 %v76_v9, %v24_v8  ;;  %v133_v13 = vcombine.low %v125_v10, %v132_v11 }
  0x19   :  { %83 = vst.msk [vmem:[%s214_s1] sm:$0xf] %vm180_vm0, %v78_v12  ;;  %v140_v15 = vrot.slane %v133_v13, %v60_v21 }
  0x1b   :  { %v142_v16 = vadd.f32 %v140_v15, %v84_v14 }
  0x1d   :  { %143 = vst.msk [vmem:[%s215_s2] sm:$0xf] %vm180_vm0, %v142_v16 }

// kernel: feature_extractor_forward.51
= control target key start
LH: loop header
LB: loop body
LE: loop exit
PB: predicated region body
PF: predicated region fallthrough
CT: control target
= control target key end

     0   :  { %v20_v0 = vlaneseq  ;;  %s132_s1 = inlined_call_operand.vmem [shape: f32[1,512], index: 1, kind: input, shape index: {}]   ;;  %s133_s2 = inlined_call_operand.vmem [shape: f32[1,512], index: 2, kind: input, shape index: {}]   ;;  %s134_s0 = inlined_call_operand.vmem [shape: f32[8,512], index: 0, kind: input, shape index: {}]   ;;  %s135_s3 = inlined_call_operand.vmem [shape: f32[8,512], index: 3, kind: output, shape index: {}]  }
   0x1   :  { %v18_v2 = vld [vmem:[%s132_s1] sm:$0xf]  ;;  %v15_v9 = vld [vmem:[%s134_s0 + $0x8] sm:$0xff]  ;;  %v16_v14 = vld [vmem:[%s134_s0 + $0x10] sm:$0xff] }
   0x2   :  { %v21_v1 = vshrl.u32 %v20_v0, 7  ;;  %v44_v3 = vld [vmem:[%s133_s2] sm:$0xf]  ;;  %v17_v15 = vld [vmem:[%s134_s0 + $0x18] sm:$0xff] }
   0x3   :  { %v14_v8 = vld [vmem:[%s134_s0] sm:$0xff] }
   0x4   :  { %v22_v4 = vsub.s32 0, %v21_v1  ;;  %v26_v5 = vsub.s32 1, %v21_v1  ;;  %v30_v6 = vsub.s32 2, %v21_v1  ;;  %v34_v7 = vsub.s32 3, %v21_v1 }
   0x6   :  { %v23_v10 = vrot.slane %v18_v2, %v22_v4  ;;  %v49_v11 = vrot.slane %v44_v3, %v22_v4  ;;  %v27_v12 = vrot.slane %v18_v2, %v26_v5  ;;  %v53_v13 = vrot.slane %v44_v3, %v26_v5 }
   0x7   :  { %v31_v16 = vrot.slane %v18_v2, %v30_v6  ;;  %v57_v17 = vrot.slane %v44_v3, %v30_v6  ;;  %v35_v18 = vrot.slane %v18_v2, %v34_v7  ;;  %v61_v19 = vrot.slane %v44_v3, %v34_v7 }
   0x8   :  { %v40_v20 = vmul.f32 %v23_v10, %v14_v8  ;;  %v41_v21 = vmul.f32 %v27_v12, %v15_v9 }
   0x9   :  { %v42_v22 = vmul.f32 %v31_v16, %v16_v14  ;;  %v43_v23 = vmul.f32 %v35_v18, %v17_v15 }
   0xa   :  { %v66_v24 = vadd.f32 %v49_v11, %v40_v20  ;;  %v67_v25 = vadd.f32 %v53_v13, %v41_v21 }
   0xb   :  { %v68_v26 = vadd.f32 %v57_v17, %v42_v22  ;;  %v69_v27 = vadd.f32 %v61_v19, %v43_v23 }
   0xc   :  { %v70_v28 = vmax.f32 %v66_v24, 0.0  ;;  %v71_v29 = vmax.f32 %v67_v25, 0.0 }
   0xd   :  { %v72_v30 = vmax.f32 %v68_v26, 0.0  ;;  %v73_v31 = vmax.f32 %v69_v27, 0.0 }
   0xe   :  { %74 = vst [vmem:[%s135_s3] sm:$0xff] %v70_v28  ;;  %75 = vst [vmem:[%s135_s3 + $0x8] sm:$0xff] %v71_v29 }
   0xf   :  { %76 = vst [vmem:[%s135_s3 + $0x10] sm:$0xff] %v72_v30  ;;  %77 = vst [vmem:[%s135_s3 + $0x18] sm:$0xff] %v73_v31 }

</bundles_post_ra>
